<compile_context>
chip_gen: v5e
topology: v5e:2x2
jax: 0.10.0
libtpu: 0.0.40
codegen_flags: <defaults>
</compile_context>

<pallas_src>
import functools

import jax
import jax.numpy as jnp
from jax import lax
from jax.experimental import pallas as pl
from jax.experimental.pallas import tpu as pltpu

EPS = 1e-5        # PyTorch GroupNorm default eps
_PAD_OFF = 8      # sublane-aligned column offset of the image interior in the pad scratch


# --------------------------- in-kernel helpers --------------------------------

def _group_norm_flat(h, gamma, beta, gmat):
    """h: (N, C) f32. GroupNorm via one stacked (2,C)@(C,C) group-mean matmul."""
    s1 = jnp.sum(h, axis=0, keepdims=True)                    # (1, C)
    s2 = jnp.sum(h * h, axis=0, keepdims=True)                # (1, C)
    st = jnp.dot(jnp.concatenate([s1, s2], axis=0), gmat,
                 preferred_element_type=jnp.float32)          # (2, C): [mean, E[x^2]]
    mean = st[0:1]
    var = jnp.maximum(st[1:2] - mean * mean, 0.0)             # clamp f32 cancellation
    inv = lax.rsqrt(var + EPS)
    return (h - mean) * inv * gamma + beta


def _conv3x3_from_pad(pad_ref, w_ref, H, W):
    """In-VMEM im2col from the zero-bordered pad scratch + one big-K MXU matmul.

    pad scratch layout: data rows at dim0 [1, H+1), data cols at dim1 [_PAD_OFF, _PAD_OFF+W),
    zero border at rows 0 / H+1 and cols _PAD_OFF-1 / _PAD_OFF+W.
    """
    C = pad_ref.shape[-1]
    cols = [pad_ref[pl.ds(dy, H), pl.ds(_PAD_OFF - 1 + dx, W), :]
            for dy in range(3) for dx in range(3)]
    patches = jnp.concatenate(cols, axis=-1).reshape(H * W, 9 * C).astype(jnp.bfloat16)
    return jnp.dot(patches, w_ref[...], preferred_element_type=jnp.float32)


# --------------------------- fused Pallas kernel --------------------------------

def _resblock_kernel(H, W, scale, conv_shortcut, *refs):
    if conv_shortcut:
        (x_ref, g1_ref, b1_ref, gmi_ref, w1_ref, bias1_ref,
         g2_ref, b2_ref, gmo_ref, w2_ref, bias2_ref, scw_ref,
         ga_ref, ba_ref, wqkv_ref, bqkv_ref, wp_ref, pb_ref,
         o_ref, pad1_ref, pad2_ref) = refs
    else:
        (x_ref, g1_ref, b1_ref, gmi_ref, w1_ref, bias1_ref,
         g2_ref, b2_ref, gmo_ref, w2_ref, bias2_ref,
         ga_ref, ba_ref, wqkv_ref, bqkv_ref, wp_ref, pb_ref,
         o_ref, pad1_ref, pad2_ref) = refs
        scw_ref = None

    cin = x_ref.shape[-1]
    cout = o_ref.shape[-1]
    N = H * W
    bf16 = jnp.bfloat16

    # Zero the pad scratches every step: cheap (~a few hundred KiB of vector stores) and
    # keeps each grid step independent, so "parallel" batch sharding across cores is safe.
    pad1_ref[...] = jnp.zeros_like(pad1_ref)
    pad2_ref[...] = jnp.zeros_like(pad2_ref)

    # ---- stage 1: GN -> Swish -> Conv3x3 (conv1 bias + temb/cond proj pre-fused) ----
    x = x_ref[0]                                              # (H, W, Cin) f32
    xf = x.reshape(N, cin)
    y1 = _group_norm_flat(xf, g1_ref[...], b1_ref[...], gmi_ref[...])
    y1 = y1 * jax.nn.sigmoid(y1)                              # Swish
    pad1_ref[pl.ds(1, H), pl.ds(_PAD_OFF, W), :] = y1.reshape(H, W, cin)
    h1 = _conv3x3_from_pad(pad1_ref, w1_ref, H, W) + bias1_ref[0]         # (N, Cout)

    # ---- stage 2: GN -> Swish -> (Dropout = identity) -> Conv3x3 + shortcut ----
    # TODO(synk): nn.Dropout treated as identity (inference / eval mode).
    y2 = _group_norm_flat(h1, g2_ref[...], b2_ref[...], gmo_ref[...])
    y2 = y2 * jax.nn.sigmoid(y2)
    pad2_ref[pl.ds(1, H), pl.ds(_PAD_OFF, W), :] = y2.reshape(H, W, cout)
    h2 = _conv3x3_from_pad(pad2_ref, w2_ref, H, W) + bias2_ref[...]
    if conv_shortcut:
        sc = jnp.dot(xf.astype(bf16), scw_ref[...], preferred_element_type=jnp.float32)
    else:
        sc = xf                                               # identity shortcut
    h = h2 + sc                                               # (N, Cout) f32

    # ---- stage 3: AttnBlock: GN -> fused q/k/v -> softmax attention -> proj -> +res ----
    hn = _group_norm_flat(h, ga_ref[...], ba_ref[...], gmo_ref[...]).astype(bf16)
    qkv = jnp.dot(hn, wqkv_ref[...], preferred_element_type=jnp.float32) + bqkv_ref[...]
    q = qkv[:, :cout]
    k = qkv[:, cout:2 * cout]
    v = qkv[:, 2 * cout:]
    # TODO(synk): single-tile softmax attention; tile the kv axis flash-style if H*W grows
    # so the (N, N) f32 score block stays within VMEM (v7x: 64 MiB total).
    s = lax.dot_general(q.astype(bf16), k.astype(bf16), (((1,), (1,)), ((), ())),
                        preferred_element_type=jnp.float32) * scale      # (N, N)
    m = jnp.max(s, axis=-1, keepdims=True)
    p = jnp.exp(s - m)
    l = jnp.sum(p, axis=-1, keepdims=True)
    a = jnp.dot(p.astype(bf16), v.astype(bf16), preferred_element_type=jnp.float32)
    a = a * pl.reciprocal(l, approx=True)                     # deferred softmax divide
    out = (jnp.dot(a.astype(bf16), wp_ref[...], preferred_element_type=jnp.float32)
           + pb_ref[...] + h)
    o_ref[0] = out


# --------------------------- JAX glue -------------------------------------------

def group_mat(C, groups, N):
    """(C, C) matrix s.t. (sum_over_N(x) @ gmat) = per-channel group mean."""
    cg = C // groups
    gid = jnp.arange(C) // cg
    m = (gid[:, None] == gid[None, :]).astype(jnp.float32)
    return m / float(N * cg)


def im2col_3x3(x_bhwc):
    """(B, H, W, C) -> (B, H*W, 9*C), pad=1, patch order (kh, kw, cin). Reference only."""
    B, H, W, C = x_bhwc.shape
    xp = jnp.pad(x_bhwc, ((0, 0), (1, 1), (1, 1), (0, 0)))
    cols = [xp[:, dy:dy + H, dx:dx + W, :] for dy in range(3) for dx in range(3)]
    p = jnp.stack(cols, axis=3)                               # (B, H, W, 9, C)
    return p.reshape(B, H * W, 9 * C)


def init_params(key, in_ch, out_ch, tdim):
    ks = jax.random.split(key, 20)

    def nrm(k, shape, s=0.1):
        return (s * jax.random.normal(k, shape)).astype(jnp.float32)

    return dict(
        gn1_g=1.0 + nrm(ks[0], (1, in_ch)), gn1_b=nrm(ks[1], (1, in_ch)),
        conv1_w=nrm(ks[2], (3, 3, in_ch, out_ch)), conv1_b=nrm(ks[3], (out_ch,)),
        temb_w=nrm(ks[4], (tdim, out_ch)), temb_b=nrm(ks[5], (out_ch,)),
        cond_w=nrm(ks[6], (tdim, out_ch)), cond_b=nrm(ks[7], (out_ch,)),
        gn2_g=1.0 + nrm(ks[8], (1, out_ch)), gn2_b=nrm(ks[9], (1, out_ch)),
        conv2_w=nrm(ks[10], (3, 3, out_ch, out_ch)), conv2_b=nrm(ks[11], (out_ch,)),
        sc_w=nrm(ks[12], (in_ch, out_ch)), sc_b=nrm(ks[13], (out_ch,)),
        gna_g=1.0 + nrm(ks[14], (1, out_ch)), gna_b=nrm(ks[15], (1, out_ch)),
        qkv_w=nrm(ks[16], (out_ch, 3 * out_ch)), qkv_b=nrm(ks[17], (3 * out_ch,)),
        proj_w=nrm(ks[18], (out_ch, out_ch)), proj_b=nrm(ks[19], (out_ch,)),
    )


def resblock_forward(x_nchw, temb, labels, p, in_ch, out_ch, groups=32):
    B, C, H, W = x_nchw.shape
    assert C == in_ch
    N = H * W
    bf16 = jnp.bfloat16

    x_nhwc = jnp.transpose(x_nchw, (0, 2, 3, 1))              # (B, H, W, Cin), no padding

    gm_in = group_mat(in_ch, groups, N)
    gm_out = group_mat(out_ch, groups, N)

    # conv weights -> (9*Cin, Cout) bf16, patch order (kh, kw, cin)
    w1 = p['conv1_w'].reshape(9 * in_ch, out_ch).astype(bf16)
    w2 = p['conv2_w'].reshape(9 * out_ch, out_ch).astype(bf16)

    # temb/cond projections hoisted out of the kernel: ONE batched XLA matmul producing a
    # per-batch bias row that also carries conv1's bias.
    z = jnp.concatenate([temb, labels], axis=-1)              # (B, 2*tdim)
    z = z * jax.nn.sigmoid(z)                                 # Swish (elementwise, so legal)
    tcw = jnp.concatenate([p['temb_w'], p['cond_w']], axis=0)  # (2*tdim, Cout)
    bias1 = (z @ tcw + (p['conv1_b'] + p['temb_b'] + p['cond_b'])[None, :])
    bias1 = bias1.reshape(B, 1, out_ch).astype(jnp.float32)

    conv_shortcut = (in_ch != out_ch)
    if conv_shortcut:
        scw = p['sc_w'].astype(bf16)
        bias2 = (p['conv2_b'] + p['sc_b']).reshape(1, out_ch)
    else:
        scw = None
        bias2 = p['conv2_b'].reshape(1, out_ch)

    wqkv = p['qkv_w'].astype(bf16)                            # (Cout, 3*Cout): fused q/k/v
    bqkv = p['qkv_b'].reshape(1, 3 * out_ch)
    wp = p['proj_w'].astype(bf16)
    pb = p['proj_b'].reshape(1, out_ch)

    def _rep(shape):                                          # broadcast (replicated) operand
        nd = len(shape)
        return pl.BlockSpec(shape, lambda b: (0,) * nd)

    in_specs = [
        pl.BlockSpec((1, H, W, in_ch), lambda b: (b, 0, 0, 0)),   # x
        _rep((1, in_ch)), _rep((1, in_ch)), _rep((in_ch, in_ch)),  # gn1 g/b, gm_in
        _rep((9 * in_ch, out_ch)),                                # w1
        pl.BlockSpec((1, 1, out_ch), lambda b: (b, 0, 0)),        # fused per-batch bias
        _rep((1, out_ch)), _rep((1, out_ch)), _rep((out_ch, out_ch)),  # gn2 g/b, gm_out
        _rep((9 * out_ch, out_ch)),                               # w2
        _rep((1, out_ch)),                                        # bias2
    ]
    args = [x_nhwc, p['gn1_g'], p['gn1_b'], gm_in, w1, bias1,
            p['gn2_g'], p['gn2_b'], gm_out, w2, bias2]
    if conv_shortcut:
        in_specs.append(_rep((in_ch, out_ch)))
        args.append(scw)
    in_specs += [
        _rep((1, out_ch)), _rep((1, out_ch)),                     # attn GN g/b
        _rep((out_ch, 3 * out_ch)), _rep((1, 3 * out_ch)),        # wqkv, bqkv
        _rep((out_ch, out_ch)), _rep((1, out_ch)),                # wp, pb
    ]
    args += [p['gna_g'], p['gna_b'], wqkv, bqkv, wp, pb]

    scale = float(int(out_ch)) ** (-0.5)
    wpad = _PAD_OFF + W + 8   # interior sublane-aligned at col 8; right zero border fits

    out = pl.pallas_call(
        functools.partial(_resblock_kernel, H, W, scale, conv_shortcut),
        out_shape=jax.ShapeDtypeStruct((B, N, out_ch), jnp.float32),
        grid=(B,),
        in_specs=in_specs,
        out_specs=pl.BlockSpec((1, N, out_ch), lambda b: (b, 0, 0)),
        scratch_shapes=[pltpu.VMEM((H + 2, wpad, in_ch), jnp.float32),
                        pltpu.VMEM((H + 2, wpad, out_ch), jnp.float32)],
        compiler_params=pltpu.CompilerParams(
            dimension_semantics=("parallel",)),   # v7x: shard batch across 2 TensorCores
    )(*args)

    return out.reshape(B, H, W, out_ch).transpose(0, 3, 1, 2)  # back to NCHW


# --------------------------- pure-JAX f32 reference (sanity check) ---------------

def ref_forward(x_nchw, temb, labels, p, in_ch, out_ch, groups=32):
    B, C, H, W = x_nchw.shape
    N = H * W
    x = x_nchw.transpose(0, 2, 3, 1).reshape(B, N, in_ch)

    def gn(h, g, b, swish):
        Bc, Nc, Cc = h.shape
        cg = Cc // groups
        hr = h.reshape(Bc, Nc, groups, cg)
        mean = hr.mean(axis=(1, 3), keepdims=True)
        var = hr.var(axis=(1, 3), keepdims=True)
        y = ((hr - mean) / jnp.sqrt(var + EPS)).reshape(Bc, Nc, Cc)
        y = y * g.reshape(1, 1, Cc) + b.reshape(1, 1, Cc)
        if swish:
            y = y * jax.nn.sigmoid(y)
        return y

    def conv3(h, w, b):
        cin = h.shape[-1]
        patches = im2col_3x3(h.reshape(B, H, W, cin))
        return patches @ w.reshape(9 * cin, -1) + b.reshape(1, 1, -1)

    def sw_lin(z, w, b):
        zs = z * jax.nn.sigmoid(z)
        return zs @ w + b

    h = conv3(gn(x, p['gn1_g'], p['gn1_b'], True), p['conv1_w'], p['conv1_b'])
    h = h + sw_lin(temb, p['temb_w'], p['temb_b'])[:, None, :]
    h = h + sw_lin(labels, p['cond_w'], p['cond_b'])[:, None, :]
    h2 = conv3(gn(h, p['gn2_g'], p['gn2_b'], True), p['conv2_w'], p['conv2_b'])
    sc = (x @ p['sc_w'] + p['sc_b'].reshape(1, 1, -1)) if in_ch != out_ch else x
    h = h2 + sc
    hn = gn(h, p['gna_g'], p['gna_b'], False)
    qkv = hn @ p['qkv_w'] + p['qkv_b'].reshape(1, 1, -1)
    q, k, v = qkv[..., :out_ch], qkv[..., out_ch:2 * out_ch], qkv[..., 2 * out_ch:]
    s = jnp.einsum('bnc,bmc->bnm', q, k) * (int(out_ch) ** (-0.5))
    w_ = jax.nn.softmax(s, axis=-1)
    a = jnp.einsum('bnm,bmc->bnc', w_, v)
    out = a @ p['proj_w'] + p['proj_b'].reshape(1, 1, -1) + h
    return out.reshape(B, H, W, out_ch).transpose(0, 3, 1, 2)


# --------------------------- main -------------------------------------------------

if __name__ == "__main__":
    B, in_ch, out_ch, H, W, tdim = 2, 32, 64, 16, 16, 32

    key = jax.random.PRNGKey(0)
    kx, kt, kl, kp = jax.random.split(key, 4)
    x = jax.random.normal(kx, (B, in_ch, H, W), jnp.float32)
    temb = jax.random.normal(kt, (B, tdim), jnp.float32)
    labels = jax.random.normal(kl, (B, tdim), jnp.float32)
    params = init_params(kp, in_ch, out_ch, tdim)

    fwd = jax.jit(functools.partial(resblock_forward, in_ch=in_ch, out_ch=out_ch))
    out = jax.block_until_ready(fwd(x, temb, labels, params))
    ref = jax.block_until_ready(ref_forward(x, temb, labels, params, in_ch, out_ch))

    assert out.shape == (B, out_ch, H, W), out.shape
    err = float(jnp.max(jnp.abs(out - ref)))
    ref_scale = float(jnp.max(jnp.abs(ref)))
    # bf16 matmul inputs (f32 accumulation) -> allow ~2.5% of the output scale.
    assert err <= 2.5e-2 * ref_scale + 2e-3, f"max abs err {err} vs ref scale {ref_scale}"
    print("KERNEL_OK")
</pallas_src>

<mosaic_0001>
module attributes {stable_mosaic.version = 11 : i64} {
  func.func @_resblock_kernel(%arg0: i32, %arg1: memref<1x16x16x32xf32, #tpu.memory_space<vmem>>, %arg2: memref<1x32xf32, #tpu.memory_space<vmem>>, %arg3: memref<1x32xf32, #tpu.memory_space<vmem>>, %arg4: memref<32x32xf32, #tpu.memory_space<vmem>>, %arg5: memref<288x64xbf16, #tpu.memory_space<vmem>>, %arg6: memref<1x1x64xf32, #tpu.memory_space<vmem>>, %arg7: memref<1x64xf32, #tpu.memory_space<vmem>>, %arg8: memref<1x64xf32, #tpu.memory_space<vmem>>, %arg9: memref<64x64xf32, #tpu.memory_space<vmem>>, %arg10: memref<576x64xbf16, #tpu.memory_space<vmem>>, %arg11: memref<1x64xf32, #tpu.memory_space<vmem>>, %arg12: memref<32x64xbf16, #tpu.memory_space<vmem>>, %arg13: memref<1x64xf32, #tpu.memory_space<vmem>>, %arg14: memref<1x64xf32, #tpu.memory_space<vmem>>, %arg15: memref<64x192xbf16, #tpu.memory_space<vmem>>, %arg16: memref<1x192xf32, #tpu.memory_space<vmem>>, %arg17: memref<64x64xbf16, #tpu.memory_space<vmem>>, %arg18: memref<1x64xf32, #tpu.memory_space<vmem>>, %arg19: memref<1x256x64xf32, #tpu.memory_space<vmem>>, %arg20: memref<18x32x32xf32, #tpu.memory_space<vmem>>, %arg21: memref<18x32x64xf32, #tpu.memory_space<vmem>>) attributes {dimension_semantics = [#tpu.dimension_semantics<parallel>], iteration_bounds = array<i64: 2>, scalar_prefetch = 0 : i64, scratch_operands = 2 : i64, tpu.core_type = #tpu.core_type<tc>, window_params = [{transform_indices = @transform_0, window_bounds = array<i64: 1, 16, 16, 32>}, {pipeline_mode = #tpu.pipeline_mode<synchronous>, transform_indices = @transform_1, window_bounds = array<i64: 1, 32>}, {pipeline_mode = #tpu.pipeline_mode<synchronous>, transform_indices = @transform_2, window_bounds = array<i64: 1, 32>}, {pipeline_mode = #tpu.pipeline_mode<synchronous>, transform_indices = @transform_3, window_bounds = array<i64: 32, 32>}, {pipeline_mode = #tpu.pipeline_mode<synchronous>, transform_indices = @transform_4, window_bounds = array<i64: 288, 64>}, {transform_indices = @transform_5, window_bounds = array<i64: 1, 1, 64>}, {pipeline_mode = #tpu.pipeline_mode<synchronous>, transform_indices = @transform_6, window_bounds = array<i64: 1, 64>}, {pipeline_mode = #tpu.pipeline_mode<synchronous>, transform_indices = @transform_7, window_bounds = array<i64: 1, 64>}, {pipeline_mode = #tpu.pipeline_mode<synchronous>, transform_indices = @transform_8, window_bounds = array<i64: 64, 64>}, {pipeline_mode = #tpu.pipeline_mode<synchronous>, transform_indices = @transform_9, window_bounds = array<i64: 576, 64>}, {pipeline_mode = #tpu.pipeline_mode<synchronous>, transform_indices = @transform_10, window_bounds = array<i64: 1, 64>}, {pipeline_mode = #tpu.pipeline_mode<synchronous>, transform_indices = @transform_11, window_bounds = array<i64: 32, 64>}, {pipeline_mode = #tpu.pipeline_mode<synchronous>, transform_indices = @transform_12, window_bounds = array<i64: 1, 64>}, {pipeline_mode = #tpu.pipeline_mode<synchronous>, transform_indices = @transform_13, window_bounds = array<i64: 1, 64>}, {pipeline_mode = #tpu.pipeline_mode<synchronous>, transform_indices = @transform_14, window_bounds = array<i64: 64, 192>}, {pipeline_mode = #tpu.pipeline_mode<synchronous>, transform_indices = @transform_15, window_bounds = array<i64: 1, 192>}, {pipeline_mode = #tpu.pipeline_mode<synchronous>, transform_indices = @transform_16, window_bounds = array<i64: 64, 64>}, {pipeline_mode = #tpu.pipeline_mode<synchronous>, transform_indices = @transform_17, window_bounds = array<i64: 1, 64>}, {transform_indices = @transform_18, window_bounds = array<i64: 1, 256, 64>}]} {
    %cst = arith.constant 0.000000e+00 : f32
    %0 = vector.broadcast %cst : f32 to vector<18x32x32xf32>
    %c0 = arith.constant 0 : index
    %c0_0 = arith.constant 0 : index
    %c0_1 = arith.constant 0 : index
    %1 = vector.load %arg20[%c0, %c0_0, %c0_1] : memref<18x32x32xf32, #tpu.memory_space<vmem>>, vector<18x32x32xf32>
    tpu.vector_store %arg20[%c0, %c0_0, %c0_1], %0 {strides = array<i32>} : memref<18x32x32xf32, #tpu.memory_space<vmem>>, vector<18x32x32xf32>,
    %cst_2 = arith.constant 0.000000e+00 : f32
    %2 = vector.broadcast %cst_2 : f32 to vector<18x32x64xf32>
    %c0_3 = arith.constant 0 : index
    %c0_4 = arith.constant 0 : index
    %c0_5 = arith.constant 0 : index
    %3 = vector.load %arg21[%c0_3, %c0_4, %c0_5] : memref<18x32x64xf32, #tpu.memory_space<vmem>>, vector<18x32x64xf32>
    tpu.vector_store %arg21[%c0_3, %c0_4, %c0_5], %2 {strides = array<i32>} : memref<18x32x64xf32, #tpu.memory_space<vmem>>, vector<18x32x64xf32>,
    %c0_6 = arith.constant 0 : index
    %c0_7 = arith.constant 0 : index
    %c0_8 = arith.constant 0 : index
    %c0_9 = arith.constant 0 : index
    %4 = vector.load %arg1[%c0_6, %c0_7, %c0_8, %c0_9] : memref<1x16x16x32xf32, #tpu.memory_space<vmem>>, vector<1x16x16x32xf32>
    %5 = vector.shape_cast %4 : vector<1x16x16x32xf32> to vector<16x16x32xf32>
    %6 = vector.shape_cast %5 : vector<16x16x32xf32> to vector<256x32xf32>
    %c0_10 = arith.constant 0 : index
    %c0_11 = arith.constant 0 : index
    %7 = vector.load %arg2[%c0_10, %c0_11] : memref<1x32xf32, #tpu.memory_space<vmem>>, vector<1x32xf32>
    %c0_12 = arith.constant 0 : index
    %c0_13 = arith.constant 0 : index
    %8 = vector.load %arg3[%c0_12, %c0_13] : memref<1x32xf32, #tpu.memory_space<vmem>>, vector<1x32xf32>
    %c0_14 = arith.constant 0 : index
    %c0_15 = arith.constant 0 : index
    %9 = vector.load %arg4[%c0_14, %c0_15] : memref<32x32xf32, #tpu.memory_space<vmem>>, vector<32x32xf32>
    %cst_16 = arith.constant dense<0.000000e+00> : vector<32xf32>
    %10 = vector.multi_reduction <add>, %6, %cst_16 [0] : vector<256x32xf32> to vector<32xf32>
    %11 = vector.shape_cast %10 : vector<32xf32> to vector<1x32xf32>
    %12 = arith.mulf %6, %6 : vector<256x32xf32>
    %cst_17 = arith.constant dense<0.000000e+00> : vector<32xf32>
    %13 = vector.multi_reduction <add>, %12, %cst_17 [0] : vector<256x32xf32> to vector<32xf32>
    %14 = vector.shape_cast %13 : vector<32xf32> to vector<1x32xf32>
    %15 = tpu.concatenate %11, %14 in 0 : vector<1x32xf32>, vector<1x32xf32> -> vector<2x32xf32>
    %cst_18 = arith.constant dense<0.000000e+00> : vector<2x32xf32>
    %16 = tpu.matmul %15, %9, %cst_18 {dimension_numbers = #tpu.dot_dimension_numbers<[1], [0], [0], [1], [0, 0, 1, 1], [], []>} : vector<2x32xf32>, vector<32x32xf32>, vector<2x32xf32> -> vector<2x32xf32>
    %17 = vector.extract_strided_slice %16 {offsets = [0, 0], sizes = [1, 32], strides = [1, 1]} : vector<2x32xf32> to vector<1x32xf32>
    %18 = vector.extract_strided_slice %16 {offsets = [1, 0], sizes = [1, 32], strides = [1, 1]} : vector<2x32xf32> to vector<1x32xf32>
    %19 = arith.mulf %17, %17 : vector<1x32xf32>
    %20 = arith.subf %18, %19 : vector<1x32xf32>
    %cst_19 = arith.constant 0.000000e+00 : f32
    %21 = vector.broadcast %cst_19 : f32 to vector<1x32xf32>
    %22 = arith.maximumf %20, %21 : vector<1x32xf32>
    %cst_20 = arith.constant 9.99999974E-6 : f32
    %23 = vector.broadcast %cst_20 : f32 to vector<1x32xf32>
    %24 = arith.addf %22, %23 : vector<1x32xf32>
    %25 = math.rsqrt %24 : vector<1x32xf32>
    %26 = vector.broadcast %17 : vector<1x32xf32> to vector<256x32xf32>
    %27 = arith.subf %6, %26 : vector<256x32xf32>
    %28 = vector.broadcast %25 : vector<1x32xf32> to vector<256x32xf32>
    %29 = arith.mulf %27, %28 : vector<256x32xf32>
    %30 = vector.broadcast %7 : vector<1x32xf32> to vector<256x32xf32>
    %31 = arith.mulf %29, %30 : vector<256x32xf32>
    %32 = vector.broadcast %8 : vector<1x32xf32> to vector<256x32xf32>
    %33 = arith.addf %31, %32 : vector<256x32xf32>
    %34 = arith.negf %33 : vector<256x32xf32>
    %35 = math.exp %34 : vector<256x32xf32>
    %cst_21 = arith.constant 1.000000e+00 : f32
    %36 = vector.broadcast %cst_21 : f32 to vector<256x32xf32>
    %37 = arith.addf %36, %35 : vector<256x32xf32>
    %38 = arith.divf %36, %37 : vector<256x32xf32>
    %39 = arith.mulf %33, %38 : vector<256x32xf32>
    %40 = vector.shape_cast %39 : vector<256x32xf32> to vector<16x16x32xf32>
    %c1 = arith.constant 1 : index
    %c8 = arith.constant 8 : index
    %c0_22 = arith.constant 0 : index
    %41 = vector.load %arg20[%c1, %c8, %c0_22] : memref<18x32x32xf32, #tpu.memory_space<vmem>>, vector<16x16x32xf32>
    tpu.vector_store %arg20[%c1, %c8, %c0_22], %40 {strides = array<i32>} : memref<18x32x32xf32, #tpu.memory_space<vmem>>, vector<16x16x32xf32>,
    %c0_23 = arith.constant 0 : index
    %c7 = arith.constant 7 : index
    %c0_24 = arith.constant 0 : index
    %42 = vector.load %arg20[%c0_23, %c7, %c0_24] : memref<18x32x32xf32, #tpu.memory_space<vmem>>, vector<16x16x32xf32>
    %c0_25 = arith.constant 0 : index
    %c8_26 = arith.constant 8 : index
    %c0_27 = arith.constant 0 : index
    %43 = vector.load %arg20[%c0_25, %c8_26, %c0_27] : memref<18x32x32xf32, #tpu.memory_space<vmem>>, vector<16x16x32xf32>
    %c0_28 = arith.constant 0 : index
    %c9 = arith.constant 9 : index
    %c0_29 = arith.constant 0 : index
    %44 = vector.load %arg20[%c0_28, %c9, %c0_29] : memref<18x32x32xf32, #tpu.memory_space<vmem>>, vector<16x16x32xf32>
    %c1_30 = arith.constant 1 : index
    %c7_31 = arith.constant 7 : index
    %c0_32 = arith.constant 0 : index
    %45 = vector.load %arg20[%c1_30, %c7_31, %c0_32] : memref<18x32x32xf32, #tpu.memory_space<vmem>>, vector<16x16x32xf32>
    %c1_33 = arith.constant 1 : index
    %c8_34 = arith.constant 8 : index
    %c0_35 = arith.constant 0 : index
    %46 = vector.load %arg20[%c1_33, %c8_34, %c0_35] : memref<18x32x32xf32, #tpu.memory_space<vmem>>, vector<16x16x32xf32>
    %c1_36 = arith.constant 1 : index
    %c9_37 = arith.constant 9 : index
    %c0_38 = arith.constant 0 : index
    %47 = vector.load %arg20[%c1_36, %c9_37, %c0_38] : memref<18x32x32xf32, #tpu.memory_space<vmem>>, vector<16x16x32xf32>
    %c2 = arith.constant 2 : index
    %c7_39 = arith.constant 7 : index
    %c0_40 = arith.constant 0 : index
    %48 = vector.load %arg20[%c2, %c7_39, %c0_40] : memref<18x32x32xf32, #tpu.memory_space<vmem>>, vector<16x16x32xf32>
    %c2_41 = arith.constant 2 : index
    %c8_42 = arith.constant 8 : index
    %c0_43 = arith.constant 0 : index
    %49 = vector.load %arg20[%c2_41, %c8_42, %c0_43] : memref<18x32x32xf32, #tpu.memory_space<vmem>>, vector<16x16x32xf32>
    %c2_44 = arith.constant 2 : index
    %c9_45 = arith.constant 9 : index
    %c0_46 = arith.constant 0 : index
    %50 = vector.load %arg20[%c2_44, %c9_45, %c0_46] : memref<18x32x32xf32, #tpu.memory_space<vmem>>, vector<16x16x32xf32>
    %51 = tpu.concatenate %42, %43, %44, %45, %46, %47, %48, %49, %50 in 2 : vector<16x16x32xf32>, vector<16x16x32xf32>, vector<16x16x32xf32>, vector<16x16x32xf32>, vector<16x16x32xf32>, vector<16x16x32xf32>, vector<16x16x32xf32>, vector<16x16x32xf32>, vector<16x16x32xf32> -> vector<16x16x288xf32>
    %52 = vector.shape_cast %51 : vector<16x16x288xf32> to vector<256x288xf32>
    %53 = arith.truncf %52 : vector<256x288xf32> to vector<256x288xbf16>
    %c0_47 = arith.constant 0 : index
    %c0_48 = arith.constant 0 : index
    %54 = vector.load %arg5[%c0_47, %c0_48] : memref<288x64xbf16, #tpu.memory_space<vmem>>, vector<288x64xbf16>
    %cst_49 = arith.constant dense<0.000000e+00> : vector<256x64xf32>
    %55 = tpu.matmul %53, %54, %cst_49 {dimension_numbers = #tpu.dot_dimension_numbers<[1], [0], [0], [1], [0, 0, 1, 1], [], []>} : vector<256x288xbf16>, vector<288x64xbf16>, vector<256x64xf32> -> vector<256x64xf32>
    %c0_50 = arith.constant 0 : index
    %c0_51 = arith.constant 0 : index
    %c0_52 = arith.constant 0 : index
    %56 = vector.load %arg6[%c0_50, %c0_51, %c0_52] : memref<1x1x64xf32, #tpu.memory_space<vmem>>, vector<1x1x64xf32>
    %57 = vector.shape_cast %56 : vector<1x1x64xf32> to vector<1x64xf32>
    %58 = vector.broadcast %57 : vector<1x64xf32> to vector<256x64xf32>
    %59 = arith.addf %55, %58 : vector<256x64xf32>
    %c0_53 = arith.constant 0 : index
    %c0_54 = arith.constant 0 : index
    %60 = vector.load %arg7[%c0_53, %c0_54] : memref<1x64xf32, #tpu.memory_space<vmem>>, vector<1x64xf32>
    %c0_55 = arith.constant 0 : index
    %c0_56 = arith.constant 0 : index
    %61 = vector.load %arg8[%c0_55, %c0_56] : memref<1x64xf32, #tpu.memory_space<vmem>>, vector<1x64xf32>
    %c0_57 = arith.constant 0 : index
    %c0_58 = arith.constant 0 : index
    %62 = vector.load %arg9[%c0_57, %c0_58] : memref<64x64xf32, #tpu.memory_space<vmem>>, vector<64x64xf32>
    %cst_59 = arith.constant dense<0.000000e+00> : vector<64xf32>
    %63 = vector.multi_reduction <add>, %59, %cst_59 [0] : vector<256x64xf32> to vector<64xf32>
    %64 = vector.shape_cast %63 : vector<64xf32> to vector<1x64xf32>
    %65 = arith.mulf %59, %59 : vector<256x64xf32>
    %cst_60 = arith.constant dense<0.000000e+00> : vector<64xf32>
    %66 = vector.multi_reduction <add>, %65, %cst_60 [0] : vector<256x64xf32> to vector<64xf32>
    %67 = vector.shape_cast %66 : vector<64xf32> to vector<1x64xf32>
    %68 = tpu.concatenate %64, %67 in 0 : vector<1x64xf32>, vector<1x64xf32> -> vector<2x64xf32>
    %cst_61 = arith.constant dense<0.000000e+00> : vector<2x64xf32>
    %69 = tpu.matmul %68, %62, %cst_61 {dimension_numbers = #tpu.dot_dimension_numbers<[1], [0], [0], [1], [0, 0, 1, 1], [], []>} : vector<2x64xf32>, vector<64x64xf32>, vector<2x64xf32> -> vector<2x64xf32>
    %70 = vector.extract_strided_slice %69 {offsets = [0, 0], sizes = [1, 64], strides = [1, 1]} : vector<2x64xf32> to vector<1x64xf32>
    %71 = vector.extract_strided_slice %69 {offsets = [1, 0], sizes = [1, 64], strides = [1, 1]} : vector<2x64xf32> to vector<1x64xf32>
    %72 = arith.mulf %70, %70 : vector<1x64xf32>
    %73 = arith.subf %71, %72 : vector<1x64xf32>
    %cst_62 = arith.constant 0.000000e+00 : f32
    %74 = vector.broadcast %cst_62 : f32 to vector<1x64xf32>
    %75 = arith.maximumf %73, %74 : vector<1x64xf32>
    %cst_63 = arith.constant 9.99999974E-6 : f32
    %76 = vector.broadcast %cst_63 : f32 to vector<1x64xf32>
    %77 = arith.addf %75, %76 : vector<1x64xf32>
    %78 = math.rsqrt %77 : vector<1x64xf32>
    %79 = vector.broadcast %70 : vector<1x64xf32> to vector<256x64xf32>
    %80 = arith.subf %59, %79 : vector<256x64xf32>
    %81 = vector.broadcast %78 : vector<1x64xf32> to vector<256x64xf32>
    %82 = arith.mulf %80, %81 : vector<256x64xf32>
    %83 = vector.broadcast %60 : vector<1x64xf32> to vector<256x64xf32>
    %84 = arith.mulf %82, %83 : vector<256x64xf32>
    %85 = vector.broadcast %61 : vector<1x64xf32> to vector<256x64xf32>
    %86 = arith.addf %84, %85 : vector<256x64xf32>
    %87 = arith.negf %86 : vector<256x64xf32>
    %88 = math.exp %87 : vector<256x64xf32>
    %cst_64 = arith.constant 1.000000e+00 : f32
    %89 = vector.broadcast %cst_64 : f32 to vector<256x64xf32>
    %90 = arith.addf %89, %88 : vector<256x64xf32>
    %91 = arith.divf %89, %90 : vector<256x64xf32>
    %92 = arith.mulf %86, %91 : vector<256x64xf32>
    %93 = vector.shape_cast %92 : vector<256x64xf32> to vector<16x16x64xf32>
    %c1_65 = arith.constant 1 : index
    %c8_66 = arith.constant 8 : index
    %c0_67 = arith.constant 0 : index
    %94 = vector.load %arg21[%c1_65, %c8_66, %c0_67] : memref<18x32x64xf32, #tpu.memory_space<vmem>>, vector<16x16x64xf32>
    tpu.vector_store %arg21[%c1_65, %c8_66, %c0_67], %93 {strides = array<i32>} : memref<18x32x64xf32, #tpu.memory_space<vmem>>, vector<16x16x64xf32>,
    %c0_68 = arith.constant 0 : index
    %c7_69 = arith.constant 7 : index
    %c0_70 = arith.constant 0 : index
    %95 = vector.load %arg21[%c0_68, %c7_69, %c0_70] : memref<18x32x64xf32, #tpu.memory_space<vmem>>, vector<16x16x64xf32>
    %c0_71 = arith.constant 0 : index
    %c8_72 = arith.constant 8 : index
    %c0_73 = arith.constant 0 : index
    %96 = vector.load %arg21[%c0_71, %c8_72, %c0_73] : memref<18x32x64xf32, #tpu.memory_space<vmem>>, vector<16x16x64xf32>
    %c0_74 = arith.constant 0 : index
    %c9_75 = arith.constant 9 : index
    %c0_76 = arith.constant 0 : index
    %97 = vector.load %arg21[%c0_74, %c9_75, %c0_76] : memref<18x32x64xf32, #tpu.memory_space<vmem>>, vector<16x16x64xf32>
    %c1_77 = arith.constant 1 : index
    %c7_78 = arith.constant 7 : index
    %c0_79 = arith.constant 0 : index
    %98 = vector.load %arg21[%c1_77, %c7_78, %c0_79] : memref<18x32x64xf32, #tpu.memory_space<vmem>>, vector<16x16x64xf32>
    %c1_80 = arith.constant 1 : index
    %c8_81 = arith.constant 8 : index
    %c0_82 = arith.constant 0 : index
    %99 = vector.load %arg21[%c1_80, %c8_81, %c0_82] : memref<18x32x64xf32, #tpu.memory_space<vmem>>, vector<16x16x64xf32>
    %c1_83 = arith.constant 1 : index
    %c9_84 = arith.constant 9 : index
    %c0_85 = arith.constant 0 : index
    %100 = vector.load %arg21[%c1_83, %c9_84, %c0_85] : memref<18x32x64xf32, #tpu.memory_space<vmem>>, vector<16x16x64xf32>
    %c2_86 = arith.constant 2 : index
    %c7_87 = arith.constant 7 : index
    %c0_88 = arith.constant 0 : index
    %101 = vector.load %arg21[%c2_86, %c7_87, %c0_88] : memref<18x32x64xf32, #tpu.memory_space<vmem>>, vector<16x16x64xf32>
    %c2_89 = arith.constant 2 : index
    %c8_90 = arith.constant 8 : index
    %c0_91 = arith.constant 0 : index
    %102 = vector.load %arg21[%c2_89, %c8_90, %c0_91] : memref<18x32x64xf32, #tpu.memory_space<vmem>>, vector<16x16x64xf32>
    %c2_92 = arith.constant 2 : index
    %c9_93 = arith.constant 9 : index
    %c0_94 = arith.constant 0 : index
    %103 = vector.load %arg21[%c2_92, %c9_93, %c0_94] : memref<18x32x64xf32, #tpu.memory_space<vmem>>, vector<16x16x64xf32>
    %104 = tpu.concatenate %95, %96, %97, %98, %99, %100, %101, %102, %103 in 2 : vector<16x16x64xf32>, vector<16x16x64xf32>, vector<16x16x64xf32>, vector<16x16x64xf32>, vector<16x16x64xf32>, vector<16x16x64xf32>, vector<16x16x64xf32>, vector<16x16x64xf32>, vector<16x16x64xf32> -> vector<16x16x576xf32>
    %105 = vector.shape_cast %104 : vector<16x16x576xf32> to vector<256x576xf32>
    %106 = arith.truncf %105 : vector<256x576xf32> to vector<256x576xbf16>
    %c0_95 = arith.constant 0 : index
    %c0_96 = arith.constant 0 : index
    %107 = vector.load %arg10[%c0_95, %c0_96] : memref<576x64xbf16, #tpu.memory_space<vmem>>, vector<576x64xbf16>
    %cst_97 = arith.constant dense<0.000000e+00> : vector<256x64xf32>
    %108 = tpu.matmul %106, %107, %cst_97 {dimension_numbers = #tpu.dot_dimension_numbers<[1], [0], [0], [1], [0, 0, 1, 1], [], []>} : vector<256x576xbf16>, vector<576x64xbf16>, vector<256x64xf32> -> vector<256x64xf32>
    %c0_98 = arith.constant 0 : index
    %c0_99 = arith.constant 0 : index
    %109 = vector.load %arg11[%c0_98, %c0_99] : memref<1x64xf32, #tpu.memory_space<vmem>>, vector<1x64xf32>
    %110 = vector.broadcast %109 : vector<1x64xf32> to vector<256x64xf32>
    %111 = arith.addf %108, %110 : vector<256x64xf32>
    %112 = arith.truncf %6 : vector<256x32xf32> to vector<256x32xbf16>
    %c0_100 = arith.constant 0 : index
    %c0_101 = arith.constant 0 : index
    %113 = vector.load %arg12[%c0_100, %c0_101] : memref<32x64xbf16, #tpu.memory_space<vmem>>, vector<32x64xbf16>
    %cst_102 = arith.constant dense<0.000000e+00> : vector<256x64xf32>
    %114 = tpu.matmul %112, %113, %cst_102 {dimension_numbers = #tpu.dot_dimension_numbers<[1], [0], [0], [1], [0, 0, 1, 1], [], []>} : vector<256x32xbf16>, vector<32x64xbf16>, vector<256x64xf32> -> vector<256x64xf32>
    %115 = arith.addf %111, %114 : vector<256x64xf32>
    %c0_103 = arith.constant 0 : index
    %c0_104 = arith.constant 0 : index
    %116 = vector.load %arg13[%c0_103, %c0_104] : memref<1x64xf32, #tpu.memory_space<vmem>>, vector<1x64xf32>
    %c0_105 = arith.constant 0 : index
    %c0_106 = arith.constant 0 : index
    %117 = vector.load %arg14[%c0_105, %c0_106] : memref<1x64xf32, #tpu.memory_space<vmem>>, vector<1x64xf32>
    %c0_107 = arith.constant 0 : index
    %c0_108 = arith.constant 0 : index
    %118 = vector.load %arg9[%c0_107, %c0_108] : memref<64x64xf32, #tpu.memory_space<vmem>>, vector<64x64xf32>
    %cst_109 = arith.constant dense<0.000000e+00> : vector<64xf32>
    %119 = vector.multi_reduction <add>, %115, %cst_109 [0] : vector<256x64xf32> to vector<64xf32>
    %120 = vector.shape_cast %119 : vector<64xf32> to vector<1x64xf32>
    %121 = arith.mulf %115, %115 : vector<256x64xf32>
    %cst_110 = arith.constant dense<0.000000e+00> : vector<64xf32>
    %122 = vector.multi_reduction <add>, %121, %cst_110 [0] : vector<256x64xf32> to vector<64xf32>
    %123 = vector.shape_cast %122 : vector<64xf32> to vector<1x64xf32>
    %124 = tpu.concatenate %120, %123 in 0 : vector<1x64xf32>, vector<1x64xf32> -> vector<2x64xf32>
    %cst_111 = arith.constant dense<0.000000e+00> : vector<2x64xf32>
    %125 = tpu.matmul %124, %118, %cst_111 {dimension_numbers = #tpu.dot_dimension_numbers<[1], [0], [0], [1], [0, 0, 1, 1], [], []>} : vector<2x64xf32>, vector<64x64xf32>, vector<2x64xf32> -> vector<2x64xf32>
    %126 = vector.extract_strided_slice %125 {offsets = [0, 0], sizes = [1, 64], strides = [1, 1]} : vector<2x64xf32> to vector<1x64xf32>
    %127 = vector.extract_strided_slice %125 {offsets = [1, 0], sizes = [1, 64], strides = [1, 1]} : vector<2x64xf32> to vector<1x64xf32>
    %128 = arith.mulf %126, %126 : vector<1x64xf32>
    %129 = arith.subf %127, %128 : vector<1x64xf32>
    %cst_112 = arith.constant 0.000000e+00 : f32
    %130 = vector.broadcast %cst_112 : f32 to vector<1x64xf32>
    %131 = arith.maximumf %129, %130 : vector<1x64xf32>
    %cst_113 = arith.constant 9.99999974E-6 : f32
    %132 = vector.broadcast %cst_113 : f32 to vector<1x64xf32>
    %133 = arith.addf %131, %132 : vector<1x64xf32>
    %134 = math.rsqrt %133 : vector<1x64xf32>
    %135 = vector.broadcast %126 : vector<1x64xf32> to vector<256x64xf32>
    %136 = arith.subf %115, %135 : vector<256x64xf32>
    %137 = vector.broadcast %134 : vector<1x64xf32> to vector<256x64xf32>
    %138 = arith.mulf %136, %137 : vector<256x64xf32>
    %139 = vector.broadcast %116 : vector<1x64xf32> to vector<256x64xf32>
    %140 = arith.mulf %138, %139 : vector<256x64xf32>
    %141 = vector.broadcast %117 : vector<1x64xf32> to vector<256x64xf32>
    %142 = arith.addf %140, %141 : vector<256x64xf32>
    %143 = arith.truncf %142 : vector<256x64xf32> to vector<256x64xbf16>
    %c0_114 = arith.constant 0 : index
    %c0_115 = arith.constant 0 : index
    %144 = vector.load %arg15[%c0_114, %c0_115] : memref<64x192xbf16, #tpu.memory_space<vmem>>, vector<64x192xbf16>
    %cst_116 = arith.constant dense<0.000000e+00> : vector<256x192xf32>
    %145 = tpu.matmul %143, %144, %cst_116 {dimension_numbers = #tpu.dot_dimension_numbers<[1], [0], [0], [1], [0, 0, 1, 1], [], []>} : vector<256x64xbf16>, vector<64x192xbf16>, vector<256x192xf32> -> vector<256x192xf32>
    %c0_117 = arith.constant 0 : index
    %c0_118 = arith.constant 0 : index
    %146 = vector.load %arg16[%c0_117, %c0_118] : memref<1x192xf32, #tpu.memory_space<vmem>>, vector<1x192xf32>
    %147 = vector.broadcast %146 : vector<1x192xf32> to vector<256x192xf32>
    %148 = arith.addf %145, %147 : vector<256x192xf32>
    %149 = vector.extract_strided_slice %148 {offsets = [0, 0], sizes = [256, 64], strides = [1, 1]} : vector<256x192xf32> to vector<256x64xf32>
    %150 = vector.extract_strided_slice %148 {offsets = [0, 64], sizes = [256, 64], strides = [1, 1]} : vector<256x192xf32> to vector<256x64xf32>
    %151 = vector.extract_strided_slice %148 {offsets = [0, 128], sizes = [256, 64], strides = [1, 1]} : vector<256x192xf32> to vector<256x64xf32>
    %152 = arith.truncf %149 : vector<256x64xf32> to vector<256x64xbf16>
    %153 = arith.truncf %150 : vector<256x64xf32> to vector<256x64xbf16>
    %cst_119 = arith.constant dense<0.000000e+00> : vector<256x256xf32>
    %154 = tpu.matmul %152, %153, %cst_119 {dimension_numbers = #tpu.dot_dimension_numbers<[1], [1], [0], [0], [0, 0, 1, 0], [], []>} : vector<256x64xbf16>, vector<256x64xbf16>, vector<256x256xf32> -> vector<256x256xf32>
    %cst_120 = arith.constant 1.250000e-01 : f32
    %155 = vector.broadcast %cst_120 : f32 to vector<256x256xf32>
    %156 = arith.mulf %154, %155 : vector<256x256xf32>
    %cst_121 = arith.constant dense<0xFF800000> : vector<256xf32>
    %157 = vector.multi_reduction <maximumf>, %156, %cst_121 [1] : vector<256x256xf32> to vector<256xf32>
    %158 = vector.shape_cast %157 : vector<256xf32> to vector<256x1xf32>
    %159 = vector.broadcast %158 : vector<256x1xf32> to vector<256x256xf32>
    %160 = arith.subf %156, %159 : vector<256x256xf32>
    %161 = math.exp %160 : vector<256x256xf32>
    %cst_122 = arith.constant dense<0.000000e+00> : vector<256xf32>
    %162 = vector.multi_reduction <add>, %161, %cst_122 [1] : vector<256x256xf32> to vector<256xf32>
    %163 = vector.shape_cast %162 : vector<256xf32> to vector<256x1xf32>
    %164 = arith.truncf %161 : vector<256x256xf32> to vector<256x256xbf16>
    %165 = arith.truncf %151 : vector<256x64xf32> to vector<256x64xbf16>
    %cst_123 = arith.constant dense<0.000000e+00> : vector<256x64xf32>
    %166 = tpu.matmul %164, %165, %cst_123 {dimension_numbers = #tpu.dot_dimension_numbers<[1], [0], [0], [1], [0, 0, 1, 1], [], []>} : vector<256x256xbf16>, vector<256x64xbf16>, vector<256x64xf32> -> vector<256x64xf32>
    %167 = tpu.reciprocal %163 {approx = true} : vector<256x1xf32> -> vector<256x1xf32>
    %168 = vector.broadcast %167 : vector<256x1xf32> to vector<256x64xf32>
    %169 = arith.mulf %166, %168 : vector<256x64xf32>
    %170 = arith.truncf %169 : vector<256x64xf32> to vector<256x64xbf16>
    %c0_124 = arith.constant 0 : index
    %c0_125 = arith.constant 0 : index
    %171 = vector.load %arg17[%c0_124, %c0_125] : memref<64x64xbf16, #tpu.memory_space<vmem>>, vector<64x64xbf16>
    %cst_126 = arith.constant dense<0.000000e+00> : vector<256x64xf32>
    %172 = tpu.matmul %170, %171, %cst_126 {dimension_numbers = #tpu.dot_dimension_numbers<[1], [0], [0], [1], [0, 0, 1, 1], [], []>} : vector<256x64xbf16>, vector<64x64xbf16>, vector<256x64xf32> -> vector<256x64xf32>
    %c0_127 = arith.constant 0 : index
    %c0_128 = arith.constant 0 : index
    %173 = vector.load %arg18[%c0_127, %c0_128] : memref<1x64xf32, #tpu.memory_space<vmem>>, vector<1x64xf32>
    %174 = vector.broadcast %173 : vector<1x64xf32> to vector<256x64xf32>
    %175 = arith.addf %172, %174 : vector<256x64xf32>
    %176 = arith.addf %175, %115 : vector<256x64xf32>
    %c0_129 = arith.constant 0 : index
    %c0_130 = arith.constant 0 : index
    %c0_131 = arith.constant 0 : index
    %177 = vector.load %arg19[%c0_129, %c0_130, %c0_131] : memref<1x256x64xf32, #tpu.memory_space<vmem>>, vector<1x256x64xf32>
    %178 = vector.shape_cast %177 : vector<1x256x64xf32> to vector<256x64xf32>
    %179 = vector.shape_cast %176 : vector<256x64xf32> to vector<1x256x64xf32>
    tpu.vector_store %arg19[%c0_129, %c0_130, %c0_131], %179 {strides = array<i32>} : memref<1x256x64xf32, #tpu.memory_space<vmem>>, vector<1x256x64xf32>,
    return
  }
  func.func @transform_0(%arg0: i32) -> (i32, i32, i32, i32) {
    %c0_i32 = arith.constant 0 : i32
    %c0_i32_0 = arith.constant 0 : i32
    %c0_i32_1 = arith.constant 0 : i32
    %c0_i32_2 = arith.constant 0 : i32
    return %arg0, %c0_i32, %c0_i32_0, %c0_i32_1 : i32, i32, i32, i32
  }
  func.func @transform_1(%arg0: i32) -> (i32, i32) {
    %c0_i32 = arith.constant 0 : i32
    %c0_i32_0 = arith.constant 0 : i32
    %c0_i32_1 = arith.constant 0 : i32
    return %c0_i32, %c0_i32_0 : i32, i32
  }
  func.func @transform_2(%arg0: i32) -> (i32, i32) {
    %c0_i32 = arith.constant 0 : i32
    %c0_i32_0 = arith.constant 0 : i32
    %c0_i32_1 = arith.constant 0 : i32
    return %c0_i32, %c0_i32_0 : i32, i32
  }
  func.func @transform_3(%arg0: i32) -> (i32, i32) {
    %c0_i32 = arith.constant 0 : i32
    %c0_i32_0 = arith.constant 0 : i32
    %c0_i32_1 = arith.constant 0 : i32
    return %c0_i32, %c0_i32_0 : i32, i32
  }
  func.func @transform_4(%arg0: i32) -> (i32, i32) {
    %c0_i32 = arith.constant 0 : i32
    %c0_i32_0 = arith.constant 0 : i32
    %c0_i32_1 = arith.constant 0 : i32
    return %c0_i32, %c0_i32_0 : i32, i32
  }
  func.func @transform_5(%arg0: i32) -> (i32, i32, i32) {
    %c0_i32 = arith.constant 0 : i32
    %c0_i32_0 = arith.constant 0 : i32
    %c0_i32_1 = arith.constant 0 : i32
    return %arg0, %c0_i32, %c0_i32_0 : i32, i32, i32
  }
  func.func @transform_6(%arg0: i32) -> (i32, i32) {
    %c0_i32 = arith.constant 0 : i32
    %c0_i32_0 = arith.constant 0 : i32
    %c0_i32_1 = arith.constant 0 : i32
    return %c0_i32, %c0_i32_0 : i32, i32
  }
  func.func @transform_7(%arg0: i32) -> (i32, i32) {
    %c0_i32 = arith.constant 0 : i32
    %c0_i32_0 = arith.constant 0 : i32
    %c0_i32_1 = arith.constant 0 : i32
    return %c0_i32, %c0_i32_0 : i32, i32
  }
  func.func @transform_8(%arg0: i32) -> (i32, i32) {
    %c0_i32 = arith.constant 0 : i32
    %c0_i32_0 = arith.constant 0 : i32
    %c0_i32_1 = arith.constant 0 : i32
    return %c0_i32, %c0_i32_0 : i32, i32
  }
  func.func @transform_9(%arg0: i32) -> (i32, i32) {
    %c0_i32 = arith.constant 0 : i32
    %c0_i32_0 = arith.constant 0 : i32
    %c0_i32_1 = arith.constant 0 : i32
    return %c0_i32, %c0_i32_0 : i32, i32
  }
  func.func @transform_10(%arg0: i32) -> (i32, i32) {
    %c0_i32 = arith.constant 0 : i32
    %c0_i32_0 = arith.constant 0 : i32
    %c0_i32_1 = arith.constant 0 : i32
    return %c0_i32, %c0_i32_0 : i32, i32
  }
  func.func @transform_11(%arg0: i32) -> (i32, i32) {
    %c0_i32 = arith.constant 0 : i32
    %c0_i32_0 = arith.constant 0 : i32
    %c0_i32_1 = arith.constant 0 : i32
    return %c0_i32, %c0_i32_0 : i32, i32
  }
  func.func @transform_12(%arg0: i32) -> (i32, i32) {
    %c0_i32 = arith.constant 0 : i32
    %c0_i32_0 = arith.constant 0 : i32
    %c0_i32_1 = arith.constant 0 : i32
    return %c0_i32, %c0_i32_0 : i32, i32
  }
  func.func @transform_13(%arg0: i32) -> (i32, i32) {
    %c0_i32 = arith.constant 0 : i32
    %c0_i32_0 = arith.constant 0 : i32
    %c0_i32_1 = arith.constant 0 : i32
    return %c0_i32, %c0_i32_0 : i32, i32
  }
  func.func @transform_14(%arg0: i32) -> (i32, i32) {
    %c0_i32 = arith.constant 0 : i32
    %c0_i32_0 = arith.constant 0 : i32
    %c0_i32_1 = arith.constant 0 : i32
    return %c0_i32, %c0_i32_0 : i32, i32
  }
  func.func @transform_15(%arg0: i32) -> (i32, i32) {
    %c0_i32 = arith.constant 0 : i32
    %c0_i32_0 = arith.constant 0 : i32
    %c0_i32_1 = arith.constant 0 : i32
    return %c0_i32, %c0_i32_0 : i32, i32
  }
  func.func @transform_16(%arg0: i32) -> (i32, i32) {
    %c0_i32 = arith.constant 0 : i32
    %c0_i32_0 = arith.constant 0 : i32
    %c0_i32_1 = arith.constant 0 : i32
    return %c0_i32, %c0_i32_0 : i32, i32
  }
  func.func @transform_17(%arg0: i32) -> (i32, i32) {
    %c0_i32 = arith.constant 0 : i32
    %c0_i32_0 = arith.constant 0 : i32
    %c0_i32_1 = arith.constant 0 : i32
    return %c0_i32, %c0_i32_0 : i32, i32
  }
  func.func @transform_18(%arg0: i32) -> (i32, i32, i32) {
    %c0_i32 = arith.constant 0 : i32
    %c0_i32_0 = arith.constant 0 : i32
    %c0_i32_1 = arith.constant 0 : i32
    return %arg0, %c0_i32, %c0_i32_0 : i32, i32, i32
  }
}

</mosaic_0001>

<bundles_post_ra>
// kernel: resblock_forward.1
= control target key start
LH: loop header
LB: loop body
LE: loop exit
PB: predicated region body
PF: predicated region fallthrough
CT: control target
= control target key end

     0   :  { %s17489_s0 = inlined_call_operand.vmem [shape: f32[2,16,16,32], index: 0, kind: input, shape index: {}]   ;;  %s17490_s1 = inlined_call_operand.vmem [shape: f32[1,32], index: 1, kind: input, shape index: {}]   ;;  %s17491_s2 = inlined_call_operand.vmem [shape: f32[1,32], index: 2, kind: input, shape index: {}]   ;;  %s17492_s3 = inlined_call_operand.vmem [shape: f32[32,32], index: 3, kind: input, shape index: {}]   ;;  %s17493_s4 = inlined_call_operand.vmem [shape: bf16[288,64], index: 4, kind: input, shape index: {}]   ;;  %s17494_s5 = inlined_call_operand.vmem [shape: f32[2,1,64], index: 5, kind: input, shape index: {}]   ;;  %s17495_s6 = inlined_call_operand.vmem [shape: f32[1,64], index: 6, kind: input, shape index: {}]   ;;  %s17496_s7 = inlined_call_operand.vmem [shape: f32[1,64], index: 7, kind: input, shape index: {}]   ;;  %s17497_s8 = inlined_call_operand.vmem [shape: f32[64,64], index: 8, kind: input, shape index: {}]   ;;  %s17498_s9 = inlined_call_operand.vmem [shape: bf16[576,64], index: 9, kind: input, shape index: {}]   ;;  %s17499_s10 = inlined_call_operand.vmem [shape: f32[1,64], index: 10, kind: input, shape index: {}]   ;;  %s17500_s11 = inlined_call_operand.vmem [shape: bf16[32,64], index: 11, kind: input, shape index: {}]   ;;  %s17501_s12 = inlined_call_operand.vmem [shape: f32[1,64], index: 12, kind: input, shape index: {}]   ;;  %s17502_s13 = inlined_call_operand.vmem [shape: f32[1,64], index: 13, kind: input, shape index: {}]   ;;  %s17503_s14 = inlined_call_operand.vmem [shape: bf16[64,192], index: 14, kind: input, shape index: {}]   ;;  %s17504_s15 = inlined_call_operand.vmem [shape: f32[1,192], index: 15, kind: input, shape index: {}]   ;;  %s17505_s16 = inlined_call_operand.vmem [shape: bf16[64,64], index: 16, kind: input, shape index: {}]   ;;  %s17506_s17 = inlined_call_operand.vmem [shape: f32[1,64], index: 17, kind: input, shape index: {}]   ;;  %s17507_s18 = inlined_call_operand.hbm [shape: f32[2,256,64], index: 18, kind: output, shape index: {}]  }
   0x1   :  { %17632 = sst [smem:[#allocation73_spill]] %s17489_s0 }
   0x2   :  { %17633 = sst [smem:[#allocation74_spill]] %s17490_s1 }
   0x3   :  { %17634 = sst [smem:[#allocation75_spill]] %s17491_s2 }
   0x4   :  { %17635 = sst [smem:[#allocation76_spill]] %s17492_s3 }
   0x5   :  { %17636 = sst [smem:[#allocation77_spill]] %s17493_s4 }
   0x6   :  { %17637 = sst [smem:[#allocation78_spill]] %s17494_s5 }
   0x7   :  { %17638 = sst [smem:[#allocation79_spill]] %s17495_s6 }
   0x8   :  { %23 = vsyncpa [#allocation5], 0 }
   0x9   :  { %25 = vsyncpa [#allocation5 + $0x1], 0  ;;  %s10715_s27 = smov 0   ;;  %s10717_s28 = smov 0  }
   0xa   :  { %s10719_s29 = smov 0   ;;  %s10721_s30 = smov 0  }
   0xb LB: > { %17639 = sst [smem:[#allocation7_spill]] %s10600_s27  ;;  %s10736_s0 = sadd.s32 4294967295, %s10612_s30   ;;  %s10612_s30 = sphi %s10721_s30, %s18641_s30   ;;  %s10608_s29 = sphi %s10719_s29, %s18643_s29   ;;  %s10604_s28 = sphi %s10717_s28, %s18645_s28   ;;  %s10600_s27 = sphi %s10715_s27, %s18644_s27  }
   0xc   : > { %17640 = sst [smem:[#allocation8_spill]] %s10608_s29  ;;  %s8649_s19 = sadd.s32 4294967294, %s10612_s30  }
   0xd   : > { %s10740_s1 = sadd.s32 1, %s10612_s30   ;;  %s426_s20 = sadd.s32 1, %s10608_s29 }
   0xe   : > { %17641 = sst [smem:[#allocation9_spill]] %s10740_s1  ;;  %s423_s21 = ssub.s32 %s10612_s30, %s10740_s1 }
   0xf   : > { %p436_p0 = scmp.ne.s32.totalorder %s10608_s29, %s10604_s28  ;;  %p424_p1 = scmp.eq.s32.totalorder %s423_s21, 0 }
  0x10   : > { %p437_p2 = scmp.eq.s32.totalorder %s10736_s0, 1  ;;  %p442_p3 = scmp.ne.s32.totalorder %s10604_s28, %s10600_s27 }
  0x11   : > { %p443_p4 = scmp.eq.s32.totalorder %s8649_s19, 1  ;;  %p8652_p7 = scmp.ge.s32.totalorder %s10612_s30, 1 }
  0x12   : > { %s10751_s22 = scalar_select %p424_p1, %s10608_s29, %s426_s20  }
  0x13   : > { %p10753_p5 = por %p437_p2, %p436_p0  ;;  %p10757_p6 = por %p443_p4, %p442_p3 }
  0x14   : > { %17642 = sst [smem:[#allocation10_spill]] %s10751_s22  ;;  %p523_p8 = scmp.lt.s32.totalorder %s10612_s30, 3 }
  0x15   : > { %s17644_s23 = scalar_select %p10757_p6, 1, 0 }
  0x16   : > { %p524_p9 = pnand %p8652_p7, %p523_p8 }
  0x17   : > { %17645 = sst [smem:[#allocation11_spill]] %s17644_s23 }
  0x18   : > { %527 = sbr.rel (%p524_p9) target bundleno = 3492 (0xda4), region = 92 }
  0x1d   : > { %s17646_s3 = sld [smem:[#allocation76_spill]]  ;;  %p580_p10 = scmp.lt.s32.totalorder %s10736_s0, 1  ;;  %vm17520_vm0 = vcmask 261120   ;;  %v17515_v3 = vmov 0.0   ;;  %vm17517_vm1 = vcmask 1040384  }
  0x1e   : > { %655 = vst.msk [vmem:[#allocation2 + $0x208] sm:$0xff] %vm17520_vm0, %v17515_v3  ;;  %s17647_s5 = sld [smem:[#allocation78_spill]]  ;;  %s17528_s29 = smov 64  }
  0x1f   : > { %s581_s22 = scalar_select %p580_p10, %s10736_s0, 1  ;;  %656 = vst.msk [vmem:[#allocation2 + $0x210] sm:$0xff] %vm17520_vm0, %v17515_v3 }
  0x20   : > { %590 = vst.msk [vmem:[#allocation2] sm:$0xff] %vm17520_vm0, %v17515_v3  ;;  %s17648_s23 = sld [smem:[#allocation73_spill]]  ;;  %s17526_s24 = smov 32  }
  0x21   : > { %s9128_s26 = sshll.u32 %s581_s22, 8  ;;  %591 = vst.msk [vmem:[#allocation2 + $0x8] sm:$0xff] %vm17520_vm0, %v17515_v3  ;;  %s17654_s4 = sld [smem:[#allocation77_spill]] }
  0x22   : > { %592 = vst.msk [vmem:[#allocation2 + $0x10] sm:$0xff] %vm17520_vm0, %v17515_v3  ;;  %s17655_s19 = sld [smem:[#allocation74_spill]]  ;;  %s9197_s20 = sshll.u32 %s10736_s0, 8 }
  0x23   : > { %v772_v0 = vld [vmem:[%s17646_s3 + $0x18] sm:$0xff]  ;;  %v771_v1 = vld [vmem:[%s17646_s3 + $0x10] sm:$0xff]  ;;  %v770_v2 = vld [vmem:[%s17646_s3 + $0x8] sm:$0xff]  ;;  %593 = vst.msk [vmem:[#allocation2 + $0x18] sm:$0xff] %vm17520_vm0, %v17515_v3  ;;  %s17874_s6 = sld [smem:[#allocation79_spill]] }
  0x24   : > { %960 = vmatpush.msra.mxu0 %v772_v0  ;;  %v769_v4 = vld [vmem:[%s17646_s3] sm:$0xff]  ;;  %s10786_s21 = scalar_lea.vmem %s17647_s5, %s581_s22  ;;  %594 = vst.msk [vmem:[#allocation2 + $0x20] sm:$0xff] %vm17520_vm0, %v17515_v3  ;;  %s17656_s22 = sld [smem:[#allocation75_spill]] }
  0x25   : > { %595 = vst.msk [vmem:[#allocation2 + $0x28] sm:$0xff] %vm17520_vm0, %v17515_v3  ;;  %s577_s3 = sand.u32 1, %s10604_s28  }
  0x26   : > { %961 = vmatpush.msra.mxu0 %v771_v1  ;;  %s10793_s27 = scalar_lea.vmem %s17648_s23, %s9128_s26  ;;  %596 = vst.msk [vmem:[#allocation2 + $0x30] sm:$0xff] %vm17520_vm0, %v17515_v3  ;;  %s10616_s23 = smov 96  }
  0x27   : > { %v10798_v5 = vld [vmem:[%s10793_s27] sm:$0xff]  ;;  %v10801_v6 = vld [vmem:[%s10793_s27 + $0x8] sm:$0xff]  ;;  %v10804_v7 = vld [vmem:[%s10793_s27 + $0x10] sm:$0xff]  ;;  %597 = vst.msk [vmem:[#allocation2 + $0x38] sm:$0xff] %vm17520_vm0, %v17515_v3  ;;  %s8653_s5 = sshll.u32 %s577_s3, 8  ;;  %s8563_s0 = scalar_lea.sflag [#allocation5], %s577_s3 }
  0x28   : > { %962 = vmatpush.msra.mxu0 %v770_v2  ;;  %v773_v8 = vsel %vm17520_vm0, %v10798_v5, 0.0  ;;  %v774_v9 = vsel %vm17520_vm0, %v10801_v6, 0.0  ;;  %v776_v10 = vsel %vm17520_vm0, %v10804_v7, 0.0  ;;  %v10815_v11 = vld [vmem:[%s10793_s27 + $0x18] sm:$0xff]  ;;  %v10820_v14 = vld [vmem:[%s10793_s27 + $0x20] sm:$0xff]  ;;  %v10825_v17 = vld [vmem:[%s10793_s27 + $0x28] sm:$0xff]  ;;  %v842_v25 = vmul.f32 %v10798_v5, %v10798_v5 }
  0x29   : > { %v775_v12 = vadd.f32 %v774_v9, %v773_v8  ;;  %v778_v13 = vsel %vm17520_vm0, %v10815_v11, 0.0  ;;  %v780_v16 = vsel %vm17520_vm0, %v10820_v14, 0.0  ;;  %v782_v19 = vsel %vm17520_vm0, %v10825_v17, 0.0  ;;  %v10830_v20 = vld [vmem:[%s10793_s27 + $0x30] sm:$0xff]  ;;  %v10839_v23 = vld [vmem:[%s10793_s27 + $0x38] sm:$0xff]  ;;  %v10854_v29 = vld [vmem:[%s10793_s27 + $0x40] sm:$0xff] }
  0x2a   : > { %963 = vmatpush.msra.mxu0 %v769_v4  ;;  %v784_v22 = vsel %vm17520_vm0, %v10830_v20, 0.0  ;;  %v786_v26 = vsel %vm17520_vm0, %v10839_v23, 0.0  ;;  %v843_v27 = vmul.f32 %v10801_v6, %v10801_v6  ;;  %v844_v28 = vmul.f32 %v10804_v7, %v10804_v7  ;;  %598 = vst.msk [vmem:[#allocation2 + $0x40] sm:$0xff] %vm17520_vm0, %v17515_v3  ;;  %v10865_v33 = vld [vmem:[%s10793_s27 + $0x48] sm:$0xff]  ;;  %v745_v40 = vld [vmem:[%s10793_s27 + $0x50] sm:$0xff]  ;;  %v746_v46 = vld [vmem:[%s10793_s27 + $0x58] sm:$0xff] }
  0x2b   : > { %v777_v15 = vadd.f32 %v776_v10, %v775_v12  ;;  %v788_v31 = vsel %vm17520_vm0, %v10854_v29, 0.0  ;;  %v845_v32 = vmul.f32 %v10815_v11, %v10815_v11  ;;  %599 = vst.msk [vmem:[#allocation2 + $0x48] sm:$0xff] %vm17520_vm0, %v17515_v3  ;;  %v874_v35 = vsel %vm17520_vm0, %v842_v25, 0.0  ;;  %v747_v52 = vld [vmem:[%s10793_s27 + $0x60] sm:$0xff]  ;;  %v748_v58 = vld [vmem:[%s10793_s27 + $0x68] sm:$0xff]  ;;  %v749_v0 = vld [vmem:[%s10793_s27 + $0x70] sm:$0xff] }
  0x2c   : > { %600 = vst.msk [vmem:[#allocation2 + $0x50] sm:$0xff] %vm17520_vm0, %v17515_v3  ;;  %v790_v36 = vsel %vm17520_vm0, %v10865_v33, 0.0  ;;  %v846_v37 = vmul.f32 %v10820_v14, %v10820_v14  ;;  %v875_v38 = vsel %vm17520_vm0, %v843_v27, 0.0  ;;  %v877_v39 = vsel %vm17520_vm0, %v844_v28, 0.0  ;;  %v750_v10 = vld [vmem:[%s10793_s27 + $0x78] sm:$0xff]  ;;  %v10938_v27 = vld [vmem:[%s10793_s27 + $0x88] sm:$0xff] }
  0x2d   : > { %v779_v18 = vadd.f32 %v778_v13, %v777_v15  ;;  %601 = vst.msk [vmem:[#allocation2 + $0x58] sm:$0xff] %vm17520_vm0, %v17515_v3  ;;  %v876_v42 = vadd.f32 %v875_v38, %v874_v35  ;;  %v792_v43 = vsel %vm17520_vm0, %v745_v40, 0.0  ;;  %v847_v44 = vmul.f32 %v10825_v17, %v10825_v17  ;;  %v10948_v35 = vld [vmem:[%s10793_s27 + $0x90] sm:$0xff] }
  0x2e   : > { %602 = vst.msk [vmem:[#allocation2 + $0x60] sm:$0xff] %vm17520_vm0, %v17515_v3  ;;  %v879_v45 = vsel %vm17520_vm0, %v845_v32, 0.0  ;;  %v794_v49 = vsel %vm17520_vm0, %v746_v46, 0.0  ;;  %v848_v50 = vmul.f32 %v10830_v20, %v10830_v20  ;;  %v881_v51 = vsel %vm17520_vm0, %v846_v37, 0.0 }
  0x2f   : > { %v781_v21 = vadd.f32 %v780_v16, %v779_v18  ;;  %603 = vst.msk [vmem:[#allocation2 + $0x68] sm:$0xff] %vm17520_vm0, %v17515_v3  ;;  %v878_v48 = vadd.f32 %v877_v39, %v876_v42  ;;  %v796_v55 = vsel %vm17520_vm0, %v747_v52, 0.0  ;;  %v849_v56 = vmul.f32 %v10839_v23, %v10839_v23 }
  0x30   : > { %604 = vst.msk [vmem:[#allocation2 + $0x70] sm:$0xff] %vm17520_vm0, %v17515_v3  ;;  %v883_v57 = vsel %vm17520_vm0, %v847_v44, 0.0  ;;  %v798_v61 = vsel %vm17520_vm0, %v748_v58, 0.0  ;;  %v850_v62 = vmul.f32 %v10854_v29, %v10854_v29  ;;  %v885_v63 = vsel %vm17520_vm0, %v848_v50, 0.0 }
  0x31   : > { %v783_v24 = vadd.f32 %v782_v19, %v781_v21  ;;  %605 = vst.msk [vmem:[#allocation2 + $0x78] sm:$0xff] %vm17520_vm0, %v17515_v3  ;;  %v880_v54 = vadd.f32 %v879_v45, %v878_v48  ;;  %v800_v4 = vsel %vm17520_vm0, %v749_v0, 0.0  ;;  %v851_v8 = vmul.f32 %v10865_v33, %v10865_v33  ;;  %v751_v19 = vld [vmem:[%s10793_s27 + $0x80] sm:$0xff] }
  0x32   : > { %606 = vst.msk [vmem:[#allocation2 + $0x80] sm:$0xff] %vm17520_vm0, %v17515_v3  ;;  %v887_v9 = vsel %vm17520_vm0, %v849_v56, 0.0  ;;  %v802_v15 = vsel %vm17520_vm0, %v750_v10, 0.0  ;;  %v852_v16 = vmul.f32 %v745_v40, %v745_v40  ;;  %v889_v18 = vsel %vm17520_vm0, %v850_v62, 0.0 }
  0x33   : > { %v785_v30 = vadd.f32 %v784_v22, %v783_v24  ;;  %607 = vst.msk [vmem:[#allocation2 + $0x88] sm:$0xff] %vm17520_vm0, %v17515_v3  ;;  %v882_v60 = vadd.f32 %v881_v51, %v880_v54  ;;  %v804_v24 = vsel %vm17520_vm0, %v751_v19, 0.0  ;;  %v853_v25 = vmul.f32 %v746_v46, %v746_v46 }
  0x34   : > { %608 = vst.msk [vmem:[#allocation2 + $0x90] sm:$0xff] %vm17520_vm0, %v17515_v3  ;;  %v854_v32 = vmul.f32 %v747_v52, %v747_v52  ;;  %v808_v38 = vsel %vm17520_vm0, %v10948_v35, 0.0  ;;  %v855_v39 = vmul.f32 %v748_v58, %v748_v58  ;;  %v856_v45 = vmul.f32 %v749_v0, %v749_v0 }
  0x35   : > { %v787_v34 = vadd.f32 %v786_v26, %v785_v30  ;;  %609 = vst.msk [vmem:[#allocation2 + $0x98] sm:$0xff] %vm17520_vm0, %v17515_v3  ;;  %v884_v2 = vadd.f32 %v883_v57, %v882_v60  ;;  %v891_v26 = vsel %vm17520_vm0, %v851_v8, 0.0  ;;  %v895_v40 = vsel %vm17520_vm0, %v853_v25, 0.0 }
  0x36   : > { %610 = vst.msk [vmem:[#allocation2 + $0xa0] sm:$0xff] %vm17520_vm0, %v17515_v3  ;;  %v897_v46 = vsel %vm17520_vm0, %v854_v32, 0.0  ;;  %v857_v51 = vmul.f32 %v750_v10, %v750_v10  ;;  %v899_v52 = vsel %vm17520_vm0, %v855_v39, 0.0  ;;  %v858_v57 = vmul.f32 %v751_v19, %v751_v19 }
  0x37   : > { %v789_v41 = vadd.f32 %v788_v31, %v787_v34  ;;  %611 = vst.msk [vmem:[#allocation2 + $0xa8] sm:$0xff] %vm17520_vm0, %v17515_v3  ;;  %v886_v13 = vadd.f32 %v885_v63, %v884_v2  ;;  %v806_v31 = vsel %vm17520_vm0, %v10938_v27, 0.0  ;;  %v893_v34 = vsel %vm17520_vm0, %v852_v16, 0.0 }
  0x38   : > { %612 = vst.msk [vmem:[#allocation2 + $0xb0] sm:$0xff] %vm17520_vm0, %v17515_v3  ;;  %v901_v58 = vsel %vm17520_vm0, %v856_v45, 0.0  ;;  %v859_v63 = vmul.f32 %v10938_v27, %v10938_v27  ;;  %v903_v0 = vsel %vm17520_vm0, %v857_v51, 0.0  ;;  %v905_v10 = vsel %vm17520_vm0, %v858_v57, 0.0  ;;  %v11055_v45 = vld [vmem:[%s10793_s27 + $0xe0] sm:$0xff] }
  0x39   : > { %v791_v47 = vadd.f32 %v790_v36, %v789_v41  ;;  %613 = vst.msk [vmem:[#allocation2 + $0xb8] sm:$0xff] %vm17520_vm0, %v17515_v3  ;;  %v888_v22 = vadd.f32 %v887_v9, %v886_v13  ;;  %v10958_v41 = vld [vmem:[%s10793_s27 + $0x98] sm:$0xff]  ;;  %v860_v9 = vmul.f32 %v10948_v35, %v10948_v35 }
  0x3a   : > { %614 = vst.msk [vmem:[#allocation2 + $0xc0] sm:$0xff] %vm17520_vm0, %v17515_v3  ;;  %v810_v44 = vsel %vm17520_vm0, %v10958_v41, 0.0  ;;  %v907_v19 = vsel %vm17520_vm0, %v859_v63, 0.0 }
  0x3b   : > { %v793_v53 = vadd.f32 %v792_v43, %v791_v47  ;;  %615 = vst.msk [vmem:[#allocation2 + $0xc8] sm:$0xff] %vm17520_vm0, %v17515_v3  ;;  %v890_v30 = vadd.f32 %v889_v18, %v888_v22  ;;  %v10968_v47 = vld [vmem:[%s10793_s27 + $0xa0] sm:$0xff]  ;;  %v861_v18 = vmul.f32 %v10958_v41, %v10958_v41 }
  0x3c   : > { %17649 = vst [vmem:[#allocation12_spill] sm:$0xff] %v10938_v27  ;;  %v812_v50 = vsel %vm17520_vm0, %v10968_v47, 0.0 }
  0x3d   : > { %v795_v59 = vadd.f32 %v794_v49, %v793_v53  ;;  %616 = vst.msk [vmem:[#allocation2 + $0xd0] sm:$0xff] %vm17520_vm0, %v17515_v3  ;;  %v892_v37 = vadd.f32 %v891_v26, %v890_v30  ;;  %v10978_v53 = vld [vmem:[%s10793_s27 + $0xa8] sm:$0xff]  ;;  %v862_v26 = vmul.f32 %v10968_v47, %v10968_v47  ;;  %v11033_v30 = vld [vmem:[%s10793_s27 + $0xd0] sm:$0xff] }
  0x3e   : > { %617 = vst.msk [vmem:[#allocation2 + $0xd8] sm:$0xff] %vm17520_vm0, %v17515_v3  ;;  %v814_v56 = vsel %vm17520_vm0, %v10978_v53, 0.0 }
  0x3f   : > { %v797_v1 = vadd.f32 %v796_v55, %v795_v59  ;;  %17650 = vst [vmem:[#allocation13_spill] sm:$0xff] %v10948_v35  ;;  %v894_v43 = vadd.f32 %v893_v34, %v892_v37  ;;  %v757_v59 = vld [vmem:[%s10793_s27 + $0xb0] sm:$0xff]  ;;  %v824_v34 = vsel %vm17520_vm0, %v11033_v30, 0.0  ;;  %v911_v37 = vsel %vm17520_vm0, %v861_v18, 0.0 }
  0x40   : > { %618 = vst.msk [vmem:[#allocation2 + $0xe0] sm:$0xff] %vm17520_vm0, %v17515_v3  ;;  %v816_v62 = vsel %vm17520_vm0, %v757_v59, 0.0 }
  0x41   : > { %v799_v12 = vadd.f32 %v798_v61, %v797_v1  ;;  %619 = vst.msk [vmem:[#allocation2 + $0xe8] sm:$0xff] %vm17520_vm0, %v17515_v3  ;;  %v896_v49 = vadd.f32 %v895_v40, %v894_v43  ;;  %v10997_v1 = vld [vmem:[%s10793_s27 + $0xb8] sm:$0xff]  ;;  %v864_v43 = vmul.f32 %v757_v59, %v757_v59  ;;  %v11079_v59 = vld [vmem:[%s10793_s27 + $0xf0] sm:$0xff] }
  0x42   : > { %17651 = vst [vmem:[#allocation14_spill] sm:$0xff] %v10958_v41  ;;  %v818_v8 = vsel %vm17520_vm0, %v10997_v1, 0.0 }
  0x43   : > { %v801_v21 = vadd.f32 %v800_v4, %v799_v12  ;;  %620 = vst.msk [vmem:[#allocation2 + $0xf0] sm:$0xff] %vm17520_vm0, %v17515_v3  ;;  %v898_v55 = vadd.f32 %v897_v46, %v896_v49  ;;  %v11009_v12 = vld [vmem:[%s10793_s27 + $0xc0] sm:$0xff]  ;;  %v828_v49 = vsel %vm17520_vm0, %v11055_v45, 0.0 }
  0x44   : > { %621 = vst.msk [vmem:[#allocation2 + $0xf8] sm:$0xff] %vm17520_vm0, %v17515_v3  ;;  %v820_v16 = vsel %vm17520_vm0, %v11009_v12, 0.0  ;;  %v866_v57 = vmul.f32 %v11009_v12, %v11009_v12 }
  0x45   : > { %v803_v28 = vadd.f32 %v802_v15, %v801_v21  ;;  %17652 = vst [vmem:[#allocation15_spill] sm:$0xff] %v10968_v47  ;;  %v900_v61 = vadd.f32 %v899_v52, %v898_v55  ;;  %v11021_v21 = vld [vmem:[%s10793_s27 + $0xc8] sm:$0xff] }
  0x46   : > { %622 = vst.msk [vmem:[#allocation2 + $0x100] sm:$0xff] %vm17520_vm0, %v17515_v3  ;;  %v822_v25 = vsel %vm17520_vm0, %v11021_v21, 0.0  ;;  %v11067_v52 = vld [vmem:[%s10793_s27 + $0xe8] sm:$0xff]  ;;  %v867_v63 = vmul.f32 %v11021_v21, %v11021_v21 }
  0x47   : > { %v805_v36 = vadd.f32 %v804_v24, %v803_v28  ;;  %623 = vst.msk [vmem:[#allocation2 + $0x108] sm:$0xff] %vm17520_vm0, %v17515_v3  ;;  %v902_v4 = vadd.f32 %v901_v58, %v900_v61  ;;  %v909_v28 = vsel %vm17520_vm0, %v860_v9, 0.0  ;;  %v917_v58 = vsel %vm17520_vm0, %v864_v43, 0.0 }
  0x48   : > { %17653 = vst [vmem:[#allocation16_spill] sm:$0xff] %v10978_v53 }
  0x49   : > { %v807_v42 = vadd.f32 %v806_v31, %v805_v36  ;;  %624 = vst.msk [vmem:[#allocation2 + $0x110] sm:$0xff] %vm17520_vm0, %v17515_v3  ;;  %v904_v15 = vadd.f32 %v903_v0, %v902_v4  ;;  %v863_v36 = vmul.f32 %v10978_v53, %v10978_v53 }
  0x4a   : > { %625 = vst.msk [vmem:[#allocation2 + $0x118] sm:$0xff] %vm17520_vm0, %v17515_v3 }
  0x4b   : > { %v809_v48 = vadd.f32 %v808_v38, %v807_v42  ;;  %626 = vst.msk [vmem:[#allocation2 + $0x120] sm:$0xff] %vm17520_vm0, %v17515_v3  ;;  %v906_v24 = vadd.f32 %v905_v10, %v904_v15  ;;  %v11045_v38 = vld [vmem:[%s10793_s27 + $0xd8] sm:$0xff]  ;;  %v915_v51 = vsel %vm17520_vm0, %v863_v36, 0.0  ;;  %v868_v10 = vmul.f32 %v11033_v30, %v11033_v30 }
  0x4c   : > { %627 = vst.msk [vmem:[#allocation2 + $0x128] sm:$0xff] %vm17520_vm0, %v17515_v3  ;;  %v826_v42 = vsel %vm17520_vm0, %v11045_v38, 0.0  ;;  %v869_v18 = vmul.f32 %v11045_v38, %v11045_v38 }
  0x4d   : > { %v811_v54 = vadd.f32 %v810_v44, %v809_v48  ;;  %628 = vst.msk [vmem:[#allocation2 + $0x130] sm:$0xff] %vm17520_vm0, %v17515_v3  ;;  %v908_v32 = vadd.f32 %v907_v19, %v906_v24  ;;  %v913_v44 = vsel %vm17520_vm0, %v862_v26, 0.0  ;;  %v923_v19 = vsel %vm17520_vm0, %v867_v63, 0.0 }
  0x4e   : > { %629 = vst.msk [vmem:[#allocation2 + $0x138] sm:$0xff] %vm17520_vm0, %v17515_v3  ;;  %v925_v26 = vsel %vm17520_vm0, %v868_v10, 0.0  ;;  %v1859_v10 = vld [vmem:[#allocation2 + $0x11] sm:$0xff] }
  0x4f   : > { %v813_v60 = vadd.f32 %v812_v50, %v811_v54  ;;  %630 = vst.msk [vmem:[#allocation2 + $0x140] sm:$0xff] %vm17520_vm0, %v17515_v3  ;;  %v910_v40 = vadd.f32 %v909_v28, %v908_v32  ;;  %v865_v50 = vmul.f32 %v10997_v1, %v10997_v1  ;;  %v927_v32 = vsel %vm17520_vm0, %v869_v18, 0.0  ;;  %v9146_v18 = vld [vmem:[%s17654_s4 + $0x88] sm:$0xff] }
  0x50   : > { %631 = vst.msk [vmem:[#allocation2 + $0x148] sm:$0xff] %vm17520_vm0, %v17515_v3  ;;  %3472 = vmatpush.bf16.msra.mxu3 %v9146_v18 }
  0x51   : > { %v815_v2 = vadd.f32 %v814_v56, %v813_v60  ;;  %632 = vst.msk [vmem:[#allocation2 + $0x150] sm:$0xff] %vm17520_vm0, %v17515_v3  ;;  %v912_v48 = vadd.f32 %v911_v37, %v910_v40  ;;  %v830_v56 = vsel %vm17520_vm0, %v11067_v52, 0.0  ;;  %v919_v0 = vsel %vm17520_vm0, %v865_v50, 0.0 }
  0x52   : > { %633 = vst.msk [vmem:[#allocation2 + $0x158] sm:$0xff] %vm17520_vm0, %v17515_v3  ;;  %v872_v37 = vmul.f32 %v11079_v59, %v11079_v59 }
  0x53   : > { %v817_v13 = vadd.f32 %v816_v62, %v815_v2  ;;  %634 = vst.msk [vmem:[#allocation2 + $0x160] sm:$0xff] %vm17520_vm0, %v17515_v3  ;;  %v914_v55 = vadd.f32 %v913_v44, %v912_v48  ;;  %v832_v62 = vsel %vm17520_vm0, %v11079_v59, 0.0  ;;  %v11091_v2 = vld [vmem:[%s10793_s27 + $0xf8] sm:$0xff] }
  0x54   : > { %635 = vst.msk [vmem:[#allocation2 + $0x168] sm:$0xff] %vm17520_vm0, %v17515_v3  ;;  %v834_v9 = vsel %vm17520_vm0, %v11091_v2, 0.0  ;;  %v933_v48 = vsel %vm17520_vm0, %v872_v37, 0.0 }
  0x55   : > { %v819_v22 = vadd.f32 %v818_v8, %v817_v13  ;;  %636 = vst.msk [vmem:[#allocation2 + $0x170] sm:$0xff] %vm17520_vm0, %v17515_v3  ;;  %v916_v61 = vadd.f32 %v915_v51, %v914_v55  ;;  %v921_v13 = vsel %vm17520_vm0, %v866_v57, 0.0 }
  0x56   : > { %637 = vst.msk [vmem:[#allocation2 + $0x178] sm:$0xff] %vm17520_vm0, %v17515_v3 }
  0x57   : > { %v821_v31 = vadd.f32 %v820_v16, %v819_v22  ;;  %638 = vst.msk [vmem:[#allocation2 + $0x180] sm:$0xff] %vm17520_vm0, %v17515_v3  ;;  %v918_v8 = vadd.f32 %v917_v58, %v916_v61 }
  0x58   : > { %639 = vst.msk [vmem:[#allocation2 + $0x188] sm:$0xff] %vm17520_vm0, %v17515_v3 }
  0x59   : > { %v823_v39 = vadd.f32 %v822_v25, %v821_v31  ;;  %640 = vst.msk [vmem:[#allocation2 + $0x190] sm:$0xff] %vm17520_vm0, %v17515_v3  ;;  %v920_v16 = vadd.f32 %v919_v0, %v918_v8  ;;  %v870_v25 = vmul.f32 %v11055_v45, %v11055_v45  ;;  %v871_v31 = vmul.f32 %v11067_v52, %v11067_v52 }
  0x5a   : > { %641 = vst.msk [vmem:[#allocation2 + $0x198] sm:$0xff] %vm17520_vm0, %v17515_v3 }
  0x5b   : > { %v825_v46 = vadd.f32 %v824_v34, %v823_v39  ;;  %642 = vst.msk [vmem:[#allocation2 + $0x1a0] sm:$0xff] %vm17520_vm0, %v17515_v3  ;;  %v922_v24 = vadd.f32 %v921_v13, %v920_v16  ;;  %v929_v39 = vsel %vm17520_vm0, %v870_v25, 0.0  ;;  %v931_v43 = vsel %vm17520_vm0, %v871_v31, 0.0 }
  0x5c   : > { %643 = vst.msk [vmem:[#allocation2 + $0x1a8] sm:$0xff] %vm17520_vm0, %v17515_v3 }
  0x5d   : > { %v827_v54 = vadd.f32 %v826_v42, %v825_v46  ;;  %644 = vst.msk [vmem:[#allocation2 + $0x1b0] sm:$0xff] %vm17520_vm0, %v17515_v3  ;;  %v924_v28 = vadd.f32 %v923_v19, %v922_v24  ;;  %v873_v42 = vmul.f32 %v11091_v2, %v11091_v2 }
  0x5e   : > { %645 = vst.msk [vmem:[#allocation2 + $0x1b8] sm:$0xff] %vm17520_vm0, %v17515_v3 }
  0x5f   : > { %v829_v60 = vadd.f32 %v828_v49, %v827_v54  ;;  %646 = vst.msk [vmem:[#allocation2 + $0x1c0] sm:$0xff] %vm17520_vm0, %v17515_v3  ;;  %v926_v36 = vadd.f32 %v925_v26, %v924_v28  ;;  %v935_v50 = vsel %vm17520_vm0, %v873_v42, 0.0 }
  0x60   : > { %647 = vst.msk [vmem:[#allocation2 + $0x1c8] sm:$0xff] %vm17520_vm0, %v17515_v3 }
  0x61   : > { %v831_v4 = vadd.f32 %v830_v56, %v829_v60  ;;  %648 = vst.msk [vmem:[#allocation2 + $0x1d0] sm:$0xff] %vm17520_vm0, %v17515_v3  ;;  %v928_v40 = vadd.f32 %v927_v32, %v926_v36 }
  0x62   : > { %649 = vst.msk [vmem:[#allocation2 + $0x1d8] sm:$0xff] %vm17520_vm0, %v17515_v3 }
  0x63   : > { %v833_v15 = vadd.f32 %v832_v62, %v831_v4  ;;  %650 = vst.msk [vmem:[#allocation2 + $0x1e0] sm:$0xff] %vm17520_vm0, %v17515_v3  ;;  %v930_v46 = vadd.f32 %v929_v39, %v928_v40 }
  0x64   : > { %651 = vst.msk [vmem:[#allocation2 + $0x1e8] sm:$0xff] %vm17520_vm0, %v17515_v3 }
  0x65   : > { %v835_v22 = vadd.f32 %v834_v9, %v833_v15  ;;  %652 = vst.msk [vmem:[#allocation2 + $0x1f0] sm:$0xff] %vm17520_vm0, %v17515_v3  ;;  %v932_v49 = vadd.f32 %v931_v43, %v930_v46  ;;  %v1858_v9 = vld [vmem:[#allocation2 + $0x9] sm:$0xff]  ;;  %v11167_v46 = vld [vmem:[%s17655_s19] ss:$0 sm:$0xff] }
  0x66   : > { %653 = vst.msk [vmem:[#allocation2 + $0x1f8] sm:$0xff] %vm17520_vm0, %v17515_v3  ;;  %v9263_v13 = vpack.i.bf16 %v1859_v10, %v1858_v9 }
  0x67   : > { %v836_v34 = vrot.slane %v835_v22, 4  ;;  %654 = vst.msk [vmem:[#allocation2 + $0x200] sm:$0xff] %vm17520_vm0, %v17515_v3  ;;  %v934_v54 = vadd.f32 %v933_v48, %v932_v49 }
  0x68   : > { %657 = vst.msk [vmem:[#allocation2 + $0x218] sm:$0xff] %vm17520_vm0, %v17515_v3  ;;  %9264 = vrot.lane.b32.xlu2 %v9263_v13, %s17528_s29 }
  0x69   : > { %v837_v44 = vadd.f32 %v836_v34, %v835_v22  ;;  %658 = vst.msk [vmem:[#allocation2 + $0x220] sm:$0xff] %vm17520_vm0, %v17515_v3  ;;  %v936_v55 = vadd.f32 %v935_v50, %v934_v54  ;;  %v9145_v22 = vld [vmem:[%s17654_s4 + $0x80] sm:$0xff] }
  0x6a   : > { %659 = vst.msk [vmem:[#allocation2 + $0x228] sm:$0xff] %vm17520_vm0, %v17515_v3  ;;  %3473 = vmatpush.bf16.msra.mxu3 %v9145_v22 }
  0x6b   : > { %660 = vst.msk [vmem:[#allocation2 + $0x230] sm:$0xff] %vm17520_vm0, %v17515_v3  ;;  %v838_v51 = vrot.slane %v837_v44, 2  ;;  %v937_v57 = vrot.slane %v936_v55, 4 }
  0x6c   : > { %661 = vst.msk [vmem:[#allocation2 + $0x238] sm:$0xff] %vm17520_vm0, %v17515_v3 }
  0x6d   : > { %v839_v56 = vadd.f32 %v838_v51, %v837_v44  ;;  %v938_v58 = vadd.f32 %v937_v57, %v936_v55 }
  0x6f   : > { %v840_v60 = vrot.slane %v839_v56, 1  ;;  %v939_v61 = vrot.slane %v938_v58, 2 }
  0x71   : > { %v940_v62 = vadd.f32 %v939_v61, %v938_v58  ;;  %v841_v63 = vadd.f32 %v840_v60, %v839_v56 }
  0x73   : > { %v941_v0 = vrot.slane %v940_v62, 1 }
  0x75   : > { %v942_v4 = vadd.f32 %v941_v0, %v940_v62 }
  0x77   : > { %v944_v8 = vsel %vm17517_vm1, %v841_v63, %v942_v4 }
  0x78   : > { %8656 = vmatmul.msk.f32.vlgmr.msra.gmra.mxu0 %vm17520_vm0, %v944_v8 }
  0xf5   : > { %v965_v15 = vpop.f32.mrf.mxu0 }
  0xf6   : > { %v968_v16 = vmul.f32 %v965_v15, %v965_v15  ;;  %v11156_v39 = vperm.slane %v965_v15, 0 }
  0xf8   : > { %v970_v19 = vrot.slane %v968_v16, 7  ;;  %v1011_v43 = vsub.f32 %v11021_v21, %v11156_v39  ;;  %v1012_v44 = vsub.f32 %v11033_v30, %v11156_v39  ;;  %v1013_v48 = vsub.f32 %v11045_v38, %v11156_v39  ;;  %v11178_v21 = vld [vmem:[%s17656_s22] ss:$0 sm:$0xff] }
  0xf9   : > { %v1014_v49 = vsub.f32 %v11055_v45, %v11156_v39  ;;  %v1015_v30 = vsub.f32 %v11067_v52, %v11156_v39  ;;  %v1016_v38 = vsub.f32 %v11079_v59, %v11156_v39  ;;  %v1017_v58 = vsub.f32 %v11091_v2, %v11156_v39 }
  0xfa   : > { %v972_v24 = vsub.f32 %v965_v15, %v970_v19  ;;  %v988_v59 = vsub.f32 %v10804_v7, %v11156_v39  ;;  %v989_v62 = vsub.f32 %v10815_v11, %v11156_v39  ;;  %v986_v2 = vsub.f32 %v10798_v5, %v11156_v39 }
  0xfb   : > { %v987_v5 = vsub.f32 %v10801_v6, %v11156_v39 }
  0xfc   : > { %v973_v25 = vmax.f32 %v972_v24, 0.0 }
  0xfe   : > { %v974_v26 = vadd.f32 1e-05, %v973_v25 }
 0x100   : > { %10052 = vrsqrt.f32 %v974_v26  ;;  %vm981_vm3 = vweird.f32 %v974_v26 }
 0x106   : > { %v10053_v28 = vpop.eup %10052 }
 0x107   : > { %v976_v31 = vmul.f32 %v10053_v28, %v974_v26  ;;  %vm982_vm2 = vweird.f32 %v10053_v28 }
 0x108   : > { %vm983_vm4 = vmor %vm981_vm3, %vm982_vm2 }
 0x109   : > { %v977_v32 = vmul.f32 %v10053_v28, %v976_v31 }
 0x10b   : > { %v978_v34 = vmul.f32 0.5, %v977_v32 }
 0x10d   : > { %v979_v36 = vsub.f32 1.5, %v978_v34 }
 0x10f   : > { %v980_v37 = vmul.f32 %v10053_v28, %v979_v36  ;;  %v990_v36 = vsub.f32 %v10820_v14, %v11156_v39 }
 0x111   : > { %v984_v40 = vsel %vm983_vm4, %v10053_v28, %v980_v37 }
 0x112   : > { %v11158_v42 = vperm.slane %v984_v40, 1 }
 0x114   : > { %v1044_v50 = vmul.f32 %v11158_v42, %v1011_v43  ;;  %v1045_v51 = vmul.f32 %v11158_v42, %v1012_v44  ;;  %v1046_v54 = vmul.f32 %v11158_v42, %v1013_v48  ;;  %v1047_v55 = vmul.f32 %v11158_v42, %v1014_v49 }
 0x115   : > { %v1048_v45 = vmul.f32 %v11158_v42, %v1015_v30  ;;  %v1049_v60 = vmul.f32 %v11158_v42, %v1016_v38  ;;  %v1050_v63 = vmul.f32 %v11158_v42, %v1017_v58  ;;  %v1021_v9 = vmul.f32 %v11158_v42, %v988_v59 }
 0x116   : > { %v1079_v56 = vmul.f32 %v11167_v46, %v1044_v50  ;;  %v1080_v57 = vmul.f32 %v11167_v46, %v1045_v51  ;;  %v1081_v52 = vmul.f32 %v11167_v46, %v1046_v54  ;;  %v1082_v0 = vmul.f32 %v11167_v46, %v1047_v55 }
 0x117   : > { %v1083_v8 = vmul.f32 %v11167_v46, %v1048_v45  ;;  %v1022_v10 = vmul.f32 %v11158_v42, %v989_v62  ;;  %v1084_v7 = vmul.f32 %v11167_v46, %v1049_v60  ;;  %v1019_v13 = vmul.f32 %v11158_v42, %v986_v2 }
 0x118   : > { %v11194_v61 = vadd.f32 %v11178_v21, %v1079_v56  ;;  %v11203_v4 = vadd.f32 %v11178_v21, %v1080_v57  ;;  %v11212_v11 = vadd.f32 %v11178_v21, %v1081_v52  ;;  %v1056_v15 = vmul.f32 %v11167_v46, %v1021_v9 }
 0x119   : > { %v1057_v16 = vmul.f32 %v11167_v46, %v1022_v10  ;;  %v1085_v19 = vmul.f32 %v11167_v46, %v1050_v63  ;;  %v11222_v22 = vadd.f32 %v11178_v21, %v1082_v0  ;;  %v11226_v25 = vadd.f32 %v11178_v21, %v1083_v8 }
 0x11a   : > { %v8682_v18 = vmul.f32 -1.442695, %v11194_v61  ;;  %v8683_v24 = vmul.f32 -1.442695, %v11203_v4  ;;  %v11229_v26 = vadd.f32 %v11178_v21, %v1056_v15  ;;  %v1020_v31 = vmul.f32 %v11158_v42, %v987_v5 }
 0x11b   : > { %v11232_v28 = vadd.f32 %v11178_v21, %v1057_v16  ;;  %v11236_v6 = vadd.f32 %v11178_v21, %v1084_v7  ;;  %v8684_v32 = vmul.f32 -1.442695, %v11212_v11  ;;  %v1054_v34 = vmul.f32 %v11167_v46, %v1019_v13 }
 0x11c   : > { %v8659_v37 = vmul.f32 -1.442695, %v11229_v26  ;;  %10054 = vpow2.f32 %v8682_v18  ;;  %v1055_v43 = vmul.f32 %v11167_v46, %v1020_v31  ;;  %v8685_v44 = vmul.f32 -1.442695, %v11222_v22 }
 0x11d   : > { %v8660_v40 = vmul.f32 -1.442695, %v11232_v28  ;;  %10056 = vpow2.f32 %v8683_v24  ;;  %v11247_v48 = vadd.f32 %v11178_v21, %v1054_v34  ;;  %v1023_v49 = vmul.f32 %v11158_v42, %v990_v36 }
 0x11e   : > { %v11251_v50 = vadd.f32 %v11178_v21, %v1085_v19  ;;  %10058 = vpow2.f32 %v8659_v37  ;;  %v8686_v14 = vmul.f32 -1.442695, %v11226_v25  ;;  %v11255_v51 = vadd.f32 %v11178_v21, %v1055_v43 }
 0x11f   : > { %10060 = vpow2.f32 %v8660_v40  ;;  %v8687_v30 = vmul.f32 -1.442695, %v11236_v6  ;;  %v991_v54 = vsub.f32 %v10825_v17, %v11156_v39  ;;  %v8657_v38 = vmul.f32 -1.442695, %v11247_v48 }
 0x120   : > { %10062 = vpow2.f32 %v8684_v32  ;;  %v8658_v55 = vmul.f32 -1.442695, %v11255_v51  ;;  %v1058_v56 = vmul.f32 %v11167_v46, %v1023_v49  ;;  %v1009_v58 = vsub.f32 %v10997_v1, %v11156_v39 }
 0x121   : > { %10064 = vpow2.f32 %v8685_v44  ;;  %v1024_v45 = vmul.f32 %v11158_v42, %v991_v54  ;;  %v1010_v60 = vsub.f32 %v11009_v12, %v11156_v39  ;;  %v8688_v52 = vmul.f32 -1.442695, %v11251_v50 }
 0x122   : > { %v10055_v57 = vpop.eup %10054  ;;  %10066 = vpow2.f32 %v8686_v14  ;;  %v1042_v1 = vmul.f32 %v11158_v42, %v1009_v58  ;;  %v992_v12 = vsub.f32 %v10830_v20, %v11156_v39  ;;  %v11283_v7 = vadd.f32 %v11178_v21, %v1058_v56 }
 0x123   : > { %v10057_v17 = vpop.eup %10056  ;;  %10068 = vpow2.f32 %v8687_v30  ;;  %v1043_v2 = vmul.f32 %v11158_v42, %v1010_v60  ;;  %v1059_v10 = vmul.f32 %v11167_v46, %v1024_v45  ;;  %v11293_v19 = vadd.f32 1.0, %v10055_v57 }
 0x124   : > { %v10059_v0 = vpop.eup %10058  ;;  %10070 = vpow2.f32 %v8657_v38  ;;  %v1025_v18 = vmul.f32 %v11158_v42, %v992_v12  ;;  %v993_v24 = vsub.f32 %v10839_v23, %v11156_v39  ;;  %v11298_v32 = vmul.f32 %v11167_v46, %v1042_v1 }
 0x125   : > { %v10061_v8 = vpop.eup %10060  ;;  %v11279_v9 = vadd.f32 1.0, %v10059_v0  ;;  %10072 = vpow2.f32 %v8658_v55  ;;  %v11301_v34 = vmul.f32 %v11167_v46, %v1043_v2  ;;  %v11304_v36 = vadd.f32 1.0, %v10057_v17 }
 0x126   : > { %v10063_v13 = vpop.eup %10062  ;;  %v11287_v16 = vadd.f32 1.0, %v10061_v8  ;;  %10074 = vpow2.f32 %v8688_v52  ;;  %v11307_v40 = vadd.f32 %v11178_v21, %v1059_v10  ;;  %v11310_v43 = vmul.f32 -1.442695, %v11283_v7 }
 0x127   : > { %v10065_v5 = vpop.eup %10064  ;;  %10076 = vrcp.f32 %v11279_v9  ;;  %17657 = vst [vmem:[#allocation17_spill] sm:$0xff] %v11301_v34  ;;  %v1288_v14 = vand.u32 2147483647, %v11279_v9  ;;  %v1290_v30 = vand.u32 2147483648, %v11279_v9  ;;  %v11319_v54 = vmul.f32 %v11158_v42, %v993_v24 }
 0x128   : > { %v10067_v31 = vpop.eup %10066  ;;  %10078 = vrcp.f32 %v11287_v16  ;;  %17658 = vst [vmem:[#allocation18_spill] sm:$0xff] %v11307_v40  ;;  %v11322_v38 = vmul.f32 %v11167_v46, %v1025_v18  ;;  %v1303_v45 = vand.u32 2147483647, %v11287_v16  ;;  %v11327_v57 = vadd.f32 1.0, %v10063_v13 }
 0x129   : > { %v10069_v37 = vpop.eup %10068  ;;  %v1305_v52 = vand.u32 2147483648, %v11287_v16  ;;  %v1635_v0 = vand.u32 2147483648, %v11293_v19  ;;  %vm1284_vm5 = vweird.f32 %v11279_v9  ;;  %vm1299_vm6 = vweird.f32 %v11287_v16 }
 0x12a   : > { %v10071_v49 = vpop.eup %10070  ;;  %vm11340_vm7 = vcmp.eq.f32.partialorder %v1288_v14, 8.507059e+37  ;;  %v1291_v18 = vor.u32 1.1754944e-38, %v1290_v30  ;;  %vm11346_vm8 = vcmp.eq.f32.partialorder %v1303_v45, 8.507059e+37  ;;  %v11352_v3 = vadd.f32 1.0, %v10067_v31 }
 0x12b   : > { %v10073_v55 = vpop.eup %10072  ;;  %v11325_v56 = vadd.f32 1.0, %v10071_v49  ;;  %v1306_v20 = vor.u32 1.1754944e-38, %v1305_v52  ;;  %v11354_v59 = vadd.f32 1.0, %v10069_v37 }
 0x12c   : > { %v10075_v60 = vpop.eup %10074  ;;  %v11331_v17 = vadd.f32 1.0, %v10073_v55  ;;  %v11350_v55 = vadd.f32 1.0, %v10065_v5 }
 0x12d   : > { %v10077_v2 = vpop.eup %10076  ;;  %10080 = vrcp.f32 %v11325_v56  ;;  %v11356_v14 = vadd.f32 1.0, %v10075_v60  ;;  %vm1254_vm10 = vweird.f32 %v11325_v56  ;;  %v1258_v5 = vand.u32 2147483647, %v11325_v56 }
 0x12e   : > { %v10079_v8 = vpop.eup %10078  ;;  %v1280_v10 = vmul.f32 %v10077_v2, %v11279_v9  ;;  %10082 = vrcp.f32 %v11331_v17  ;;  %vm1285_vm9 = vweird.f32 %v10077_v2  ;;  %v1260_v37 = vand.u32 2147483648, %v11325_v56 }
 0x12f   : > { %v1295_v24 = vmul.f32 %v10079_v8, %v11287_v16  ;;  %10084 = vrcp.f32 %v11293_v19  ;;  %vm1300_vm11 = vweird.f32 %v10079_v8  ;;  %vm1269_vm12 = vweird.f32 %v11331_v17  ;;  %vm1286_vm13 = vmor %vm1284_vm5, %vm1285_vm9 }
 0x130   : > { %v1281_v62 = vsub.f32 1.0, %v1280_v10  ;;  %10086 = vrcp.f32 %v11304_v36  ;;  %vm1301_vm14 = vmor %vm1299_vm6, %vm1300_vm11  ;;  %v1275_v30 = vand.u32 2147483648, %v11331_v17  ;;  %vm11392_vm3 = vcmp.eq.f32.partialorder %v1258_v5, 8.507059e+37  ;;  %v11410_v5 = vld [vmem:[#allocation2 + $0x10] sm:$0xff] }
 0x131   : > { %v1296_v15 = vsub.f32 1.0, %v1295_v24  ;;  %10088 = vrcp.f32 %v11327_v57  ;;  %v1680_v49 = vand.u32 2147483648, %v11350_v55  ;;  %vm1659_vm9 = vweird.f32 %v11327_v57 }
 0x132   : > { %v1282_v63 = vmul.f32 %v10077_v2, %v1281_v62  ;;  %10090 = vrcp.f32 %v11350_v55  ;;  %vm1674_vm11 = vweird.f32 %v11350_v55 }
 0x133   : > { %v10081_v31 = vpop.eup %10080  ;;  %v1297_v10 = vmul.f32 %v10079_v8, %v1296_v15  ;;  %v1273_v15 = vand.u32 2147483647, %v11331_v17  ;;  %10092 = vrcp.f32 %v11352_v3 }
 0x134   : > { %v10083_v60 = vpop.eup %10082  ;;  %v1283_v52 = vadd.f32 %v10077_v2, %v1282_v63  ;;  %v1250_v24 = vmul.f32 %v10081_v31, %v11325_v56  ;;  %vm1255_vm15 = vweird.f32 %v10081_v31  ;;  %10094 = vrcp.f32 %v11354_v59 }
 0x135   : > { %v1298_v62 = vadd.f32 %v10079_v8, %v1297_v10  ;;  %v1265_v44 = vmul.f32 %v10083_v60, %v11331_v17  ;;  %v11377_v1 = vpop.eup %10084  ;;  %vm1270_vm2 = vweird.f32 %v10083_v60  ;;  %10096 = vrcp.f32 %v11356_v14  ;;  %vm1256_vm4 = vmor %vm1254_vm10, %vm1255_vm15 }
 0x136   : > { %v1287_v23 = vsel %vm1286_vm13, %v10077_v2, %v1283_v52  ;;  %v1251_v63 = vsub.f32 1.0, %v1250_v24  ;;  %v11385_v52 = vpop.eup %10086  ;;  %vm11403_vm5 = vcmp.eq.f32.partialorder %v1273_v15, 8.507059e+37  ;;  %vm1271_vm6 = vmor %vm1269_vm12, %vm1270_vm2  ;;  %vm1630_vm10 = vweird.f32 %v11377_v1 }
 0x137   : > { %v1292_v9 = vsel %vm11340_vm7, %v1291_v18, %v1287_v23  ;;  %v1302_v10 = vsel %vm1301_vm14, %v10079_v8, %v1298_v62  ;;  %v1266_v58 = vsub.f32 1.0, %v1265_v44  ;;  %v11389_v23 = vpop.eup %10088  ;;  %v1276_v18 = vor.u32 1.1754944e-38, %v1275_v30 }
 0x138   : > { %v1307_v45 = vsel %vm11346_vm8, %v1306_v20, %v1302_v10  ;;  %v1731_v2 = vmul.f32 %v1292_v9, %v11229_v26  ;;  %v1252_v16 = vmul.f32 %v10081_v31, %v1251_v63  ;;  %v1261_v26 = vor.u32 1.1754944e-38, %v1260_v37  ;;  %v11397_v13 = vpop.eup %10090 }
 0x139   : > { %v1732_v24 = vmul.f32 %v1307_v45, %v11232_v28  ;;  %v1267_v12 = vmul.f32 %v10083_v60, %v1266_v58  ;;  %v11408_v45 = vld [vmem:[#allocation2 + $0x8] sm:$0xff]  ;;  %v11412_v37 = vpop.eup %10092  ;;  %vm1629_vm7 = vweird.f32 %v11293_v19  ;;  %vm1644_vm8 = vweird.f32 %v11304_v36 }
 0x13a   : > { %1764 = vst.msk [vmem:[#allocation2 + $0x48] sm:$0xff] %vm17520_vm0, %v1731_v2  ;;  %v1253_v44 = vadd.f32 %v10081_v31, %v1252_v16  ;;  %v11426_v17 = vpop.eup %10094  ;;  %v1625_v20 = vmul.f32 %v11377_v1, %v11293_v19  ;;  %vm1645_vm12 = vweird.f32 %v11385_v52  ;;  %v1655_v58 = vmul.f32 %v11389_v23, %v11327_v57 }
 0x13b   : > { %1765 = vst.msk [vmem:[#allocation2 + $0x50] sm:$0xff] %vm17520_vm0, %v1732_v24  ;;  %v1268_v28 = vadd.f32 %v10083_v60, %v1267_v12  ;;  %v11435_v24 = vpop.eup %10096  ;;  %vm1689_vm13 = vweird.f32 %v11352_v3  ;;  %vm1660_vm14 = vweird.f32 %v11389_v23  ;;  %vm1675_vm2 = vweird.f32 %v11397_v13 }
 0x13c   : > { %v1257_v62 = vsel %vm1256_vm4, %v10081_v31, %v1253_v44  ;;  %v11475_v16 = vor.u32 1.1754944e-38, %v1680_v49  ;;  %v1715_v9 = vmul.f32 %v11435_v24, %v11356_v14  ;;  %v17673_v49 = vand.u32 2147483647, %v11304_v36  ;;  %vm11512_vm4 = vmor %vm1629_vm7, %vm1630_vm10 }
 0x13d   : > { %v1262_v15 = vsel %vm11392_vm3, %v1261_v26, %v1257_v62  ;;  %v1272_v63 = vsel %vm1271_vm6, %v10083_v60, %v1268_v28  ;;  %v11443_v26 = vor.u32 1.1754944e-38, %v1635_v0  ;;  %v1670_v0 = vmul.f32 %v11397_v13, %v11350_v55  ;;  %vm11538_vm7 = vmor %vm1659_vm9, %vm1660_vm14 }
 0x13e   : > { %v1277_v10 = vsel %vm11403_vm5, %v1276_v18, %v1272_v63  ;;  %v1729_v2 = vmul.f32 %v1262_v15, %v11247_v48  ;;  %v1640_v48 = vmul.f32 %v11385_v52, %v11304_v36  ;;  %v1685_v62 = vmul.f32 %v11412_v37, %v11352_v3 }
 0x13f   : > { %v1730_v44 = vmul.f32 %v1277_v10, %v11255_v51  ;;  %v17667_v51 = vand.u32 2147483648, %v11304_v36  ;;  %v1700_v15 = vmul.f32 %v11426_v17, %v11354_v59  ;;  %vm1690_vm3 = vweird.f32 %v11412_v37 }
 0x140   : > { %1762 = vst.msk [vmem:[#allocation2 + $0x28] sm:$0xff] %vm17520_vm0, %v1729_v2  ;;  %vm11494_vm1 = vcmp.eq.f32.partialorder %v17673_v49, 8.507059e+37  ;;  %v1626_v56 = vsub.f32 1.0, %v1625_v20  ;;  %v1641_v8 = vsub.f32 1.0, %v1640_v48  ;;  %v1686_v35 = vsub.f32 1.0, %v1685_v62  ;;  %vm11565_vm9 = vmor %vm1689_vm13, %vm1690_vm3 }
 0x141   : > { %v11452_v28 = vor.u32 1.1754944e-38, %v17667_v51  ;;  %v2019_v18 = vld [vmem:[#allocation2 + $0x48] sm:$0xff]  ;;  %1763 = vst.msk [vmem:[#allocation2 + $0x30] sm:$0xff] %vm17520_vm0, %v1730_v44  ;;  %v17668_v44 = vand.u32 2147483648, %v11327_v57  ;;  %v1701_v53 = vsub.f32 1.0, %v1700_v15  ;;  %v1716_v20 = vsub.f32 1.0, %v1715_v9 }
 0x142   : > { %v11465_v63 = vld [vmem:[#allocation2 + $0x49] sm:$0xff]  ;;  %v11467_v10 = vld [vmem:[#allocation2 + $0x51] sm:$0xff]  ;;  %v17681_v48 = vand.u32 2147483647, %v11350_v55  ;;  %10098 = vpow2.f32 %v11310_v43  ;;  %v1627_v9 = vmul.f32 %v11377_v1, %v1626_v56  ;;  %v1687_v43 = vmul.f32 %v11412_v37, %v1686_v35 }
 0x143   : > { %v2020_v2 = vld [vmem:[#allocation2 + $0x50] sm:$0xff]  ;;  %v11472_v51 = vor.u32 1.1754944e-38, %v17668_v44  ;;  %v3046_v31 = vpack.c.bf16 %v11467_v10, %v11465_v63  ;;  %v17670_v44 = vand.u32 2147483647, %v11293_v19  ;;  %v1702_v27 = vmul.f32 %v11426_v17, %v1701_v53 }
 0x144   : > { %v11481_v60 = vpack.i.bf16 %v2020_v2, %v2019_v18  ;;  %v17676_v18 = vand.u32 2147483647, %v11327_v57  ;;  %vm11518_vm5 = vcmp.eq.f32.partialorder %v17681_v48, 8.507059e+37  ;;  %v1717_v47 = vmul.f32 %v11435_v24, %v1716_v20 }
 0x145   : > { %vm11488_vm6 = vcmp.eq.f32.partialorder %v17670_v44, 8.507059e+37  ;;  %v1656_v44 = vsub.f32 1.0, %v1655_v58  ;;  %8761 = vmatmul.msk.bf16.vlgmr.msra.gmra.mxu3 %vm17520_vm0, %v3046_v31  ;;  %vm11526_vm0 = vmor %vm1644_vm8, %vm1645_vm12  ;;  %v8662_v58 = vmul.f32 -1.442695, %v11307_v40  ;;  %v1628_v57 = vadd.f32 %v11377_v1, %v1627_v9  ;;  %v10506_v31 = vld [vmem:[%s10793_s27 + $0x50] sm:$0xff] }
 0x146   : > { %17669 = vst [vmem:[#allocation19_spill] sm:$0xff] %v11481_v60  ;;  %vm11500_vm15 = vcmp.eq.f32.partialorder %v17676_v18, 8.507059e+37  ;;  %9254 = vrot.lane.b32.xlu1 %v11481_v60, %s10616_s23  ;;  %v1671_v18 = vsub.f32 1.0, %v1670_v0  ;;  %v1642_v0 = vmul.f32 %v11385_v52, %v1641_v8  ;;  %vm11555_vm8 = vmor %vm1674_vm11, %vm1675_vm2  ;;  %v1703_v55 = vadd.f32 %v11426_v17, %v1702_v27 }
 0x147   : > { %v1890_v62 = vld [vmem:[#allocation2 + $0x27] sm:$0xff]  ;;  %v1657_v36 = vmul.f32 %v11389_v23, %v1656_v44  ;;  %10100 = vpow2.f32 %v8662_v58  ;;  %v1718_v20 = vadd.f32 %v11435_v24, %v1717_v47  ;;  %v1632_v58 = vsel %vm11512_vm4, %v11377_v1, %v1628_v57  ;;  %v1988_v57 = vld [vmem:[#allocation2 + $0x4f] sm:$0xff] }
 0x148   : > { %v1672_v48 = vmul.f32 %v11397_v13, %v1671_v18  ;;  %v1954_v56 = vld [vmem:[#allocation2 + $0x29] sm:$0xff]  ;;  %v1955_v60 = vld [vmem:[#allocation2 + $0x31] sm:$0xff]  ;;  %v1643_v41 = vadd.f32 %v11385_v52, %v1642_v0  ;;  %v1688_v18 = vadd.f32 %v11412_v37, %v1687_v43  ;;  %v17692_v9 = vand.u32 2147483647, %v11352_v3  ;;  %v10099_v49 = vpop.eup %10098 }
 0x149   : > { %v1891_v8 = vld [vmem:[#allocation2 + $0x2f] sm:$0xff]  ;;  %v11549_v40 = vpack.i.bf16 %v1955_v60, %v1954_v56  ;;  %v1658_v53 = vadd.f32 %v11389_v23, %v1657_v36  ;;  %v17695_v27 = vand.u32 2147483648, %v11352_v3  ;;  %vm17696_vm11 = vweird.f32 %v11426_v17 }
 0x14a   : > { %v9268_v34 = vpack.i.bf16 %v1891_v8, %v1890_v62  ;;  %v1673_v44 = vadd.f32 %v11397_v13, %v1672_v48  ;;  %vm11580_vm10 = vcmp.eq.f32.partialorder %v17692_v9, 8.507059e+37  ;;  %vm17697_vm12 = vweird.f32 %v11354_v59 }
 0x14b   : > { %9244 = vrot.lane.b32.xlu0 %v11549_v40, %s17526_s24  ;;  %v1696_v62 = vor.u32 1.1754944e-38, %v17695_v27  ;;  %vm11590_vm13 = vmor %vm17697_vm12, %vm17696_vm11  ;;  %v1662_v1 = vsel %vm11538_vm7, %v11389_v23, %v1658_v53  ;;  %v17700_v3 = vand.u32 2147483647, %v11354_v59  ;;  %v1692_v19 = vsel %vm11565_vm9, %v11412_v37, %v1688_v18  ;;  %v10508_v23 = vld [vmem:[%s10793_s27 + $0x60] sm:$0xff] }
 0x14c   : > { %9269 = vrot.lane.b32.xlu2 %v9268_v34, %s10616_s23  ;;  %v1647_v34 = vsel %vm11526_vm0, %v11385_v52, %v1643_v41  ;;  %v1677_v48 = vsel %vm11555_vm8, %v11397_v13, %v1673_v44  ;;  %v1707_v41 = vsel %vm11590_vm13, %v11426_v17, %v1703_v55  ;;  %v17703_v52 = vpack.i.bf16 %v11410_v5, %v11408_v45 }
 0x14d   : > { %vm11602_vm14 = vcmp.eq.f32.partialorder %v17700_v3, 8.507059e+37  ;;  %vm17704_vm0 = vweird.f32 %v11435_v24  ;;  %vm17705_vm2 = vweird.f32 %v11356_v14  ;;  %v11627_v13 = vadd.f32 1.0, %v10099_v49  ;;  %v10101_v5 = vpop.eup %10100 }
 0x14e   : > { %9259 = vrot.lane.b32.xlu1 %v17703_v52, %s17526_s24  ;;  %vm11623_vm3 = vmor %vm17705_vm2, %vm17704_vm0  ;;  %v1637_v37 = vsel %vm11488_vm6, %v11443_v26, %v1632_v58  ;;  %v1652_v17 = vsel %vm11494_vm1, %v11452_v28, %v1647_v34  ;;  %v1667_v45 = vsel %vm11500_vm15, %v11472_v51, %v1662_v1  ;;  %v17708_v15 = vand.u32 2147483648, %v11354_v59  ;;  %v1987_v26 = vld [vmem:[#allocation2 + $0x47] sm:$0xff] }
 0x14f   : > { %v17709_v56 = vand.u32 2147483647, %v11356_v14  ;;  %v17710_v8 = vand.u32 2147483648, %v11356_v14  ;;  %v1722_v12 = vsel %vm11623_vm3, %v11435_v24, %v1718_v20  ;;  %v11647_v28 = vadd.f32 1.0, %v10101_v5 }
 0x150   : > { %v1711_v43 = vor.u32 1.1754944e-38, %v17708_v15  ;;  %10102 = vrcp.f32 %v11627_v13  ;;  %v1682_v59 = vsel %vm11518_vm5, %v11475_v16, %v1677_v48  ;;  %v1697_v14 = vsel %vm11580_vm10, %v1696_v62, %v1692_v19 }
 0x151   : > { %vm1724_vm4 = vcmp.eq.f32.partialorder %v17709_v56, 8.507059e+37  ;;  %v1726_v30 = vor.u32 1.1754944e-38, %v17710_v8  ;;  %v1754_v2 = vmul.f32 %v1637_v37, %v11194_v61  ;;  %v1755_v35 = vmul.f32 %v1652_v17, %v11203_v4  ;;  %v10507_v61 = vld [vmem:[%s10793_s27 + $0x58] sm:$0xff] }
 0x152   : > { %v1712_v51 = vsel %vm11602_vm14, %v1711_v43, %v1707_v41  ;;  %v1756_v24 = vmul.f32 %v1667_v45, %v11212_v11  ;;  %v11660_v53 = vpack.i.bf16 %v1988_v57, %v1987_v26  ;;  %10104 = vrcp.f32 %v11647_v28 }
 0x153   : > { %v1727_v44 = vsel %vm1724_vm4, %v1726_v30, %v1722_v12  ;;  %v996_v16 = vsub.f32 %v10506_v31, %v11156_v39  ;;  %v1318_v60 = vand.u32 2147483647, %v11627_v13  ;;  %v1757_v18 = vmul.f32 %v1682_v59, %v11222_v22 }
 0x154   : > { %v1758_v55 = vmul.f32 %v1697_v14, %v11226_v25  ;;  %vm17711_vm1 = vcmask 261120   ;;  %v997_v4 = vsub.f32 %v10507_v61, %v11156_v39  ;;  %9249 = vrot.lane.b32.xlu0 %v11660_v53, %s17528_s29  ;;  %v1320_v11 = vand.u32 2147483648, %v11627_v13 }
 0x155   : > { %1787 = vst.msk [vmem:[#allocation2 + $0x1b0] sm:$0xff] %vm17711_vm1, %v1754_v2  ;;  %v11676_v20 = vpack.i.bf16 %v11467_v10, %v11465_v63  ;;  %v1759_v58 = vmul.f32 %v1712_v51, %v11236_v6  ;;  %v1061_v22 = vmul.f32 %v11167_v46, %v11319_v54  ;;  %vm17712_vm15 = vmmov %vm17711_vm1  ;;  %vm1314_vm5 = vweird.f32 %v11627_v13 }
 0x156   : > { %1788 = vst.msk [vmem:[#allocation2 + $0x1c8] sm:$0xff] %vm17712_vm15, %v1755_v35  ;;  %v1760_v25 = vmul.f32 %v1727_v44, %v11251_v50  ;;  %v11686_v9 = vadd.f32 %v11178_v21, %v11322_v38  ;;  %vm17713_vm6 = vmmov %vm17711_vm1  ;;  %v17714_v63 = vsub.f32 %v10854_v29, %v11156_v39  ;;  %v17715_v54 = vsub.f32 %v10865_v33, %v11156_v39  ;;  %v10103_v0 = vpop.eup %10102  ;;  %v10509_v35 = vld [vmem:[%s10793_s27 + $0x68] sm:$0xff] }
 0x157   : > { %1789 = vst.msk [vmem:[#allocation2 + $0x1d0] sm:$0xff] %vm17713_vm6, %v1756_v24  ;;  %v1333_v27 = vand.u32 2147483647, %v11647_v28  ;;  %v11699_v50 = vadd.f32 %v11178_v21, %v1061_v22  ;;  %vm17716_vm7 = vmmov %vm17711_vm1  ;;  %v1029_v38 = vmul.f32 %v11158_v42, %v996_v16  ;;  %v1030_v62 = vmul.f32 %v11158_v42, %v997_v4 }
 0x158   : > { %v1027_v6 = vmul.f32 %v11158_v42, %v17714_v63  ;;  %v1028_v10 = vmul.f32 %v11158_v42, %v17715_v54  ;;  %1790 = vst.msk [vmem:[#allocation2 + $0x1e8] sm:$0xff] %vm17716_vm7, %v1757_v18  ;;  %v1310_v29 = vmul.f32 %v10103_v0, %v11627_v13  ;;  %vm11705_vm8 = vcmp.eq.f32.partialorder %v1318_v60, 8.507059e+37  ;;  %vm17719_vm10 = vmmov %vm17711_vm1  ;;  %v10105_v49 = vpop.eup %10104  ;;  %v1828_v60 = vld [vmem:[#allocation2 + $0x28] sm:$0xff]  ;;  %v1829_v18 = vld [vmem:[#allocation2 + $0x30] sm:$0xff] }
 0x159   : > { %vm1329_vm9 = vweird.f32 %v11647_v28  ;;  %v1335_v33 = vand.u32 2147483648, %v11647_v28  ;;  %v8663_v34 = vmul.f32 -1.442695, %v11686_v9  ;;  %1791 = vst.msk [vmem:[#allocation2 + $0x1f0] sm:$0xff] %vm17719_vm10, %v1758_v55  ;;  %v8664_v3 = vmul.f32 -1.442695, %v11699_v50  ;;  %vm17720_vm11 = vmmov %vm17711_vm1 }
 0x15a   : > { %v1062_v1 = vmul.f32 %v11167_v46, %v1027_v6  ;;  %1792 = vst.msk [vmem:[#allocation2 + $0x208] sm:$0xff] %vm17720_vm11, %v1759_v58  ;;  %v1063_v36 = vmul.f32 %v11167_v46, %v1028_v10  ;;  %v1064_v48 = vmul.f32 %v11167_v46, %v1029_v38  ;;  %v1065_v19 = vmul.f32 %v11167_v46, %v1030_v62  ;;  %vm17721_vm12 = vmmov %vm17711_vm1  ;;  %v11770_v10 = vld [vmem:[%s10793_s27 + $0xb0] sm:$0xff] }
 0x15b   : > { %v1311_v41 = vsub.f32 1.0, %v1310_v29  ;;  %v1325_v52 = vmul.f32 %v10105_v49, %v11647_v28  ;;  %10106 = vpow2.f32 %v8663_v34  ;;  %1793 = vst.msk [vmem:[#allocation2 + $0x210] sm:$0xff] %vm17721_vm12, %v1760_v25  ;;  %v998_v37 = vsub.f32 %v10508_v23, %v11156_v39  ;;  %v17725_v38 = vld [vmem:[#allocation18_spill] sm:$0xff]  ;;  %vm17726_vm4 = vmmov %vm17711_vm1  ;;  %v17729_v34 = vld [vmem:[#allocation15_spill] sm:$0xff] }
 0x15c   : > { %10108 = vpow2.f32 %v8664_v3  ;;  %v11724_v17 = vadd.f32 %v11178_v21, %v1062_v1  ;;  %v11727_v45 = vadd.f32 %v11178_v21, %v1063_v36  ;;  %v11730_v5 = vadd.f32 %v11178_v21, %v1064_v48  ;;  %9274 = vrot.lane.b32.xlu0 %v11676_v20, %s17526_s24  ;;  %v17727_v29 = vld [vmem:[#allocation14_spill] sm:$0xff]  ;;  %vm17735_vm12 = vmmov %vm17711_vm1 }
 0x15d   : > { %v1312_v15 = vmul.f32 %v10103_v0, %v1311_v41  ;;  %vm1315_vm13 = vweird.f32 %v10103_v0  ;;  %v1326_v43 = vsub.f32 1.0, %v1325_v52  ;;  %v11733_v56 = vadd.f32 %v11178_v21, %v1065_v19 }
 0x15e   : > { %v1321_v8 = vor.u32 1.1754944e-38, %v1320_v11  ;;  %v8665_v30 = vmul.f32 -1.442695, %v11724_v17  ;;  %v8666_v26 = vmul.f32 -1.442695, %v11727_v45  ;;  %v1031_v57 = vmul.f32 %v11158_v42, %v998_v37  ;;  %vm1316_vm0 = vmor %vm1314_vm5, %vm1315_vm13 }
 0x15f   : > { %v1313_v12 = vadd.f32 %v10103_v0, %v1312_v15  ;;  %v1327_v59 = vmul.f32 %v10105_v49, %v1326_v43  ;;  %vm1330_vm14 = vweird.f32 %v10105_v49  ;;  %v8667_v14 = vmul.f32 -1.442695, %v11730_v5 }
 0x160   : > { %vm11743_vm2 = vcmp.eq.f32.partialorder %v1333_v27, 8.507059e+37  ;;  %v1336_v2 = vor.u32 1.1754944e-38, %v1335_v33  ;;  %10110 = vpow2.f32 %v8665_v30  ;;  %v999_v24 = vsub.f32 %v10509_v35, %v11156_v39  ;;  %vm1331_vm3 = vmor %vm1329_vm9, %vm1330_vm14  ;;  %v17724_v27 = vld [vmem:[#allocation17_spill] sm:$0xff] }
 0x161   : > { %v10107_v44 = vpop.eup %10106  ;;  %v1317_v31 = vsel %vm1316_vm0, %v10103_v0, %v1313_v12  ;;  %v1328_v16 = vadd.f32 %v10105_v49, %v1327_v59  ;;  %10112 = vpow2.f32 %v8666_v26  ;;  %v8668_v55 = vmul.f32 -1.442695, %v11733_v56  ;;  %v10511_v26 = vld [vmem:[%s10793_s27 + $0x70] sm:$0xff]  ;;  %v11817_v12 = vld [vmem:[%s10793_s27 + $0x78] sm:$0xff] }
 0x162   : > { %v10109_v13 = vpop.eup %10108  ;;  %v1322_v61 = vsel %vm11705_vm8, %v1321_v8, %v1317_v31  ;;  %v11755_v4 = vadd.f32 1.0, %v10107_v44  ;;  %v1032_v11 = vmul.f32 %v11158_v42, %v999_v24  ;;  %v1066_v58 = vmul.f32 %v11167_v46, %v1031_v57 }
 0x163   : > { %v1332_v22 = vsel %vm1331_vm3, %v10105_v49, %v1328_v16  ;;  %v1733_v25 = vmul.f32 %v1322_v61, %v11283_v7  ;;  %v11760_v63 = vadd.f32 1.0, %v10109_v13  ;;  %10114 = vpow2.f32 %v8667_v14 }
 0x164   : > { %v11764_v6 = vadd.f32 %v11178_v21, %v11298_v32  ;;  %v1337_v28 = vsel %vm11743_vm2, %v1336_v2, %v1332_v22  ;;  %10116 = vrcp.f32 %v11755_v4  ;;  %v9288_v54 = vpack.i.bf16 %v1829_v18, %v1828_v60 }
 0x165   : > { %v1008_v0 = vsub.f32 %v11770_v10, %v11156_v39  ;;  %v11776_v7 = vadd.f32 %v11178_v21, %v17724_v27  ;;  %v1734_v62 = vmul.f32 %v1337_v28, %v17725_v38  ;;  %1766 = vst.msk [vmem:[#allocation2 + $0x68] sm:$0xff] %vm17726_vm4, %v1733_v25  ;;  %10118 = vrcp.f32 %v11760_v63 }
 0x166   : > { %v10111_v32 = vpop.eup %10110  ;;  %v17728_v47 = vsub.f32 %v17727_v29, %v11156_v39  ;;  %v17730_v1 = vsub.f32 %v17729_v34, %v11156_v39  ;;  %9289 = vrot.lane.b32.xlu0 %v9288_v54, %s17526_s24  ;;  %10120 = vpow2.f32 %v8668_v55  ;;  %v11795_v3 = vadd.f32 %v11178_v21, %v1066_v58  ;;  %v11926_v55 = vld [vmem:[%s17655_s19] ss:$0 sm:$0xff] }
 0x167   : > { %v10113_v36 = vpop.eup %10112  ;;  %1767 = vst.msk [vmem:[#allocation2 + $0x70] sm:$0xff] %vm17711_vm1, %v1734_v62  ;;  %v1348_v48 = vand.u32 2147483647, %v11755_v4  ;;  %v1350_v19 = vand.u32 2147483648, %v11755_v4  ;;  %v11800_v41 = vadd.f32 1.0, %v10111_v32  ;;  %v1067_v52 = vmul.f32 %v11167_v46, %v1032_v11 }
 0x168   : > { %v11785_v33 = vmul.f32 %v11158_v42, %v17728_v47  ;;  %v11791_v49 = vmul.f32 %v11158_v42, %v17730_v1  ;;  %v11804_v23 = vmul.f32 -1.442695, %v11764_v6  ;;  %v1363_v37 = vand.u32 2147483647, %v11760_v63 }
 0x169   : > { %v1365_v15 = vand.u32 2147483648, %v11760_v63  ;;  %v11808_v43 = vadd.f32 1.0, %v10113_v36  ;;  %v10115_v8 = vpop.eup %10114  ;;  %v11811_v30 = vmul.f32 -1.442695, %v11776_v7  ;;  %10122 = vrcp.f32 %v11800_v41 }
 0x16a   : > { %v1000_v57 = vsub.f32 %v10511_v26, %v11156_v39  ;;  %v1001_v46 = vsub.f32 %v11817_v12, %v11156_v39  ;;  %v11821_v59 = vpop.eup %10116  ;;  %vm1344_vm15 = vweird.f32 %v11755_v4  ;;  %vm1359_vm5 = vweird.f32 %v11760_v63 }
 0x16b   : > { %10124 = vrcp.f32 %v11808_v43  ;;  %v8669_v14 = vmul.f32 -1.442695, %v11795_v3  ;;  %v11827_v51 = vpop.eup %10118  ;;  %v1340_v2 = vmul.f32 %v11821_v59, %v11755_v4  ;;  %vm11831_vm6 = vcmp.eq.f32.partialorder %v1348_v48, 8.507059e+37 }
 0x16c   : > { %v1351_v24 = vor.u32 1.1754944e-38, %v1350_v19  ;;  %v11836_v44 = vadd.f32 %v11178_v21, %v1067_v52  ;;  %v11839_v31 = vmul.f32 %v11158_v42, %v1000_v57  ;;  %v10121_v16 = vpop.eup %10120  ;;  %v2021_v60 = vld [vmem:[#allocation2 + $0x68] sm:$0xff]  ;;  %v1355_v18 = vmul.f32 %v11827_v51, %v11760_v63 }
 0x16d   : > { %vm11843_vm7 = vcmp.eq.f32.partialorder %v1363_v37, 8.507059e+37  ;;  %v1366_v13 = vor.u32 1.1754944e-38, %v1365_v15  ;;  %v1378_v61 = vand.u32 2147483647, %v11800_v41  ;;  %v1380_v11 = vand.u32 2147483648, %v11800_v41  ;;  %v1989_v58 = vld [vmem:[#allocation2 + $0x67] sm:$0xff] }
 0x16e   : > { %v1341_v21 = vsub.f32 1.0, %v1340_v2  ;;  %v1393_v22 = vand.u32 2147483647, %v11808_v43  ;;  %v1395_v25 = vand.u32 2147483648, %v11808_v43  ;;  %v11851_v28 = vadd.f32 1.0, %v10115_v8  ;;  %v2022_v54 = vld [vmem:[#allocation2 + $0x70] sm:$0xff] }
 0x16f   : > { %v2053_v27 = vld [vmem:[#allocation2 + $0x69] sm:$0xff]  ;;  %v2054_v38 = vld [vmem:[#allocation2 + $0x71] sm:$0xff]  ;;  %vm1345_vm8 = vweird.f32 %v11821_v59  ;;  %v1356_v62 = vsub.f32 1.0, %v1355_v18  ;;  %vm1360_vm9 = vweird.f32 %v11827_v51  ;;  %vm1374_vm10 = vweird.f32 %v11800_v41  ;;  %v10123_v32 = vpop.eup %10122 }
 0x170   : > { %10126 = vpow2.f32 %v8669_v14  ;;  %v11856_v29 = vpack.i.bf16 %v2022_v54, %v2021_v60  ;;  %v3049_v47 = vpack.c.bf16 %v2054_v38, %v2053_v27  ;;  %v1990_v34 = vld [vmem:[#allocation2 + $0x6f] sm:$0xff]  ;;  %v1342_v1 = vmul.f32 %v11821_v59, %v1341_v21  ;;  %vm1346_vm14 = vmor %vm1344_vm15, %vm1345_vm8 }
 0x171   : > { %vm1389_vm11 = vweird.f32 %v11808_v43  ;;  %v11860_v36 = vadd.f32 1.0, %v10121_v16  ;;  %v10125_v48 = vpop.eup %10124  ;;  %v11862_v19 = vpack.i.bf16 %v1990_v34, %v1989_v58  ;;  %v1357_v52 = vmul.f32 %v11827_v51, %v1356_v62  ;;  %vm1361_vm2 = vmor %vm1359_vm5, %vm1360_vm9 }
 0x172   : > { %v11865_v37 = vpack.i.bf16 %v2054_v38, %v2053_v27  ;;  %v1370_v15 = vmul.f32 %v10123_v32, %v11800_v41  ;;  %9284 = vrot.lane.b32.xlu2 %v11856_v29, %s10616_s23  ;;  %8762 = vmatmul.msk.bf16.gmra.mxu3 %vm17735_vm12, %v3049_v47  ;;  %v1343_v8 = vadd.f32 %v11821_v59, %v1342_v1  ;;  %vm11872_vm13 = vcmp.eq.f32.partialorder %v1378_v61, 8.507059e+37  ;;  %vm17740_vm5 = vmmov %vm17711_vm1 }
 0x173   : > { %v1385_v57 = vmul.f32 %v10125_v48, %v11808_v43  ;;  %10128 = vrcp.f32 %v11851_v28  ;;  %9279 = vrot.lane.b32.xlu1 %v11862_v19, %s17528_s29  ;;  %v1358_v14 = vadd.f32 %v11827_v51, %v1357_v52  ;;  %v1381_v16 = vor.u32 1.1754944e-38, %v1380_v11  ;;  %vm17745_vm12 = vmmov %vm17711_vm1 }
 0x174   : > { %9304 = vrot.lane.b32.xlu0 %v11865_v37, %s17526_s24  ;;  %v1371_v2 = vsub.f32 1.0, %v1370_v15  ;;  %vm11887_vm0 = vcmp.eq.f32.partialorder %v1393_v22, 8.507059e+37  ;;  %v1347_v18 = vsel %vm1346_vm14, %v11821_v59, %v1343_v8  ;;  %10130 = vrcp.f32 %v11860_v36 }
 0x175   : > { %v1386_v4 = vsub.f32 1.0, %v1385_v57  ;;  %v8670_v61 = vmul.f32 -1.442695, %v11836_v44  ;;  %v1352_v11 = vsel %vm11831_vm6, %v1351_v24, %v1347_v18  ;;  %v1362_v21 = vsel %vm1361_vm2, %v11827_v51, %v1358_v14  ;;  %v11963_v14 = vld [vmem:[%s17656_s22] ss:$0 sm:$0xff] }
 0x176   : > { %v10127_v58 = vpop.eup %10126  ;;  %v1372_v22 = vmul.f32 %v10123_v32, %v1371_v2  ;;  %vm1375_vm3 = vweird.f32 %v10123_v32  ;;  %v1367_v59 = vsel %vm11843_vm7, %v1366_v13, %v1362_v21  ;;  %v1735_v54 = vmul.f32 %v1352_v11, %v11686_v9 }
 0x177   : > { %v1387_v63 = vmul.f32 %v10125_v48, %v1386_v4  ;;  %vm1390_vm4 = vweird.f32 %v10125_v48  ;;  %v1736_v27 = vmul.f32 %v1367_v59, %v11699_v50  ;;  %v1396_v62 = vor.u32 1.1754944e-38, %v1395_v25  ;;  %vm1376_vm15 = vmor %vm1374_vm10, %vm1375_vm3 }
 0x178   : > { %v1373_v38 = vadd.f32 %v10123_v32, %v1372_v22  ;;  %v1408_v47 = vand.u32 2147483647, %v11851_v28  ;;  %1768 = vst.msk [vmem:[#allocation2 + $0x88] sm:$0xff] %vm17711_vm1, %v1735_v54  ;;  %v1410_v35 = vand.u32 2147483648, %v11851_v28  ;;  %10132 = vpow2.f32 %v8670_v61  ;;  %vm1391_vm6 = vmor %vm1389_vm11, %vm1390_vm4 }
 0x179   : > { %v11906_v34 = vpop.eup %10128  ;;  %v1388_v51 = vadd.f32 %v10125_v48, %v1387_v63  ;;  %v11912_v9 = vadd.f32 1.0, %v10127_v58  ;;  %1769 = vst.msk [vmem:[#allocation2 + $0x90] sm:$0xff] %vm17740_vm5, %v1736_v27  ;;  %v1034_v41 = vmul.f32 %v11158_v42, %v1001_v46  ;;  %v1068_v13 = vmul.f32 %v11926_v55, %v11839_v31  ;;  %v17741_v31 = vld [vmem:[#allocation19_spill] sm:$0xff]  ;;  %vm17744_vm10 = vmmov %vm17711_vm1 }
 0x17a   : > { %v1377_v50 = vsel %vm1376_vm15, %v10123_v32, %v1373_v38  ;;  %v1400_v24 = vmul.f32 %v11906_v34, %v11851_v28  ;;  %v11930_v25 = vpop.eup %10130  ;;  %9299 = vrot.lane.b32.xlu2 %v11660_v53, %s10616_s23  ;;  %vm1404_vm7 = vweird.f32 %v11851_v28  ;;  %vm1405_vm8 = vweird.f32 %v11906_v34 }
 0x17b   : > { %v1382_v43 = vsel %vm11872_vm13, %v1381_v16, %v1377_v50  ;;  %v1392_v32 = vsel %vm1391_vm6, %v10125_v48, %v1388_v51  ;;  %10134 = vrcp.f32 %v11912_v9  ;;  %9294 = vrot.lane.b32.xlu1 %v11549_v40, %s17528_s29  ;;  %v1415_v1 = vmul.f32 %v11930_v25, %v11860_v36  ;;  %v10515_v16 = vld [vmem:[%s10793_s27 + $0x80] sm:$0xff]  ;;  %vm11975_vm13 = vmor %vm1404_vm7, %vm1405_vm8 }
 0x17c   : > { %v1397_v12 = vsel %vm11887_vm0, %v1396_v62, %v1392_v32  ;;  %v1737_v46 = vmul.f32 %v1382_v43, %v11724_v17  ;;  %9319 = vrot.lane.b32.xlu0 %v17741_v31, %s17526_s24  ;;  %v1401_v53 = vsub.f32 1.0, %v1400_v24  ;;  %vm11949_vm9 = vcmp.eq.f32.partialorder %v1408_v47, 8.507059e+37  ;;  %v17748_v62 = vld [vmem:[#allocation12_spill] sm:$0xff]  ;;  %vm17750_vm0 = vmmov %vm17711_vm1 }
 0x17d   : > { %v1738_v48 = vmul.f32 %v1397_v12, %v11727_v45  ;;  %v1411_v40 = vor.u32 1.1754944e-38, %v1410_v35  ;;  %v1416_v15 = vsub.f32 1.0, %v1415_v1  ;;  %vm1419_vm11 = vweird.f32 %v11860_v36  ;;  %vm17751_vm4 = vmmov %vm17750_vm0 }
 0x17e   : > { %1770 = vst.msk [vmem:[#allocation2 + $0xa8] sm:$0xff] %vm17744_vm10, %v1737_v46  ;;  %v1402_v17 = vmul.f32 %v11906_v34, %v1401_v53  ;;  %v1069_v8 = vmul.f32 %v11926_v55, %v1034_v41  ;;  %v10133_v26 = vpop.eup %10132  ;;  %v1423_v45 = vand.u32 2147483647, %v11860_v36  ;;  %v1425_v57 = vand.u32 2147483648, %v11860_v36  ;;  %vm17754_vm15 = vmmov %vm17750_vm0 }
 0x17f   : > { %1771 = vst.msk [vmem:[#allocation2 + $0xb0] sm:$0xff] %vm17745_vm12, %v1738_v48  ;;  %v11966_v2 = vadd.f32 %v11963_v14, %v1068_v13  ;;  %v1002_v60 = vsub.f32 %v10515_v16, %v11156_v39  ;;  %v2023_v18 = vld [vmem:[#allocation2 + $0x88] sm:$0xff]  ;;  %v1417_v11 = vmul.f32 %v11930_v25, %v1416_v15  ;;  %vm1420_vm14 = vweird.f32 %v11930_v25 }
 0x180   : > { %v1991_v4 = vld [vmem:[#allocation2 + $0x87] sm:$0xff]  ;;  %v1403_v61 = vadd.f32 %v11906_v34, %v1402_v17  ;;  %v11981_v21 = vadd.f32 1.0, %v10133_v26  ;;  %v2024_v59 = vld [vmem:[#allocation2 + $0x90] sm:$0xff]  ;;  %v11986_v27 = vadd.f32 %v11963_v14, %v1069_v8  ;;  %v17749_v47 = vsub.f32 %v17748_v62, %v11156_v39  ;;  %vm1421_vm2 = vmor %vm1419_vm11, %vm1420_vm14 }
 0x181   : > { %v11983_v22 = vpop.eup %10134  ;;  %v2055_v54 = vld [vmem:[#allocation2 + $0x89] sm:$0xff]  ;;  %v2056_v63 = vld [vmem:[#allocation2 + $0x91] sm:$0xff]  ;;  %v8671_v28 = vmul.f32 -1.442695, %v11966_v2  ;;  %v1035_v38 = vmul.f32 %v11158_v42, %v1002_v60  ;;  %v11994_v35 = vpack.i.bf16 %v2024_v59, %v2023_v18  ;;  %v1418_v12 = vadd.f32 %v11930_v25, %v1417_v11  ;;  %v17752_v17 = vld [vmem:[#allocation16_spill] sm:$0xff] }
 0x182   : > { %v1036_v51 = vmul.f32 %v11158_v42, %v17749_v47  ;;  %v3052_v50 = vpack.c.bf16 %v2056_v63, %v2055_v54  ;;  %v1992_v24 = vld [vmem:[#allocation2 + $0x8f] sm:$0xff]  ;;  %v11996_v41 = vpack.i.bf16 %v2056_v63, %v2055_v54  ;;  %v1407_v13 = vsel %vm11975_vm13, %v11906_v34, %v1403_v61  ;;  %vm17760_vm13 = vmmov %vm17750_vm0 }
 0x183   : > { %v12001_v43 = vpack.i.bf16 %v1992_v24, %v1991_v4  ;;  %v1412_v32 = vsel %vm11949_vm9, %v1411_v40, %v1407_v13  ;;  %v1430_v46 = vmul.f32 %v11983_v22, %v11912_v9  ;;  %9314 = vrot.lane.b32.xlu2 %v11994_v35, %s10616_s23  ;;  %vm1424_vm3 = vcmp.eq.f32.partialorder %v1423_v45, 8.507059e+37  ;;  %v17755_v16 = vld [vmem:[#allocation13_spill] sm:$0xff]  ;;  %vm17759_vm9 = vmmov %vm17750_vm0 }
 0x184   : > { %8763 = vmatmul.msk.bf16.gmra.mxu3 %vm17750_vm0, %v3052_v50  ;;  %v1426_v34 = vor.u32 1.1754944e-38, %v1425_v57  ;;  %v1739_v31 = vmul.f32 %v1412_v32, %v11730_v5  ;;  %10136 = vrcp.f32 %v11981_v21  ;;  %9334 = vrot.lane.b32.xlu0 %v11996_v41, %s17526_s24  ;;  %v1422_v53 = vsel %vm1421_vm2, %v11930_v25, %v1418_v12 }
 0x185   : > { %9309 = vrot.lane.b32.xlu1 %v12001_v43, %s17528_s29  ;;  %v1431_v1 = vsub.f32 1.0, %v1430_v46  ;;  %v1438_v48 = vand.u32 2147483647, %v11912_v9  ;;  %v1071_v36 = vmul.f32 %v11926_v55, %v1036_v51  ;;  %10138 = vpow2.f32 %v8671_v28  ;;  %v2025_v62 = vld [vmem:[#allocation2 + $0xa8] sm:$0xff] }
 0x186   : > { %v1427_v52 = vsel %vm1424_vm3, %v1426_v34, %v1422_v53  ;;  %1772 = vst.msk [vmem:[#allocation2 + $0xc8] sm:$0xff] %vm17751_vm4, %v1739_v31  ;;  %v8672_v5 = vmul.f32 -1.442695, %v11986_v27  ;;  %v1070_v40 = vmul.f32 %v11926_v55, %v1035_v38  ;;  %v17753_v15 = vsub.f32 %v17752_v17, %v11156_v39  ;;  %v2026_v47 = vld [vmem:[#allocation2 + $0xb0] sm:$0xff] }
 0x187   : > { %10140 = vpow2.f32 %v11804_v23  ;;  %v1740_v25 = vmul.f32 %v1427_v52, %v11733_v56  ;;  %v1440_v26 = vand.u32 2147483648, %v11912_v9  ;;  %v12038_v45 = vmul.f32 %v11158_v42, %v1008_v0  ;;  %v2057_v13 = vld [vmem:[#allocation2 + $0xa9] sm:$0xff] }
 0x188   : > { %v1040_v8 = vmul.f32 %v11158_v42, %v17753_v15  ;;  %10142 = vpow2.f32 %v11811_v30  ;;  %v1432_v57 = vmul.f32 %v11983_v22, %v1431_v1  ;;  %vm1435_vm1 = vweird.f32 %v11983_v22  ;;  %v1994_v31 = vld [vmem:[#allocation2 + $0xaf] sm:$0xff] }
 0x189   : > { %1773 = vst.msk [vmem:[#allocation2 + $0xd0] sm:$0xff] %vm17754_vm15, %v1740_v25  ;;  %10144 = vpow2.f32 %v8672_v5  ;;  %v12045_v23 = vadd.f32 %v11963_v14, %v1070_v40  ;;  %v12048_v56 = vadd.f32 %v11963_v14, %v1071_v36  ;;  %v17756_v10 = vsub.f32 %v17755_v16, %v11156_v39 }
 0x18a   : > { %v12054_v60 = vpop.eup %10136  ;;  %v1433_v30 = vadd.f32 %v11983_v22, %v1432_v57  ;;  %vm1434_vm5 = vweird.f32 %v11912_v9  ;;  %vm12058_vm6 = vcmp.eq.f32.partialorder %v1438_v48, 8.507059e+37  ;;  %v1073_v4 = vmul.f32 %v11926_v55, %v11785_v33 }
 0x18b   : > { %v1037_v0 = vmul.f32 %v11158_v42, %v17756_v10  ;;  %vm1436_vm7 = vmor %vm1434_vm5, %vm1435_vm1  ;;  %v1441_v61 = vor.u32 1.1754944e-38, %v1440_v26  ;;  %v1445_v39 = vmul.f32 %v12054_v60, %v11981_v21  ;;  %v8673_v42 = vmul.f32 -1.442695, %v12045_v23  ;;  %v10139_v11 = vpop.eup %10138  ;;  %9329 = vrot.lane.b32.xlu2 %v11862_v19, %s10616_s23 }
 0x18c   : > { %v8674_v58 = vmul.f32 -1.442695, %v12048_v56  ;;  %v1437_v9 = vsel %vm1436_vm7, %v11983_v22, %v1433_v30  ;;  %v1453_v59 = vand.u32 2147483647, %v11981_v21  ;;  %v12074_v33 = vadd.f32 %v11963_v14, %v1073_v4  ;;  %9349 = vrot.lane.b32.xlu0 %v11856_v29, %s17526_s24  ;;  %v2058_v29 = vld [vmem:[#allocation2 + $0xb1] sm:$0xff] }
 0x18d   : > { %v1072_v54 = vmul.f32 %v11926_v55, %v1037_v0  ;;  %v10141_v63 = vpop.eup %10140  ;;  %9324 = vrot.lane.b32.xlu1 %v11676_v20, %s17528_s29  ;;  %v1442_v28 = vsel %vm12058_vm6, %v1441_v61, %v1437_v9  ;;  %v1446_v19 = vsub.f32 1.0, %v1445_v39  ;;  %v12082_v38 = vadd.f32 1.0, %v10139_v11 }
 0x18e   : > { %10146 = vpow2.f32 %v8673_v42  ;;  %v10143_v22 = vpop.eup %10142  ;;  %v1455_v51 = vand.u32 2147483648, %v11981_v21  ;;  %v1741_v50 = vmul.f32 %v1442_v28, %v11795_v3  ;;  %v8676_v20 = vmul.f32 -1.442695, %v12074_v33  ;;  %v1993_v3 = vld [vmem:[#allocation2 + $0xa7] sm:$0xff] }
 0x18f   : > { %10148 = vpow2.f32 %v8674_v58  ;;  %v10145_v24 = vpop.eup %10144  ;;  %v1447_v32 = vmul.f32 %v12054_v60, %v1446_v19  ;;  %vm1450_vm8 = vweird.f32 %v12054_v60  ;;  %v1074_v12 = vmul.f32 %v11926_v55, %v11791_v49 }
 0x190   : > { %10150 = vrcp.f32 %v12082_v38  ;;  %v1075_v46 = vmul.f32 %v11926_v55, %v1040_v8  ;;  %v12093_v34 = vadd.f32 1.0, %v10141_v63  ;;  %1774 = vst.msk [vmem:[#allocation2 + $0xe8] sm:$0xff] %vm17759_vm9, %v1741_v50  ;;  %v12096_v53 = vadd.f32 1.0, %v10145_v24  ;;  %v12134_v18 = vld [vmem:[#allocation2 + $0xc9] sm:$0xff]  ;;  %v12136_v4 = vld [vmem:[#allocation2 + $0xd1] sm:$0xff] }
 0x191   : > { %v12099_v1 = vadd.f32 %v11963_v14, %v1072_v54  ;;  %v12101_v48 = vpack.i.bf16 %v2026_v47, %v2025_v62  ;;  %v1448_v36 = vadd.f32 %v12054_v60, %v1447_v32  ;;  %vm1449_vm10 = vweird.f32 %v11981_v21  ;;  %v1995_v54 = vld [vmem:[#allocation2 + $0xc7] sm:$0xff]  ;;  %v1996_v63 = vld [vmem:[#allocation2 + $0xcf] sm:$0xff] }
 0x192   : > { %10152 = vpow2.f32 %v8676_v20  ;;  %v3055_v49 = vpack.c.bf16 %v2058_v29, %v2057_v13  ;;  %v12105_v52 = vpack.i.bf16 %v2058_v29, %v2057_v13  ;;  %vm1451_vm11 = vmor %vm1449_vm10, %vm1450_vm8  ;;  %v1456_v5 = vor.u32 1.1754944e-38, %v1455_v51 }
 0x193   : > { %10154 = vrcp.f32 %v12096_v53  ;;  %v12110_v17 = vpack.i.bf16 %v1994_v31, %v1993_v3  ;;  %v1452_v15 = vsel %vm1451_vm11, %v12054_v60, %v1448_v36  ;;  %vm1454_vm12 = vcmp.eq.f32.partialorder %v1453_v59, 8.507059e+37  ;;  %9344 = vrot.lane.b32.xlu2 %v12101_v48, %s10616_s23  ;;  %v2027_v60 = vld [vmem:[#allocation2 + $0xc8] sm:$0xff]  ;;  %vm17765_vm8 = vmmov %vm17750_vm0 }
 0x194   : > { %v10147_v40 = vpop.eup %10146  ;;  %v12114_v8 = vadd.f32 %v11963_v14, %v1074_v12  ;;  %v1076_v25 = vmul.f32 %v11926_v55, %v12038_v45  ;;  %8764 = vmatmul.msk.bf16.gmra.mxu3 %vm17760_vm13, %v3055_v49  ;;  %v1457_v26 = vsel %vm1454_vm12, %v1456_v5, %v1452_v15  ;;  %v8675_v16 = vmul.f32 -1.442695, %v12099_v1  ;;  %v2028_v55 = vld [vmem:[#allocation2 + $0xd0] sm:$0xff]  ;;  %9364 = vrot.lane.b32.xlu0 %v12105_v52, %s17526_s24  ;;  %vm17766_vm11 = vmmov %vm17750_vm0 }
 0x195   : > { %v10149_v21 = vpop.eup %10148  ;;  %v12121_v57 = vadd.f32 1.0, %v10147_v40  ;;  %v12124_v0 = vadd.f32 1.0, %v10143_v22  ;;  %10156 = vrcp.f32 %v12093_v34  ;;  %9339 = vrot.lane.b32.xlu1 %v12110_v17, %s17528_s29  ;;  %v1742_v45 = vmul.f32 %v1457_v26, %v11836_v44 }
 0x196   : > { %v10151_v10 = vpop.eup %10150  ;;  %v12132_v30 = vadd.f32 1.0, %v10149_v21  ;;  %vm1464_vm14 = vweird.f32 %v12082_v38  ;;  %v12142_v39 = vadd.f32 %v11963_v14, %v1075_v46  ;;  %v1468_v44 = vand.u32 2147483647, %v12082_v38 }
 0x197   : > { %v1460_v61 = vmul.f32 %v10151_v10, %v12082_v38  ;;  %10158 = vrcp.f32 %v12121_v57  ;;  %1775 = vst.msk [vmem:[#allocation2 + $0xf0] sm:$0xff] %vm17750_vm0, %v1742_v45  ;;  %v1470_v58 = vand.u32 2147483648, %v12082_v38  ;;  %v8677_v11 = vmul.f32 -1.442695, %v12114_v8 }
 0x198   : > { %v10153_v42 = vpop.eup %10152  ;;  %10160 = vrcp.f32 %v12132_v30  ;;  %v12149_v59 = vpack.i.bf16 %v2028_v55, %v2027_v60  ;;  %v12152_v19 = vadd.f32 %v11963_v14, %v1076_v25  ;;  %v3058_v22 = vpack.c.bf16 %v12136_v4, %v12134_v18 }
 0x199   : > { %v10155_v9 = vpop.eup %10154  ;;  %v1461_v28 = vsub.f32 1.0, %v1460_v61  ;;  %10162 = vpow2.f32 %v8675_v16  ;;  %v12158_v62 = vpack.i.bf16 %v12136_v4, %v12134_v18  ;;  %v1483_v51 = vand.u32 2147483647, %v12096_v53 }
 0x19a   : > { %v1475_v47 = vmul.f32 %v10155_v9, %v12096_v53  ;;  %vm1465_vm2 = vweird.f32 %v10151_v10  ;;  %v1485_v20 = vand.u32 2147483648, %v12096_v53  ;;  %v12163_v24 = vadd.f32 1.0, %v10153_v42 }
 0x19b   : > { %v1462_v50 = vmul.f32 %v10151_v10, %v1461_v28  ;;  %v12165_v13 = vpop.eup %10156  ;;  %v12167_v14 = vpack.i.bf16 %v1996_v63, %v1995_v54  ;;  %vm12169_vm3 = vcmp.eq.f32.partialorder %v1468_v44, 8.507059e+37  ;;  %10164 = vpow2.f32 %v8677_v11  ;;  %9359 = vrot.lane.b32.xlu2 %v12001_v43, %s10616_s23  ;;  %vm1466_vm1 = vmor %vm1464_vm14, %vm1465_vm2 }
 0x19c   : > { %v1476_v32 = vsub.f32 1.0, %v1475_v47  ;;  %v1471_v3 = vor.u32 1.1754944e-38, %v1470_v58  ;;  %vm1479_vm4 = vweird.f32 %v12096_v53  ;;  %10166 = vrcp.f32 %v12163_v24  ;;  %9379 = vrot.lane.b32.xlu0 %v11994_v35, %s17526_s24  ;;  %vm17769_vm14 = vmmov %vm17750_vm0 }
 0x19d   : > { %v12173_v12 = vpop.eup %10158  ;;  %v1463_v46 = vadd.f32 %v10151_v10, %v1462_v50  ;;  %9354 = vrot.lane.b32.xlu1 %v11865_v37, %s17528_s29  ;;  %vm1480_vm15 = vweird.f32 %v10155_v9  ;;  %vm12188_vm5 = vcmp.eq.f32.partialorder %v1483_v51, 8.507059e+37  ;;  %v1486_v15 = vor.u32 1.1754944e-38, %v1485_v20 }
 0x19e   : > { %v12179_v31 = vpop.eup %10160  ;;  %v1477_v36 = vmul.f32 %v10155_v9, %v1476_v32  ;;  %v1490_v49 = vmul.f32 %v12173_v12, %v12121_v57  ;;  %v8678_v35 = vmul.f32 -1.442695, %v12142_v39  ;;  %vm1494_vm6 = vweird.f32 %v12121_v57  ;;  %vm1481_vm7 = vmor %vm1479_vm4, %vm1480_vm15 }
 0x19f   : > { %v10163_v5 = vpop.eup %10162  ;;  %v1467_v40 = vsel %vm1466_vm1, %v10151_v10, %v1463_v46  ;;  %v1505_v37 = vmul.f32 %v12179_v31, %v12132_v30  ;;  %v1498_v25 = vand.u32 2147483647, %v12121_v57  ;;  %v1500_v10 = vand.u32 2147483648, %v12121_v57  ;;  %vm17770_vm1 = vmmov %vm17765_vm8 }
 0x1a0   : > { %v1472_v38 = vsel %vm12169_vm3, %v1471_v3, %v1467_v40  ;;  %v1478_v21 = vadd.f32 %v10155_v9, %v1477_v36  ;;  %v1491_v16 = vsub.f32 1.0, %v1490_v49  ;;  %v1513_v60 = vand.u32 2147483647, %v12132_v30 }
 0x1a1   : > { %v1743_v26 = vmul.f32 %v1472_v38, %v11966_v2  ;;  %v10165_v55 = vpop.eup %10164  ;;  %v1506_v18 = vsub.f32 1.0, %v1505_v37  ;;  %v1515_v4 = vand.u32 2147483648, %v12132_v30  ;;  %v12207_v61 = vadd.f32 1.0, %v10163_v5  ;;  %v2030_v5 = vld [vmem:[#allocation2 + $0xf0] sm:$0xff] }
 0x1a2   : > { %v1482_v45 = vsel %vm1481_vm7, %v10155_v9, %v1478_v21  ;;  %v12209_v42 = vpop.eup %10166  ;;  %v1492_v2 = vmul.f32 %v12173_v12, %v1491_v16  ;;  %vm1495_vm9 = vweird.f32 %v12173_v12  ;;  %10168 = vpow2.f32 %v8678_v35  ;;  %v2061_v37 = vld [vmem:[#allocation2 + $0xe9] sm:$0xff]  ;;  %v2062_v35 = vld [vmem:[#allocation2 + $0xf1] sm:$0xff] }
 0x1a3   : > { %v1487_v53 = vsel %vm12188_vm5, %v1486_v15, %v1482_v45  ;;  %1776 = vst.msk [vmem:[#allocation2 + $0x108] sm:$0xff] %vm17765_vm8, %v1743_v26  ;;  %v1507_v58 = vmul.f32 %v12179_v31, %v1506_v18  ;;  %vm1510_vm10 = vweird.f32 %v12179_v31  ;;  %10170 = vrcp.f32 %v12207_v61  ;;  %9374 = vrot.lane.b32.xlu2 %v12149_v59, %s10616_s23  ;;  %vm1496_vm0 = vmor %vm1494_vm6, %vm1495_vm9  ;;  %v1997_v15 = vld [vmem:[#allocation2 + $0xe7] sm:$0xff]  ;;  %v1998_v38 = vld [vmem:[#allocation2 + $0xef] sm:$0xff] }
 0x1a4   : > { %v1744_v44 = vmul.f32 %v1487_v53, %v11986_v27  ;;  %8765 = vmatmul.msk.bf16.gmra.mxu3 %vm17766_vm11, %v3058_v22  ;;  %v1493_v11 = vadd.f32 %v12173_v12, %v1492_v2  ;;  %vm12224_vm12 = vcmp.eq.f32.partialorder %v1498_v25, 8.507059e+37  ;;  %vm1509_vm13 = vweird.f32 %v12132_v30  ;;  %9394 = vrot.lane.b32.xlu0 %v12158_v62, %s17526_s24  ;;  %vm17771_vm5 = vmmov %vm17770_vm1  ;;  %v9143_v53 = vld [vmem:[%s17654_s4 + $0x70] sm:$0xff] }
 0x1a5   : > { %v1535_v27 = vmul.f32 %v12209_v42, %v12163_v24  ;;  %9369 = vrot.lane.b32.xlu1 %v12167_v14, %s17528_s29  ;;  %v1501_v54 = vor.u32 1.1754944e-38, %v1500_v10  ;;  %v1508_v63 = vadd.f32 %v12179_v31, %v1507_v58  ;;  %v12241_v30 = vadd.f32 1.0, %v10165_v55  ;;  %vm1511_vm2 = vmor %vm1509_vm13, %vm1510_vm10  ;;  %v9136_v55 = vld [vmem:[%s17654_s4 + $0x38] sm:$0xff] }
 0x1a6   : > { %1777 = vst.msk [vmem:[#allocation2 + $0x110] sm:$0xff] %vm17769_vm14, %v1744_v44  ;;  %v8679_v28 = vmul.f32 -1.442695, %v12152_v19  ;;  %v1497_v22 = vsel %vm1496_vm0, %v12173_v12, %v1493_v11  ;;  %vm1514_vm3 = vcmp.eq.f32.partialorder %v1513_v60, 8.507059e+37  ;;  %v1516_v47 = vor.u32 1.1754944e-38, %v1515_v4  ;;  %3288 = vmatpush.bf16.msra.mxu1 %v9136_v55 }
 0x1a7   : > { %v1536_v51 = vsub.f32 1.0, %v1535_v27  ;;  %v1502_v50 = vsel %vm12224_vm12, %v1501_v54, %v1497_v22  ;;  %v1512_v57 = vsel %vm1511_vm2, %v12179_v31, %v1508_v63  ;;  %v1545_v20 = vand.u32 2147483648, %v12163_v24  ;;  %v2029_v31 = vld [vmem:[#allocation2 + $0xe8] sm:$0xff]  ;;  %vm17774_vm12 = vmmov %vm17770_vm1 }
 0x1a8   : > { %10172 = vrcp.f32 %v12241_v30  ;;  %v10169_v29 = vpop.eup %10168  ;;  %v1517_v32 = vsel %vm1514_vm3, %v1516_v47, %v1512_v57  ;;  %v1745_v46 = vmul.f32 %v1502_v50, %v12045_v23  ;;  %vm1540_vm4 = vweird.f32 %v12209_v42  ;;  %vm17777_vm2 = vmmov %vm17770_vm1 }
 0x1a9   : > { %v1537_v12 = vmul.f32 %v12209_v42, %v1536_v51  ;;  %v12255_v3 = vpop.eup %10170  ;;  %v1746_v36 = vmul.f32 %v1517_v32, %v12048_v56  ;;  %v1543_v43 = vand.u32 2147483647, %v12163_v24  ;;  %v12259_v49 = vadd.f32 1.0, %v10169_v29  ;;  %v9142_v29 = vld [vmem:[%s17654_s4 + $0x68] sm:$0xff] }
 0x1aa   : > { %10174 = vpow2.f32 %v8679_v28  ;;  %1778 = vst.msk [vmem:[#allocation2 + $0x128] sm:$0xff] %vm17770_vm1, %v1745_v46  ;;  %v1520_v23 = vmul.f32 %v12255_v3, %v12207_v61  ;;  %vm1539_vm15 = vweird.f32 %v12163_v24  ;;  %v1546_v25 = vor.u32 1.1754944e-38, %v1545_v20  ;;  %v9131_v20 = vld [vmem:[%s17654_s4 + $0x10] sm:$0xff] }
 0x1ab   : > { %v1538_v40 = vadd.f32 %v12209_v42, %v1537_v12  ;;  %1779 = vst.msk [vmem:[#allocation2 + $0x130] sm:$0xff] %vm17771_vm5, %v1746_v36  ;;  %vm12267_vm6 = vmor %vm1539_vm15, %vm1540_vm4  ;;  %10176 = vrcp.f32 %v12259_v49  ;;  %9389 = vrot.lane.b32.xlu2 %v12110_v17, %s10616_s23  ;;  %v12280_v16 = vpack.i.bf16 %v2030_v5, %v2029_v31  ;;  %v9144_v17 = vld [vmem:[%s17654_s4 + $0x78] sm:$0xff]  ;;  %v1528_v10 = vand.u32 2147483647, %v12207_v61 }
 0x1ac   : > { %10178 = vrcp.f32 %v12124_v0  ;;  %v1521_v21 = vsub.f32 1.0, %v1520_v23  ;;  %9409 = vrot.lane.b32.xlu0 %v12101_v48, %s17526_s24  ;;  %v1530_v60 = vand.u32 2147483648, %v12207_v61  ;;  %vm1544_vm7 = vcmp.eq.f32.partialorder %v1543_v43, 8.507059e+37  ;;  %3377 = vmatpush.bf16.msra.mxu2 %v9144_v17  ;;  %v9141_v23 = vld [vmem:[%s17654_s4 + $0x60] sm:$0xff] }
 0x1ad   : > { %v1542_v24 = vsel %vm12267_vm6, %v12209_v42, %v1538_v40  ;;  %9384 = vrot.lane.b32.xlu1 %v11996_v41, %s17528_s29  ;;  %vm1525_vm8 = vweird.f32 %v12255_v3  ;;  %v3061_v4 = vpack.c.bf16 %v2062_v35, %v2061_v37  ;;  %v12298_v42 = vpack.i.bf16 %v1998_v38, %v1997_v15 }
 0x1ae   : > { %v12278_v26 = vpop.eup %10172  ;;  %v1522_v45 = vmul.f32 %v12255_v3, %v1521_v21  ;;  %v1547_v41 = vsel %vm1544_vm7, %v1546_v25, %v1542_v24  ;;  %v1558_v44 = vand.u32 2147483647, %v12241_v30  ;;  %vm1524_vm9 = vweird.f32 %v12207_v61  ;;  %v9135_v61 = vld [vmem:[%s17654_s4 + $0x30] sm:$0xff]  ;;  %v12372_v24 = vpop.permute.xlu2 %9264 }
 0x1af   : > { %v1550_v48 = vmul.f32 %v12278_v26, %v12241_v30  ;;  %v1748_v2 = vmul.f32 %v1547_v41, %v12074_v33  ;;  %v1560_v9 = vand.u32 2147483648, %v12241_v30  ;;  %vm1526_vm10 = vmor %vm1524_vm9, %vm1525_vm8  ;;  %vm1529_vm11 = vcmp.eq.f32.partialorder %v1528_v10, 8.507059e+37  ;;  %3289 = vmatpush.bf16.msra.mxu1 %v9135_v61  ;;  %v2000_v61 = vld [vmem:[#allocation2 + $0x10f] sm:$0xff] }
 0x1b0   : > { %v10175_v18 = vpop.eup %10174  ;;  %v1523_v58 = vadd.f32 %v12255_v3, %v1522_v45  ;;  %v1531_v54 = vor.u32 1.1754944e-38, %v1530_v60  ;;  %vm1555_vm13 = vweird.f32 %v12278_v26  ;;  %v1595_v51 = vmul.f32 %v12165_v13, %v12093_v34  ;;  %3378 = vmatpush.bf16.msra.mxu2 %v9143_v53  ;;  %vm17778_vm8 = vmmov %vm17770_vm1  ;;  %v9140_v45 = vld [vmem:[%s17654_s4 + $0x58] sm:$0xff]  ;;  %v2031_v53 = vld [vmem:[#allocation2 + $0x108] sm:$0xff] }
 0x1b1   : > { %v1551_v11 = vsub.f32 1.0, %v1550_v48  ;;  %v12308_v27 = vpop.eup %10176  ;;  %1781 = vst.msk [vmem:[#allocation2 + $0x150] sm:$0xff] %vm17774_vm12, %v1748_v2  ;;  %v12314_v33 = vadd.f32 1.0, %v10175_v18  ;;  %v12327_v50 = vpack.i.bf16 %v2062_v35, %v2061_v37  ;;  %vm1554_vm14 = vweird.f32 %v12241_v30  ;;  %v2032_v2 = vld [vmem:[#allocation2 + $0x110] sm:$0xff] }
 0x1b2   : > { %v12316_v63 = vpop.eup %10178  ;;  %v1527_v28 = vsel %vm1526_vm10, %v12255_v3, %v1523_v58  ;;  %v1565_v47 = vmul.f32 %v12308_v27, %v12259_v49  ;;  %vm12330_vm0 = vcmp.eq.f32.partialorder %v1558_v44, 8.507059e+37  ;;  %v1561_v12 = vor.u32 1.1754944e-38, %v1560_v9  ;;  %vm1556_vm3 = vmor %vm1554_vm14, %vm1555_vm13  ;;  %v2063_v44 = vld [vmem:[#allocation2 + $0x109] sm:$0xff]  ;;  %v2064_v58 = vld [vmem:[#allocation2 + $0x111] sm:$0xff] }
 0x1b3   : > { %v1552_v22 = vmul.f32 %v12278_v26, %v1551_v11  ;;  %v1532_v57 = vsel %vm1529_vm11, %v1531_v54, %v1527_v28  ;;  %9404 = vrot.lane.b32.xlu2 %v12280_v16, %s10616_s23  ;;  %vm1569_vm4 = vweird.f32 %v12259_v49  ;;  %v1573_v30 = vand.u32 2147483647, %v12259_v49  ;;  %vm17779_vm13 = vmmov %vm17770_vm1  ;;  %v1999_v54 = vld [vmem:[#allocation2 + $0x107] sm:$0xff] }
 0x1b4   : > { %8766 = vmatmul.msk.bf16.gmra.mxu3 %vm17777_vm2, %v3061_v4  ;;  %v1747_v32 = vmul.f32 %v1532_v57, %v12099_v1  ;;  %v1566_v3 = vsub.f32 1.0, %v1565_v47  ;;  %9424 = vrot.lane.b32.xlu0 %v12327_v50, %s17526_s24  ;;  %v1575_v36 = vand.u32 2147483648, %v12259_v49  ;;  %10180 = vrcp.f32 %v12314_v33  ;;  %v9134_v1 = vld [vmem:[%s17654_s4 + $0x28] sm:$0xff] }
 0x1b5   : > { %v1553_v46 = vadd.f32 %v12278_v26, %v1552_v22  ;;  %9399 = vrot.lane.b32.xlu1 %v12298_v42, %s17528_s29  ;;  %vm1570_vm15 = vweird.f32 %v12308_v27  ;;  %v1596_v5 = vsub.f32 1.0, %v1595_v51  ;;  %3379 = vmatpush.bf16.msra.mxu2 %v9142_v29  ;;  %vm1600_vm5 = vweird.f32 %v12165_v13 }
 0x1b6   : > { %1780 = vst.msk [vmem:[#allocation2 + $0x148] sm:$0xff] %vm17770_vm1, %v1747_v32  ;;  %v1567_v31 = vmul.f32 %v12308_v27, %v1566_v3  ;;  %v1603_v15 = vand.u32 2147483647, %v12093_v34  ;;  %v1605_v56 = vand.u32 2147483648, %v12093_v34  ;;  %v1610_v21 = vmul.f32 %v12316_v63, %v12124_v0  ;;  %vm1571_vm6 = vmor %vm1569_vm4, %vm1570_vm15  ;;  %3290 = vmatpush.bf16.msra.mxu1 %v9134_v1 }
 0x1b7   : > { %v1557_v43 = vsel %vm1556_vm3, %v12278_v26, %v1553_v46  ;;  %v1597_v38 = vmul.f32 %v12165_v13, %v1596_v5  ;;  %vm1574_vm7 = vcmp.eq.f32.partialorder %v1573_v30, 8.507059e+37  ;;  %v1576_v25 = vor.u32 1.1754944e-38, %v1575_v36  ;;  %v9133_v26 = vld [vmem:[%s17654_s4 + $0x20] sm:$0xff]  ;;  %vm17780_vm3 = vmmov %vm17770_vm1  ;;  %v12429_v46 = vpop.permute.xlu2 %9269 }
 0x1b8   : > { %v1562_v40 = vsel %vm12330_vm0, %v1561_v12, %v1557_v43  ;;  %v1568_v37 = vadd.f32 %v12308_v27, %v1567_v31  ;;  %vm1599_vm9 = vweird.f32 %v12093_v34  ;;  %v1611_v10 = vsub.f32 1.0, %v1610_v21  ;;  %v9130_v43 = vld [vmem:[%s17654_s4 + $0x8] sm:$0xff]  ;;  %v9137_v31 = vld [vmem:[%s17654_s4 + $0x40] sm:$0xff]  ;;  %v9255_v5 = vpop.permute.xlu1 %9254 }
 0x1b9   : > { %v1749_v35 = vmul.f32 %v1562_v40, %v12114_v8  ;;  %v1598_v8 = vadd.f32 %v12165_v13, %v1597_v38  ;;  %3380 = vmatpush.bf16.msra.mxu2 %v9141_v23  ;;  %vm1601_vm10 = vmor %vm1599_vm9, %vm1600_vm5  ;;  %vm1604_vm11 = vcmp.eq.f32.partialorder %v1603_v15, 8.507059e+37  ;;  %v1606_v55 = vor.u32 1.1754944e-38, %v1605_v56  ;;  %v1922_v21 = vld [vmem:[#allocation2 + $0x28] sm:$0xff] }
 0x1ba   : > { %v1572_v17 = vsel %vm1571_vm6, %v12308_v27, %v1568_v37  ;;  %v12383_v60 = vpop.eup %10180  ;;  %v1620_v18 = vand.u32 2147483648, %v12124_v0  ;;  %v1612_v4 = vmul.f32 %v12316_v63, %v1611_v10  ;;  %vm1615_vm12 = vweird.f32 %v12316_v63  ;;  %3291 = vmatpush.bf16.msra.mxu1 %v9133_v26  ;;  %vm17781_vm5 = vmmov %vm17780_vm3 }
 0x1bb   : > { %1782 = vst.msk [vmem:[#allocation2 + $0x168] sm:$0xff] %vm17778_vm8, %v1749_v35  ;;  %v1577_v49 = vsel %vm1574_vm7, %v1576_v25, %v1572_v17  ;;  %9419 = vrot.lane.b32.xlu2 %v12167_v14, %s10616_s23  ;;  %v1580_v34 = vmul.f32 %v12383_v60, %v12314_v33  ;;  %v1602_v48 = vsel %vm1601_vm10, %v12165_v13, %v1598_v8  ;;  %v1590_v11 = vand.u32 2147483648, %v12314_v33  ;;  %vm17782_vm7 = vmmov %vm17780_vm3  ;;  %v1923_v25 = vld [vmem:[#allocation2 + $0x30] sm:$0xff] }
 0x1bc   : > { %v1750_v41 = vmul.f32 %v1577_v49, %v12142_v39  ;;  %9439 = vrot.lane.b32.xlu0 %v12149_v59, %s17526_s24  ;;  %v1607_v14 = vsel %vm1604_vm11, %v1606_v55, %v1602_v48  ;;  %v1618_v39 = vand.u32 2147483647, %v12124_v0  ;;  %v9139_v59 = vld [vmem:[%s17654_s4 + $0x50] sm:$0xff]  ;;  %v1613_v27 = vadd.f32 %v12316_v63, %v1612_v4  ;;  %vm17783_vm8 = vmmov %vm17780_vm3  ;;  %v2001_v48 = vld [vmem:[#allocation2 + $0x127] sm:$0xff] }
 0x1bd   : > { %9414 = vrot.lane.b32.xlu1 %v12105_v52, %s17528_s29  ;;  %v1581_v13 = vsub.f32 1.0, %v1580_v34  ;;  %3381 = vmatpush.bf16.msra.mxu2 %v9140_v45  ;;  %v9132_v52 = vld [vmem:[%s17654_s4 + $0x18] sm:$0xff]  ;;  %v1752_v9 = vmul.f32 %v1607_v14, %v11764_v6  ;;  %vm1614_vm14 = vweird.f32 %v12124_v0  ;;  %vm1585_vm0 = vweird.f32 %v12383_v60  ;;  %v9245_v57 = vpop.permute.xlu0 %9244  ;;  %vm17784_vm11 = vmmov %vm17780_vm3 }
 0x1be   : > { %1783 = vst.msk [vmem:[#allocation2 + $0x170] sm:$0xff] %vm17779_vm13, %v1750_v41  ;;  %v1588_v22 = vand.u32 2147483647, %v12314_v33  ;;  %vm1616_vm2 = vmor %vm1614_vm14, %vm1615_vm12  ;;  %v1621_v47 = vor.u32 1.1754944e-38, %v1620_v18  ;;  %v12420_v51 = vpack.i.bf16 %v2032_v2, %v2031_v53  ;;  %vm1619_vm4 = vcmp.eq.f32.partialorder %v1618_v39, 8.507059e+37  ;;  %3292 = vmatpush.bf16.msra.mxu1 %v9132_v52  ;;  %v2065_v41 = vld [vmem:[#allocation2 + $0x129] sm:$0xff] }
 0x1bf   : > { %v1582_v28 = vmul.f32 %v12383_v60, %v1581_v13  ;;  %1785 = vst.msk [vmem:[#allocation2 + $0x190] sm:$0xff] %vm17780_vm3, %v1752_v9  ;;  %v1617_v6 = vsel %vm1616_vm2, %v12316_v63, %v1613_v27  ;;  %v3064_v0 = vpack.c.bf16 %v2064_v58, %v2063_v44  ;;  %vm1584_vm1 = vweird.f32 %v12314_v33  ;;  %v9138_v33 = vld [vmem:[%s17654_s4 + $0x48] sm:$0xff]  ;;  %vm17785_vm12 = vmmov %vm17780_vm3  ;;  %v2066_v34 = vld [vmem:[#allocation2 + $0x131] sm:$0xff] }
 0x1c0   : > { %v1622_v32 = vsel %vm1619_vm4, %v1621_v47, %v1617_v6  ;;  %v12431_v12 = vpack.i.bf16 %v2000_v61, %v1999_v54  ;;  %v12433_v3 = vpack.i.bf16 %v2064_v58, %v2063_v44  ;;  %vm1586_vm15 = vmor %vm1584_vm1, %vm1585_vm0  ;;  %v1591_v63 = vor.u32 1.1754944e-38, %v1590_v11  ;;  %v2002_v18 = vld [vmem:[#allocation2 + $0x12f] sm:$0xff] }
 0x1c1   : > { %v1583_v29 = vadd.f32 %v12383_v60, %v1582_v28  ;;  %3382 = vmatpush.bf16.msra.mxu2 %v9139_v59  ;;  %v1753_v30 = vmul.f32 %v1622_v32, %v11776_v7  ;;  %vm1589_vm6 = vcmp.eq.f32.partialorder %v1588_v22, 8.507059e+37  ;;  %v9247_v23 = vunpack.i.h.bf16 %v9245_v57  ;;  %vm17789_vm13 = vmmov %vm17780_vm3  ;;  %v2036_v44 = vld [vmem:[#allocation2 + $0x150] sm:$0xff]  ;;  %v2035_v13 = vld [vmem:[#allocation2 + $0x148] sm:$0xff]  ;;  %v9260_v28 = vpop.permute.xlu1 %9259 }
 0x1c2   : > { %3293 = vmatpush.bf16.msra.mxu1 %v9131_v20  ;;  %v9246_v40 = vunpack.i.l.bf16 %v9245_v57  ;;  %v9257_v56 = vunpack.i.h.bf16 %v9255_v5  ;;  %v9256_v37 = vunpack.i.l.bf16 %v9255_v5  ;;  %vm17583_vm9 = vcmask 523264   ;;  %v2067_v58 = vld [vmem:[#allocation2 + $0x149] sm:$0xff]  ;;  %v2068_v52 = vld [vmem:[#allocation2 + $0x151] sm:$0xff]  ;;  %vm17790_vm14 = vmmov %vm17780_vm3 }
 0x1c3   : > { %9434 = vrot.lane.b32.xlu2 %v12420_v51, %s10616_s23  ;;  %v1587_v36 = vsel %vm1586_vm15, %v12383_v60, %v1583_v29  ;;  %1786 = vst.msk [vmem:[#allocation2 + $0x1a8] sm:$0xff] %vm17782_vm7, %v1753_v30  ;;  %vm2915_vm10 = vcmask 785408   ;;  %v2949_v17 = vsel %vm17785_vm12, %v1923_v25, %v9247_v23  ;;  %v17788_v49 = vmov 0.0   ;;  %v2003_v59 = vld [vmem:[#allocation2 + $0x147] sm:$0xff]  ;;  %v2004_v11 = vld [vmem:[#allocation2 + $0x14f] sm:$0xff]  ;;  %vm17791_vm0 = vmmov %vm17780_vm3 }
 0x1c4   : > { %8767 = vmatmul.msk.bf16.gmra.mxu3 %vm17781_vm5, %v3064_v0  ;;  %9454 = vrot.lane.b32.xlu0 %v12433_v3, %s17526_s24  ;;  %v1592_v1 = vsel %vm1589_vm6, %v1591_v63, %v1587_v36  ;;  %v2948_v26 = vsel %vm17784_vm11, %v1922_v21, %v9246_v40  ;;  %s17787_s24 = smov 32   ;;  %663 = vst.msk [vmem:[#allocation3] sm:$0xff] %vm17583_vm9, %v17788_v49  ;;  %v2037_v47 = vld [vmem:[#allocation2 + $0x168] sm:$0xff]  ;;  %v9262_v29 = vunpack.i.h.bf16 %v9260_v28  ;;  %v9261_v32 = vunpack.i.l.bf16 %v9260_v28  ;;  %vm17792_vm2 = vmmov %vm17791_vm0  ;;  %v1925_v25 = vld [vmem:[#allocation2 + $0x50] sm:$0xff] }
 0x1c5   : > { %9429 = vrot.lane.b32.xlu1 %v12431_v12, %s17528_s29  ;;  %v1751_v7 = vmul.f32 %v1592_v1, %v12152_v19  ;;  %3383 = vmatpush.bf16.msra.mxu2 %v9138_v33  ;;  %v9129_v19 = vld [vmem:[%s17654_s4] sm:$0xff]  ;;  %s17786_s29 = smov 64   ;;  %664 = vst.msk [vmem:[#allocation3 + $0x8] sm:$0xff] %vm17583_vm9, %v17788_v49  ;;  %v3067_v4 = vpack.c.bf16 %v2066_v34, %v2065_v41  ;;  %v2069_v6 = vld [vmem:[#allocation2 + $0x169] sm:$0xff]  ;;  %v2070_v0 = vld [vmem:[#allocation2 + $0x171] sm:$0xff]  ;;  %v9267_v33 = vunpack.i.h.bf16 %v12372_v24  ;;  %v9266_v36 = vunpack.i.l.bf16 %v12372_v24 }
 0x1c6   : > { %v9250_v15 = vpop.permute.xlu0 %9249  ;;  %3294 = vmatpush.bf16.msra.mxu1 %v9130_v43  ;;  %665 = vst.msk [vmem:[#allocation3 + $0x10] sm:$0xff] %vm17583_vm9, %v17788_v49  ;;  %v9458_v39 = vpack.i.bf16 %v2002_v18, %v2001_v48  ;;  %v12487_v53 = vpack.i.bf16 %v2066_v34, %v2065_v41  ;;  %v12534_v9 = vpack.i.bf16 %v2036_v44, %v2035_v13  ;;  %v2005_v57 = vld [vmem:[#allocation2 + $0x167] sm:$0xff]  ;;  %v2006_v20 = vld [vmem:[#allocation2 + $0x16f] sm:$0xff]  ;;  %v9272_v1 = vunpack.i.h.bf16 %v12429_v46  ;;  %vm17793_vm3 = vmmov %vm17791_vm0 }
 0x1c7   : > { %1784 = vst.msk [vmem:[#allocation2 + $0x188] sm:$0xff] %vm17783_vm8, %v1751_v7  ;;  %v9252_v35 = vunpack.i.h.bf16 %v9250_v15  ;;  %v9251_v38 = vunpack.i.l.bf16 %v9250_v15  ;;  %v3070_v27 = vpack.c.bf16 %v2068_v52, %v2067_v58  ;;  %v12538_v54 = vpack.i.bf16 %v2004_v11, %v2003_v59  ;;  %v1794_v5 = vld [vmem:[#allocation2 + $0x7] sm:$0xff]  ;;  %v1795_v23 = vld [vmem:[#allocation2 + $0xf] sm:$0xff]  ;;  %vm17794_vm4 = vmmov %vm17791_vm0 }
 0x1c8   : > { %666 = vst.msk [vmem:[#allocation3 + $0x18] sm:$0xff] %vm17583_vm9, %v17788_v49  ;;  %v12542_v61 = vpack.i.bf16 %v2068_v52, %v2067_v58  ;;  %v12591_v63 = vpack.i.bf16 %v2006_v20, %v2005_v57  ;;  %v12593_v30 = vpack.i.bf16 %v2070_v0, %v2069_v6  ;;  %v9271_v7 = vunpack.i.l.bf16 %v12429_v46  ;;  %v1924_v21 = vld [vmem:[#allocation2 + $0x48] sm:$0xff]  ;;  %vm17795_vm1 = vmmov %vm17791_vm0  ;;  %v2040_v59 = vld [vmem:[#allocation2 + $0x190] sm:$0xff] }
 0x1c9   : > { %3384 = vmatpush.bf16.msra.mxu2 %v9137_v31  ;;  %v2980_v10 = vsel %vm17583_vm9, %v2948_v26, %v9251_v38  ;;  %v2981_v60 = vsel %vm17583_vm9, %v2949_v17, %v9252_v35  ;;  %667 = vst.msk [vmem:[#allocation3 + $0x20] sm:$0xff] %vm17583_vm9, %v17788_v49  ;;  %v2851_v35 = vsel %vm17792_vm2, %v1794_v5, %v9261_v32  ;;  %v1796_v58 = vld [vmem:[#allocation2 + $0x27] sm:$0xff]  ;;  %v1797_v52 = vld [vmem:[#allocation2 + $0x2f] sm:$0xff]  ;;  %vm17796_vm15 = vmmov %vm17791_vm0 }
 0x1ca   : > { %3295 = vmatpush.bf16.msra.mxu1 %v9129_v19  ;;  %v3012_v55 = vsel %vm2915_vm10, %v2980_v10, %v9256_v37  ;;  %v3013_v45 = vsel %vm2915_vm10, %v2981_v60, %v9257_v56  ;;  %668 = vst.msk [vmem:[#allocation3 + $0x28] sm:$0xff] %vm17583_vm9, %v17788_v49  ;;  %v2852_v38 = vsel %vm17793_vm3, %v1795_v23, %v9262_v29  ;;  %vm17797_vm5 = vmmov %vm17791_vm0 }
 0x1cb   : > { %9449 = vrot.lane.b32.xlu2 %v12298_v42, %s10616_s23  ;;  %v2033_v42 = vld [vmem:[#allocation2 + $0x128] sm:$0xff]  ;;  %669 = vst.msk [vmem:[#allocation3 + $0x30] sm:$0xff] %vm17583_vm9, %v17788_v49  ;;  %v2883_v26 = vsel %vm17583_vm9, %v2851_v35, %v9266_v36  ;;  %v2884_v17 = vsel %vm17583_vm9, %v2852_v38, %v9267_v33  ;;  %vm17798_vm6 = vmmov %vm17791_vm0 }
 0x1cc   : > { %v12465_v8 = vpop.permute.xlu2 %9284  ;;  %9469 = vrot.lane.b32.xlu0 %v12280_v16, %s17787_s24  ;;  %v3045_v16 = vpack.c.bf16 %v3013_v45, %v3012_v55  ;;  %670 = vst.msk [vmem:[#allocation3 + $0x38] sm:$0xff] %vm17583_vm9, %v17788_v49  ;;  %v2916_v60 = vsel %vm2915_vm10, %v2883_v26, %v9271_v7  ;;  %vm17799_vm7 = vmmov %vm17791_vm0 }
 0x1cd   : > { %9444 = vrot.lane.b32.xlu1 %v12158_v62, %s17786_s29  ;;  %v2034_v62 = vld [vmem:[#allocation2 + $0x130] sm:$0xff]  ;;  %671 = vst.msk [vmem:[#allocation3 + $0x40] sm:$0xff] %vm17583_vm9, %v17788_v49  ;;  %v9287_v56 = vunpack.i.h.bf16 %v12465_v8  ;;  %v9286_v37 = vunpack.i.l.bf16 %v12465_v8  ;;  %vm17800_vm8 = vmmov %vm17791_vm0 }
 0x1ce   : > { %3385 = vmatmul.bf16.vlgmr.msra.gmra.mxu2 %v3045_v16  ;;  %v9463_v14 = vpack.i.bf16 %v2034_v62, %v2033_v42  ;;  %672 = vst.msk [vmem:[#allocation3 + $0x48] sm:$0xff] %vm17583_vm9, %v17788_v49  ;;  %v9275_v31 = vpop.permute.xlu0 %9274  ;;  %v2917_v42 = vsel %vm2915_vm10, %v2884_v17, %v9272_v1  ;;  %v2071_v28 = vld [vmem:[#allocation2 + $0x189] sm:$0xff]  ;;  %vm17801_vm11 = vmmov %vm17791_vm0 }
 0x1cf   : > { %673 = vst.msk [vmem:[#allocation3 + $0x50] sm:$0xff] %vm17583_vm9, %v17788_v49  ;;  %v9277_v15 = vunpack.i.h.bf16 %v9275_v31  ;;  %v9276_v19 = vunpack.i.l.bf16 %v9275_v31  ;;  %v3044_v62 = vpack.c.bf16 %v2917_v42, %v2916_v60  ;;  %vm17802_vm12 = vmmov %vm17791_vm0 }
 0x1d0   : > { %674 = vst.msk [vmem:[#allocation3 + $0x58] sm:$0xff] %vm17583_vm9, %v17788_v49  ;;  %vm17805_vm2 = vmmov %vm17791_vm0 }
 0x1d1   : > { %675 = vst.msk [vmem:[#allocation3 + $0x60] sm:$0xff] %vm17583_vm9, %v17788_v49  ;;  %v2950_v10 = vsel %vm17794_vm4, %v1924_v21, %v9276_v19  ;;  %v2951_v8 = vsel %vm17795_vm1, %v1925_v25, %v9277_v15  ;;  %3296 = vmatmul.bf16.vlgmr.msra.gmra.mxu1 %v3044_v62  ;;  %v1927_v15 = vld [vmem:[#allocation2 + $0x70] sm:$0xff]  ;;  %vm17806_vm3 = vmmov %vm17791_vm0 }
 0x1d2   : > { %676 = vst.msk [vmem:[#allocation3 + $0x68] sm:$0xff] %vm17583_vm9, %v17788_v49  ;;  %v1799_v62 = vld [vmem:[#allocation2 + $0x4f] sm:$0xff]  ;;  %vm17807_vm4 = vmmov %vm17791_vm0 }
 0x1d3   : > { %9464 = vrot.lane.b32.xlu2 %v9463_v14, %s10616_s23  ;;  %677 = vst.msk [vmem:[#allocation3 + $0x70] sm:$0xff] %vm17583_vm9, %v17788_v49  ;;  %vm17808_vm1 = vmmov %vm17791_vm0 }
 0x1d4   : > { %8768 = vmatmul.msk.bf16.gmra.mxu3 %vm17789_vm13, %v3067_v4  ;;  %9484 = vrot.lane.b32.xlu0 %v12487_v53, %s17787_s24  ;;  %v12502_v2 = vpop.permute.xlu2 %9299  ;;  %678 = vst.msk [vmem:[#allocation3 + $0x78] sm:$0xff] %vm17583_vm9, %v17788_v49  ;;  %vm17803_vm13 = vmmov %vm17791_vm0 }
 0x1d5   : > { %9459 = vrot.lane.b32.xlu1 %v9458_v39, %s17786_s29  ;;  %679 = vst.msk [vmem:[#allocation3 + $0x80] sm:$0xff] %vm17583_vm9, %v17788_v49  ;;  %v9301_v57 = vunpack.i.l.bf16 %v12502_v2 }
 0x1d6   : > { %680 = vst.msk [vmem:[#allocation3 + $0x88] sm:$0xff] %vm17583_vm9, %v17788_v49 }
 0x1d7   : > { %681 = vst.msk [vmem:[#allocation3 + $0x90] sm:$0xff] %vm17583_vm9, %v17788_v49 }
 0x1d8   : > { %682 = vst.msk [vmem:[#allocation3 + $0x98] sm:$0xff] %vm17583_vm9, %v17788_v49  ;;  %v9290_v18 = vpop.permute.xlu0 %9289 }
 0x1d9   : > { %683 = vst.msk [vmem:[#allocation3 + $0xa0] sm:$0xff] %vm17583_vm9, %v17788_v49  ;;  %v9292_v44 = vunpack.i.h.bf16 %v9290_v18  ;;  %v9291_v13 = vunpack.i.l.bf16 %v9290_v18  ;;  %v2073_v18 = vld [vmem:[#allocation2 + $0x1a9] sm:$0xff] }
 0x1da   : > { %684 = vst.msk [vmem:[#allocation3 + $0xa8] sm:$0xff] %vm17583_vm9, %v17788_v49 }
 0x1db   : > { %9479 = vrot.lane.b32.xlu2 %v12431_v12, %s10616_s23  ;;  %685 = vst.msk [vmem:[#allocation3 + $0xb0] sm:$0xff] %vm17583_vm9, %v17788_v49  ;;  %v2853_v11 = vsel %vm17796_vm15, %v1796_v58, %v9291_v13  ;;  %vm17809_vm15 = vmmov %vm17791_vm0 }
 0x1dc   : > { %9499 = vrot.lane.b32.xlu0 %v12420_v51, %s17787_s24  ;;  %686 = vst.msk [vmem:[#allocation3 + $0xb8] sm:$0xff] %vm17583_vm9, %v17788_v49  ;;  %v2038_v51 = vld [vmem:[#allocation2 + $0x170] sm:$0xff] }
 0x1dd   : > { %9474 = vrot.lane.b32.xlu1 %v12327_v50, %s17786_s29  ;;  %v12530_v50 = vpop.permute.xlu2 %9314  ;;  %687 = vst.msk [vmem:[#allocation3 + $0xc0] sm:$0xff] %vm17583_vm9, %v17788_v49  ;;  %v12587_v12 = vpack.i.bf16 %v2038_v51, %v2037_v47  ;;  %v2072_v47 = vld [vmem:[#allocation2 + $0x191] sm:$0xff] }
 0x1de   : > { %688 = vst.msk [vmem:[#allocation3 + $0xc8] sm:$0xff] %vm17583_vm9, %v17788_v49  ;;  %v3076_v29 = vpack.c.bf16 %v2072_v47, %v2071_v28  ;;  %v9316_v19 = vunpack.i.l.bf16 %v12530_v50 }
 0x1df   : > { %689 = vst.msk [vmem:[#allocation3 + $0xd0] sm:$0xff] %vm17583_vm9, %v17788_v49 }
 0x1e0   : > { %690 = vst.msk [vmem:[#allocation3 + $0xd8] sm:$0xff] %vm17583_vm9, %v17788_v49 }
 0x1e1   : > { %691 = vst.msk [vmem:[#allocation3 + $0xe0] sm:$0xff] %vm17583_vm9, %v17788_v49 }
 0x1e2   : > { %692 = vst.msk [vmem:[#allocation3 + $0xe8] sm:$0xff] %vm17583_vm9, %v17788_v49 }
 0x1e3   : > { %9494 = vrot.lane.b32.xlu2 %v12534_v9, %s10616_s23  ;;  %693 = vst.msk [vmem:[#allocation3 + $0xf0] sm:$0xff] %vm17583_vm9, %v17788_v49 }
 0x1e4   : > { %8769 = vmatmul.msk.bf16.gmra.mxu3 %vm17790_vm14, %v3070_v27  ;;  %9514 = vrot.lane.b32.xlu0 %v12542_v61, %s17787_s24  ;;  %694 = vst.msk [vmem:[#allocation3 + $0xf8] sm:$0xff] %vm17583_vm9, %v17788_v49  ;;  %v2854_v27 = vsel %vm17797_vm5, %v1797_v52, %v9292_v44  ;;  %vm17804_vm14 = vmmov %vm17791_vm0 }
 0x1e5   : > { %9489 = vrot.lane.b32.xlu1 %v12538_v54, %s17786_s29  ;;  %v12565_v22 = vpop.permute.xlu2 %9329  ;;  %695 = vst.msk [vmem:[#allocation3 + $0x100] sm:$0xff] %vm17583_vm9, %v17788_v49  ;;  %v9280_v43 = vpop.permute.xlu1 %9279  ;;  %vm17810_vm5 = vmmov %vm17791_vm0 }
 0x1e6   : > { %696 = vst.msk [vmem:[#allocation3 + $0x108] sm:$0xff] %vm17583_vm9, %v17788_v49  ;;  %v9282_v24 = vunpack.i.h.bf16 %v9280_v43  ;;  %v9281_v40 = vunpack.i.l.bf16 %v9280_v43  ;;  %v9305_v36 = vpop.permute.xlu0 %9304  ;;  %v9332_v58 = vunpack.i.h.bf16 %v12565_v22  ;;  %v9331_v52 = vunpack.i.l.bf16 %v12565_v22 }
 0x1e7   : > { %697 = vst.msk [vmem:[#allocation3 + $0x110] sm:$0xff] %vm17583_vm9, %v17788_v49  ;;  %v9307_v5 = vunpack.i.h.bf16 %v9305_v36  ;;  %v9306_v23 = vunpack.i.l.bf16 %v9305_v36 }
 0x1e8   : > { %698 = vst.msk [vmem:[#allocation3 + $0x118] sm:$0xff] %vm17583_vm9, %v17788_v49  ;;  %v2982_v55 = vsel %vm17583_vm9, %v2950_v10, %v9281_v40  ;;  %v2983_v45 = vsel %vm17583_vm9, %v2951_v8, %v9282_v24  ;;  %v9317_v24 = vunpack.i.h.bf16 %v12530_v50  ;;  %v1926_v40 = vld [vmem:[#allocation2 + $0x68] sm:$0xff] }
 0x1e9   : > { %699 = vst.msk [vmem:[#allocation3 + $0x120] sm:$0xff] %vm17583_vm9, %v17788_v49  ;;  %v3014_v41 = vsel %vm2915_vm10, %v2982_v55, %v9286_v37  ;;  %v3015_v34 = vsel %vm2915_vm10, %v2983_v45, %v9287_v56  ;;  %v2952_v37 = vsel %vm17799_vm7, %v1926_v40, %v9306_v23  ;;  %v2953_v35 = vsel %vm17800_vm8, %v1927_v15, %v9307_v5  ;;  %vm17812_vm7 = vmmov %vm17791_vm0 }
 0x1ea   : > { %700 = vst.msk [vmem:[#allocation3 + $0x128] sm:$0xff] %vm17583_vm9, %v17788_v49  ;;  %v3048_v16 = vpack.c.bf16 %v3015_v34, %v3014_v41  ;;  %v2042_v41 = vld [vmem:[#allocation2 + $0x1b0] sm:$0xff]  ;;  %vm17813_vm8 = vmmov %vm17791_vm0 }
 0x1eb   : > { %9509 = vrot.lane.b32.xlu2 %v9458_v39, %s10616_s23  ;;  %701 = vst.msk [vmem:[#allocation3 + $0x130] sm:$0xff] %vm17583_vm9, %v17788_v49 }
 0x1ec   : > { %9529 = vrot.lane.b32.xlu0 %v9463_v14, %s17787_s24  ;;  %702 = vst.msk [vmem:[#allocation3 + $0x138] sm:$0xff] %vm17583_vm9, %v17788_v49  ;;  %3390 = vmatmul.bf16.gmra.mxu2 %v3048_v16 }
 0x1ed   : > { %9504 = vrot.lane.b32.xlu1 %v12433_v3, %s17786_s29  ;;  %v3073_v3 = vpack.c.bf16 %v2070_v0, %v2069_v6  ;;  %703 = vst.msk [vmem:[#allocation3 + $0x140] sm:$0xff] %vm17583_vm9, %v17788_v49  ;;  %v12606_v46 = vpop.permute.xlu2 %9344  ;;  %v9295_v48 = vpop.permute.xlu1 %9294  ;;  %v9302_v0 = vunpack.i.h.bf16 %v12502_v2 }
 0x1ee   : > { %704 = vst.msk [vmem:[#allocation3 + $0x148] sm:$0xff] %vm17583_vm9, %v17788_v49  ;;  %v9297_v4 = vunpack.i.h.bf16 %v9295_v48  ;;  %v9296_v39 = vunpack.i.l.bf16 %v9295_v48  ;;  %v9320_v10 = vpop.permute.xlu0 %9319  ;;  %v2041_v48 = vld [vmem:[#allocation2 + $0x1a8] sm:$0xff]  ;;  %v9346_v36 = vunpack.i.l.bf16 %v12606_v46 }
 0x1ef   : > { %705 = vst.msk [vmem:[#allocation3 + $0x150] sm:$0xff] %vm17583_vm9, %v17788_v49  ;;  %v9322_v55 = vunpack.i.h.bf16 %v9320_v10  ;;  %v9321_v45 = vunpack.i.l.bf16 %v9320_v10  ;;  %v2044_v10 = vld [vmem:[#allocation2 + $0x1d0] sm:$0xff] }
 0x1f0   : > { %706 = vst.msk [vmem:[#allocation3 + $0x158] sm:$0xff] %vm17583_vm9, %v17788_v49  ;;  %v2885_v51 = vsel %vm17583_vm9, %v2853_v11, %v9296_v39  ;;  %v2886_v6 = vsel %vm17583_vm9, %v2854_v27, %v9297_v4  ;;  %v2074_v4 = vld [vmem:[#allocation2 + $0x1b1] sm:$0xff]  ;;  %v12731_v39 = vpop.f32.mrf.mxu3 }
 0x1f1   : > { %707 = vst.msk [vmem:[#allocation3 + $0x160] sm:$0xff] %vm17583_vm9, %v17788_v49  ;;  %v2918_v2 = vsel %vm2915_vm10, %v2885_v51, %v9301_v57  ;;  %v2919_v1 = vsel %vm2915_vm10, %v2886_v6, %v9302_v0  ;;  %v2856_v16 = vsel %vm17802_vm12, %v1799_v62, %v9322_v55  ;;  %v3079_v11 = vpack.c.bf16 %v2074_v4, %v2073_v18  ;;  %v2011_v55 = vld [vmem:[#allocation2 + $0x1c7] sm:$0xff]  ;;  %vm17815_vm12 = vmmov %vm17791_vm0 }
 0x1f2   : > { %708 = vst.msk [vmem:[#allocation3 + $0x168] sm:$0xff] %vm17583_vm9, %v17788_v49  ;;  %v3047_v56 = vpack.c.bf16 %v2919_v1, %v2918_v2 }
 0x1f3   : > { %9524 = vrot.lane.b32.xlu2 %v12587_v12, %s10616_s23  ;;  %709 = vst.msk [vmem:[#allocation3 + $0x170] sm:$0xff] %vm17583_vm9, %v17788_v49 }
 0x1f4   : > { %8770 = vmatmul.msk.bf16.gmra.mxu3 %vm17791_vm0, %v3073_v3  ;;  %9544 = vrot.lane.b32.xlu0 %v12593_v30, %s17787_s24  ;;  %710 = vst.msk [vmem:[#allocation3 + $0x178] sm:$0xff] %vm17583_vm9, %v17788_v49  ;;  %v12672_v3 = vpack.i.bf16 %v2072_v47, %v2071_v28 }
 0x1f5   : > { %9519 = vrot.lane.b32.xlu1 %v12591_v63, %s17786_s29  ;;  %711 = vst.msk [vmem:[#allocation3 + $0x180] sm:$0xff] %vm17583_vm9, %v17788_v49  ;;  %v12644_v14 = vpop.permute.xlu2 %9359  ;;  %3301 = vmatmul.bf16.gmra.mxu1 %v3047_v56 }
 0x1f6   : > { %712 = vst.msk [vmem:[#allocation3 + $0x188] sm:$0xff] %vm17583_vm9, %v17788_v49  ;;  %v9335_v47 = vpop.permute.xlu0 %9334 }
 0x1f7   : > { %713 = vst.msk [vmem:[#allocation3 + $0x190] sm:$0xff] %vm17583_vm9, %v17788_v49  ;;  %v9310_v33 = vpop.permute.xlu1 %9309  ;;  %v9337_v0 = vunpack.i.h.bf16 %v9335_v47  ;;  %v9336_v57 = vunpack.i.l.bf16 %v9335_v47  ;;  %v1930_v47 = vld [vmem:[#allocation2 + $0xa8] sm:$0xff] }
 0x1f8   : > { %714 = vst.msk [vmem:[#allocation3 + $0x198] sm:$0xff] %vm17583_vm9, %v17788_v49  ;;  %v9312_v43 = vunpack.i.h.bf16 %v9310_v33  ;;  %v9311_v31 = vunpack.i.l.bf16 %v9310_v33  ;;  %v1929_v33 = vld [vmem:[#allocation2 + $0x90] sm:$0xff]  ;;  %v12768_v15 = vpop.f32.mrf.mxu3 }
 0x1f9   : > { %715 = vst.msk [vmem:[#allocation3 + $0x1a0] sm:$0xff] %vm17583_vm9, %v17788_v49 }
 0x1fa   : > { %716 = vst.msk [vmem:[#allocation3 + $0x1a8] sm:$0xff] %vm17583_vm9, %v17788_v49  ;;  %v2984_v38 = vsel %vm17583_vm9, %v2952_v37, %v9311_v31  ;;  %v2985_v21 = vsel %vm17583_vm9, %v2953_v35, %v9312_v43  ;;  %v2955_v43 = vsel %vm17791_vm0, %v1929_v33, %v9337_v0 }
 0x1fb   : > { %9539 = vrot.lane.b32.xlu2 %v12538_v54, %s10616_s23  ;;  %v2039_v54 = vld [vmem:[#allocation2 + $0x188] sm:$0xff]  ;;  %717 = vst.msk [vmem:[#allocation3 + $0x1b0] sm:$0xff] %vm17583_vm9, %v17788_v49  ;;  %v3016_v50 = vsel %vm2915_vm10, %v2984_v38, %v9316_v19  ;;  %v3017_v25 = vsel %vm2915_vm10, %v2985_v21, %v9317_v24 }
 0x1fc   : > { %9559 = vrot.lane.b32.xlu0 %v12534_v9, %s17787_s24  ;;  %v2008_v9 = vld [vmem:[#allocation2 + $0x18f] sm:$0xff]  ;;  %v12666_v20 = vpack.i.bf16 %v2040_v59, %v2039_v54  ;;  %718 = vst.msk [vmem:[#allocation3 + $0x1b8] sm:$0xff] %vm17583_vm9, %v17788_v49  ;;  %v3051_v26 = vpack.c.bf16 %v3017_v25, %v3016_v50  ;;  %v12739_v59 = vpack.i.bf16 %v2042_v41, %v2041_v48  ;;  %v1800_v50 = vld [vmem:[#allocation2 + $0x67] sm:$0xff] }
 0x1fd   : > { %9534 = vrot.lane.b32.xlu1 %v12487_v53, %s17786_s29  ;;  %v2007_v53 = vld [vmem:[#allocation2 + $0x187] sm:$0xff]  ;;  %719 = vst.msk [vmem:[#allocation3 + $0x1c0] sm:$0xff] %vm17583_vm9, %v17788_v49  ;;  %v12683_v7 = vpop.permute.xlu2 %9374  ;;  %v12745_v54 = vpack.i.bf16 %v2074_v4, %v2073_v18  ;;  %v1801_v25 = vld [vmem:[#allocation2 + $0x6f] sm:$0xff] }
 0x1fe   : > { %v12670_v32 = vpack.i.bf16 %v2008_v9, %v2007_v53  ;;  %720 = vst.msk [vmem:[#allocation3 + $0x1c8] sm:$0xff] %vm17583_vm9, %v17788_v49  ;;  %3395 = vmatmul.bf16.gmra.mxu2 %v3051_v26  ;;  %v9350_v56 = vpop.permute.xlu0 %9349  ;;  %v2043_v26 = vld [vmem:[#allocation2 + $0x1c8] sm:$0xff] }
 0x1ff   : > { %721 = vst.msk [vmem:[#allocation3 + $0x1d0] sm:$0xff] %vm17583_vm9, %v17788_v49  ;;  %v9325_v17 = vpop.permute.xlu1 %9324  ;;  %v9352_v38 = vunpack.i.h.bf16 %v9350_v56  ;;  %v9351_v21 = vunpack.i.l.bf16 %v9350_v56  ;;  %v12784_v41 = vpack.i.bf16 %v2044_v10, %v2043_v26 }
 0x200   : > { %722 = vst.msk [vmem:[#allocation3 + $0x1d8] sm:$0xff] %vm17583_vm9, %v17788_v49  ;;  %v9327_v60 = vunpack.i.h.bf16 %v9325_v17  ;;  %v9326_v42 = vunpack.i.l.bf16 %v9325_v17 }
 0x201   : > { %723 = vst.msk [vmem:[#allocation3 + $0x1e0] sm:$0xff] %vm17583_vm9, %v17788_v49  ;;  %v2857_v17 = vsel %vm17805_vm2, %v1800_v50, %v9351_v21  ;;  %v2078_v21 = vld [vmem:[#allocation2 + $0x1f1] sm:$0xff]  ;;  %v2013_v50 = vld [vmem:[#allocation2 + $0x1e7] sm:$0xff]  ;;  %vm17818_vm2 = vmmov %vm17791_vm0 }
 0x202   : > { %724 = vst.msk [vmem:[#allocation3 + $0x1e8] sm:$0xff] %vm17583_vm9, %v17788_v49  ;;  %v2888_v13 = vsel %vm17583_vm9, %v2856_v16, %v9327_v60  ;;  %v2075_v60 = vld [vmem:[#allocation2 + $0x1c9] sm:$0xff] }
 0x203   : > { %9554 = vrot.lane.b32.xlu2 %v12666_v20, %s10616_s23  ;;  %725 = vst.msk [vmem:[#allocation3 + $0x1f0] sm:$0xff] %vm17583_vm9, %v17788_v49  ;;  %v2921_v53 = vsel %vm2915_vm10, %v2888_v13, %v9332_v58 }
 0x204   : > { %8771 = vmatmul.msk.bf16.gmra.mxu3 %vm17798_vm6, %v3076_v29  ;;  %9574 = vrot.lane.b32.xlu0 %v12672_v3, %s17787_s24  ;;  %726 = vst.msk [vmem:[#allocation3 + $0x1f8] sm:$0xff] %vm17583_vm9, %v17788_v49  ;;  %v1928_v29 = vld [vmem:[#allocation2 + $0x88] sm:$0xff]  ;;  %vm17811_vm6 = vmmov %vm17791_vm0 }
 0x205   : > { %9549 = vrot.lane.b32.xlu1 %v12670_v32, %s17786_s29  ;;  %727 = vst.msk [vmem:[#allocation3 + $0x200] sm:$0xff] %vm17583_vm9, %v17788_v49  ;;  %v12715_v8 = vpop.permute.xlu2 %9389  ;;  %v2954_v1 = vsel %vm17804_vm14, %v1928_v29, %v9336_v57  ;;  %vm17817_vm14 = vmmov %vm17791_vm0 }
 0x206   : > { %728 = vst.msk [vmem:[#allocation3 + $0x208] sm:$0xff] %vm17583_vm9, %v17788_v49  ;;  %v9365_v4 = vpop.permute.xlu0 %9364 }
 0x207   : > { %729 = vst.msk [vmem:[#allocation3 + $0x210] sm:$0xff] %vm17583_vm9, %v17788_v49  ;;  %v9340_v28 = vpop.permute.xlu1 %9339 }
 0x208   : > { %730 = vst.msk [vmem:[#allocation3 + $0x218] sm:$0xff] %vm17583_vm9, %v17788_v49  ;;  %v9342_v51 = vunpack.i.h.bf16 %v9340_v28  ;;  %v9341_v6 = vunpack.i.l.bf16 %v9340_v28  ;;  %v9377_v28 = vunpack.i.h.bf16 %v12683_v7 }
 0x209   : > { %731 = vst.msk [vmem:[#allocation3 + $0x220] sm:$0xff] %vm17583_vm9, %v17788_v49 }
 0x20a   : > { %732 = vst.msk [vmem:[#allocation3 + $0x228] sm:$0xff] %vm17583_vm9, %v17788_v49  ;;  %v2986_v31 = vsel %vm17583_vm9, %v2954_v1, %v9341_v6  ;;  %v2987_v5 = vsel %vm17583_vm9, %v2955_v43, %v9342_v51 }
 0x20b   : > { %9569 = vrot.lane.b32.xlu2 %v12591_v63, %s10616_s23  ;;  %v1798_v63 = vld [vmem:[#allocation2 + $0x47] sm:$0xff]  ;;  %733 = vst.msk [vmem:[#allocation3 + $0x230] sm:$0xff] %vm17583_vm9, %v17788_v49  ;;  %v3018_v23 = vsel %vm2915_vm10, %v2986_v31, %v9346_v36 }
 0x20c   : > { %9589 = vrot.lane.b32.xlu0 %v12587_v12, %s17787_s24  ;;  %v2855_v34 = vsel %vm17801_vm11, %v1798_v63, %v9321_v45  ;;  %v2010_v12 = vld [vmem:[#allocation2 + $0x1af] sm:$0xff]  ;;  %734 = vst.msk [vmem:[#allocation3 + $0x238] sm:$0xff] %vm17583_vm9, %v17788_v49  ;;  %v9347_v49 = vunpack.i.h.bf16 %v12606_v46  ;;  %vm17814_vm11 = vmmov %vm17791_vm0 }
 0x20d   : > { %9564 = vrot.lane.b32.xlu1 %v12542_v61, %s17786_s29  ;;  %v2009_v61 = vld [vmem:[#allocation2 + $0x1a7] sm:$0xff]  ;;  %v2887_v44 = vsel %vm17583_vm9, %v2855_v34, %v9326_v42  ;;  %v12754_v9 = vpop.permute.xlu2 %9404  ;;  %v2076_v42 = vld [vmem:[#allocation2 + $0x1d1] sm:$0xff] }
 0x20e   : > { %v12743_v27 = vpack.i.bf16 %v2010_v12, %v2009_v61  ;;  %v2920_v22 = vsel %vm2915_vm10, %v2887_v44, %v9331_v52  ;;  %v3019_v24 = vsel %vm2915_vm10, %v2987_v5, %v9347_v49  ;;  %v2012_v45 = vld [vmem:[#allocation2 + $0x1cf] sm:$0xff]  ;;  %v3082_v34 = vpack.c.bf16 %v2076_v42, %v2075_v60  ;;  %v12795_v44 = vpop.f32.mrf.mxu3  ;;  %v9380_v1 = vpop.permute.xlu0 %9379 }
 0x20f   : > { %v3050_v2 = vpack.c.bf16 %v2921_v53, %v2920_v22  ;;  %v3054_v40 = vpack.c.bf16 %v3019_v24, %v3018_v23  ;;  %v9355_v19 = vpop.permute.xlu1 %9354  ;;  %v12786_v16 = vpack.i.bf16 %v2012_v45, %v2011_v55  ;;  %v12788_v48 = vpack.i.bf16 %v2076_v42, %v2075_v60  ;;  %v1931_v22 = vld [vmem:[#allocation2 + $0xb0] sm:$0xff]  ;;  %v1802_v24 = vld [vmem:[#allocation2 + $0x87] sm:$0xff] }
 0x210   : > { %v9357_v37 = vunpack.i.h.bf16 %v9355_v19  ;;  %v9356_v35 = vunpack.i.l.bf16 %v9355_v19  ;;  %v9367_v52 = vunpack.i.h.bf16 %v9365_v4  ;;  %v9376_v53 = vunpack.i.l.bf16 %v12683_v7  ;;  %v2045_v19 = vld [vmem:[#allocation2 + $0x1e8] sm:$0xff] }
 0x211   : > { %3306 = vmatmul.bf16.gmra.mxu1 %v3050_v2  ;;  %3400 = vmatmul.bf16.gmra.mxu2 %v3054_v40  ;;  %v9382_v5 = vunpack.i.h.bf16 %v9380_v1  ;;  %v9381_v23 = vunpack.i.l.bf16 %v9380_v1  ;;  %v1803_v40 = vld [vmem:[#allocation2 + $0x8f] sm:$0xff] }
 0x212   : > { %v2889_v63 = vsel %vm17583_vm9, %v2857_v17, %v9356_v35  ;;  %v2957_v0 = vsel %vm17809_vm15, %v1931_v22, %v9367_v52  ;;  %v2046_v35 = vld [vmem:[#allocation2 + $0x1f0] sm:$0xff]  ;;  %v9391_v17 = vunpack.i.l.bf16 %v12715_v8  ;;  %vm17822_vm15 = vmmov %vm17791_vm0 }
 0x213   : > { %9584 = vrot.lane.b32.xlu2 %v12739_v59, %s10616_s23  ;;  %v1805_v1 = vld [vmem:[#allocation2 + $0xaf] sm:$0xff] }
 0x214   : > { %8772 = vmatmul.msk.bf16.gmra.mxu3 %vm17803_vm13, %v3079_v11  ;;  %9604 = vrot.lane.b32.xlu0 %v12745_v54, %s17787_s24  ;;  %v9366_v11 = vunpack.i.l.bf16 %v9365_v4  ;;  %v9407_v4 = vunpack.i.h.bf16 %v12754_v9  ;;  %vm17816_vm13 = vmmov %vm17791_vm0 }
 0x215   : > { %9579 = vrot.lane.b32.xlu1 %v12743_v27, %s17786_s29  ;;  %v12772_v46 = vpop.permute.xlu2 %9419 }
 0x216   : > { %v2956_v6 = vsel %vm17808_vm1, %v1930_v47, %v9366_v11  ;;  %v12819_v56 = vpop.f32.mrf.mxu3  ;;  %v9395_v45 = vpop.permute.xlu0 %9394  ;;  %vm17821_vm1 = vmmov %vm17791_vm0 }
 0x217   : > { %v9370_v18 = vpop.permute.xlu1 %9369 }
 0x218   : > { %v9372_v13 = vunpack.i.h.bf16 %v9370_v18  ;;  %v9371_v58 = vunpack.i.l.bf16 %v9370_v18  ;;  %v9396_v18 = vunpack.i.l.bf16 %v9395_v45 }
 0x21a   : > { %v2988_v57 = vsel %vm17583_vm9, %v2956_v6, %v9371_v58  ;;  %v2989_v49 = vsel %vm17583_vm9, %v2957_v0, %v9372_v13  ;;  %v9406_v13 = vunpack.i.l.bf16 %v12754_v9 }
 0x21b   : > { %9599 = vrot.lane.b32.xlu2 %v12670_v32, %s10616_s23  ;;  %v2858_v32 = vsel %vm17806_vm3, %v1801_v25, %v9352_v38  ;;  %v3020_v29 = vsel %vm2915_vm10, %v2988_v57, %v9376_v53  ;;  %v3021_v33 = vsel %vm2915_vm10, %v2989_v49, %v9377_v28  ;;  %v2077_v38 = vld [vmem:[#allocation2 + $0x1e9] sm:$0xff]  ;;  %vm17819_vm3 = vmmov %vm17791_vm0 }
 0x21c   : > { %9619 = vrot.lane.b32.xlu0 %v12666_v20, %s17787_s24  ;;  %v2890_v62 = vsel %vm17583_vm9, %v2858_v32, %v9357_v37  ;;  %v9361_v20 = vunpack.i.l.bf16 %v12644_v14  ;;  %v3057_v36 = vpack.c.bf16 %v3021_v33, %v3020_v29  ;;  %v2860_v37 = vsel %vm17811_vm6, %v1803_v40, %v9382_v5  ;;  %v2014_v25 = vld [vmem:[#allocation2 + $0x1ef] sm:$0xff]  ;;  %v2015_v40 = vld [vmem:[#allocation2 + $0x207] sm:$0xff]  ;;  %vm17824_vm6 = vmmov %vm17791_vm0 }
 0x21d   : > { %9594 = vrot.lane.b32.xlu1 %v12593_v30, %s17786_s29  ;;  %v9362_v30 = vunpack.i.h.bf16 %v12644_v14  ;;  %v12797_v14 = vpop.permute.xlu2 %9434  ;;  %v12827_v32 = vpack.i.bf16 %v2046_v35, %v2045_v19  ;;  %v3085_v10 = vpack.c.bf16 %v2078_v21, %v2077_v38  ;;  %v12829_v60 = vpack.i.bf16 %v2014_v25, %v2013_v50  ;;  %v2048_v5 = vld [vmem:[#allocation2 + $0x210] sm:$0xff] }
 0x21e   : > { %v2922_v61 = vsel %vm2915_vm10, %v2889_v63, %v9361_v20  ;;  %v12831_v42 = vpack.i.bf16 %v2078_v21, %v2077_v38  ;;  %v12850_v22 = vpop.f32.mrf.mxu3  ;;  %v9410_v57 = vpop.permute.xlu0 %9409  ;;  %v2016_v19 = vld [vmem:[#allocation2 + $0x20f] sm:$0xff] }
 0x21f   : > { %v2923_v12 = vsel %vm2915_vm10, %v2890_v62, %v9362_v30  ;;  %v9385_v2 = vpop.permute.xlu1 %9384  ;;  %v9412_v33 = vunpack.i.h.bf16 %v9410_v57  ;;  %v12870_v50 = vpack.i.bf16 %v2016_v19, %v2015_v40 }
 0x220   : > { %v3053_v51 = vpack.c.bf16 %v2923_v12, %v2922_v61  ;;  %v9387_v43 = vunpack.i.h.bf16 %v9385_v2  ;;  %v9386_v31 = vunpack.i.l.bf16 %v9385_v2  ;;  %v1932_v61 = vld [vmem:[#allocation2 + $0xc8] sm:$0xff]  ;;  %v1933_v12 = vld [vmem:[#allocation2 + $0xd0] sm:$0xff] }
 0x221   : > { %3405 = vmatmul.bf16.gmra.mxu2 %v3057_v36  ;;  %v2958_v52 = vsel %vm17813_vm8, %v1932_v61, %v9396_v18  ;;  %v9411_v36 = vunpack.i.l.bf16 %v9410_v57  ;;  %v1804_v2 = vld [vmem:[#allocation2 + $0xa7] sm:$0xff]  ;;  %vm17826_vm8 = vmmov %vm17791_vm0 }
 0x222   : > { %3311 = vmatmul.bf16.gmra.mxu1 %v3053_v51  ;;  %v2049_v57 = vld [vmem:[#allocation2 + $0x228] sm:$0xff] }
 0x223   : > { %9614 = vrot.lane.b32.xlu2 %v12784_v41, %s10616_s23 }
 0x224   : > { %8773 = vmatmul.msk.bf16.gmra.mxu3 %vm17807_vm4, %v3082_v34  ;;  %9634 = vrot.lane.b32.xlu0 %v12788_v48, %s17787_s24  ;;  %v9397_v34 = vunpack.i.h.bf16 %v9395_v45  ;;  %vm17820_vm4 = vmmov %vm17791_vm0 }
 0x225   : > { %9609 = vrot.lane.b32.xlu1 %v12786_v16, %s17786_s29  ;;  %v12813_v7 = vpop.permute.xlu2 %9449 }
 0x226   : > { %v2959_v11 = vsel %vm17814_vm11, %v1933_v12, %v9397_v34  ;;  %v12868_v21 = vpop.f32.mrf.mxu3  ;;  %vm17827_vm11 = vmmov %vm17791_vm0 }
 0x227   : > { %v9400_v55 = vpop.permute.xlu1 %9399 }
 0x228   : > { %v9401_v20 = vunpack.i.l.bf16 %v9400_v55 }
 0x22a   : > { %v2990_v28 = vsel %vm17583_vm9, %v2958_v52, %v9401_v20  ;;  %v9436_v20 = vunpack.i.l.bf16 %v12797_v14 }
 0x22b   : > { %9629 = vrot.lane.b32.xlu2 %v12743_v27, %s10616_s23  ;;  %v2859_v27 = vsel %vm17810_vm5, %v1802_v24, %v9381_v23  ;;  %v3022_v53 = vsel %vm2915_vm10, %v2990_v28, %v9406_v13  ;;  %v2079_v23 = vld [vmem:[#allocation2 + $0x209] sm:$0xff]  ;;  %v2080_v24 = vld [vmem:[#allocation2 + $0x211] sm:$0xff]  ;;  %vm17823_vm5 = vmmov %vm17791_vm0 }
 0x22c   : > { %9649 = vrot.lane.b32.xlu0 %v12739_v59, %s17787_s24  ;;  %v2891_v26 = vsel %vm17583_vm9, %v2859_v27, %v9386_v31  ;;  %v9392_v59 = vunpack.i.h.bf16 %v12715_v8  ;;  %v9402_v8 = vunpack.i.h.bf16 %v9400_v55  ;;  %v2861_v31 = vsel %vm17815_vm12, %v1804_v2, %v9411_v36  ;;  %v2018_v36 = vld [vmem:[#allocation2 + $0x22f] sm:$0xff]  ;;  %vm17828_vm12 = vmmov %vm17791_vm0 }
 0x22d   : > { %9624 = vrot.lane.b32.xlu1 %v12672_v3, %s17786_s29  ;;  %v2892_v3 = vsel %vm17583_vm9, %v2860_v37, %v9387_v43  ;;  %v2924_v63 = vsel %vm2915_vm10, %v2891_v26, %v9391_v17  ;;  %v12838_v30 = vpop.permute.xlu2 %9464  ;;  %v2047_v43 = vld [vmem:[#allocation2 + $0x208] sm:$0xff]  ;;  %v3088_v38 = vpack.c.bf16 %v2080_v24, %v2079_v23  ;;  %v9703_v25 = vpack.i.bf16 %v2080_v24, %v2079_v23 }
 0x22e   : > { %v2925_v62 = vsel %vm2915_vm10, %v2892_v3, %v9392_v59  ;;  %v2991_v47 = vsel %vm17583_vm9, %v2959_v11, %v9402_v8  ;;  %v9673_v35 = vpack.i.bf16 %v2048_v5, %v2047_v43  ;;  %v9425_v3 = vpop.permute.xlu0 %9424  ;;  %v1935_v8 = vld [vmem:[#allocation2 + $0xf0] sm:$0xff]  ;;  %v9451_v23 = vunpack.i.l.bf16 %v12813_v7 }
 0x22f   : > { %v3056_v58 = vpack.c.bf16 %v2925_v62, %v2924_v63  ;;  %v3023_v51 = vsel %vm2915_vm10, %v2991_v47, %v9407_v4  ;;  %v9415_v0 = vpop.permute.xlu1 %9414  ;;  %v9426_v45 = vunpack.i.l.bf16 %v9425_v3  ;;  %v9437_v63 = vunpack.i.h.bf16 %v12797_v14  ;;  %v1934_v62 = vld [vmem:[#allocation2 + $0xe8] sm:$0xff] }
 0x230   : > { %v3060_v6 = vpack.c.bf16 %v3023_v51, %v3022_v53  ;;  %v9417_v49 = vunpack.i.h.bf16 %v9415_v0  ;;  %v9416_v29 = vunpack.i.l.bf16 %v9415_v0  ;;  %v1806_v0 = vld [vmem:[#allocation2 + $0xc7] sm:$0xff] }
 0x231   : > { %v2960_v4 = vsel %vm17791_vm0, %v1934_v62, %v9426_v45 }
 0x232   : > { %3316 = vmatmul.bf16.gmra.mxu1 %v3056_v58  ;;  %3410 = vmatmul.bf16.gmra.mxu2 %v3060_v6  ;;  %v2893_v27 = vsel %vm17583_vm9, %v2861_v31, %v9416_v29  ;;  %v1807_v29 = vld [vmem:[#allocation2 + $0xcf] sm:$0xff] }
 0x233   : > { %9644 = vrot.lane.b32.xlu2 %v12827_v32, %s10616_s23 }
 0x234   : > { %8774 = vmatmul.msk.bf16.gmra.mxu3 %vm17812_vm7, %v3085_v10  ;;  %9664 = vrot.lane.b32.xlu0 %v12831_v42, %s17787_s24  ;;  %vm17825_vm7 = vmmov %vm17791_vm0 }
 0x235   : > { %9639 = vrot.lane.b32.xlu1 %v12829_v60, %s17786_s29  ;;  %v12856_v9 = vpop.permute.xlu2 %9479 }
 0x236   : > { %v9440_v47 = vpop.permute.xlu0 %9439 }
 0x237   : > { %v9430_v26 = vpop.permute.xlu1 %9429  ;;  %v9442_v51 = vunpack.i.h.bf16 %v9440_v47  ;;  %v9441_v6 = vunpack.i.l.bf16 %v9440_v47 }
 0x238   : > { %v9432_v10 = vunpack.i.h.bf16 %v9430_v26  ;;  %v9431_v55 = vunpack.i.l.bf16 %v9430_v26 }
 0x239   : > { %v2863_v2 = vsel %vm17819_vm3, %v1806_v0, %v9441_v6  ;;  %vm17832_vm3 = vmmov %vm17791_vm0 }
 0x23a   : > { %v2992_v12 = vsel %vm17583_vm9, %v2960_v4, %v9431_v55 }
 0x23b   : > { %9659 = vrot.lane.b32.xlu2 %v12786_v16, %s10616_s23  ;;  %v2862_v16 = vsel %vm17816_vm13, %v1805_v1, %v9412_v33  ;;  %v3024_v58 = vsel %vm2915_vm10, %v2992_v12, %v9436_v20  ;;  %v2017_v33 = vld [vmem:[#allocation2 + $0x227] sm:$0xff]  ;;  %v1809_v12 = vld [vmem:[#allocation2 + $0xef] sm:$0xff]  ;;  %vm17829_vm13 = vmmov %vm17791_vm0 }
 0x23c   : > { %9679 = vrot.lane.b32.xlu0 %v12784_v41, %s17787_s24  ;;  %v2894_v37 = vsel %vm17583_vm9, %v2862_v16, %v9417_v49  ;;  %v9421_v41 = vunpack.i.l.bf16 %v12772_v46  ;;  %v2050_v49 = vld [vmem:[#allocation2 + $0x230] sm:$0xff]  ;;  %v9688_v5 = vpack.i.bf16 %v2018_v36, %v2017_v33  ;;  %v1938_v33 = vld [vmem:[#allocation2 + $0x128] sm:$0xff] }
 0x23d   : > { %9654 = vrot.lane.b32.xlu1 %v12745_v54, %s17786_s29  ;;  %v9422_v54 = vunpack.i.h.bf16 %v12772_v46  ;;  %v9427_v46 = vunpack.i.h.bf16 %v9425_v3  ;;  %v12881_v34 = vpop.permute.xlu2 %9494  ;;  %v9698_v1 = vpack.i.bf16 %v2050_v49, %v2049_v57  ;;  %v1939_v36 = vld [vmem:[#allocation2 + $0x130] sm:$0xff] }
 0x23e   : > { %v2926_v59 = vsel %vm2915_vm10, %v2893_v27, %v9421_v41  ;;  %v9455_v24 = vpop.permute.xlu0 %9454 }
 0x23f   : > { %v2927_v17 = vsel %vm2915_vm10, %v2894_v37, %v9422_v54  ;;  %v2961_v61 = vsel %vm17818_vm2, %v1935_v8, %v9427_v46  ;;  %v9445_v28 = vpop.permute.xlu1 %9444  ;;  %v9457_v54 = vunpack.i.h.bf16 %v9455_v24  ;;  %v9456_v41 = vunpack.i.l.bf16 %v9455_v24  ;;  %vm17831_vm2 = vmmov %vm17791_vm0 }
 0x240   : > { %v3059_v18 = vpack.c.bf16 %v2927_v17, %v2926_v59  ;;  %v2993_v13 = vsel %vm17583_vm9, %v2961_v61, %v9432_v10  ;;  %v9447_v14 = vunpack.i.h.bf16 %v9445_v28  ;;  %v9446_v53 = vunpack.i.l.bf16 %v9445_v28  ;;  %v1808_v61 = vld [vmem:[#allocation2 + $0xe7] sm:$0xff] }
 0x241   : > { %v3025_v52 = vsel %vm2915_vm10, %v2993_v13, %v9437_v63  ;;  %v9481_v28 = vunpack.i.l.bf16 %v12856_v9 }
 0x242   : > { %v3063_v11 = vpack.c.bf16 %v3025_v52, %v3024_v58  ;;  %3321 = vmatmul.bf16.gmra.mxu1 %v3059_v18  ;;  %v2895_v31 = vsel %vm17583_vm9, %v2863_v2, %v9446_v53  ;;  %v9496_v2 = vunpack.i.l.bf16 %v12881_v34 }
 0x243   : > { %9674 = vrot.lane.b32.xlu2 %v9673_v35, %s10616_s23  ;;  %v2928_v40 = vsel %vm2915_vm10, %v2895_v31, %v9451_v23  ;;  %v9467_v35 = vunpack.i.h.bf16 %v12838_v30 }
 0x244   : > { %8775 = vmatmul.msk.bf16.gmra.mxu3 %vm17817_vm14, %v3088_v38  ;;  %9704 = vrot.lane.b32.xlu0 %v9703_v25, %s17787_s24  ;;  %v1936_v38 = vld [vmem:[#allocation2 + $0x108] sm:$0xff]  ;;  %v1937_v25 = vld [vmem:[#allocation2 + $0x110] sm:$0xff]  ;;  %vm17830_vm14 = vmmov %vm17791_vm0 }
 0x245   : > { %9669 = vrot.lane.b32.xlu1 %v12870_v50, %s17786_s29  ;;  %3415 = vmatmul.bf16.gmra.mxu2 %v3063_v11  ;;  %v12897_v43 = vpop.permute.xlu2 %9509  ;;  %v2962_v3 = vsel %vm17821_vm1, %v1936_v38, %v9456_v41  ;;  %v2963_v59 = vsel %vm17822_vm15, %v1937_v25, %v9457_v54  ;;  %v1810_v54 = vld [vmem:[#allocation2 + $0x107] sm:$0xff]  ;;  %v1811_v41 = vld [vmem:[#allocation2 + $0x10f] sm:$0xff]  ;;  %vm17834_vm1 = vmmov %vm17791_vm0 }
 0x246   : > { %v9470_v8 = vpop.permute.xlu0 %9469  ;;  %vm17835_vm15 = vmmov %vm17791_vm0 }
 0x247   : > { %v9472_v18 = vunpack.i.h.bf16 %v9470_v8  ;;  %v9471_v4 = vunpack.i.l.bf16 %v9470_v8 }
 0x249   : > { %v2865_v13 = vsel %vm17823_vm5, %v1808_v61, %v9471_v4  ;;  %v2866_v58 = vsel %vm17824_vm6, %v1809_v12, %v9472_v18  ;;  %v1940_v61 = vld [vmem:[#allocation2 + $0x148] sm:$0xff]  ;;  %v1941_v12 = vld [vmem:[#allocation2 + $0x150] sm:$0xff]  ;;  %vm17836_vm5 = vmmov %vm17791_vm0 }
 0x24a   : > { %vm17837_vm6 = vmmov %vm17791_vm0 }
 0x24b   : > { %9694 = vrot.lane.b32.xlu2 %v12829_v60, %s10616_s23  ;;  %v2864_v60 = vsel %vm17820_vm4, %v1807_v29, %v9442_v51  ;;  %v9497_v29 = vunpack.i.h.bf16 %v12881_v34  ;;  %vm17833_vm4 = vmmov %vm17791_vm0 }
 0x24c   : > { %9709 = vrot.lane.b32.xlu0 %v12827_v32, %s17787_s24  ;;  %v2896_v16 = vsel %vm17583_vm9, %v2864_v60, %v9447_v14  ;;  %v9460_v32 = vpop.permute.xlu1 %9459 }
 0x24d   : > { %9684 = vrot.lane.b32.xlu1 %v12788_v48, %s17786_s29  ;;  %v9452_v48 = vunpack.i.h.bf16 %v12813_v7  ;;  %v9462_v27 = vunpack.i.h.bf16 %v9460_v32  ;;  %v9461_v37 = vunpack.i.l.bf16 %v9460_v32  ;;  %v9466_v7 = vunpack.i.l.bf16 %v12838_v30  ;;  %v12915_v63 = vpop.permute.xlu2 %9524 }
 0x24e   : > { %v9485_v14 = vpop.permute.xlu0 %9484  ;;  %v9527_v4 = vunpack.i.h.bf16 %v12915_v63 }
 0x24f   : > { %v2929_v19 = vsel %vm2915_vm10, %v2896_v16, %v9452_v48  ;;  %v2994_v17 = vsel %vm17583_vm9, %v2962_v3, %v9461_v37  ;;  %v2995_v10 = vsel %vm17583_vm9, %v2963_v59, %v9462_v27  ;;  %v9487_v57 = vunpack.i.h.bf16 %v9485_v14 }
 0x250   : > { %v3062_v26 = vpack.c.bf16 %v2929_v19, %v2928_v40  ;;  %v3026_v55 = vsel %vm2915_vm10, %v2994_v17, %v9466_v7  ;;  %v3027_v46 = vsel %vm2915_vm10, %v2995_v10, %v9467_v35  ;;  %v9486_v49 = vunpack.i.l.bf16 %v9485_v14 }
 0x251   : > { %v3066_v45 = vpack.c.bf16 %v3027_v46, %v3026_v55  ;;  %v3386_v32 = vpop.f32.mrf.mxu2  ;;  %v9512_v3 = vunpack.i.h.bf16 %v12897_v43  ;;  %v9511_v59 = vunpack.i.l.bf16 %v12897_v43  ;;  %v9526_v43 = vunpack.i.l.bf16 %v12915_v63 }
 0x252   : > { %3326 = vmatmul.bf16.gmra.mxu1 %v3062_v26 }
 0x253   : > { %9699 = vrot.lane.b32.xlu2 %v9698_v1, %s10616_s23  ;;  %v2965_v1 = vsel %vm17826_vm8, %v1939_v36, %v9487_v57  ;;  %vm17839_vm8 = vmmov %vm17791_vm0 }
 0x254   : > { %v9475_v62 = vpop.permute.xlu1 %9474 }
 0x255   : > { %9689 = vrot.lane.b32.xlu1 %v9688_v5, %s17786_s29  ;;  %3420 = vmatmul.bf16.gmra.mxu2 %v3066_v45  ;;  %v9477_v30 = vunpack.i.h.bf16 %v9475_v62  ;;  %v9476_v20 = vunpack.i.l.bf16 %v9475_v62  ;;  %v12929_v51 = vpop.permute.xlu2 %9539  ;;  %v12950_v45 = vld [vmem:[%s10786_s21] ss:$0 sm:$0xff] }
 0x256   : > { %v9500_v40 = vpop.permute.xlu0 %9499 }
 0x257   : > { %v2897_v52 = vsel %vm17583_vm9, %v2865_v13, %v9476_v20  ;;  %v2898_v11 = vsel %vm17583_vm9, %v2866_v58, %v9477_v30  ;;  %v9502_v27 = vunpack.i.h.bf16 %v9500_v40  ;;  %v9501_v37 = vunpack.i.l.bf16 %v9500_v40  ;;  %v12953_v13 = vpop.f32.mrf.mxu3 }
 0x258   : > { %v2930_v53 = vsel %vm2915_vm10, %v2897_v52, %v9481_v28  ;;  %v9542_v40 = vunpack.i.h.bf16 %v12929_v51 }
 0x259   : > { %v2867_v38 = vsel %vm17827_vm11, %v1810_v54, %v9501_v37  ;;  %v2868_v25 = vsel %vm17828_vm12, %v1811_v41, %v9502_v27  ;;  %v3388_v18 = vpop.f32.mrf.mxu2  ;;  %vm17840_vm11 = vmmov %vm17791_vm0 }
 0x25a   : > { %vm17841_vm12 = vmmov %vm17791_vm0 }
 0x25b   : > { %9719 = vrot.lane.b32.xlu2 %v12870_v50, %s10616_s23  ;;  %v9482_v50 = vunpack.i.h.bf16 %v12856_v9  ;;  %v2964_v9 = vsel %vm17825_vm7, %v1938_v33, %v9486_v49  ;;  %vm17838_vm7 = vmmov %vm17791_vm0 }
 0x25c   : > { %v9490_v47 = vpop.permute.xlu1 %9489 }
 0x25d   : > { %9714 = vrot.lane.b32.xlu1 %v12831_v42, %s17786_s29  ;;  %v2931_v42 = vsel %vm2915_vm10, %v2898_v11, %v9482_v50  ;;  %v9492_v6 = vunpack.i.h.bf16 %v9490_v47  ;;  %v9491_v0 = vunpack.i.l.bf16 %v9490_v47  ;;  %v12939_v35 = vpop.permute.xlu2 %9554  ;;  %v3297_v50 = vpop.f32.mrf.mxu1 }
 0x25e   : > { %v3065_v60 = vpack.c.bf16 %v2931_v42, %v2930_v53  ;;  %v9515_v10 = vpop.permute.xlu0 %9514  ;;  %v3298_v53 = vadd.f32 %v12950_v45, %v3297_v50 }
 0x25f   : > { %v2996_v31 = vsel %vm17583_vm9, %v2964_v9, %v9491_v0  ;;  %v2997_v16 = vsel %vm17583_vm9, %v2965_v1, %v9492_v6  ;;  %v9517_v30 = vunpack.i.h.bf16 %v9515_v10  ;;  %v9516_v20 = vunpack.i.l.bf16 %v9515_v10  ;;  %v1812_v9 = vld [vmem:[#allocation2 + $0x127] sm:$0xff] }
 0x260   : > { %v3028_v5 = vsel %vm2915_vm10, %v2996_v31, %v9496_v2  ;;  %v3029_v48 = vsel %vm2915_vm10, %v2997_v16, %v9497_v29  ;;  %v12965_v63 = vadd.f32 %v3386_v32, %v3298_v53 }
 0x261   : > { %v3069_v23 = vpack.c.bf16 %v3029_v48, %v3028_v5  ;;  %v2966_v52 = vsel %vm17829_vm13, %v1940_v61, %v9516_v20  ;;  %v2967_v11 = vsel %vm17830_vm14, %v1941_v12, %v9517_v30  ;;  %v12969_v48 = vpop.f32.mrf.mxu3  ;;  %vm17842_vm13 = vmmov %vm17791_vm0 }
 0x262   : > { %3331 = vmatmul.bf16.gmra.mxu1 %v3065_v60  ;;  %v1813_v60 = vld [vmem:[#allocation2 + $0x12f] sm:$0xff]  ;;  %vm17843_vm14 = vmmov %vm17791_vm0 }
 0x264   : > { %v9505_v24 = vpop.permute.xlu1 %9504 }
 0x265   : > { %3425 = vmatmul.bf16.gmra.mxu2 %v3069_v23  ;;  %v9507_v34 = vunpack.i.h.bf16 %v9505_v24  ;;  %v9506_v19 = vunpack.i.l.bf16 %v9505_v24  ;;  %v12960_v14 = vpop.permute.xlu2 %9569  ;;  %v3299_v16 = vpop.f32.mrf.mxu1 }
 0x266   : > { %v9530_v49 = vpop.permute.xlu0 %9529  ;;  %v3300_v23 = vadd.f32 %v12950_v45, %v3299_v16 }
 0x267   : > { %v2899_v7 = vsel %vm17583_vm9, %v2867_v38, %v9506_v19  ;;  %v2900_v26 = vsel %vm17583_vm9, %v2868_v25, %v9507_v34  ;;  %v9532_v36 = vunpack.i.h.bf16 %v9530_v49  ;;  %v9531_v2 = vunpack.i.l.bf16 %v9530_v49 }
 0x268   : > { %v2932_v55 = vsel %vm2915_vm10, %v2899_v7, %v9511_v59  ;;  %v2933_v46 = vsel %vm2915_vm10, %v2900_v26, %v9512_v3  ;;  %v9541_v34 = vunpack.i.l.bf16 %v12929_v51  ;;  %v12978_v27 = vadd.f32 %v3388_v18, %v3300_v23  ;;  %v1943_v59 = vld [vmem:[#allocation2 + $0x170] sm:$0xff]  ;;  %v1942_v51 = vld [vmem:[#allocation2 + $0x168] sm:$0xff] }
 0x269   : > { %v3068_v58 = vpack.c.bf16 %v2933_v46, %v2932_v55  ;;  %v2870_v1 = vsel %vm17791_vm0, %v1813_v60, %v9532_v36  ;;  %v2869_v5 = vsel %vm17831_vm2, %v1812_v9, %v9531_v2  ;;  %v9572_v9 = vunpack.i.h.bf16 %v12960_v14  ;;  %vm17844_vm2 = vmmov %vm17791_vm0 }
 0x26c   : > { %v9520_v17 = vpop.permute.xlu1 %9519 }
 0x26d   : > { %v9522_v62 = vunpack.i.h.bf16 %v9520_v17  ;;  %v9521_v8 = vunpack.i.l.bf16 %v9520_v17  ;;  %v12976_v19 = vpop.permute.xlu2 %9584  ;;  %v9557_v17 = vunpack.i.h.bf16 %v12939_v35 }
 0x26e   : > { %v9545_v54 = vpop.permute.xlu0 %9544 }
 0x26f   : > { %v2998_v28 = vsel %vm17583_vm9, %v2966_v52, %v9521_v8  ;;  %v2999_v47 = vsel %vm17583_vm9, %v2967_v11, %v9522_v62  ;;  %v3391_v31 = vpop.f32.mrf.mxu2  ;;  %v9547_v26 = vunpack.i.h.bf16 %v9545_v54  ;;  %v9546_v3 = vunpack.i.l.bf16 %v9545_v54 }
 0x270   : > { %v3030_v42 = vsel %vm2915_vm10, %v2998_v28, %v9526_v43  ;;  %v3031_v6 = vsel %vm2915_vm10, %v2999_v47, %v9527_v4  ;;  %v9556_v62 = vunpack.i.l.bf16 %v12939_v35  ;;  %v12991_v43 = vpop.f32.mrf.mxu3 }
 0x271   : > { %v3072_v0 = vpack.c.bf16 %v3031_v6, %v3030_v42  ;;  %v2969_v46 = vsel %vm17832_vm3, %v1943_v59, %v9547_v26  ;;  %v2968_v30 = vsel %vm17833_vm4, %v1942_v51, %v9546_v3  ;;  %v1815_v6 = vld [vmem:[#allocation2 + $0x14f] sm:$0xff]  ;;  %v9586_v59 = vunpack.i.l.bf16 %v12976_v19  ;;  %vm17845_vm3 = vmmov %vm17791_vm0 }
 0x272   : > { %3336 = vmatmul.bf16.gmra.mxu1 %v3068_v58  ;;  %v3302_v8 = vpop.f32.mrf.mxu1  ;;  %v1944_v26 = vld [vmem:[#allocation2 + $0x188] sm:$0xff]  ;;  %vm17846_vm4 = vmmov %vm17791_vm0 }
 0x273   : > { %v3303_v18 = vadd.f32 %v12950_v45, %v3302_v8 }
 0x274   : > { %v9535_v57 = vpop.permute.xlu1 %9534 }
 0x275   : > { %3430 = vmatmul.bf16.gmra.mxu2 %v3072_v0  ;;  %v9537_v29 = vunpack.i.h.bf16 %v9535_v57  ;;  %v9536_v33 = vunpack.i.l.bf16 %v9535_v57  ;;  %v12993_v58 = vadd.f32 %v3391_v31, %v3303_v18  ;;  %v12995_v50 = vpop.permute.xlu2 %9599  ;;  %v1814_v0 = vld [vmem:[#allocation2 + $0x147] sm:$0xff] }
 0x276   : > { %v9560_v11 = vpop.permute.xlu0 %9559 }
 0x277   : > { %v2901_v32 = vsel %vm17583_vm9, %v2869_v5, %v9536_v33  ;;  %v2902_v24 = vsel %vm17583_vm9, %v2870_v1, %v9537_v29  ;;  %v3393_v55 = vpop.f32.mrf.mxu2  ;;  %v9562_v53 = vunpack.i.h.bf16 %v9560_v11  ;;  %v9561_v42 = vunpack.i.l.bf16 %v9560_v11 }
 0x278   : > { %v2934_v41 = vsel %vm2915_vm10, %v2901_v32, %v9541_v34  ;;  %v2935_v38 = vsel %vm2915_vm10, %v2902_v24, %v9542_v40  ;;  %v9571_v1 = vunpack.i.l.bf16 %v12960_v14  ;;  %v13008_v24 = vpop.f32.mrf.mxu3 }
 0x279   : > { %v3071_v10 = vpack.c.bf16 %v2935_v38, %v2934_v41  ;;  %v2872_v57 = vsel %vm17834_vm1, %v1815_v6, %v9562_v53  ;;  %v2871_v33 = vsel %vm17835_vm15, %v1814_v0, %v9561_v42  ;;  %v1945_v41 = vld [vmem:[#allocation2 + $0x190] sm:$0xff]  ;;  %v9587_v38 = vunpack.i.h.bf16 %v12976_v19  ;;  %vm17847_vm1 = vmmov %vm17791_vm0 }
 0x27a   : > { %v3304_v29 = vpop.f32.mrf.mxu1  ;;  %vm17848_vm15 = vmmov %vm17791_vm0 }
 0x27b   : > { %v3305_v36 = vadd.f32 %v12950_v45, %v3304_v29 }
 0x27c   : > { %v9550_v37 = vpop.permute.xlu1 %9549 }
 0x27d   : > { %v9552_v25 = vunpack.i.h.bf16 %v9550_v37  ;;  %v9551_v7 = vunpack.i.l.bf16 %v9550_v37  ;;  %v13004_v31 = vadd.f32 %v3393_v55, %v3305_v36  ;;  %v9601_v36 = vunpack.i.l.bf16 %v12995_v50 }
 0x27e   : > { %v9575_v5 = vpop.permute.xlu0 %9574 }
 0x27f   : > { %v3001_v20 = vsel %vm17583_vm9, %v2969_v46, %v9552_v25  ;;  %v3000_v4 = vsel %vm17583_vm9, %v2968_v30, %v9551_v7  ;;  %v9577_v37 = vunpack.i.h.bf16 %v9575_v5  ;;  %v9576_v54 = vunpack.i.l.bf16 %v9575_v5  ;;  %v9615_v25 = vpop.permute.xlu2 %9614 }
 0x280   : > { %v3033_v61 = vsel %vm2915_vm10, %v3001_v20, %v9557_v17  ;;  %v3032_v12 = vsel %vm2915_vm10, %v3000_v4, %v9556_v62  ;;  %v13021_v11 = vpop.f32.mrf.mxu3 }
 0x281   : > { %v3075_v52 = vpack.c.bf16 %v3033_v61, %v3032_v12  ;;  %v3396_v49 = vpop.f32.mrf.mxu2  ;;  %v2971_v3 = vsel %vm17836_vm5, %v1945_v41, %v9577_v37  ;;  %v9617_v37 = vunpack.i.h.bf16 %v9615_v25  ;;  %vm17849_vm5 = vmmov %vm17791_vm0 }
 0x282   : > { %3341 = vmatmul.bf16.gmra.mxu1 %v3071_v10  ;;  %v2970_v10 = vsel %vm17837_vm6, %v1944_v26, %v9576_v54  ;;  %v1946_v54 = vld [vmem:[#allocation2 + $0x1a8] sm:$0xff]  ;;  %vm17850_vm6 = vmmov %vm17791_vm0 }
 0x284   : > { %v9565_v35 = vpop.permute.xlu1 %9564 }
 0x285   : > { %v9567_v28 = vunpack.i.h.bf16 %v9565_v35  ;;  %v9566_v47 = vunpack.i.l.bf16 %v9565_v35  ;;  %3435 = vmatmul.bf16.gmra.mxu2 %v3075_v52  ;;  %v1817_v35 = vld [vmem:[#allocation2 + $0x16f] sm:$0xff] }
 0x286   : > { %v9590_v4 = vpop.permute.xlu0 %9589 }
 0x287   : > { %v2903_v2 = vsel %vm17583_vm9, %v2871_v33, %v9566_v47  ;;  %v2904_v60 = vsel %vm17583_vm9, %v2872_v57, %v9567_v28  ;;  %v9592_v12 = vunpack.i.h.bf16 %v9590_v4  ;;  %v9591_v52 = vunpack.i.l.bf16 %v9590_v4  ;;  %v1816_v28 = vld [vmem:[#allocation2 + $0x167] sm:$0xff]  ;;  %v9630_v0 = vpop.permute.xlu2 %9629 }
 0x288   : > { %v2936_v23 = vsel %vm2915_vm10, %v2903_v2, %v9571_v1  ;;  %v2937_v32 = vsel %vm2915_vm10, %v2904_v60, %v9572_v9  ;;  %v9602_v33 = vunpack.i.h.bf16 %v12995_v50  ;;  %v9616_v50 = vunpack.i.l.bf16 %v9615_v25 }
 0x289   : > { %v3074_v7 = vpack.c.bf16 %v2937_v32, %v2936_v23  ;;  %v3398_v14 = vpop.f32.mrf.mxu2  ;;  %v2874_v47 = vsel %vm17838_vm7, %v1817_v35, %v9592_v12  ;;  %v2873_v6 = vsel %vm17839_vm8, %v1816_v28, %v9591_v52  ;;  %v1818_v52 = vld [vmem:[#allocation2 + $0x187] sm:$0xff]  ;;  %vm17851_vm7 = vmmov %vm17791_vm0 }
 0x28a   : > { %vm17852_vm8 = vmmov %vm17791_vm0 }
 0x28c   : > { %v9580_v16 = vpop.permute.xlu1 %9579 }
 0x28d   : > { %v9582_v40 = vunpack.i.h.bf16 %v9580_v16  ;;  %v9581_v34 = vunpack.i.l.bf16 %v9580_v16 }
 0x28e   : > { %v3307_v17 = vpop.f32.mrf.mxu1  ;;  %v9605_v9 = vpop.permute.xlu0 %9604 }
 0x28f   : > { %v3003_v55 = vsel %vm17583_vm9, %v2971_v3, %v9582_v40  ;;  %v3308_v51 = vadd.f32 %v12950_v45, %v3307_v17  ;;  %v3002_v46 = vsel %vm17583_vm9, %v2970_v10, %v9581_v34  ;;  %v9607_v32 = vunpack.i.h.bf16 %v9605_v9  ;;  %v1947_v40 = vld [vmem:[#allocation2 + $0x1b0] sm:$0xff] }
 0x290   : > { %v3035_v62 = vsel %vm2915_vm10, %v3003_v55, %v9587_v38  ;;  %v3034_v8 = vsel %vm2915_vm10, %v3002_v46, %v9586_v59  ;;  %v9606_v34 = vunpack.i.l.bf16 %v9605_v9  ;;  %v13037_v59 = vpop.f32.mrf.mxu3  ;;  %v9645_v46 = vpop.permute.xlu2 %9644 }
 0x291   : > { %v13019_v30 = vadd.f32 %v3396_v49, %v3308_v51  ;;  %v3078_v20 = vpack.c.bf16 %v3035_v62, %v3034_v8  ;;  %v2973_v41 = vsel %vm17840_vm11, %v1947_v40, %v9607_v32  ;;  %vm17853_vm11 = vmmov %vm17791_vm0 }
 0x292   : > { %3346 = vmatmul.bf16.gmra.mxu1 %v3074_v7  ;;  %v2972_v26 = vsel %vm17841_vm12, %v1946_v54, %v9606_v34  ;;  %v1949_v34 = vld [vmem:[#allocation2 + $0x1d0] sm:$0xff]  ;;  %v9647_v54 = vunpack.i.h.bf16 %v9645_v46  ;;  %vm17854_vm12 = vmmov %vm17791_vm0 }
 0x294   : > { %v9595_v18 = vpop.permute.xlu1 %9594  ;;  %v3401_v53 = vpop.f32.mrf.mxu2 }
 0x295   : > { %v9597_v19 = vunpack.i.h.bf16 %v9595_v18  ;;  %v9596_v61 = vunpack.i.l.bf16 %v9595_v18  ;;  %3440 = vmatmul.bf16.gmra.mxu2 %v3078_v20 }
 0x296   : > { %v3309_v42 = vpop.f32.mrf.mxu1  ;;  %v9620_v20 = vpop.permute.xlu0 %9619 }
 0x297   : > { %v3310_v57 = vadd.f32 %v12950_v45, %v3309_v42  ;;  %v2905_v49 = vsel %vm17583_vm9, %v2873_v6, %v9596_v61  ;;  %v2906_v29 = vsel %vm17583_vm9, %v2874_v47, %v9597_v19  ;;  %v9622_v19 = vunpack.i.h.bf16 %v9620_v20  ;;  %v1819_v61 = vld [vmem:[#allocation2 + $0x18f] sm:$0xff] }
 0x298   : > { %v2938_v1 = vsel %vm2915_vm10, %v2905_v49, %v9601_v36  ;;  %v2939_v16 = vsel %vm2915_vm10, %v2906_v29, %v9602_v33  ;;  %v9621_v12 = vunpack.i.l.bf16 %v9620_v20  ;;  %v9632_v49 = vunpack.i.h.bf16 %v9630_v0  ;;  %v13050_v33 = vpop.f32.mrf.mxu3 }
 0x299   : > { %v13030_v2 = vadd.f32 %v3398_v14, %v3310_v57  ;;  %v3077_v38 = vpack.c.bf16 %v2939_v16, %v2938_v1  ;;  %v2876_v35 = vsel %vm17842_vm13, %v1819_v61, %v9622_v19  ;;  %v9631_v29 = vunpack.i.l.bf16 %v9630_v0  ;;  %vm17855_vm13 = vmmov %vm17791_vm0 }
 0x29a   : > { %v2875_v42 = vsel %vm17843_vm14, %v1818_v52, %v9621_v12  ;;  %v1821_v12 = vld [vmem:[#allocation2 + $0x1af] sm:$0xff] }
 0x29c   : > { %v9610_v60 = vpop.permute.xlu1 %9609  ;;  %v3403_v7 = vpop.f32.mrf.mxu2 }
 0x29d   : > { %v9612_v5 = vunpack.i.h.bf16 %v9610_v60  ;;  %v9611_v23 = vunpack.i.l.bf16 %v9610_v60 }
 0x29e   : > { %v9635_v9 = vpop.permute.xlu0 %9634 }
 0x29f   : > { %v3312_v14 = vpop.f32.mrf.mxu1  ;;  %v3005_v3 = vsel %vm17583_vm9, %v2973_v41, %v9612_v5  ;;  %v3004_v10 = vsel %vm17583_vm9, %v2972_v26, %v9611_v23  ;;  %v9660_v5 = vpop.permute.xlu2 %9659  ;;  %v9637_v40 = vunpack.i.h.bf16 %v9635_v9  ;;  %v1948_v41 = vld [vmem:[#allocation2 + $0x1c8] sm:$0xff] }
 0x2a0   : > { %v3313_v17 = vadd.f32 %v12950_v45, %v3312_v14  ;;  %v3037_v55 = vsel %vm2915_vm10, %v3005_v3, %v9617_v37  ;;  %v3036_v51 = vsel %vm2915_vm10, %v3004_v10, %v9616_v50  ;;  %v9636_v37 = vunpack.i.l.bf16 %v9635_v9  ;;  %v13067_v61 = vpop.f32.mrf.mxu3  ;;  %v2081_v9 = vld [vmem:[#allocation2 + $0x229] sm:$0xff] }
 0x2a1   : > { %v3081_v25 = vpack.c.bf16 %v3037_v55, %v3036_v51  ;;  %v2975_v0 = vsel %vm17791_vm0, %v1949_v34, %v9637_v40 }
 0x2a2   : > { %3351 = vmatmul.bf16.gmra.mxu1 %v3077_v38  ;;  %v13043_v62 = vadd.f32 %v3401_v53, %v3313_v17  ;;  %v2974_v26 = vsel %vm17844_vm2, %v1948_v41, %v9636_v37 }
 0x2a4   : > { %v9625_v8 = vpop.permute.xlu1 %9624  ;;  %v3406_v28 = vpop.f32.mrf.mxu2 }
 0x2a5   : > { %v9627_v18 = vunpack.i.h.bf16 %v9625_v8  ;;  %v9626_v4 = vunpack.i.l.bf16 %v9625_v8  ;;  %3445 = vmatmul.bf16.gmra.mxu2 %v3081_v25 }
 0x2a7   : > { %v3314_v47 = vpop.f32.mrf.mxu1  ;;  %v2907_v53 = vsel %vm17583_vm9, %v2875_v42, %v9626_v4  ;;  %v2908_v57 = vsel %vm17583_vm9, %v2876_v35, %v9627_v18  ;;  %v9650_v18 = vpop.permute.xlu0 %9649 }
 0x2a8   : > { %v3315_v6 = vadd.f32 %v12950_v45, %v3314_v47  ;;  %v2940_v1 = vsel %vm2915_vm10, %v2907_v53, %v9631_v29  ;;  %v2941_v16 = vsel %vm2915_vm10, %v2908_v57, %v9632_v49  ;;  %v9652_v19 = vunpack.i.h.bf16 %v9650_v18  ;;  %v9675_v35 = vpop.permute.xlu2 %9674  ;;  %v1820_v47 = vld [vmem:[#allocation2 + $0x1a7] sm:$0xff] }
 0x2a9   : > { %v3080_v38 = vpack.c.bf16 %v2941_v16, %v2940_v1  ;;  %v9651_v52 = vunpack.i.l.bf16 %v9650_v18  ;;  %v9662_v29 = vunpack.i.h.bf16 %v9660_v5  ;;  %v2082_v1 = vld [vmem:[#allocation2 + $0x231] sm:$0xff] }
 0x2aa   : > { %v13052_v36 = vadd.f32 %v3403_v7, %v3315_v6  ;;  %v9646_v7 = vunpack.i.l.bf16 %v9645_v46  ;;  %v2878_v42 = vsel %vm17845_vm3, %v1821_v12, %v9652_v19  ;;  %v3091_v16 = vpack.c.bf16 %v2082_v1, %v2081_v9 }
 0x2ac   : > { %v9640_v60 = vpop.permute.xlu1 %9639  ;;  %v13057_v50 = vpop.f32.mrf.mxu2  ;;  %8776 = vmatmul.msk.bf16.gmra.mxu3 %vm17847_vm1, %v3091_v16 }
 0x2ad   : > { %v9642_v23 = vunpack.i.h.bf16 %v9640_v60  ;;  %v9641_v32 = vunpack.i.l.bf16 %v9640_v60  ;;  %v9661_v60 = vunpack.i.l.bf16 %v9660_v5 }
 0x2af   : > { %v3317_v14 = vpop.f32.mrf.mxu1  ;;  %v3007_v3 = vsel %vm17583_vm9, %v2975_v0, %v9642_v23  ;;  %v3006_v10 = vsel %vm17583_vm9, %v2974_v26, %v9641_v32  ;;  %v9665_v32 = vpop.permute.xlu0 %9664  ;;  %v1951_v0 = vld [vmem:[#allocation2 + $0x1f0] sm:$0xff] }
 0x2b0   : > { %v3318_v17 = vadd.f32 %v12950_v45, %v3317_v14  ;;  %v3039_v55 = vsel %vm2915_vm10, %v3007_v3, %v9647_v54  ;;  %v3038_v51 = vsel %vm2915_vm10, %v3006_v10, %v9646_v7  ;;  %v9667_v41 = vunpack.i.h.bf16 %v9665_v32  ;;  %v1950_v14 = vld [vmem:[#allocation2 + $0x1e8] sm:$0xff] }
 0x2b1   : > { %v3084_v8 = vpack.c.bf16 %v3039_v55, %v3038_v51  ;;  %v9677_v7 = vunpack.i.h.bf16 %v9675_v35 }
 0x2b2   : > { %3356 = vmatmul.bf16.gmra.mxu1 %v3080_v38  ;;  %v13065_v25 = vadd.f32 %v3406_v28, %v3318_v17  ;;  %v2877_v28 = vsel %vm17846_vm4, %v1820_v47, %v9651_v52  ;;  %v9666_v38 = vunpack.i.l.bf16 %v9665_v32  ;;  %v2977_v5 = vsel %vm17848_vm15, %v1951_v0, %v9667_v41 }
 0x2b3   : > { %v9676_v17 = vunpack.i.l.bf16 %v9675_v35 }
 0x2b4   : > { %v9655_v20 = vpop.permute.xlu1 %9654  ;;  %v2976_v55 = vsel %vm17849_vm5, %v1950_v14, %v9666_v38 }
 0x2b5   : > { %v9657_v46 = vunpack.i.h.bf16 %v9655_v20  ;;  %v9656_v4 = vunpack.i.l.bf16 %v9655_v20  ;;  %3450 = vmatmul.bf16.gmra.mxu2 %v3084_v8  ;;  %v3411_v6 = vpop.f32.mrf.mxu2  ;;  %v13083_v8 = vpop.f32.mrf.mxu3 }
 0x2b6   : > { %v9695_v20 = vpop.permute.xlu2 %9694 }
 0x2b7   : > { %v13070_v53 = vpop.f32.mrf.mxu1  ;;  %v2909_v57 = vsel %vm17583_vm9, %v2877_v28, %v9656_v4  ;;  %v2910_v49 = vsel %vm17583_vm9, %v2878_v42, %v9657_v46  ;;  %v9680_v47 = vpop.permute.xlu0 %9679 }
 0x2b8   : > { %v2942_v40 = vsel %vm2915_vm10, %v2909_v57, %v9661_v60  ;;  %v2943_v34 = vsel %vm2915_vm10, %v2910_v49, %v9662_v29  ;;  %v9682_v57 = vunpack.i.h.bf16 %v9680_v47  ;;  %v1823_v49 = vld [vmem:[#allocation2 + $0x1cf] sm:$0xff]  ;;  %v9681_v29 = vunpack.i.l.bf16 %v9680_v47  ;;  %v1822_v60 = vld [vmem:[#allocation2 + $0x1c7] sm:$0xff] }
 0x2b9   : > { %v3083_v26 = vpack.c.bf16 %v2943_v34, %v2942_v40  ;;  %v9697_v40 = vunpack.i.h.bf16 %v9695_v20  ;;  %v9696_v34 = vunpack.i.l.bf16 %v9695_v20 }
 0x2ba   : > { %v2880_v9 = vsel %vm17850_vm6, %v1823_v49, %v9682_v57 }
 0x2bc   : > { %v9670_v23 = vpop.permute.xlu1 %9669 }
 0x2bd   : > { %v9672_v37 = vunpack.i.h.bf16 %v9670_v23  ;;  %v9671_v54 = vunpack.i.l.bf16 %v9670_v23  ;;  %v13079_v3 = vpop.f32.mrf.mxu2  ;;  %v2879_v23 = vsel %vm17851_vm7, %v1822_v60, %v9681_v29 }
 0x2bf   : > { %v3322_v10 = vpop.f32.mrf.mxu1  ;;  %v3009_v51 = vsel %vm17583_vm9, %v2977_v5, %v9672_v37  ;;  %v3008_v46 = vsel %vm17583_vm9, %v2976_v55, %v9671_v54  ;;  %v13097_v37 = vpop.f32.mrf.mxu3  ;;  %v1953_v55 = vld [vmem:[#allocation2 + $0x210] sm:$0xff] }
 0x2c0   : > { %v3323_v18 = vadd.f32 %v12950_v45, %v3322_v10  ;;  %v3041_v4 = vsel %vm2915_vm10, %v3009_v51, %v9677_v7  ;;  %v3040_v19 = vsel %vm2915_vm10, %v3008_v46, %v9676_v17  ;;  %v9700_v54 = vpop.permute.xlu2 %9699  ;;  %v9705_v0 = vpop.permute.xlu0 %9704 }
 0x2c1   : > { %v3087_v52 = vpack.c.bf16 %v3041_v4, %v3040_v19  ;;  %v9702_v14 = vunpack.i.h.bf16 %v9700_v54  ;;  %v9707_v17 = vunpack.i.h.bf16 %v9705_v0  ;;  %v9701_v10 = vunpack.i.l.bf16 %v9700_v54 }
 0x2c2   : > { %3361 = vmatmul.bf16.gmra.mxu1 %v3083_v26  ;;  %v13089_v12 = vadd.f32 %v3411_v6, %v3323_v18  ;;  %v9706_v51 = vunpack.i.l.bf16 %v9705_v0  ;;  %v1952_v18 = vld [vmem:[#allocation2 + $0x208] sm:$0xff] }
 0x2c3   : > { %v2979_v46 = vsel %vm17852_vm8, %v1953_v55, %v9707_v17  ;;  %v1824_v0 = vld [vmem:[#allocation2 + $0x1e7] sm:$0xff] }
 0x2c4   : > { %v9685_v35 = vpop.permute.xlu1 %9684 }
 0x2c5   : > { %v9687_v42 = vunpack.i.h.bf16 %v9685_v35  ;;  %v9686_v28 = vunpack.i.l.bf16 %v9685_v35  ;;  %3455 = vmatmul.bf16.gmra.mxu2 %v3087_v52  ;;  %v2978_v52 = vsel %vm17853_vm11, %v1952_v18, %v9706_v51 }
 0x2c7   : > { %v13092_v16 = vpop.f32.mrf.mxu1  ;;  %v2911_v6 = vsel %vm17583_vm9, %v2879_v23, %v9686_v28  ;;  %v2912_v32 = vsel %vm17583_vm9, %v2880_v9, %v9687_v42 }
 0x2c8   : > { %v3416_v1 = vpop.f32.mrf.mxu2  ;;  %v2944_v38 = vsel %vm2915_vm10, %v2911_v6, %v9696_v34  ;;  %v2945_v7 = vsel %vm2915_vm10, %v2912_v32, %v9697_v40  ;;  %v9710_v9 = vpop.permute.xlu0 %9709  ;;  %v1825_v34 = vld [vmem:[#allocation2 + $0x1ef] sm:$0xff] }
 0x2c9   : > { %v3086_v20 = vpack.c.bf16 %v2945_v7, %v2944_v38  ;;  %v9712_v32 = vunpack.i.h.bf16 %v9710_v9  ;;  %v13112_v40 = vpop.f32.mrf.mxu3  ;;  %v9711_v54 = vunpack.i.l.bf16 %v9710_v9 }
 0x2cb   : > { %v2882_v38 = vsel %vm17854_vm12, %v1825_v34, %v9712_v32 }
 0x2cc   : > { %v9690_v41 = vpop.permute.xlu1 %9689 }
 0x2cd   : > { %v9692_v5 = vunpack.i.h.bf16 %v9690_v41  ;;  %v9691_v26 = vunpack.i.l.bf16 %v9690_v41  ;;  %v9720_v41 = vpop.permute.xlu2 %9719 }
 0x2ce   : > { %v9722_v17 = vunpack.i.h.bf16 %v9720_v41 }
 0x2cf   : > { %v3327_v19 = vpop.f32.mrf.mxu1  ;;  %v3011_v35 = vsel %vm17583_vm9, %v2979_v46, %v9692_v5  ;;  %v3010_v42 = vsel %vm17583_vm9, %v2978_v52, %v9691_v26 }
 0x2d0   : > { %v13102_v4 = vpop.f32.mrf.mxu2  ;;  %v3328_v47 = vadd.f32 %v12950_v45, %v3327_v19  ;;  %v3043_v28 = vsel %vm2915_vm10, %v3011_v35, %v9702_v14  ;;  %v3042_v57 = vsel %vm2915_vm10, %v3010_v42, %v9701_v10  ;;  %v9721_v10 = vunpack.i.l.bf16 %v9720_v41 }
 0x2d1   : > { %v3090_v29 = vpack.c.bf16 %v3043_v28, %v3042_v57  ;;  %v13124_v19 = vpop.f32.mrf.mxu3 }
 0x2d2   : > { %3366 = vmatmul.bf16.gmra.mxu1 %v3086_v20  ;;  %v13110_v49 = vadd.f32 %v3416_v1, %v3328_v47  ;;  %v2881_v1 = vsel %vm17855_vm13, %v1824_v0, %v9711_v54 }
 0x2d4   : > { %v9715_v60 = vpop.permute.xlu1 %9714 }
 0x2d5   : > { %v9717_v23 = vunpack.i.h.bf16 %v9715_v60  ;;  %v9716_v6 = vunpack.i.l.bf16 %v9715_v60  ;;  %3460 = vmatmul.bf16.gmra.mxu2 %v3090_v29 }
 0x2d7   : > { %v13115_v14 = vpop.f32.mrf.mxu1  ;;  %v2913_v5 = vsel %vm17583_vm9, %v2881_v1, %v9716_v6  ;;  %v2914_v26 = vsel %vm17583_vm9, %v2882_v38, %v9717_v23 }
 0x2d8   : > { %v3421_v7 = vpop.f32.mrf.mxu2  ;;  %v2946_v55 = vsel %vm2915_vm10, %v2913_v5, %v9721_v10  ;;  %v2947_v51 = vsel %vm2915_vm10, %v2914_v26, %v9722_v17  ;;  %vm17873_vm10 = vcmask 1040384  }
 0x2d9   : > { %v3089_v18 = vpack.c.bf16 %v2947_v51, %v2946_v55  ;;  %v13131_v28 = vpop.f32.mrf.mxu3 }
 0x2df   : > { %v3332_v20 = vpop.f32.mrf.mxu1 }
 0x2e0   : > { %v13122_v46 = vpop.f32.mrf.mxu2  ;;  %v3333_v52 = vadd.f32 %v12950_v45, %v3332_v20 }
 0x2e1   : > { %v13138_v23 = vpop.f32.mrf.mxu3 }
 0x2e2   : > { %3371 = vmatmul.bf16.gmra.mxu1 %v3089_v18  ;;  %v13127_v35 = vadd.f32 %v3421_v7, %v3333_v52 }
 0x2e7   : > { %v13129_v42 = vpop.f32.mrf.mxu1 }
 0x2e8   : > { %v3426_v47 = vpop.f32.mrf.mxu2 }
 0x2e9   : > { %v13142_v34 = vpop.f32.mrf.mxu3 }
 0x2ef   : > { %v3337_v29 = vpop.f32.mrf.mxu1 }
 0x2f0   : > { %v13133_v57 = vpop.f32.mrf.mxu2  ;;  %v3338_v60 = vadd.f32 %v12950_v45, %v3337_v29 }
 0x2f1   : > { %v13151_v5 = vpop.f32.mrf.mxu3 }
 0x2f2   : > { %v13136_v9 = vadd.f32 %v3426_v47, %v3338_v60 }
 0x2f7   : > { %v13140_v32 = vpop.f32.mrf.mxu1 }
 0x2f8   : > { %v3431_v6 = vpop.f32.mrf.mxu2 }
 0x2f9   : > { %v13156_v55 = vpop.f32.mrf.mxu3 }
 0x2fa   : > { %17856 = vst [vmem:[#allocation17_spill] sm:$0xff] %v13156_v55  ;;  %v13230_v55 = vadd.f32 %v12953_v13, %v13043_v62 }
 0x2ff   : > { %v3342_v41 = vpop.f32.mrf.mxu1 }
 0x300   : > { %v13144_v54 = vpop.f32.mrf.mxu2  ;;  %v3343_v0 = vadd.f32 %v12950_v45, %v3342_v41 }
 0x301   : > { %v13164_v52 = vpop.f32.mrf.mxu3 }
 0x302   : > { %v13147_v38 = vadd.f32 %v3431_v6, %v3343_v0  ;;  %17857 = vst [vmem:[#allocation18_spill] sm:$0xff] %v13164_v52  ;;  %v13178_v0 = vadd.f32 %v12768_v15, %v12978_v27  ;;  %v13195_v15 = vadd.f32 %v12819_v56, %v13004_v31  ;;  %v13203_v27 = vadd.f32 %v12850_v22, %v13019_v30 }
 0x303   : > { %v13216_v52 = vadd.f32 %v12868_v21, %v13030_v2  ;;  %v3320_v21 = vadd.f32 %v12950_v45, %v13070_v53 }
 0x304   : > { %17861 = vst [vmem:[#allocation12_spill] sm:$0xff] %v13178_v0  ;;  %v3637_v31 = vmul.f32 %v13195_v15, %v13195_v15  ;;  %v3572_v53 = vsel %vm17583_vm9, %v13203_v27, 0.0 }
 0x305   : > { %v3409_v13 = vadd.f32 %v13057_v50, %v3320_v21  ;;  %v3574_v50 = vsel %vm17583_vm9, %v13216_v52, 0.0 }
 0x307   : > { %v13149_v7 = vpop.f32.mrf.mxu1 }
 0x308   : > { %v3436_v1 = vpop.f32.mrf.mxu2 }
 0x309   : > { %v13170_v60 = vpop.f32.mrf.mxu3 }
 0x30a   : > { %17859 = vst [vmem:[#allocation15_spill] sm:$0xff] %v13170_v60  ;;  %v3635_v60 = vmul.f32 %v13178_v0, %v13178_v0 }
 0x30c   : > { %v3667_v56 = vsel %vm17583_vm9, %v3635_v60, 0.0  ;;  %v3638_v60 = vmul.f32 %v13203_v27, %v13203_v27 }
 0x30f   : > { %v3347_v26 = vpop.f32.mrf.mxu1 }
 0x310   : > { %v13153_v17 = vpop.f32.mrf.mxu2  ;;  %v3348_v10 = vadd.f32 %v12950_v45, %v3347_v26  ;;  %v3564_v26 = vld [vmem:[%s17497_s8 + $0x38] sm:$0xff] }
 0x311   : > { %3747 = vmatpush.msrb.mxu3 %v3564_v26  ;;  %v3566_v26 = vsel %vm17583_vm9, %v13178_v0, 0.0 }
 0x312   : > { %v13158_v51 = vadd.f32 %v3436_v1, %v3348_v10  ;;  %v13182_v1 = vadd.f32 %v12731_v39, %v12965_v63  ;;  %v13189_v10 = vadd.f32 %v12795_v44, %v12993_v58 }
 0x314   : > { %17862 = vst [vmem:[#allocation16_spill] sm:$0xff] %v13182_v1  ;;  %v3634_v39 = vmul.f32 %v13182_v1, %v13182_v1  ;;  %v3636_v63 = vmul.f32 %v13189_v10, %v13189_v10  ;;  %v3565_v22 = vsel %vm17583_vm9, %v13182_v1, 0.0 }
 0x315   : > { %17863 = vst [vmem:[#allocation13_spill] sm:$0xff] %v13189_v10  ;;  %v3567_v2 = vadd.f32 %v3566_v26, %v3565_v22  ;;  %v3673_v26 = vsel %vm17583_vm9, %v3638_v60, 0.0 }
 0x316   : > { %v3666_v30 = vsel %vm17583_vm9, %v3634_v39, 0.0  ;;  %v3669_v0 = vsel %vm17583_vm9, %v3636_v63, 0.0  ;;  %v3570_v39 = vsel %vm17583_vm9, %v13195_v15, 0.0  ;;  %v3639_v63 = vmul.f32 %v13216_v52, %v13216_v52 }
 0x317   : > { %v13160_v18 = vpop.f32.mrf.mxu1  ;;  %v3668_v1 = vadd.f32 %v3667_v56, %v3666_v30  ;;  %v3640_v56 = vmul.f32 %v13230_v55, %v13230_v55 }
 0x318   : > { %v13162_v20 = vpop.f32.mrf.mxu2 }
 0x31f   : > { %v13166_v47 = vpop.f32.mrf.mxu1 }
 0x320   : > { %v13168_v29 = vpop.f32.mrf.mxu2 }
 0x321   : > { %17858 = vst [vmem:[#allocation14_spill] sm:$0xff] %v13168_v29  ;;  %v3670_v29 = vadd.f32 %v3669_v0, %v3668_v1 }
 0x327   : > { %v13172_v6 = vpop.f32.mrf.mxu1 }
 0x328   : > { %v13174_v41 = vpop.f32.mrf.mxu2 }
 0x329   : > { %17860 = vst [vmem:[#allocation19_spill] sm:$0xff] %v13174_v41  ;;  %v13223_v41 = vpop.f32.mrf.mxu3 }
 0x32a   : > { %17865 = vst [vmem:[#allocation21_spill] sm:$0xff] %v13223_v41  ;;  %v13241_v41 = vadd.f32 %v12969_v48, %v13052_v36  ;;  %v3325_v48 = vadd.f32 %v12950_v45, %v13092_v16 }
 0x32c   : > { %v3641_v30 = vmul.f32 %v13241_v41, %v13241_v41 }
 0x32f   : > { %v13205_v44 = vpop.f32.mrf.mxu1 }
 0x330   : > { %v13207_v58 = vpop.f32.mrf.mxu2 }
 0x331   : > { %17864 = vst [vmem:[#allocation20_spill] sm:$0xff] %v13207_v58  ;;  %v3568_v58 = vsel %vm17583_vm9, %v13189_v10, 0.0  ;;  %v3671_v10 = vsel %vm17583_vm9, %v3637_v31, 0.0  ;;  %v13251_v31 = vadd.f32 %v12991_v43, %v13065_v25  ;;  %v13265_v43 = vadd.f32 %v13008_v24, %v3409_v13  ;;  %v13281_v13 = vpop.f32.mrf.mxu3 }
 0x332   : > { %v3569_v62 = vadd.f32 %v3568_v58, %v3567_v2  ;;  %v3672_v22 = vadd.f32 %v3671_v10, %v3670_v29  ;;  %v3675_v58 = vsel %vm17583_vm9, %v3639_v63, 0.0  ;;  %v3414_v25 = vadd.f32 %v13079_v3, %v3325_v48 }
 0x333   : > { %v3576_v29 = vsel %vm17583_vm9, %v13230_v55, 0.0  ;;  %v3677_v10 = vsel %vm17583_vm9, %v3640_v56, 0.0  ;;  %v3642_v21 = vmul.f32 %v13251_v31, %v13251_v31  ;;  %v13275_v2 = vadd.f32 %v13021_v11, %v13089_v12 }
 0x334   : > { %v3571_v36 = vadd.f32 %v3570_v39, %v3569_v62  ;;  %v3674_v60 = vadd.f32 %v3673_v26, %v3672_v22  ;;  %v3330_v24 = vadd.f32 %v12950_v45, %v13115_v14  ;;  %v3578_v3 = vsel %vm17583_vm9, %v13241_v41, 0.0 }
 0x335   : > { %v3679_v62 = vsel %vm17583_vm9, %v3641_v30, 0.0  ;;  %v13287_v26 = vadd.f32 %v13037_v59, %v3414_v25  ;;  %v3580_v14 = vsel %vm17583_vm9, %v13251_v31, 0.0  ;;  %v3681_v48 = vsel %vm17583_vm9, %v3642_v21, 0.0 }
 0x336   : > { %v3573_v16 = vadd.f32 %v3572_v53, %v3571_v36  ;;  %v3676_v63 = vadd.f32 %v3675_v58, %v3674_v60  ;;  %v3643_v53 = vmul.f32 %v13265_v43, %v13265_v43  ;;  %v3419_v11 = vadd.f32 %v13102_v4, %v3330_v24 }
 0x337   : > { %v13257_v0 = vpop.f32.mrf.mxu1  ;;  %v3644_v36 = vmul.f32 %v13275_v2, %v13275_v2  ;;  %v13297_v22 = vadd.f32 %v13050_v33, %v13110_v49  ;;  %v3335_v59 = vadd.f32 %v12950_v45, %v13129_v42  ;;  %v3582_v4 = vsel %vm17583_vm9, %v13265_v43, 0.0 }
 0x338   : > { %v13259_v1 = vpop.f32.mrf.mxu2  ;;  %v3575_v39 = vadd.f32 %v3574_v50, %v3573_v16  ;;  %v3678_v56 = vadd.f32 %v3677_v10, %v3676_v63  ;;  %v3683_v16 = vsel %vm17583_vm9, %v3643_v53, 0.0  ;;  %v3645_v60 = vmul.f32 %v13287_v26, %v13287_v26 }
 0x339   : > { %v13311_v33 = vadd.f32 %v13067_v61, %v3419_v11  ;;  %v3424_v49 = vadd.f32 %v13122_v46, %v3335_v59  ;;  %v3584_v10 = vsel %vm17583_vm9, %v13275_v2, 0.0  ;;  %v3685_v21 = vsel %vm17583_vm9, %v3644_v36, 0.0 }
 0x33a   : > { %v3577_v12 = vadd.f32 %v3576_v29, %v3575_v39  ;;  %v3680_v58 = vadd.f32 %v3679_v62, %v3678_v56  ;;  %v3646_v24 = vmul.f32 %v13297_v22, %v13297_v22  ;;  %v13321_v39 = vadd.f32 %v13083_v8, %v13127_v35  ;;  %v13333_v8 = vpop.f32.mrf.mxu3 }
 0x33b   : > { %v3586_v61 = vsel %vm17583_vm9, %v13287_v26, 0.0  ;;  %v3687_v46 = vsel %vm17583_vm9, %v3645_v60, 0.0  ;;  %v3647_v62 = vmul.f32 %v13311_v33, %v13311_v33  ;;  %v13329_v53 = vadd.f32 %v13097_v37, %v3424_v49 }
 0x33c   : > { %v3579_v50 = vadd.f32 %v3578_v3, %v3577_v12  ;;  %v3682_v29 = vadd.f32 %v3681_v48, %v3680_v58  ;;  %v3340_v11 = vadd.f32 %v12950_v45, %v13140_v32  ;;  %v3588_v35 = vsel %vm17583_vm9, %v13297_v22, 0.0 }
 0x33d   : > { %v3648_v48 = vmul.f32 %v13321_v39, %v13321_v39  ;;  %v13342_v36 = vadd.f32 %v13112_v40, %v13136_v9  ;;  %v3590_v58 = vsel %vm17583_vm9, %v13311_v33, 0.0  ;;  %v3345_v60 = vadd.f32 %v12950_v45, %v13149_v7 }
 0x33e   : > { %v3581_v42 = vadd.f32 %v3580_v14, %v3579_v50  ;;  %v3684_v3 = vadd.f32 %v3683_v16, %v3682_v29  ;;  %v3689_v14 = vsel %vm17583_vm9, %v3646_v24, 0.0  ;;  %v3429_v37 = vadd.f32 %v13133_v57, %v3340_v11 }
 0x33f   : > { %v13303_v30 = vpop.f32.mrf.mxu1  ;;  %v3649_v16 = vmul.f32 %v13329_v53, %v13329_v53  ;;  %v3592_v57 = vsel %vm17583_vm9, %v13321_v39, 0.0  ;;  %v3693_v29 = vsel %vm17583_vm9, %v3648_v48, 0.0  ;;  %v3434_v7 = vadd.f32 %v13144_v54, %v3345_v60 }
 0x340   : > { %v13305_v25 = vpop.f32.mrf.mxu2  ;;  %v3583_v63 = vadd.f32 %v3582_v4, %v3581_v42  ;;  %v3686_v56 = vadd.f32 %v3685_v21, %v3684_v3  ;;  %v3691_v4 = vsel %vm17583_vm9, %v3647_v62, 0.0  ;;  %v3563_v42 = vld [vmem:[%s17497_s8 + $0x30] sm:$0xff]  ;;  %v13365_v21 = vadd.f32 %v13124_v19, %v3429_v37 }
 0x341   : > { %3748 = vmatpush.msrb.mxu3 %v3563_v42  ;;  %v3350_v3 = vadd.f32 %v12950_v45, %v13160_v18  ;;  %v13375_v62 = vadd.f32 %v13131_v28, %v13147_v38  ;;  %v3353_v54 = vadd.f32 %v12950_v45, %v13166_v47 }
 0x342   : > { %v3585_v12 = vadd.f32 %v3584_v10, %v3583_v63  ;;  %v3688_v32 = vadd.f32 %v3687_v46, %v3686_v56  ;;  %v3650_v10 = vmul.f32 %v13342_v36, %v13342_v36  ;;  %v3695_v46 = vsel %vm17583_vm9, %v3649_v16, 0.0  ;;  %v13388_v28 = vpop.f32.mrf.mxu3 }
 0x343   : > { %v3596_v56 = vsel %vm17583_vm9, %v13342_v36, 0.0  ;;  %v3598_v47 = vsel %vm17583_vm9, %v13365_v21, 0.0 }
 0x344   : > { %v3587_v59 = vadd.f32 %v3586_v61, %v3585_v12  ;;  %v3690_v40 = vadd.f32 %v3689_v14, %v3688_v32  ;;  %v3594_v61 = vsel %vm17583_vm9, %v13329_v53, 0.0  ;;  %v3439_v12 = vadd.f32 %v13153_v17, %v3350_v3 }
 0x345   : > { %v3697_v18 = vsel %vm17583_vm9, %v3650_v10, 0.0  ;;  %v13386_v14 = vadd.f32 %v13138_v23, %v3434_v7  ;;  %v3442_v17 = vadd.f32 %v13162_v20, %v3353_v54  ;;  %v13397_v32 = vadd.f32 %v13142_v34, %v13158_v51  ;;  %v17866_v51 = vld [vmem:[#allocation14_spill] sm:$0xff]  ;;  %v13417_v10 = vld [vmem:[%s10786_s21] ss:$0 sm:$0xff]  ;;  %s8574_s21 = scalar_lea.hbm %s17507_s18, %s9197_s20  ;;  %s10570_s20 = scalar_lea.hbm %s17507_s18, 512 }
 0x346   : > { %v3589_v49 = vadd.f32 %v3588_v35, %v3587_v59  ;;  %v3692_v63 = vadd.f32 %v3691_v4, %v3690_v40  ;;  %v3651_v35 = vmul.f32 %v13365_v21, %v13365_v21  ;;  %v3652_v59 = vmul.f32 %v13375_v62, %v13375_v62  ;;  %s8577_s24 = sshll.u32 %s8574_s21, 4  ;;  %s8578_s24 = int_to_ptr.hbm [resolvable:$true] %s8577_s24 }
 0x347   : > { %v13345_v50 = vpop.f32.mrf.mxu1  ;;  %v3355_v23 = vadd.f32 %v12950_v45, %v13172_v6  ;;  %v13402_v16 = vadd.f32 %v13151_v5, %v3439_v12  ;;  %v3358_v20 = vadd.f32 %v12950_v45, %v13205_v44  ;;  %v3653_v34 = vmul.f32 %v13386_v14, %v13386_v14  ;;  %v17867_v6 = vld [vmem:[#allocation17_spill] sm:$0xff]  ;;  %v3561_v12 = vld [vmem:[%s17497_s8 + $0x20] sm:$0xff] }
 0x348   : > { %v13356_v9 = vpop.f32.mrf.mxu2  ;;  %v3591_v24 = vadd.f32 %v3590_v58, %v3589_v49  ;;  %v3694_v19 = vadd.f32 %v3693_v29, %v3692_v63  ;;  %v3699_v60 = vsel %vm17583_vm9, %v3651_v35, 0.0  ;;  %v3600_v49 = vsel %vm17583_vm9, %v13375_v62, 0.0  ;;  %v17868_v29 = vld [vmem:[#allocation19_spill] sm:$0xff] }
 0x349   : > { %v3444_v40 = vadd.f32 %v17866_v51, %v3355_v23  ;;  %v13413_v42 = vadd.f32 %v17867_v6, %v3442_v17  ;;  %v3447_v5 = vadd.f32 %v17868_v29, %v3358_v20  ;;  %v3360_v45 = vadd.f32 %v13417_v10, %v13257_v0  ;;  %v3562_v0 = vld [vmem:[%s17497_s8 + $0x28] sm:$0xff] }
 0x34a   : > { %v3593_v11 = vadd.f32 %v3592_v57, %v3591_v24  ;;  %v3696_v48 = vadd.f32 %v3695_v46, %v3694_v19  ;;  %v3701_v7 = vsel %vm17583_vm9, %v3652_v59, 0.0  ;;  %v3602_v24 = vsel %vm17583_vm9, %v13386_v14, 0.0  ;;  %3749 = vmatpush.msrb.mxu3 %v3562_v0  ;;  %v17871_v59 = vld [vmem:[#allocation15_spill] sm:$0xff]  ;;  %v17872_v6 = vld [vmem:[#allocation21_spill] sm:$0xff] }
 0x34b   : > { %v3654_v63 = vmul.f32 %v13397_v32, %v13397_v32  ;;  %v3655_v46 = vmul.f32 %v13402_v16, %v13402_v16  ;;  %v3703_v54 = vsel %vm17583_vm9, %v3653_v34, 0.0  ;;  %v13446_v23 = vadd.f32 %v17871_v59, %v3447_v5  ;;  %v3547_v34 = vpop.f32.mrf.mxu3  ;;  %v3559_v5 = vld [vmem:[%s17497_s8 + $0x10] sm:$0xff] }
 0x34c   : > { %v3595_v38 = vadd.f32 %v3594_v61, %v3593_v11  ;;  %v3698_v4 = vadd.f32 %v3697_v18, %v3696_v48  ;;  %v17869_v11 = vld [vmem:[#allocation20_spill] sm:$0xff]  ;;  %v17870_v18 = vld [vmem:[#allocation18_spill] sm:$0xff]  ;;  %3750 = vmatpush.msrb.mxu3 %v3561_v12 }
 0x34d   : > { %v3449_v19 = vadd.f32 %v17869_v11, %v3360_v45  ;;  %v13439_v35 = vadd.f32 %v17870_v18, %v3444_v40  ;;  %v3705_v20 = vsel %vm17583_vm9, %v3654_v63, 0.0  ;;  %v3608_v45 = vsel %vm17583_vm9, %v13413_v42, 0.0  ;;  %v3557_v18 = vld [vmem:[%s17497_s8] sm:$0xff] }
 0x34e   : > { %v3597_v58 = vadd.f32 %v3596_v56, %v3595_v38  ;;  %v3700_v3 = vadd.f32 %v3699_v60, %v3698_v4  ;;  %v3604_v56 = vsel %vm17583_vm9, %v13397_v32, 0.0  ;;  %v3363_v38 = vadd.f32 %v13417_v10, %v13303_v30  ;;  %v3560_v4 = vld [vmem:[%s17497_s8 + $0x18] sm:$0xff] }
 0x34f   : > { %v3367_v37 = vpop.f32.mrf.mxu1  ;;  %v3606_v60 = vsel %vm17583_vm9, %v13402_v16, 0.0  ;;  %v13459_v29 = vadd.f32 %v17872_v6, %v3449_v19  ;;  %3751 = vmatpush.msrb.mxu3 %v3560_v4  ;;  %v3610_v11 = vsel %vm17583_vm9, %v13439_v35, 0.0 }
 0x350   : > { %v3599_v57 = vadd.f32 %v3598_v47, %v3597_v58  ;;  %v3458_v44 = vpop.f32.mrf.mxu2  ;;  %v3702_v48 = vadd.f32 %v3701_v7, %v3700_v3  ;;  %v3656_v47 = vmul.f32 %v13413_v42, %v13413_v42  ;;  %v3452_v30 = vadd.f32 %v13259_v1, %v3363_v38 }
 0x351   : > { %v3657_v1 = vmul.f32 %v13439_v35, %v13439_v35  ;;  %v3368_v7 = vadd.f32 %v13417_v10, %v3367_v37  ;;  %3752 = vmatpush.msrb.mxu3 %v3559_v5  ;;  %v3614_v4 = vsel %vm17583_vm9, %v13459_v29, 0.0 }
 0x352   : > { %v3601_v61 = vadd.f32 %v3600_v49, %v3599_v57  ;;  %v3365_v49 = vadd.f32 %v13417_v10, %v13345_v50  ;;  %v3704_v51 = vadd.f32 %v3703_v54, %v3702_v48  ;;  %v3707_v57 = vsel %vm17583_vm9, %v3655_v46, 0.0  ;;  %v3558_v46 = vld [vmem:[%s17497_s8 + $0x8] sm:$0xff] }
 0x353   : > { %v3709_v3 = vsel %vm17583_vm9, %v3656_v47, 0.0  ;;  %v13479_v19 = vadd.f32 %v13281_v13, %v3452_v30  ;;  %v3659_v54 = vmul.f32 %v13459_v29, %v13459_v29  ;;  %v3711_v38 = vsel %vm17583_vm9, %v3657_v1, 0.0  ;;  %3753 = vmatpush.msrb.mxu3 %v3558_v46 }
 0x354   : > { %v3603_v17 = vadd.f32 %v3602_v24, %v3601_v61  ;;  %v3454_v50 = vadd.f32 %v13305_v25, %v3365_v49  ;;  %v3706_v24 = vadd.f32 %v3705_v20, %v3704_v51  ;;  %v3658_v61 = vmul.f32 %v13446_v23, %v13446_v23  ;;  %v3550_v51 = vpop.f32.mrf.mxu3 }
 0x355   : > { %v3457_v25 = vadd.f32 %v13356_v9, %v3368_v7  ;;  %v3612_v13 = vsel %vm17583_vm9, %v13446_v23, 0.0  ;;  %v3660_v20 = vmul.f32 %v13479_v19, %v13479_v19  ;;  %3754 = vmatpush.msrb.mxu3 %v3557_v18  ;;  %v3715_v49 = vsel %vm17583_vm9, %v3659_v54, 0.0 }
 0x356   : > { %v3605_v40 = vadd.f32 %v3604_v56, %v3603_v17  ;;  %v3708_v0 = vadd.f32 %v3707_v57, %v3706_v24  ;;  %v13492_v9 = vadd.f32 %v13333_v8, %v3454_v50  ;;  %v3713_v59 = vsel %vm17583_vm9, %v3658_v61, 0.0 }
 0x357   : > { %v3369_v58 = vpop.f32.mrf.mxu1  ;;  %v3717_v1 = vsel %vm17583_vm9, %v3660_v20, 0.0 }
 0x358   : > { %v3607_v63 = vadd.f32 %v3606_v60, %v3605_v40  ;;  %v3370_v37 = vadd.f32 %v13417_v10, %v3369_v58  ;;  %v3461_v56 = vpop.f32.mrf.mxu2  ;;  %v3710_v17 = vadd.f32 %v3709_v3, %v3708_v0  ;;  %v13500_v60 = vadd.f32 %v13388_v28, %v3457_v25 }
 0x359   : > { %v3616_v40 = vsel %vm17583_vm9, %v13479_v19, 0.0  ;;  %v3661_v57 = vmul.f32 %v13492_v9, %v13492_v9  ;;  %v3618_v50 = vsel %vm17583_vm9, %v13492_v9, 0.0 }
 0x35a   : > { %v3609_v12 = vadd.f32 %v3608_v45, %v3607_v63  ;;  %v3459_v48 = vadd.f32 %v3458_v44, %v3370_v37  ;;  %v3712_v8 = vadd.f32 %v3711_v38, %v3710_v17  ;;  %v3662_v7 = vmul.f32 %v13500_v60, %v13500_v60 }
 0x35b   : > { %v3719_v61 = vsel %vm17583_vm9, %v3661_v57, 0.0 }
 0x35c   : > { %v3611_v47 = vadd.f32 %v3610_v11, %v3609_v12  ;;  %v13508_v6 = vadd.f32 %v3547_v34, %v3459_v48  ;;  %v3714_v45 = vadd.f32 %v3713_v59, %v3712_v8  ;;  %v3620_v34 = vsel %vm17583_vm9, %v13500_v60, 0.0 }
 0x35d   : > { %v3721_v12 = vsel %vm17583_vm9, %v3662_v7, 0.0 }
 0x35e   : > { %v3613_v44 = vadd.f32 %v3612_v13, %v3611_v47  ;;  %v3716_v63 = vadd.f32 %v3715_v49, %v3714_v45  ;;  %v3663_v46 = vmul.f32 %v13508_v6, %v13508_v6  ;;  %v3622_v54 = vsel %vm17583_vm9, %v13508_v6, 0.0 }
 0x35f   : > { %v3372_v58 = vpop.f32.mrf.mxu1 }
 0x360   : > { %v3373_v30 = vadd.f32 %v13417_v10, %v3372_v58  ;;  %v3615_v28 = vadd.f32 %v3614_v4, %v3613_v44  ;;  %v3718_v11 = vadd.f32 %v3717_v1, %v3716_v63  ;;  %v3463_v0 = vpop.f32.mrf.mxu2  ;;  %v3723_v48 = vsel %vm17583_vm9, %v3663_v46, 0.0  ;;  %v3552_v4 = vpop.f32.mrf.mxu3 }
 0x362   : > { %v3462_v5 = vadd.f32 %v3461_v56, %v3373_v30  ;;  %v3617_v3 = vadd.f32 %v3616_v40, %v3615_v28  ;;  %v3720_v38 = vadd.f32 %v3719_v61, %v3718_v11 }
 0x364   : > { %v13515_v24 = vadd.f32 %v3550_v51, %v3462_v5  ;;  %v3619_v25 = vadd.f32 %v3618_v50, %v3617_v3  ;;  %v3722_v59 = vadd.f32 %v3721_v12, %v3720_v38  ;;  %v4618_v12 = vld [vmem:[#allocation3 + $0x10] sm:$0xff] }
 0x366   : > { %v3664_v56 = vmul.f32 %v13515_v24, %v13515_v24  ;;  %v3621_v13 = vadd.f32 %v3620_v34, %v3619_v25  ;;  %v3624_v17 = vsel %vm17583_vm9, %v13515_v24, 0.0  ;;  %v3724_v8 = vadd.f32 %v3723_v48, %v3722_v59 }
 0x367   : > { %v3374_v37 = vpop.f32.mrf.mxu1 }
 0x368   : > { %v3375_v18 = vadd.f32 %v13417_v10, %v3374_v37  ;;  %v3623_v58 = vadd.f32 %v3622_v54, %v3621_v13  ;;  %v3725_v20 = vsel %vm17583_vm9, %v3664_v56, 0.0 }
 0x369   : > { %v3726_v51 = vadd.f32 %v3725_v20, %v3724_v8 }
 0x36a   : > { %v3464_v47 = vadd.f32 %v3463_v0, %v3375_v18  ;;  %v3625_v44 = vadd.f32 %v3624_v17, %v3623_v58  ;;  %v4617_v0 = vld [vmem:[#allocation3 + $0x8] sm:$0xff] }
 0x36b   : > { %v9728_v54 = vpack.i.bf16 %v4618_v12, %v4617_v0 }
 0x36c   : > { %v13532_v30 = vadd.f32 %v3552_v4, %v3464_v47 }
 0x36d   : > { %9729 = vrot.lane.b32.xlu1 %v9728_v54, %s17786_s29 }
 0x36e   : > { %v3626_v10 = vsel %vm17583_vm9, %v13532_v30, 0.0  ;;  %v3665_v49 = vmul.f32 %v13532_v30, %v13532_v30 }
 0x36f   : > { %v3627_v40 = vadd.f32 %v3626_v10, %v3625_v44 }
 0x370   : > { %v3727_v57 = vsel %vm17583_vm9, %v3665_v49, 0.0 }
 0x371   : > { %v3628_v5 = vrot.slane %v3627_v40, 4  ;;  %v3728_v45 = vadd.f32 %v3727_v57, %v3726_v51 }
 0x373   : > { %v3629_v28 = vadd.f32 %v3628_v5, %v3627_v40  ;;  %v3729_v1 = vrot.slane %v3728_v45, 4 }
 0x375   : > { %v3630_v50 = vrot.slane %v3629_v28, 2  ;;  %v3730_v7 = vadd.f32 %v3729_v1, %v3728_v45 }
 0x377   : > { %v3631_v63 = vadd.f32 %v3630_v50, %v3629_v28  ;;  %v3731_v3 = vrot.slane %v3730_v7, 2 }
 0x379   : > { %v3632_v61 = vrot.slane %v3631_v63, 1  ;;  %v3732_v34 = vadd.f32 %v3731_v3, %v3730_v7 }
 0x37b   : > { %v3733_v46 = vrot.slane %v3732_v34, 1  ;;  %v3633_v11 = vadd.f32 %v3632_v61, %v3631_v63 }
 0x37d   : > { %v3734_v25 = vadd.f32 %v3733_v46, %v3732_v34  ;;  %v13617_v34 = vld [vmem:[%s17874_s6] ss:$0 sm:$0xff] }
 0x37f   : > { %v3735_v37 = vsel %vm17873_vm10, %v3633_v11, %v3734_v25 }
 0x380   : > { %8777 = vmatmul.msk.f32.vlgmr.msrb.gmra.mxu3 %vm17583_vm9, %v3735_v37 }
 0x403   : > { %v3756_v56 = vpop.f32.mrf.mxu3 }
 0x404   : > { %v3759_v18 = vmul.f32 %v3756_v56, %v3756_v56  ;;  %v13542_v58 = vperm.slane %v3756_v56, 0 }
 0x406   : > { %v3761_v38 = vrot.slane %v3759_v18, 7  ;;  %v3781_v8 = vsub.f32 %v13203_v27, %v13542_v58  ;;  %v3782_v44 = vsub.f32 %v13216_v52, %v13542_v58  ;;  %v3783_v49 = vsub.f32 %v13230_v55, %v13542_v58  ;;  %v13630_v18 = vld [vmem:[%s17496_s7] ss:$0 sm:$0xff] }
 0x407   : > { %v3784_v51 = vsub.f32 %v13241_v41, %v13542_v58  ;;  %v3785_v40 = vsub.f32 %v13251_v31, %v13542_v58  ;;  %v3786_v57 = vsub.f32 %v13265_v43, %v13542_v58  ;;  %v3787_v27 = vsub.f32 %v13275_v2, %v13542_v58 }
 0x408   : > { %v3763_v13 = vsub.f32 %v3756_v56, %v3761_v38  ;;  %v3788_v52 = vsub.f32 %v13287_v26, %v13542_v58  ;;  %v3789_v55 = vsub.f32 %v13297_v22, %v13542_v58  ;;  %v3790_v41 = vsub.f32 %v13311_v33, %v13542_v58 }
 0x409   : > { %v3791_v31 = vsub.f32 %v13321_v39, %v13542_v58  ;;  %v3792_v43 = vsub.f32 %v13329_v53, %v13542_v58  ;;  %v3793_v2 = vsub.f32 %v13342_v36, %v13542_v58  ;;  %v3794_v26 = vsub.f32 %v13365_v21, %v13542_v58 }
 0x40a   : > { %v3764_v48 = vmax.f32 %v3763_v13, 0.0  ;;  %v3795_v22 = vsub.f32 %v13375_v62, %v13542_v58  ;;  %v3796_v33 = vsub.f32 %v13386_v14, %v13542_v58  ;;  %v3797_v28 = vsub.f32 %v13397_v32, %v13542_v58 }
 0x40b   : > { %v3798_v53 = vsub.f32 %v13402_v16, %v13542_v58  ;;  %v3799_v36 = vsub.f32 %v13413_v42, %v13542_v58  ;;  %v3800_v21 = vsub.f32 %v13439_v35, %v13542_v58  ;;  %v3801_v62 = vsub.f32 %v13446_v23, %v13542_v58 }
 0x40c   : > { %v3765_v17 = vadd.f32 1e-05, %v3764_v48  ;;  %v3802_v14 = vsub.f32 %v13459_v29, %v13542_v58  ;;  %v3803_v32 = vsub.f32 %v13479_v19, %v13542_v58  ;;  %v3804_v1 = vsub.f32 %v13492_v9, %v13542_v58 }
 0x40d   : > { %v3805_v16 = vsub.f32 %v13500_v60, %v13542_v58  ;;  %v3806_v42 = vsub.f32 %v13508_v6, %v13542_v58  ;;  %v3807_v35 = vsub.f32 %v13515_v24, %v13542_v58  ;;  %v3808_v23 = vsub.f32 %v13532_v30, %v13542_v58 }
 0x40e   : > { %10182 = vrsqrt.f32 %v3765_v17  ;;  %vm3772_vm0 = vweird.f32 %v3765_v17 }
 0x414   : > { %v10183_v47 = vpop.eup %10182 }
 0x415   : > { %v3767_v59 = vmul.f32 %v10183_v47, %v3765_v17  ;;  %vm3773_vm14 = vweird.f32 %v10183_v47 }
 0x416   : > { %vm3774_vm2 = vmor %vm3772_vm0, %vm3773_vm14 }
 0x417   : > { %v3768_v4 = vmul.f32 %v10183_v47, %v3767_v59 }
 0x419   : > { %v3769_v20 = vmul.f32 0.5, %v3768_v4 }
 0x41b   : > { %v3770_v10 = vsub.f32 1.5, %v3769_v20 }
 0x41d   : > { %v3771_v5 = vmul.f32 %v10183_v47, %v3770_v10 }
 0x41f   : > { %v3775_v45 = vsel %vm3774_vm2, %v10183_v47, %v3771_v5  ;;  %v3780_v5 = vsub.f32 %v13195_v15, %v13542_v58 }
 0x420   : > { %v13578_v39 = vperm.slane %v3775_v45, 1 }
 0x422   : > { %v3814_v29 = vmul.f32 %v13578_v39, %v3781_v8  ;;  %v3815_v50 = vmul.f32 %v13578_v39, %v3782_v44  ;;  %v3816_v19 = vmul.f32 %v13578_v39, %v3783_v49  ;;  %v3817_v9 = vmul.f32 %v13578_v39, %v3784_v51 }
 0x423   : > { %v3818_v7 = vmul.f32 %v13578_v39, %v3785_v40  ;;  %v3819_v60 = vmul.f32 %v13578_v39, %v3786_v57  ;;  %v3820_v6 = vmul.f32 %v13578_v39, %v3787_v27  ;;  %v3821_v63 = vmul.f32 %v13578_v39, %v3788_v52  ;;  %v17875_v57 = vld [vmem:[#allocation13_spill] sm:$0xff] }
 0x424   : > { %v3822_v24 = vmul.f32 %v13578_v39, %v3789_v55  ;;  %v3823_v30 = vmul.f32 %v13578_v39, %v3790_v41  ;;  %v3824_v3 = vmul.f32 %v13578_v39, %v3791_v31  ;;  %v3825_v61 = vmul.f32 %v13578_v39, %v3792_v43 }
 0x425   : > { %v3826_v46 = vmul.f32 %v13578_v39, %v3793_v2  ;;  %v3827_v11 = vmul.f32 %v13578_v39, %v3794_v26  ;;  %v3828_v25 = vmul.f32 %v13578_v39, %v3795_v22  ;;  %v3829_v37 = vmul.f32 %v13578_v39, %v3796_v33 }
 0x426   : > { %v3830_v0 = vmul.f32 %v13578_v39, %v3797_v28  ;;  %v3831_v12 = vmul.f32 %v13578_v39, %v3798_v53  ;;  %v3832_v54 = vmul.f32 %v13578_v39, %v3799_v36  ;;  %v3833_v56 = vmul.f32 %v13578_v39, %v3800_v21 }
 0x427   : > { %v3834_v38 = vmul.f32 %v13578_v39, %v3801_v62  ;;  %v3835_v13 = vmul.f32 %v13578_v39, %v3802_v14  ;;  %v3836_v48 = vmul.f32 %v13578_v39, %v3803_v32  ;;  %v3837_v17 = vmul.f32 %v13578_v39, %v3804_v1 }
 0x428   : > { %v3838_v47 = vmul.f32 %v13578_v39, %v3805_v16  ;;  %v3839_v59 = vmul.f32 %v13578_v39, %v3806_v42  ;;  %v3840_v4 = vmul.f32 %v13578_v39, %v3807_v35  ;;  %v3841_v20 = vmul.f32 %v13578_v39, %v3808_v23 }
 0x429   : > { %v3849_v8 = vmul.f32 %v13617_v34, %v3814_v29  ;;  %v3850_v44 = vmul.f32 %v13617_v34, %v3815_v50  ;;  %v3779_v27 = vsub.f32 %v17875_v57, %v13542_v58  ;;  %v3813_v43 = vmul.f32 %v13578_v39, %v3780_v5 }
 0x42a   : > { %v13659_v26 = vmul.f32 %v13617_v34, %v3816_v19  ;;  %v13662_v45 = vmul.f32 %v13617_v34, %v3817_v9  ;;  %v13666_v22 = vmul.f32 %v13617_v34, %v3818_v7  ;;  %v13669_v15 = vmul.f32 %v13617_v34, %v3819_v60 }
 0x42b   : > { %v13643_v10 = vadd.f32 %v13630_v18, %v3849_v8  ;;  %v13646_v49 = vadd.f32 %v13630_v18, %v3850_v44  ;;  %v3812_v41 = vmul.f32 %v13578_v39, %v3779_v27  ;;  %v3848_v28 = vmul.f32 %v13617_v34, %v3813_v43  ;;  %v17877_v44 = vld [vmem:[#allocation12_spill] sm:$0xff] }
 0x42c   : > { %v13674_v53 = vmul.f32 %v13617_v34, %v3820_v6  ;;  %v13677_v36 = vmul.f32 %v13617_v34, %v3821_v63  ;;  %v13680_v21 = vmul.f32 %v13617_v34, %v3822_v24  ;;  %v13683_v62 = vmul.f32 %v13617_v34, %v3823_v30 }
 0x42d   : > { %v8782_v51 = vmul.f32 -1.442695, %v13643_v10  ;;  %v8783_v40 = vmul.f32 -1.442695, %v13646_v49  ;;  %v3847_v33 = vmul.f32 %v13617_v34, %v3812_v41  ;;  %v13686_v14 = vmul.f32 %v13617_v34, %v3824_v3 }
 0x42e   : > { %v13689_v32 = vmul.f32 %v13617_v34, %v3825_v61  ;;  %v13692_v1 = vmul.f32 %v13617_v34, %v3826_v46  ;;  %v13695_v16 = vmul.f32 %v13617_v34, %v3827_v11  ;;  %v13698_v42 = vmul.f32 %v13617_v34, %v3828_v25 }
 0x42f   : > { %10184 = vpow2.f32 %v8782_v51  ;;  %v13701_v35 = vmul.f32 %v13617_v34, %v3829_v37  ;;  %v13704_v29 = vmul.f32 %v13617_v34, %v3830_v0  ;;  %v13707_v50 = vmul.f32 %v13617_v34, %v3831_v12 }
 0x430   : > { %10186 = vpow2.f32 %v8783_v40  ;;  %v13710_v19 = vmul.f32 %v13617_v34, %v3832_v54  ;;  %v13713_v9 = vmul.f32 %v13617_v34, %v3833_v56  ;;  %v13716_v63 = vmul.f32 %v13617_v34, %v3834_v38 }
 0x431   : > { %v13719_v24 = vmul.f32 %v13617_v34, %v3835_v13  ;;  %v13723_v61 = vmul.f32 %v13617_v34, %v3836_v48  ;;  %v13726_v46 = vmul.f32 %v13617_v34, %v3837_v17  ;;  %v13729_v25 = vmul.f32 %v13617_v34, %v3838_v47 }
 0x432   : > { %v13732_v37 = vmul.f32 %v13617_v34, %v3839_v59  ;;  %v13735_v0 = vmul.f32 %v13617_v34, %v3840_v4  ;;  %v13738_v54 = vmul.f32 %v13617_v34, %v3841_v20  ;;  %v13741_v56 = vadd.f32 %v13630_v18, %v3847_v33  ;;  %v17876_v20 = vld [vmem:[#allocation16_spill] sm:$0xff] }
 0x433   : > { %v13744_v38 = vadd.f32 %v13630_v18, %v3848_v28  ;;  %v3777_v8 = vsub.f32 %v17876_v20, %v13542_v58  ;;  %v3778_v51 = vsub.f32 %v17877_v44, %v13542_v58 }
 0x434   : > { %v8780_v59 = vmul.f32 -1.442695, %v13741_v56 }
 0x435   : > { %v10185_v52 = vpop.eup %10184  ;;  %v8781_v4 = vmul.f32 -1.442695, %v13744_v38  ;;  %v3810_v43 = vmul.f32 %v13578_v39, %v3777_v8  ;;  %v3811_v58 = vmul.f32 %v13578_v39, %v3778_v51  ;;  %v13868_v8 = vadd.f32 %v13630_v18, %v13732_v37 }
 0x436   : > { %v10187_v55 = vpop.eup %10186  ;;  %v4012_v31 = vadd.f32 1.0, %v10185_v52 }
 0x437   : > { %v13656_v2 = vadd.f32 1.0, %v10187_v55  ;;  %17897 = vst [vmem:[#allocation31_spill] sm:$0xff] %v13868_v8 }
 0x438   : > { %10188 = vrcp.f32 %v4012_v31  ;;  %v4109_v6 = vand.u32 2147483647, %v4012_v31  ;;  %v4111_v30 = vand.u32 2147483648, %v4012_v31  ;;  %vm4105_vm1 = vweird.f32 %v4012_v31 }
 0x439   : > { %10190 = vrcp.f32 %v13656_v2  ;;  %v4124_v48 = vand.u32 2147483647, %v13656_v2  ;;  %v4126_v17 = vand.u32 2147483648, %v13656_v2  ;;  %vm4120_vm5 = vweird.f32 %v13656_v2 }
 0x43a   : > { %v4112_v57 = vor.u32 1.1754944e-38, %v4111_v30  ;;  %10192 = vpow2.f32 %v8780_v59  ;;  %vm4110_vm6 = vcmp.eq.f32.partialorder %v4109_v6, 8.507059e+37  ;;  %v13765_v30 = vadd.f32 %v13630_v18, %v13659_v26 }
 0x43b   : > { %v4127_v5 = vor.u32 1.1754944e-38, %v4126_v17  ;;  %10194 = vpow2.f32 %v8781_v4  ;;  %vm4125_vm8 = vcmp.eq.f32.partialorder %v4124_v48, 8.507059e+37  ;;  %v13788_v26 = vadd.f32 %v13630_v18, %v13677_v36 }
 0x43c   : > { %17878 = vst [vmem:[#allocation14_spill] sm:$0xff] %v13765_v30  ;;  %v13806_v36 = vadd.f32 %v13630_v18, %v13686_v14  ;;  %v13814_v48 = vadd.f32 %v13630_v18, %v13692_v1  ;;  %v13826_v14 = vadd.f32 %v13630_v18, %v13701_v35  ;;  %v13834_v1 = vadd.f32 %v13630_v18, %v13707_v50 }
 0x43d   : > { %v13846_v35 = vadd.f32 %v13630_v18, %v13716_v63  ;;  %v13851_v50 = vadd.f32 %v13630_v18, %v13719_v24  ;;  %v13864_v63 = vadd.f32 %v13630_v18, %v13729_v25  ;;  %v13872_v24 = vadd.f32 %v13630_v18, %v13735_v0 }
 0x43e   : > { %v10189_v23 = vpop.eup %10188  ;;  %17882 = vst [vmem:[#allocation18_spill] sm:$0xff] %v13806_v36 }
 0x43f   : > { %v10191_v7 = vpop.eup %10190  ;;  %v4101_v60 = vmul.f32 %v10189_v23, %v4012_v31  ;;  %vm4106_vm3 = vweird.f32 %v10189_v23  ;;  %17884 = vst [vmem:[#allocation21_spill] sm:$0xff] %v13814_v48 }
 0x440   : > { %v4116_v3 = vmul.f32 %v10191_v7, %v13656_v2  ;;  %vm4121_vm4 = vweird.f32 %v10191_v7  ;;  %vm4107_vm15 = vmor %vm4105_vm1, %vm4106_vm3  ;;  %v10193_v2 = vpop.eup %10192  ;;  %17887 = vst [vmem:[#allocation12_spill] sm:$0xff] %v13826_v14 }
 0x441   : > { %v4102_v11 = vsub.f32 1.0, %v4101_v60  ;;  %vm4122_vm7 = vmor %vm4120_vm5, %vm4121_vm4  ;;  %v3845_v60 = vmul.f32 %v13617_v34, %v3810_v43  ;;  %v4010_v6 = vadd.f32 1.0, %v10193_v2  ;;  %17889 = vst [vmem:[#allocation23_spill] sm:$0xff] %v13834_v1 }
 0x442   : > { %v4117_v12 = vsub.f32 1.0, %v4116_v3  ;;  %v13779_v3 = vadd.f32 %v13630_v18, %v13669_v15  ;;  %v13798_v15 = vadd.f32 %v13630_v18, %v13680_v21  ;;  %v13818_v21 = vadd.f32 %v13630_v18, %v13695_v16  ;;  %17892 = vst [vmem:[#allocation26_spill] sm:$0xff] %v13846_v35 }
 0x443   : > { %v4103_v13 = vmul.f32 %v10189_v23, %v4102_v11  ;;  %10196 = vrcp.f32 %v4010_v6  ;;  %v13791_v11 = vadd.f32 %v13630_v18, %v3845_v60  ;;  %v13838_v16 = vadd.f32 %v13630_v18, %v13710_v19  ;;  %17893 = vst [vmem:[#allocation27_spill] sm:$0xff] %v13851_v50 }
 0x444   : > { %v4118_v47 = vmul.f32 %v10191_v7, %v4117_v12  ;;  %17880 = vst [vmem:[#allocation19_spill] sm:$0xff] %v13798_v15  ;;  %v13802_v12 = vadd.f32 %v13630_v18, %v13683_v62  ;;  %v13822_v62 = vadd.f32 %v13630_v18, %v13698_v42  ;;  %v13842_v42 = vadd.f32 %v13630_v18, %v13713_v9 }
 0x445   : > { %v4104_v40 = vadd.f32 %v10189_v23, %v4103_v13  ;;  %v13810_v13 = vadd.f32 %v13630_v18, %v13689_v32  ;;  %17885 = vst [vmem:[#allocation13_spill] sm:$0xff] %v13818_v21  ;;  %v13830_v32 = vadd.f32 %v13630_v18, %v13704_v29  ;;  %v13855_v19 = vadd.f32 %v13630_v18, %v13723_v61 }
 0x446   : > { %v4119_v27 = vadd.f32 %v10191_v7, %v4118_v47  ;;  %17881 = vst [vmem:[#allocation20_spill] sm:$0xff] %v13802_v12  ;;  %v13860_v9 = vadd.f32 %v13630_v18, %v13726_v46  ;;  %v13876_v61 = vadd.f32 %v13630_v18, %v13738_v54  ;;  %v4081_v44 = vand.u32 2147483648, %v4010_v6 }
 0x447   : > { %v4108_v52 = vsel %vm4107_vm15, %v10189_v23, %v4104_v40  ;;  %v10195_v23 = vpop.eup %10194  ;;  %17883 = vst [vmem:[#allocation15_spill] sm:$0xff] %v13810_v13  ;;  %v8778_v51 = vmul.f32 -1.442695, %v13791_v11  ;;  %vm4075_vm13 = vweird.f32 %v4010_v6 }
 0x448   : > { %v4113_v55 = vsel %vm4110_vm6, %v4112_v57, %v4108_v52  ;;  %v4123_v41 = vsel %vm4122_vm7, %v10191_v7, %v4119_v27  ;;  %v3846_v7 = vmul.f32 %v13617_v34, %v3811_v58  ;;  %v13767_v39 = vadd.f32 1.0, %v10195_v23  ;;  %17886 = vst [vmem:[#allocation16_spill] sm:$0xff] %v13822_v62 }
 0x449   : > { %v4128_v33 = vsel %vm4125_vm8, %v4127_v5, %v4123_v41  ;;  %v4524_v31 = vmul.f32 %v4113_v55, %v13643_v10  ;;  %v13771_v10 = vadd.f32 %v13630_v18, %v13662_v45  ;;  %v13784_v34 = vadd.f32 %v13630_v18, %v13674_v53  ;;  %17888 = vst [vmem:[#allocation22_spill] sm:$0xff] %v13830_v32  ;;  %v10197_v47 = vpop.eup %10196 }
 0x44a   : > { %v4525_v28 = vmul.f32 %v4128_v33, %v13646_v49  ;;  %v13775_v49 = vadd.f32 %v13630_v18, %v13666_v22  ;;  %10198 = vrcp.f32 %v13767_v39  ;;  %v13794_v22 = vadd.f32 %v13630_v18, %v3846_v7  ;;  %17890 = vst [vmem:[#allocation24_spill] sm:$0xff] %v13838_v16 }
 0x44b   : > { %4557 = vst.msk [vmem:[#allocation3 + $0x68] sm:$0xff] %vm17583_vm9, %v4524_v31  ;;  %v4071_v29 = vmul.f32 %v10197_v47, %v4010_v6  ;;  %vm4076_vm11 = vweird.f32 %v10197_v47  ;;  %v4079_v57 = vand.u32 2147483647, %v4010_v6  ;;  %v4096_v37 = vand.u32 2147483648, %v13767_v39 }
 0x44c   : > { %4558 = vst.msk [vmem:[#allocation3 + $0x70] sm:$0xff] %vm17583_vm9, %v4525_v28  ;;  %v8779_v25 = vmul.f32 -1.442695, %v13794_v22  ;;  %v4094_v0 = vand.u32 2147483647, %v13767_v39  ;;  %10200 = vpow2.f32 %v8778_v51  ;;  %vm4077_vm10 = vmor %vm4075_vm13, %vm4076_vm11  ;;  %v4082_v18 = vor.u32 1.1754944e-38, %v4081_v44 }
 0x44d   : > { %17879 = vst [vmem:[#allocation17_spill] sm:$0xff] %v13771_v10  ;;  %v4072_v20 = vsub.f32 1.0, %v4071_v29  ;;  %vm4090_vm14 = vweird.f32 %v13767_v39  ;;  %vm4080_vm0 = vcmp.eq.f32.partialorder %v4079_v57, 8.507059e+37  ;;  %v4097_v55 = vor.u32 1.1754944e-38, %v4096_v37 }
 0x44e   : > { %17891 = vst [vmem:[#allocation25_spill] sm:$0xff] %v13842_v42  ;;  %10202 = vpow2.f32 %v8779_v25  ;;  %vm4095_vm3 = vcmp.eq.f32.partialorder %v4094_v0, 8.507059e+37 }
 0x44f   : > { %17894 = vst [vmem:[#allocation28_spill] sm:$0xff] %v13855_v19  ;;  %v4073_v40 = vmul.f32 %v10197_v47, %v4072_v20 }
 0x450   : > { %v10199_v59 = vpop.eup %10198  ;;  %17895 = vst [vmem:[#allocation29_spill] sm:$0xff] %v13860_v9 }
 0x451   : > { %v4086_v4 = vmul.f32 %v10199_v59, %v13767_v39  ;;  %17896 = vst [vmem:[#allocation30_spill] sm:$0xff] %v13864_v63  ;;  %vm4091_vm12 = vweird.f32 %v10199_v59  ;;  %v4074_v52 = vadd.f32 %v10197_v47, %v4073_v40 }
 0x452   : > { %v4685_v45 = vld [vmem:[#allocation3 + $0x67] sm:$0xff]  ;;  %17898 = vst [vmem:[#allocation32_spill] sm:$0xff] %v13872_v24  ;;  %vm4092_vm2 = vmor %vm4090_vm14, %vm4091_vm12  ;;  %v10201_v31 = vpop.eup %10200 }
 0x453   : > { %v4686_v53 = vld [vmem:[#allocation3 + $0x6f] sm:$0xff]  ;;  %17899 = vst [vmem:[#allocation33_spill] sm:$0xff] %v13876_v61  ;;  %v4087_v46 = vsub.f32 1.0, %v4086_v4  ;;  %v4078_v5 = vsel %vm4077_vm10, %v10197_v47, %v4074_v52  ;;  %v4008_v23 = vadd.f32 1.0, %v10201_v31  ;;  %v8788_v31 = vmul.f32 -1.442695, %v13784_v34 }
 0x454   : > { %v9743_v17 = vpack.i.bf16 %v4686_v53, %v4685_v45  ;;  %v4083_v41 = vsel %vm4080_vm0, %v4082_v18, %v4078_v5  ;;  %v10203_v2 = vpop.eup %10202  ;;  %v4623_v7 = vld [vmem:[#allocation3 + $0x68] sm:$0xff]  ;;  %v4624_v6 = vld [vmem:[#allocation3 + $0x70] sm:$0xff] }
 0x455   : > { %v4088_v27 = vmul.f32 %v10199_v59, %v4087_v46  ;;  %v4522_v33 = vmul.f32 %v4083_v41, %v13741_v56  ;;  %v4009_v60 = vadd.f32 1.0, %v10203_v2  ;;  %10204 = vrcp.f32 %v4008_v23 }
 0x456   : > { %9744 = vrot.lane.b32.xlu1 %v9743_v17, %s17786_s29  ;;  %v9758_v39 = vpack.i.bf16 %v4624_v6, %v4623_v7  ;;  %v4051_v4 = vand.u32 2147483648, %v4008_v23  ;;  %v4049_v46 = vand.u32 2147483647, %v4008_v23  ;;  %vm4045_vm15 = vweird.f32 %v4008_v23 }
 0x457   : > { %v4089_v54 = vadd.f32 %v10199_v59, %v4088_v27  ;;  %4555 = vst.msk [vmem:[#allocation3 + $0x48] sm:$0xff] %vm17583_vm9, %v4522_v33  ;;  %10206 = vrcp.f32 %v4009_v60  ;;  %v4066_v51 = vand.u32 2147483648, %v4009_v60  ;;  %v4064_v40 = vand.u32 2147483647, %v4009_v60 }
 0x458   : > { %v4052_v0 = vor.u32 1.1754944e-38, %v4051_v4  ;;  %vm4060_vm6 = vweird.f32 %v4009_v60  ;;  %vm4050_vm7 = vcmp.eq.f32.partialorder %v4049_v46, 8.507059e+37  ;;  %v8784_v2 = vmul.f32 -1.442695, %v13765_v30 }
 0x459   : > { %v4093_v43 = vsel %vm4092_vm2, %v10199_v59, %v4089_v54  ;;  %v4067_v54 = vor.u32 1.1754944e-38, %v4066_v51  ;;  %vm4065_vm11 = vcmp.eq.f32.partialorder %v4064_v40, 8.507059e+37  ;;  %v8785_v6 = vmul.f32 -1.442695, %v13771_v10 }
 0x45a   : > { %v4098_v58 = vsel %vm4095_vm3, %v4097_v55, %v4093_v43  ;;  %10208 = vpow2.f32 %v8788_v31  ;;  %v8795_v4 = vmul.f32 -1.442695, %v13818_v21  ;;  %v8796_v46 = vmul.f32 -1.442695, %v13822_v62 }
 0x45b   : > { %v4523_v28 = vmul.f32 %v4098_v58, %v13744_v38  ;;  %v10205_v53 = vpop.eup %10204  ;;  %10210 = vpow2.f32 %v8784_v2 }
 0x45c   : > { %v4041_v38 = vmul.f32 %v10205_v53, %v4008_v23  ;;  %vm4046_vm4 = vweird.f32 %v10205_v53 }
 0x45d   : > { %4556 = vst.msk [vmem:[#allocation3 + $0x50] sm:$0xff] %vm17583_vm9, %v4523_v28  ;;  %v10207_v56 = vpop.eup %10206  ;;  %vm4047_vm5 = vmor %vm4045_vm15, %vm4046_vm4 }
 0x45e   : > { %v4683_v45 = vld [vmem:[#allocation3 + $0x47] sm:$0xff]  ;;  %9759 = vrot.lane.b32.xlu1 %v9758_v39, %s17786_s29  ;;  %v4056_v59 = vmul.f32 %v10207_v56, %v4009_v60  ;;  %v4042_v29 = vsub.f32 1.0, %v4041_v38  ;;  %vm4061_vm1 = vweird.f32 %v10207_v56  ;;  %v8789_v60 = vmul.f32 -1.442695, %v13788_v26 }
 0x45f   : > { %v4621_v57 = vld [vmem:[#allocation3 + $0x48] sm:$0xff]  ;;  %vm4062_vm8 = vmor %vm4060_vm6, %vm4061_vm1  ;;  %v8790_v39 = vmul.f32 -1.442695, %v13798_v15 }
 0x460   : > { %v4057_v20 = vsub.f32 1.0, %v4056_v59  ;;  %v4043_v44 = vmul.f32 %v10205_v53, %v4042_v29  ;;  %10212 = vpow2.f32 %v8789_v60  ;;  %v10209_v38 = vpop.eup %10208  ;;  %v8794_v59 = vmul.f32 -1.442695, %v13814_v48 }
 0x461   : > { %10214 = vpow2.f32 %v8785_v6  ;;  %v10211_v29 = vpop.eup %10210  ;;  %v8805_v60 = vmul.f32 -1.442695, %v13860_v9 }
 0x462   : > { %v4058_v25 = vmul.f32 %v10207_v56, %v4057_v20  ;;  %v4044_v27 = vadd.f32 %v10205_v53, %v4043_v44 }
 0x464   : > { %v4684_v17 = vld [vmem:[#allocation3 + $0x4f] sm:$0xff]  ;;  %v4059_v52 = vadd.f32 %v10207_v56, %v4058_v25  ;;  %v4048_v18 = vsel %vm4047_vm5, %v10205_v53, %v4044_v27  ;;  %v8792_v53 = vmul.f32 -1.442695, %v13806_v36  ;;  %v13908_v25 = vadd.f32 1.0, %v10209_v38 }
 0x465   : > { %v9733_v47 = vpack.i.bf16 %v4684_v17, %v4683_v45  ;;  %v4622_v37 = vld [vmem:[#allocation3 + $0x50] sm:$0xff]  ;;  %v4053_v55 = vsel %vm4050_vm7, %v4052_v0, %v4048_v18  ;;  %v8791_v45 = vmul.f32 -1.442695, %v13802_v12  ;;  %v8799_v18 = vmul.f32 -1.442695, %v13834_v1 }
 0x466   : > { %v9748_v5 = vpack.i.bf16 %v4622_v37, %v4621_v57  ;;  %v4063_v41 = vsel %vm4062_vm8, %v10207_v56, %v4059_v52  ;;  %v4520_v58 = vmul.f32 %v4053_v55, %v13791_v11  ;;  %v8786_v11 = vmul.f32 -1.442695, %v13775_v49  ;;  %v10213_v44 = vpop.eup %10212 }
 0x467   : > { %9734 = vrot.lane.b32.xlu2 %v9733_v47, %s17786_s29  ;;  %v4068_v43 = vsel %vm4065_vm11, %v4067_v54, %v4063_v41  ;;  %v8793_v47 = vmul.f32 -1.442695, %v13810_v13  ;;  %v10215_v51 = vpop.eup %10214  ;;  %v8797_v57 = vmul.f32 -1.442695, %v13826_v14  ;;  %v13912_v27 = vadd.f32 1.0, %v10213_v44 }
 0x468   : > { %v4521_v33 = vmul.f32 %v4068_v43, %v13794_v22  ;;  %4553 = vst.msk [vmem:[#allocation3 + $0x28] sm:$0xff] %vm17583_vm9, %v4520_v58  ;;  %v8787_v22 = vmul.f32 -1.442695, %v13779_v3  ;;  %10216 = vpow2.f32 %v8786_v11  ;;  %v8798_v52 = vmul.f32 -1.442695, %v13830_v32 }
 0x469   : > { %v8800_v54 = vmul.f32 -1.442695, %v13838_v16  ;;  %v8801_v55 = vmul.f32 -1.442695, %v13842_v42  ;;  %v8802_v41 = vmul.f32 -1.442695, %v13846_v35  ;;  %vm4195_vm12 = vweird.f32 %v13908_v25 }
 0x46a   : > { %4554 = vst.msk [vmem:[#allocation3 + $0x30] sm:$0xff] %vm17583_vm9, %v4521_v33  ;;  %10218 = vpow2.f32 %v8787_v22  ;;  %v13919_v43 = vadd.f32 1.0, %v10211_v29  ;;  %v8803_v33 = vmul.f32 -1.442695, %v13851_v50  ;;  %v13923_v31 = vadd.f32 1.0, %v10215_v51 }
 0x46b   : > { %10220 = vpow2.f32 %v8790_v39  ;;  %v8807_v11 = vmul.f32 -1.442695, %v13868_v8  ;;  %v8808_v22 = vmul.f32 -1.442695, %v13872_v24  ;;  %vm4210_vm13 = vweird.f32 %v13912_v27 }
 0x46c   : > { %10222 = vpow2.f32 %v8791_v45 }
 0x46d   : > { %10224 = vpow2.f32 %v8792_v53  ;;  %v8809_v53 = vmul.f32 -1.442695, %v13876_v61 }
 0x46e   : > { %10226 = vpow2.f32 %v8793_v47  ;;  %v10217_v40 = vpop.eup %10216 }
 0x46f   : > { %9749 = vrot.lane.b32.xlu2 %v9748_v5, %s17786_s29  ;;  %v4681_v28 = vld [vmem:[#allocation3 + $0x27] sm:$0xff]  ;;  %10228 = vpow2.f32 %v8794_v59 }
 0x470   : > { %v4619_v17 = vld [vmem:[#allocation3 + $0x28] sm:$0xff]  ;;  %v10219_v37 = vpop.eup %10218  ;;  %10230 = vpow2.f32 %v8795_v4 }
 0x471   : > { %v4682_v23 = vld [vmem:[#allocation3 + $0x2f] sm:$0xff]  ;;  %v10221_v0 = vpop.eup %10220  ;;  %10232 = vpow2.f32 %v8796_v46  ;;  %v13933_v39 = vadd.f32 1.0, %v10219_v37 }
 0x472   : > { %v9723_v7 = vpack.i.bf16 %v4682_v23, %v4681_v28  ;;  %v4620_v56 = vld [vmem:[#allocation3 + $0x30] sm:$0xff]  ;;  %v10223_v5 = vpop.eup %10222  ;;  %10234 = vrcp.f32 %v13908_v25  ;;  %v13925_v28 = vadd.f32 1.0, %v10217_v40  ;;  %v8804_v23 = vmul.f32 -1.442695, %v13855_v19 }
 0x473   : > { %v9738_v20 = vpack.i.bf16 %v4620_v56, %v4619_v17  ;;  %v10225_v58 = vpop.eup %10224  ;;  %10236 = vpow2.f32 %v8797_v57  ;;  %v13945_v44 = vadd.f32 1.0, %v10223_v5  ;;  %v4201_v5 = vand.u32 2147483648, %v13908_v25 }
 0x474   : > { %9724 = vrot.lane.b32.xlu0 %v9723_v7, %s17786_s29  ;;  %v10227_v2 = vpop.eup %10226  ;;  %v8806_v7 = vmul.f32 -1.442695, %v13864_v63  ;;  %10238 = vrcp.f32 %v13912_v27  ;;  %v13948_v40 = vadd.f32 1.0, %v10225_v58  ;;  %vm4165_vm1 = vweird.f32 %v13925_v28 }
 0x475   : > { %v10229_v6 = vpop.eup %10228  ;;  %10240 = vpow2.f32 %v8798_v52  ;;  %17900 = vst [vmem:[#allocation34_spill] sm:$0xff] %v13945_v44  ;;  %vm4180_vm15 = vweird.f32 %v13933_v39  ;;  %v17921_v16 = vand.u32 2147483648, %v13925_v28  ;;  %v17925_v62 = vand.u32 2147483647, %v13933_v39 }
 0x476   : > { %v10231_v45 = vpop.eup %10230  ;;  %10242 = vpow2.f32 %v8799_v18  ;;  %v13954_v18 = vadd.f32 1.0, %v10227_v2  ;;  %v13962_v58 = vadd.f32 1.0, %v10229_v6  ;;  %v4216_v2 = vand.u32 2147483648, %v13912_v27 }
 0x477   : > { %v10233_v47 = vpop.eup %10232  ;;  %10244 = vpow2.f32 %v8800_v54  ;;  %v13966_v17 = vadd.f32 1.0, %v10231_v45  ;;  %v4172_v1 = vor.u32 1.1754944e-38, %v17921_v16  ;;  %vm14155_vm8 = vcmp.eq.f32.partialorder %v17925_v62, 8.507059e+37 }
 0x478   : > { %v13941_v4 = vpop.eup %10234  ;;  %10246 = vpow2.f32 %v8801_v55  ;;  %17901 = vst [vmem:[#allocation35_spill] sm:$0xff] %v13954_v18  ;;  %v13970_v29 = vadd.f32 1.0, %v10233_v47  ;;  %v17928_v15 = vand.u32 2147483648, %v13933_v39  ;;  %v17931_v48 = vand.u32 2147483648, %v13945_v44 }
 0x479   : > { %v10237_v51 = vpop.eup %10236  ;;  %10248 = vpow2.f32 %v8802_v41  ;;  %v4191_v55 = vmul.f32 %v13941_v4, %v13908_v25  ;;  %17902 = vst [vmem:[#allocation36_spill] sm:$0xff] %v13966_v17  ;;  %vm4196_vm10 = vweird.f32 %v13941_v4  ;;  %v17934_v30 = vand.u32 2147483648, %v13948_v40 }
 0x47a   : > { %v13952_v52 = vpop.eup %10238  ;;  %10250 = vpow2.f32 %v8803_v33  ;;  %v4214_v33 = vand.u32 2147483647, %v13912_v27  ;;  %17903 = vst [vmem:[#allocation37_spill] sm:$0xff] %v13970_v29  ;;  %vm4197_vm0 = vmor %vm4195_vm12, %vm4196_vm10  ;;  %v4187_v13 = vor.u32 1.1754944e-38, %v17928_v15  ;;  %v14178_v10 = vor.u32 1.1754944e-38, %v17931_v48 }
 0x47b   : > { %v10241_v54 = vpop.eup %10240  ;;  %10252 = vpow2.f32 %v8804_v23  ;;  %v4192_v23 = vsub.f32 1.0, %v4191_v55  ;;  %v4206_v37 = vmul.f32 %v13952_v52, %v13912_v27  ;;  %v13976_v55 = vadd.f32 1.0, %v10237_v51 }
 0x47c   : > { %9739 = vrot.lane.b32.xlu0 %v9738_v20, %s17786_s29  ;;  %v13943_v20 = vadd.f32 1.0, %v10221_v0  ;;  %v4199_v0 = vand.u32 2147483647, %v13908_v25  ;;  %v10243_v41 = vpop.eup %10242  ;;  %10254 = vpow2.f32 %v8805_v60  ;;  %v13978_v56 = vadd.f32 1.0, %v10241_v54  ;;  %17932 = vst [vmem:[#allocation54_spill] sm:$0xff] %v14178_v10 }
 0x47d   : > { %v10245_v38 = vpop.eup %10244  ;;  %10256 = vpow2.f32 %v8806_v7  ;;  %v4193_v59 = vmul.f32 %v13941_v4, %v4192_v23  ;;  %v4207_v7 = vsub.f32 1.0, %v4206_v37  ;;  %17904 = vst [vmem:[#allocation38_spill] sm:$0xff] %v13976_v55  ;;  %vm4211_vm14 = vweird.f32 %v13952_v52 }
 0x47e   : > { %v10247_v57 = vpop.eup %10246  ;;  %10258 = vpow2.f32 %v8807_v11  ;;  %17905 = vst [vmem:[#allocation39_spill] sm:$0xff] %v13978_v56  ;;  %v13985_v6 = vadd.f32 1.0, %v10243_v41  ;;  %v4202_v51 = vor.u32 1.1754944e-38, %v4201_v5  ;;  %vm4200_vm2 = vcmp.eq.f32.partialorder %v4199_v0, 8.507059e+37  ;;  %vm4212_vm3 = vmor %vm4210_vm13, %vm4211_vm14 }
 0x47f   : > { %v10249_v46 = vpop.eup %10248  ;;  %10260 = vpow2.f32 %v8808_v22  ;;  %v4194_v60 = vadd.f32 %v13941_v4, %v4193_v59  ;;  %v4208_v22 = vmul.f32 %v13952_v52, %v4207_v7  ;;  %v4217_v25 = vor.u32 1.1754944e-38, %v4216_v2 }
 0x480   : > { %v10251_v45 = vpop.eup %10250  ;;  %10262 = vpow2.f32 %v8809_v53  ;;  %vm4215_vm4 = vcmp.eq.f32.partialorder %v4214_v33, 8.507059e+37  ;;  %v14011_v27 = vadd.f32 1.0, %v10247_v57  ;;  %v17929_v36 = vand.u32 2147483648, %v13943_v20 }
 0x481   : > { %v10253_v47 = vpop.eup %10252  ;;  %10264 = vrcp.f32 %v13919_v43  ;;  %v4198_v59 = vsel %vm4197_vm0, %v13941_v4, %v4194_v60  ;;  %v4209_v54 = vadd.f32 %v13952_v52, %v4208_v22  ;;  %v14005_v22 = vadd.f32 1.0, %v10245_v38 }
 0x482   : > { %v10255_v23 = vpop.eup %10254  ;;  %10266 = vrcp.f32 %v13923_v31  ;;  %v4203_v11 = vsel %vm4200_vm2, %v4202_v51, %v4198_v59  ;;  %v14019_v38 = vadd.f32 1.0, %v10249_v46  ;;  %v14167_v21 = vor.u32 1.1754944e-38, %v17929_v36 }
 0x483   : > { %v10257_v37 = vpop.eup %10256  ;;  %10268 = vrcp.f32 %v13925_v28  ;;  %v4213_v4 = vsel %vm4212_vm3, %v13952_v52, %v4209_v54  ;;  %v4530_v0 = vmul.f32 %v4203_v11, %v13784_v34  ;;  %17906 = vst [vmem:[#allocation40_spill] sm:$0xff] %v14005_v22  ;;  %v14026_v54 = vadd.f32 1.0, %v10251_v45 }
 0x484   : > { %v10259_v41 = vpop.eup %10258  ;;  %10270 = vrcp.f32 %v13933_v39  ;;  %v4218_v59 = vsel %vm4215_vm4, %v4217_v25, %v4213_v4  ;;  %v14028_v25 = vadd.f32 1.0, %v10253_v47  ;;  %v14035_v4 = vadd.f32 1.0, %v10255_v23  ;;  %17930 = vst [vmem:[#allocation53_spill] sm:$0xff] %v14167_v21 }
 0x485   : > { %v10261_v5 = vpop.eup %10260  ;;  %10272 = vrcp.f32 %v13943_v20  ;;  %v4531_v52 = vmul.f32 %v4218_v59, %v13788_v26  ;;  %4563 = vst.msk [vmem:[#allocation3 + $0xc8] sm:$0xff] %vm17583_vm9, %v4530_v0  ;;  %v14042_v47 = vadd.f32 1.0, %v10257_v37  ;;  %v14049_v23 = vadd.f32 1.0, %v10259_v41 }
 0x486   : > { %v10263_v60 = vpop.eup %10262  ;;  %10274 = vrcp.f32 %v13945_v44  ;;  %v14056_v37 = vadd.f32 1.0, %v10261_v5  ;;  %v17916_v0 = vand.u32 2147483648, %v13919_v43  ;;  %v14186_v36 = vor.u32 1.1754944e-38, %v17934_v30 }
 0x487   : > { %v14009_v7 = vpop.eup %10264  ;;  %10276 = vrcp.f32 %v13948_v40  ;;  %4564 = vst.msk [vmem:[#allocation3 + $0xd0] sm:$0xff] %vm17583_vm9, %v4531_v52  ;;  %v14058_v33 = vadd.f32 1.0, %v10263_v60  ;;  %vm4135_vm13 = vweird.f32 %v13919_v43  ;;  %vm4150_vm10 = vweird.f32 %v13923_v31 }
 0x488   : > { %v14017_v34 = vpop.eup %10266  ;;  %10278 = vrcp.f32 %v13954_v18  ;;  %17907 = vst [vmem:[#allocation41_spill] sm:$0xff] %v14042_v47  ;;  %v14116_v59 = vmul.f32 %v14009_v7, %v13919_v43  ;;  %v14120_v41 = vor.u32 1.1754944e-38, %v17916_v0  ;;  %vm4136_vm11 = vweird.f32 %v14009_v7 }
 0x489   : > { %v14024_v57 = vpop.eup %10268  ;;  %10280 = vrcp.f32 %v13962_v58  ;;  %17909 = vst [vmem:[#allocation43_spill] sm:$0xff] %v14049_v23  ;;  %v14124_v5 = vmul.f32 %v14017_v34, %v13923_v31  ;;  %vm4151_vm12 = vweird.f32 %v14017_v34  ;;  %v17970_v14 = vand.u32 2147483648, %v14035_v4 }
 0x48a   : > { %v14033_v46 = vpop.eup %10270  ;;  %10282 = vrcp.f32 %v13966_v17  ;;  %17910 = vst [vmem:[#allocation44_spill] sm:$0xff] %v14056_v37  ;;  %v4161_v35 = vmul.f32 %v14024_v57, %v13925_v28  ;;  %vm4166_vm5 = vweird.f32 %v14024_v57 }
 0x48b   : > { %v14040_v45 = vpop.eup %10272  ;;  %10284 = vrcp.f32 %v13970_v29  ;;  %17911 = vst [vmem:[#allocation45_spill] sm:$0xff] %v14058_v33  ;;  %v4176_v0 = vmul.f32 %v14033_v46, %v13933_v39  ;;  %vm4181_vm6 = vweird.f32 %v14033_v46  ;;  %vm14266_vm2 = vmor %vm4165_vm1, %vm4166_vm5  ;;  %v17964_v39 = vand.u32 2147483648, %v14019_v38 }
 0x48c   : > { %v14047_v11 = vpop.eup %10274  ;;  %10286 = vrcp.f32 %v13976_v55  ;;  %v4691_v51 = vld [vmem:[#allocation3 + $0xc7] sm:$0xff]  ;;  %17917 = vst [vmem:[#allocation50_spill] sm:$0xff] %v14120_v41  ;;  %v14163_v16 = vmul.f32 %v14040_v45, %v13943_v20  ;;  %v4162_v10 = vsub.f32 1.0, %v4161_v35  ;;  %vm4182_vm3 = vmor %vm4180_vm15, %vm4181_vm6  ;;  %vm4226_vm4 = vweird.f32 %v14040_v45 }
 0x48d   : > { %17908 = vst [vmem:[#allocation42_spill] sm:$0xff] %v14047_v11  ;;  %v14054_v26 = vpop.eup %10276  ;;  %10288 = vrcp.f32 %v13978_v56  ;;  %v14174_v62 = vmul.f32 %v14047_v11, %v13945_v44  ;;  %v17937_v44 = vand.u32 2147483648, %v13954_v18  ;;  %vm14351_vm1 = vmor %vm4135_vm13, %vm4136_vm11  ;;  %vm4225_vm6 = vweird.f32 %v13943_v20 }
 0x48e   : > { %v14062_v52 = vpop.eup %10278  ;;  %10290 = vrcp.f32 %v13985_v6  ;;  %v4692_v24 = vld [vmem:[#allocation3 + $0xcf] sm:$0xff]  ;;  %v14182_v15 = vmul.f32 %v14054_v26, %v13948_v40  ;;  %17935 = vst [vmem:[#allocation56_spill] sm:$0xff] %v14186_v36  ;;  %v17939_v36 = vand.u32 2147483648, %v13962_v58  ;;  %vm4256_vm15 = vweird.f32 %v14054_v26  ;;  %vm4152_vm5 = vmor %vm4150_vm10, %vm4151_vm12 }
 0x48f   : > { %17912 = vst [vmem:[#allocation46_spill] sm:$0xff] %v14062_v52  ;;  %v14068_v53 = vpop.eup %10280  ;;  %10292 = vrcp.f32 %v14005_v22  ;;  %v9773_v2 = vpack.i.bf16 %v4692_v24, %v4691_v51  ;;  %v14193_v11 = vmul.f32 %v14062_v52, %v13954_v18  ;;  %v14197_v48 = vor.u32 1.1754944e-38, %v17937_v44 }
 0x490   : > { %v14074_v61 = vpop.eup %10282  ;;  %10294 = vrcp.f32 %v14011_v27  ;;  %17933 = vst [vmem:[#allocation55_spill] sm:$0xff] %v14182_v15  ;;  %v14204_v30 = vmul.f32 %v14068_v53, %v13962_v58  ;;  %v14208_v15 = vor.u32 1.1754944e-38, %v17939_v36  ;;  %v17942_v44 = vand.u32 2147483648, %v13966_v17 }
 0x491   : > { %v14080_v8 = vpop.eup %10284  ;;  %10296 = vrcp.f32 %v14019_v38  ;;  %9774 = vrot.lane.b32.xlu1 %v9773_v2, %s17786_s29  ;;  %v17919_v2 = vand.u32 2147483648, %v13923_v31  ;;  %17936 = vst [vmem:[#allocation57_spill] sm:$0xff] %v14193_v11  ;;  %v14212_v11 = vmul.f32 %v14074_v61, %v13966_v17  ;;  %v17944_v18 = vand.u32 2147483648, %v13970_v29 }
 0x492   : > { %17913 = vst [vmem:[#allocation47_spill] sm:$0xff] %v14080_v8  ;;  %v14085_v63 = vpop.eup %10286  ;;  %10298 = vrcp.f32 %v14026_v54  ;;  %v14216_v35 = vor.u32 1.1754944e-38, %v17942_v44  ;;  %vm4285_vm11 = vweird.f32 %v13962_v58  ;;  %vm4301_vm12 = vweird.f32 %v14074_v61 }
 0x493   : > { %17914 = vst [vmem:[#allocation48_spill] sm:$0xff] %v14085_v63  ;;  %v14091_v9 = vpop.eup %10288  ;;  %10300 = vrcp.f32 %v14028_v25  ;;  %v14132_v50 = vor.u32 1.1754944e-38, %v17919_v2  ;;  %v17922_v2 = vand.u32 2147483647, %v13925_v28  ;;  %v14227_v36 = vor.u32 1.1754944e-38, %v17944_v18 }
 0x494   : > { %17915 = vst [vmem:[#allocation49_spill] sm:$0xff] %v14091_v9  ;;  %v14098_v51 = vpop.eup %10290  ;;  %10302 = vrcp.f32 %v14035_v4  ;;  %v14235_v44 = vmul.f32 %v14085_v63, %v13976_v55  ;;  %v17948_v18 = vand.u32 2147483648, %v13978_v56 }
 0x495   : > { %v14104_v60 = vpop.eup %10292  ;;  %10304 = vrcp.f32 %v14042_v47  ;;  %17920 = vst [vmem:[#allocation52_spill] sm:$0xff] %v14132_v50  ;;  %vm14149_vm7 = vcmp.eq.f32.partialorder %v17922_v2, 8.507059e+37  ;;  %v4177_v50 = vsub.f32 1.0, %v4176_v0 }
 0x496   : > { %v14110_v19 = vpop.eup %10294  ;;  %10306 = vrcp.f32 %v14049_v23  ;;  %17938 = vst [vmem:[#allocation58_spill] sm:$0xff] %v14197_v48  ;;  %v14223_v48 = vmul.f32 %v14080_v8, %v13970_v29  ;;  %v14243_v8 = vmul.f32 %v14091_v9, %v13978_v56  ;;  %v17953_v29 = vand.u32 2147483647, %v13923_v31 }
 0x497   : > { %v14126_v24 = vpop.eup %10296  ;;  %10308 = vrcp.f32 %v14056_v37  ;;  %17940 = vst [vmem:[#allocation59_spill] sm:$0xff] %v14208_v15  ;;  %v4163_v15 = vmul.f32 %v14024_v57, %v4162_v10  ;;  %v4178_v52 = vmul.f32 %v14033_v46, %v4177_v50  ;;  %v17950_v10 = vand.u32 2147483647, %v13919_v43  ;;  %v17982_v50 = vld [vmem:[#allocation46_spill] sm:$0xff] }
 0x498   : > { %17918 = vst [vmem:[#allocation51_spill] sm:$0xff] %v14126_v24  ;;  %v14138_v42 = vpop.eup %10298  ;;  %10310 = vrcp.f32 %v14058_v33  ;;  %vm14257_vm0 = vcmp.eq.f32.partialorder %v17953_v29, 8.507059e+37  ;;  %v14275_v29 = vmul.f32 %v14098_v51, %v13985_v6  ;;  %v14283_v28 = vmul.f32 %v14104_v60, %v14005_v22 }
 0x499   : > { %v14145_v32 = vpop.eup %10300  ;;  %17941 = vst [vmem:[#allocation60_spill] sm:$0xff] %v14212_v11  ;;  %vm14251_vm14 = vcmp.eq.f32.partialorder %v17950_v10, 8.507059e+37  ;;  %v4179_v10 = vadd.f32 %v14033_v46, %v4178_v52  ;;  %v17960_v9 = vand.u32 2147483648, %v14005_v22  ;;  %v17962_v52 = vand.u32 2147483648, %v14011_v27 }
 0x49a   : > { %v14169_v2 = vpop.eup %10302  ;;  %17943 = vst [vmem:[#allocation61_spill] sm:$0xff] %v14216_v35  ;;  %v17946_v35 = vand.u32 2147483648, %v13976_v55  ;;  %v14331_v12 = vmul.f32 %v14145_v32, %v14028_v25  ;;  %v4237_v31 = vsub.f32 1.0, %v14174_v62  ;;  %v4312_v55 = vsub.f32 1.0, %v14223_v48  ;;  %v17988_v48 = vld [vmem:[#allocation47_spill] sm:$0xff] }
 0x49b   : > { %v14188_v21 = vpop.eup %10304  ;;  %17945 = vst [vmem:[#allocation62_spill] sm:$0xff] %v14227_v36  ;;  %v14247_v36 = vor.u32 1.1754944e-38, %v17948_v18  ;;  %v14287_v63 = vor.u32 1.1754944e-38, %v17960_v9  ;;  %v4183_v9 = vsel %vm4182_vm3, %v14033_v46, %v4179_v10  ;;  %v14323_v18 = vmul.f32 %v14138_v42, %v14026_v54 }
 0x49c   : > { %v14199_v41 = vpop.eup %10306  ;;  %v14239_v17 = vor.u32 1.1754944e-38, %v17946_v35  ;;  %v4164_v35 = vadd.f32 %v14024_v57, %v4163_v15  ;;  %v17958_v15 = vand.u32 2147483648, %v13985_v6  ;;  %v17966_v10 = vand.u32 2147483648, %v14026_v54 }
 0x49d   : > { %v14218_v0 = vpop.eup %10308  ;;  %17949 = vst [vmem:[#allocation64_spill] sm:$0xff] %v14247_v36  ;;  %v4132_v36 = vsub.f32 1.0, %v14116_v59  ;;  %v14295_v59 = vmul.f32 %v14110_v19, %v14011_v27  ;;  %v14368_v43 = vmul.f32 %v14199_v41, %v14049_v23 }
 0x49e   : > { %v14231_v11 = vpop.eup %10310  ;;  %17947 = vst [vmem:[#allocation63_spill] sm:$0xff] %v14239_v17  ;;  %v4147_v17 = vsub.f32 1.0, %v14124_v5  ;;  %v14279_v56 = vor.u32 1.1754944e-38, %v17958_v15  ;;  %v14299_v5 = vor.u32 1.1754944e-38, %v17962_v52  ;;  %v4168_v15 = vsel %vm14266_vm2, %v14024_v57, %v4164_v35 }
 0x49f   : > { %17961 = vst [vmem:[#allocation66_spill] sm:$0xff] %v14287_v63  ;;  %v14307_v63 = vmul.f32 %v14126_v24, %v14019_v38  ;;  %v4173_v22 = vsel %vm14149_vm7, %v4172_v1, %v4168_v15  ;;  %v4188_v52 = vsel %vm14155_vm8, %v4187_v13, %v4183_v9  ;;  %v4133_v46 = vmul.f32 %v14009_v7, %v4132_v36 }
 0x4a0   : > { %17959 = vst [vmem:[#allocation65_spill] sm:$0xff] %v14279_v56  ;;  %v14311_v56 = vor.u32 1.1754944e-38, %v17964_v39  ;;  %v4529_v57 = vmul.f32 %v4188_v52, %v13779_v3  ;;  %v4148_v35 = vmul.f32 %v14017_v34, %v4147_v17  ;;  %v14327_v39 = vor.u32 1.1754944e-38, %v17966_v10  ;;  %v17980_v17 = vld [vmem:[#allocation14_spill] sm:$0xff] }
 0x4a1   : > { %17963 = vst [vmem:[#allocation67_spill] sm:$0xff] %v14299_v5  ;;  %v4528_v5 = vmul.f32 %v4173_v22, %v13775_v49  ;;  %v17968_v49 = vand.u32 2147483648, %v14028_v25  ;;  %v14340_v3 = vmul.f32 %v14169_v2, %v14035_v4  ;;  %v14344_v1 = vor.u32 1.1754944e-38, %v17970_v14 }
 0x4a2   : > { %17965 = vst [vmem:[#allocation68_spill] sm:$0xff] %v14311_v56  ;;  %v4134_v22 = vadd.f32 %v14009_v7, %v4133_v46  ;;  %v4149_v36 = vadd.f32 %v14017_v34, %v4148_v35  ;;  %v14360_v15 = vmul.f32 %v14188_v21, %v14042_v47  ;;  %v14372_v52 = vmul.f32 %v14218_v0, %v14056_v37  ;;  %v17984_v56 = vld [vmem:[#allocation36_spill] sm:$0xff] }
 0x4a3   : > { %17967 = vst [vmem:[#allocation69_spill] sm:$0xff] %v14327_v39  ;;  %v14335_v13 = vor.u32 1.1754944e-38, %v17968_v49  ;;  %vm4286_vm7 = vweird.f32 %v14068_v53  ;;  %v14383_v46 = vmul.f32 %v14231_v11, %v14058_v33  ;;  %v4222_v35 = vsub.f32 1.0, %v14163_v16  ;;  %v17976_v49 = vld [vmem:[#allocation55_spill] sm:$0xff]  ;;  %v4630_v39 = vld [vmem:[#allocation3 + $0xd0] sm:$0xff] }
 0x4a4   : > { %17971 = vst [vmem:[#allocation71_spill] sm:$0xff] %v14344_v1  ;;  %v4138_v10 = vsel %vm14351_vm1, %v14009_v7, %v4134_v22  ;;  %vm4255_vm8 = vweird.f32 %v13948_v40  ;;  %v4252_v14 = vsub.f32 1.0, %v17976_v49  ;;  %v17978_v1 = vld [vmem:[#allocation52_spill] sm:$0xff]  ;;  %v4282_v7 = vsub.f32 1.0, %v14204_v30  ;;  %v17985_v33 = vld [vmem:[#allocation42_spill] sm:$0xff] }
 0x4a5   : > { %17969 = vst [vmem:[#allocation70_spill] sm:$0xff] %v14335_v13  ;;  %v4629_v13 = vld [vmem:[#allocation3 + $0xc8] sm:$0xff]  ;;  %vm4300_vm10 = vweird.f32 %v17984_v56  ;;  %v4357_v30 = vsub.f32 1.0, %v14275_v29  ;;  %v4447_v29 = vsub.f32 1.0, %v14340_v3 }
 0x4a6   : > { %4561 = vst.msk [vmem:[#allocation3 + $0xa8] sm:$0xff] %vm17583_vm9, %v4528_v5  ;;  %v17974_v5 = vand.u32 2147483648, %v14042_v47  ;;  %v4283_v37 = vmul.f32 %v14068_v53, %v4282_v7  ;;  %v4253_v23 = vmul.f32 %v14054_v26, %v4252_v14  ;;  %v17993_v47 = vld [vmem:[#allocation38_spill] sm:$0xff]  ;;  %v17995_v7 = vmov 0  ;;  %vm14559_vm13 = vmor %vm4300_vm10, %vm4301_vm12 }
 0x4a7   : > { %4562 = vst.msk [vmem:[#allocation3 + $0xb0] sm:$0xff] %vm17583_vm9, %v4529_v57  ;;  %v4153_v57 = vsel %vm4152_vm5, %v14017_v34, %v4149_v36  ;;  %v17979_v34 = vld [vmem:[#allocation60_spill] sm:$0xff]  ;;  %v17981_v36 = vld [vmem:[#allocation17_spill] sm:$0xff]  ;;  %v4223_v14 = vmul.f32 %v14040_v45, %v4222_v35  ;;  %vm18041_vm10 = vweird.f32 %v17982_v50 }
 0x4a8   : > { %v14364_v9 = vor.u32 1.1754944e-38, %v17974_v5  ;;  %v17977_v5 = vld [vmem:[#allocation50_spill] sm:$0xff]  ;;  %v4158_v16 = vsel %vm14257_vm0, %v17978_v1, %v4153_v57  ;;  %v4297_v62 = vsub.f32 1.0, %v17979_v34  ;;  %v4327_v1 = vsub.f32 1.0, %v14235_v44 }
 0x4a9   : > { %v4527_v49 = vmul.f32 %v4158_v16, %v17981_v36  ;;  %v4342_v57 = vsub.f32 1.0, %v14243_v8  ;;  %v4387_v16 = vsub.f32 1.0, %v14295_v59  ;;  %v14416_v34 = vpack.i.bf16 %v4630_v39, %v4629_v13  ;;  %v17990_v59 = vld [vmem:[#allocation48_spill] sm:$0xff] }
 0x4aa   : > { %17975 = vst [vmem:[#allocation72_spill] sm:$0xff] %v14364_v9  ;;  %v4143_v9 = vsel %vm14251_vm14, %v17977_v5, %v4138_v10  ;;  %v17983_v10 = vld [vmem:[#allocation57_spill] sm:$0xff]  ;;  %v4402_v8 = vsub.f32 1.0, %v14307_v63  ;;  %v4417_v36 = vsub.f32 1.0, %v14323_v18  ;;  %v4462_v13 = vsub.f32 1.0, %v14360_v15 }
 0x4ab   : > { %v4526_v22 = vmul.f32 %v4143_v9, %v17980_v17  ;;  %v4267_v5 = vsub.f32 1.0, %v17983_v10  ;;  %v4372_v9 = vsub.f32 1.0, %v14283_v28  ;;  %17986 = vst [vmem:[#allocation55_spill] sm:$0xff] %v14416_v34  ;;  %v17987_v17 = vld [vmem:[#allocation35_spill] sm:$0xff]  ;;  %v4432_v10 = vsub.f32 1.0, %v14331_v12  ;;  %v17989_v28 = vld [vmem:[#allocation34_spill] sm:$0xff]  ;;  %9789 = vrot.lane.b32.xlu1 %v14416_v34, %s17786_s29 }
 0x4ac   : > { %4560 = vst.msk [vmem:[#allocation3 + $0x90] sm:$0xff] %vm17583_vm9, %v4527_v49  ;;  %v4298_v63 = vmul.f32 %v14074_v61, %v4297_v62  ;;  %v17991_v18 = vld [vmem:[#allocation37_spill] sm:$0xff]  ;;  %v4492_v49 = vsub.f32 1.0, %v14372_v52  ;;  %v17998_v62 = vand.u32 2147483647, %v17984_v56  ;;  %v17999_v34 = vmov 0 }
 0x4ad   : > { %4559 = vst.msk [vmem:[#allocation3 + $0x88] sm:$0xff] %vm17583_vm9, %v4526_v22  ;;  %v4689_v44 = vld [vmem:[#allocation3 + $0xa7] sm:$0xff]  ;;  %v4477_v22 = vsub.f32 1.0, %v14368_v43  ;;  %v4268_v15 = vmul.f32 %v17982_v50, %v4267_v5  ;;  %v17994_v43 = vand.u32 2147483647, %v13962_v58  ;;  %v4507_v52 = vsub.f32 1.0, %v14383_v46  ;;  %vm14474_vm9 = vmor %vm4225_vm6, %vm4226_vm4 }
 0x4ae   : > { %v4690_v39 = vld [vmem:[#allocation3 + $0xaf] sm:$0xff]  ;;  %vm14447_vm5 = vcmp.eq.f32.partialorder %v17998_v62, 8.507059e+37  ;;  %v4238_v5 = vmul.f32 %v17985_v33, %v4237_v31  ;;  %v18007_v62 = vand.u32 2147483647, %v17987_v17  ;;  %v4328_v35 = vmul.f32 %v17990_v59, %v4327_v1  ;;  %vm14494_vm6 = vmor %vm4255_vm8, %vm4256_vm15  ;;  %v18066_v46 = vld [vmem:[#allocation51_spill] sm:$0xff] }
 0x4af   : > { %v17992_v12 = vld [vmem:[#allocation49_spill] sm:$0xff]  ;;  %v9763_v3 = vpack.i.bf16 %v4690_v39, %v4689_v44  ;;  %vm14441_vm2 = vcmp.eq.f32.partialorder %v17994_v43, 8.507059e+37  ;;  %v18000_v34 = vsel %vm14447_vm5, 4294967295, %v17999_v34  ;;  %v4313_v44 = vmul.f32 %v17988_v48, %v4312_v55  ;;  %v18002_v39 = vld [vmem:[#allocation39_spill] sm:$0xff]  ;;  %vm14513_vm15 = vmor %vm4285_vm11, %vm4286_vm7 }
 0x4b0   : > { %v17996_v7 = vsel %vm14441_vm2, 4294967295, %v17995_v7  ;;  %18001 = vst [vmem:[#allocation52_spill] sm:$0xff] %v18000_v34  ;;  %v18003_v43 = vand.u32 2147483647, %v13948_v40  ;;  %vm14465_vm14 = vcmp.eq.f32.partialorder %v18007_v62, 8.507059e+37  ;;  %v18008_v34 = vmov 0 }
 0x4b1   : > { %17997 = vst [vmem:[#allocation50_spill] sm:$0xff] %v17996_v7  ;;  %v18004_v7 = vmov 0  ;;  %v18009_v34 = vsel %vm14465_vm14, 4294967295, %v18008_v34  ;;  %9764 = vrot.lane.b32.xlu2 %v9763_v3, %s17786_s29  ;;  %v4343_v31 = vmul.f32 %v17992_v12, %v4342_v57  ;;  %v4358_v55 = vmul.f32 %v14098_v51, %v4357_v30  ;;  %v18162_v40 = vld [vmem:[#allocation68_spill] sm:$0xff] }
 0x4b2   : > { %vm14459_vm3 = vcmp.eq.f32.partialorder %v18003_v43, 8.507059e+37  ;;  %18010 = vst [vmem:[#allocation14_spill] sm:$0xff] %v18009_v34  ;;  %v4373_v43 = vmul.f32 %v14104_v60, %v4372_v9  ;;  %v18013_v3 = vand.u32 2147483647, %v13943_v20  ;;  %v18014_v62 = vmov 0 }
 0x4b3   : > { %v18005_v7 = vsel %vm14459_vm3, 4294967295, %v18004_v7  ;;  %v4388_v57 = vmul.f32 %v14110_v19, %v4387_v16  ;;  %v4403_v30 = vmul.f32 %v14126_v24, %v4402_v8  ;;  %v4284_v20 = vadd.f32 %v14068_v53, %v4283_v37 }
 0x4b4   : > { %18006 = vst [vmem:[#allocation60_spill] sm:$0xff] %v18005_v7  ;;  %vm14485_vm0 = vcmp.eq.f32.partialorder %v18013_v3, 8.507059e+37  ;;  %v4299_v9 = vadd.f32 %v14074_v61, %v4298_v63  ;;  %v18019_v3 = vand.u32 2147483647, %v17989_v28  ;;  %v4687_v16 = vld [vmem:[#allocation3 + $0x87] sm:$0xff]  ;;  %v4418_v37 = vmul.f32 %v14138_v42, %v4417_v36  ;;  %v4688_v36 = vld [vmem:[#allocation3 + $0x8f] sm:$0xff] }
 0x4b5   : > { %v18015_v62 = vsel %vm14485_vm0, 4294967295, %v18014_v62  ;;  %v14519_v8 = vmul.f32 %v14145_v32, %v4432_v10  ;;  %v14522_v63 = vadd.f32 %v14054_v26, %v4253_v23  ;;  %v18027_v58 = vand.u32 2147483647, %v17991_v18  ;;  %v4627_v7 = vld [vmem:[#allocation3 + $0xa8] sm:$0xff] }
 0x4b6   : > { %18016 = vst [vmem:[#allocation17_spill] sm:$0xff] %v18015_v62  ;;  %vm14504_vm1 = vcmp.eq.f32.partialorder %v18019_v3, 8.507059e+37  ;;  %v18020_v62 = vmov 0  ;;  %v14525_v3 = vadd.f32 %v17982_v50, %v4268_v15  ;;  %v18028_v34 = vmov 0  ;;  %v4625_v56 = vld [vmem:[#allocation3 + $0x88] sm:$0xff] }
 0x4b7   : > { %v18021_v62 = vsel %vm14504_vm1, 4294967295, %v18020_v62  ;;  %18025 = vst [vmem:[#allocation57_spill] sm:$0xff] %v14519_v8  ;;  %vm14530_vm7 = vcmp.eq.f32.partialorder %v18027_v58, 8.507059e+37  ;;  %v14536_v10 = vmul.f32 %v14169_v2, %v4447_v29  ;;  %v14539_v23 = vmul.f32 %v14188_v21, %v4462_v13  ;;  %v4628_v58 = vld [vmem:[#allocation3 + $0xb0] sm:$0xff]  ;;  %v18172_v29 = vld [vmem:[#allocation69_spill] sm:$0xff] }
 0x4b8   : > { %18022 = vst [vmem:[#allocation46_spill] sm:$0xff] %v18021_v62  ;;  %v18026_v62 = vld [vmem:[#allocation40_spill] sm:$0xff]  ;;  %v18029_v34 = vsel %vm14530_vm7, 4294967295, %v18028_v34  ;;  %v14542_v15 = vmul.f32 %v14199_v41, %v4477_v22  ;;  %v14545_v8 = vadd.f32 %v14040_v45, %v4223_v14  ;;  %v18034_v24 = vmov 0 }
 0x4b9   : > { %18030 = vst [vmem:[#allocation36_spill] sm:$0xff] %v18029_v34  ;;  %v18033_v34 = vand.u32 2147483647, %v17993_v47  ;;  %v9753_v13 = vpack.i.bf16 %v4688_v36, %v4687_v16  ;;  %v14564_v22 = vmul.f32 %v14218_v0, %v4492_v49  ;;  %v14567_v14 = vmul.f32 %v14231_v11, %v4507_v52 }
 0x4ba   : > { %18031 = vst [vmem:[#allocation42_spill] sm:$0xff] %v14539_v23  ;;  %v18039_v23 = vmov 0  ;;  %v4314_v49 = vadd.f32 %v17988_v48, %v4313_v44  ;;  %v14588_v52 = vadd.f32 %v17990_v59, %v4328_v35  ;;  %v4303_v16 = vsel %vm14559_vm13, %v14074_v61, %v4299_v9  ;;  %v18155_v9 = vld [vmem:[#allocation67_spill] sm:$0xff] }
 0x4bb   : > { %18032 = vst [vmem:[#allocation35_spill] sm:$0xff] %v14542_v15  ;;  %vm14550_vm11 = vcmp.eq.f32.partialorder %v18033_v34, 8.507059e+37  ;;  %v4239_v34 = vadd.f32 %v17985_v33, %v4238_v5  ;;  %v18038_v15 = vand.u32 2147483647, %v18002_v39  ;;  %v4288_v5 = vsel %vm14513_vm15, %v14068_v53, %v4284_v20  ;;  %9754 = vrot.lane.b32.xlu0 %v9753_v13, %s17786_s29 }
 0x4bc   : > { %v18035_v24 = vsel %vm14550_vm11, 4294967295, %v18034_v24  ;;  %vm18042_vm11 = vweird.f32 %v17987_v17  ;;  %v18045_v17 = vand.u32 2147483647, %v13985_v6  ;;  %vm18048_vm4 = vweird.f32 %v17985_v33 }
 0x4bd   : > { %vm14573_vm8 = vcmp.eq.f32.partialorder %v18038_v15, 8.507059e+37  ;;  %vm14582_vm7 = vmor %vm18042_vm11, %vm18041_vm10  ;;  %v14614_v61 = vadd.f32 %v17992_v12, %v4343_v31  ;;  %v14616_v44 = vpack.i.bf16 %v4628_v58, %v4627_v7  ;;  %v4258_v35 = vsel %vm14494_vm6, %v14054_v26, %v14522_v63  ;;  %v18071_v58 = vld [vmem:[#allocation41_spill] sm:$0xff] }
 0x4be   : > { %v18040_v23 = vsel %vm14573_vm8, 4294967295, %v18039_v23  ;;  %vm14599_vm11 = vcmp.eq.f32.partialorder %v18045_v17, 8.507059e+37  ;;  %vm18049_vm8 = vweird.f32 %v17989_v28  ;;  %v4273_v28 = vsel %vm14582_vm7, %v17982_v50, %v14525_v3  ;;  %v18069_v3 = vld [vmem:[#allocation61_spill] sm:$0xff]  ;;  %v18187_v17 = vld [vmem:[#allocation71_spill] sm:$0xff] }
 0x4bf   : > { %vm14608_vm1 = vmor %vm18049_vm8, %vm18048_vm4  ;;  %v18052_v20 = vand.u32 2147483647, %v18026_v62  ;;  %vm18055_vm8 = vweird.f32 %v17988_v48  ;;  %vm18056_vm10 = vweird.f32 %v17991_v18  ;;  %v4359_v50 = vadd.f32 %v14098_v51, %v4358_v55  ;;  %9779 = vrot.lane.b32.xlu2 %v14616_v44, %s17786_s29  ;;  %v18099_v55 = vld [vmem:[#allocation46_spill] sm:$0xff] }
 0x4c0   : > { %vm14638_vm6 = vmor %vm18056_vm10, %vm18055_vm8  ;;  %v14644_v7 = vadd.f32 %v14104_v60, %v4373_v43  ;;  %v14647_v31 = vadd.f32 %v14110_v19, %v4388_v57  ;;  %v4228_v1 = vsel %vm14474_vm9, %v14040_v45, %v14545_v8  ;;  %v18059_v18 = vand.u32 2147483647, %v14011_v27  ;;  %v18067_v57 = vld [vmem:[#allocation59_spill] sm:$0xff] }
 0x4c1   : > { %vm14629_vm4 = vcmp.eq.f32.partialorder %v18052_v20, 8.507059e+37  ;;  %vm18062_vm15 = vweird.f32 %v17990_v59  ;;  %vm18063_vm13 = vweird.f32 %v17993_v47  ;;  %v14670_v45 = vadd.f32 %v18066_v46, %v4403_v30  ;;  %v18081_v20 = vld [vmem:[#allocation58_spill] sm:$0xff] }
 0x4c2   : > { %vm14656_vm10 = vcmp.eq.f32.partialorder %v18059_v18, 8.507059e+37  ;;  %vm14665_vm12 = vmor %vm18063_vm13, %vm18062_vm15  ;;  %v4243_v43 = vsel %vm14608_vm1, %v17985_v33, %v4239_v34  ;;  %v4293_v63 = vsel %vm14441_vm2, %v18067_v57, %v4288_v5  ;;  %v4308_v15 = vsel %vm14447_vm5, %v18069_v3, %v4303_v16  ;;  %v4626_v5 = vld [vmem:[#allocation3 + $0x90] sm:$0xff]  ;;  %v18079_v16 = vld [vmem:[#allocation56_spill] sm:$0xff] }
 0x4c3   : > { %v18072_v30 = vand.u32 2147483647, %v14019_v38  ;;  %vm18075_vm1 = vweird.f32 %v17992_v12  ;;  %vm18076_vm8 = vweird.f32 %v18002_v39  ;;  %v14700_v13 = vadd.f32 %v14138_v42, %v4418_v37  ;;  %v18083_v57 = vld [vmem:[#allocation43_spill] sm:$0xff]  ;;  %v18092_v3 = vld [vmem:[#allocation53_spill] sm:$0xff]  ;;  %v18180_v37 = vld [vmem:[#allocation70_spill] sm:$0xff] }
 0x4c4   : > { %vm14695_vm7 = vmor %vm18076_vm8, %vm18075_vm1  ;;  %v4318_v34 = vsel %vm14638_vm6, %v17988_v48, %v4314_v49  ;;  %v4263_v53 = vsel %vm14459_vm3, %v18079_v16, %v4258_v35  ;;  %v4278_v39 = vsel %vm14465_vm14, %v18081_v20, %v4273_v28  ;;  %v18084_v8 = vand.u32 2147483647, %v14026_v54  ;;  %v18091_v49 = vld [vmem:[#allocation57_spill] sm:$0xff]  ;;  %v18114_v48 = vld [vmem:[#allocation18_spill] sm:$0xff] }
 0x4c5   : > { %vm14686_vm13 = vcmp.eq.f32.partialorder %v18072_v30, 8.507059e+37  ;;  %vm18087_vm6 = vweird.f32 %v14098_v51  ;;  %vm18088_vm8 = vweird.f32 %v13985_v6  ;;  %v14728_v35 = vadd.f32 %v14145_v32, %v18091_v49  ;;  %v18094_v30 = vld [vmem:[#allocation44_spill] sm:$0xff]  ;;  %v18102_v20 = vld [vmem:[#allocation13_spill] sm:$0xff]  ;;  %v18115_v6 = vld [vmem:[#allocation15_spill] sm:$0xff] }
 0x4c6   : > { %vm14714_vm5 = vcmp.eq.f32.partialorder %v18084_v8, 8.507059e+37  ;;  %vm14722_vm1 = vmor %vm18088_vm8, %vm18087_vm6  ;;  %v4333_v28 = vsel %vm14665_vm12, %v17990_v59, %v14588_v52  ;;  %v4348_v26 = vsel %vm14695_vm7, %v17992_v12, %v14614_v61  ;;  %v4233_v47 = vsel %vm14485_vm0, %v18092_v3, %v4228_v1  ;;  %v18098_v52 = vld [vmem:[#allocation54_spill] sm:$0xff]  ;;  %v18101_v61 = vld [vmem:[#allocation21_spill] sm:$0xff] }
 0x4c7   : > { %v18095_v16 = vand.u32 2147483647, %v14028_v25  ;;  %v4363_v59 = vsel %vm14722_vm1, %v14098_v51, %v4359_v50  ;;  %vm18100_vm12 = vnez %v18099_v55  ;;  %v4536_v33 = vmul.f32 %v4293_v63, %v18101_v61  ;;  %v18103_v18 = vld [vmem:[#allocation45_spill] sm:$0xff]  ;;  %v18112_v63 = vld [vmem:[#allocation36_spill] sm:$0xff] }
 0x4c8   : > { %v4248_v12 = vsel %vm18100_vm12, %v18098_v52, %v4243_v43  ;;  %v4537_v1 = vmul.f32 %v4308_v15, %v18102_v20  ;;  %v18104_v8 = vand.u32 2147483647, %v14035_v4  ;;  %vm18107_vm6 = vweird.f32 %v14104_v60  ;;  %v18111_v43 = vld [vmem:[#allocation62_spill] sm:$0xff]  ;;  %v18141_v61 = vld [vmem:[#allocation16_spill] sm:$0xff]  ;;  %v18147_v20 = vld [vmem:[#allocation35_spill] sm:$0xff] }
 0x4c9   : > { %vm14744_vm3 = vcmp.eq.f32.partialorder %v18095_v16, 8.507059e+37  ;;  %vm18108_vm8 = vweird.f32 %v18026_v62  ;;  %v14771_v50 = vpack.i.bf16 %v4626_v5, %v4625_v56  ;;  %vm18113_vm12 = vnez %v18112_v63  ;;  %v18123_v5 = vld [vmem:[#allocation63_spill] sm:$0xff] }
 0x4ca   : > { %vm14759_vm7 = vcmp.eq.f32.partialorder %v18104_v8, 8.507059e+37  ;;  %vm14767_vm1 = vmor %vm18108_vm8, %vm18107_vm6  ;;  %v4323_v15 = vsel %vm18113_vm12, %v18111_v43, %v4318_v34  ;;  %v4534_v3 = vmul.f32 %v4263_v53, %v18114_v48  ;;  %v4535_v16 = vmul.f32 %v4278_v39, %v18115_v6  ;;  %v18126_v39 = vld [vmem:[#allocation19_spill] sm:$0xff]  ;;  %v18156_v43 = vld [vmem:[#allocation22_spill] sm:$0xff] }
 0x4cb   : > { %v18116_v52 = vand.u32 2147483647, %v18071_v58  ;;  %vm18119_vm6 = vweird.f32 %v14110_v19  ;;  %vm18120_vm8 = vweird.f32 %v14011_v27  ;;  %v4449_v34 = vadd.f32 %v14169_v2, %v14536_v10  ;;  %9769 = vrot.lane.b32.xlu0 %v14771_v50, %s17786_s29 }
 0x4cc   : > { %vm14788_vm14 = vmor %vm18120_vm8, %vm18119_vm6  ;;  %v4378_v56 = vsel %vm14767_vm1, %v14104_v60, %v14644_v7  ;;  %vm18124_vm12 = vnez %v18035_v24  ;;  %vm18125_vm15 = vcmask 523264   ;;  %v4532_v27 = vmul.f32 %v4233_v47, %v18126_v39  ;;  %v18131_v24 = vld [vmem:[#allocation64_spill] sm:$0xff]  ;;  %v18181_v39 = vld [vmem:[#allocation25_spill] sm:$0xff] }
 0x4cd   : > { %vm14780_vm0 = vcmp.eq.f32.partialorder %v18116_v52, 8.507059e+37  ;;  %v4338_v53 = vsel %vm18124_vm12, %v18123_v5, %v4333_v28  ;;  %4569 = vst.msk [vmem:[#allocation3 + $0x128] sm:$0xff] %vm18125_vm15, %v4536_v33  ;;  %vm4511_vm6 = vweird.f32 %v14231_v11  ;;  %vm18127_vm8 = vweird.f32 %v18066_v46  ;;  %v18134_v28 = vld [vmem:[#allocation20_spill] sm:$0xff] }
 0x4ce   : > { %vm18128_vm2 = vweird.f32 %v14019_v38  ;;  %v4393_v60 = vsel %vm14788_vm14, %v14110_v19, %v14647_v31  ;;  %vm18132_vm15 = vnez %v18040_v23  ;;  %vm18133_vm1 = vcmask 523264   ;;  %v18139_v19 = vld [vmem:[#allocation42_spill] sm:$0xff] }
 0x4cf   : > { %vm14808_vm9 = vmor %vm18128_vm2, %vm18127_vm8  ;;  %v4353_v7 = vsel %vm18132_vm15, %v18131_v24, %v4348_v26  ;;  %4570 = vst.msk [vmem:[#allocation3 + $0x130] sm:$0xff] %vm18133_vm1, %v4537_v1  ;;  %v4533_v38 = vmul.f32 %v4248_v12, %v18134_v28  ;;  %vm18135_vm2 = vweird.f32 %v14138_v42  ;;  %vm18136_vm12 = vweird.f32 %v14026_v54  ;;  %v18140_v26 = vld [vmem:[#allocation65_spill] sm:$0xff]  ;;  %v18188_v28 = vld [vmem:[#allocation26_spill] sm:$0xff] }
 0x4d0   : > { %vm14827_vm8 = vmor %vm18136_vm12, %vm18135_vm2  ;;  %v4464_v31 = vadd.f32 %v14188_v21, %v18139_v19  ;;  %v4408_v23 = vsel %vm14808_vm9, %v18066_v46, %v14670_v45  ;;  %v4368_v12 = vsel %vm14599_vm11, %v18140_v26, %v4363_v59  ;;  %v4538_v33 = vmul.f32 %v4323_v15, %v18141_v61  ;;  %v18148_v46 = vld [vmem:[#allocation66_spill] sm:$0xff]  ;;  %v18149_v59 = vld [vmem:[#allocation12_spill] sm:$0xff] }
 0x4d1   : > { %vm18142_vm14 = vmmov %vm18133_vm1  ;;  %vm18143_vm15 = vweird.f32 %v14145_v32  ;;  %vm18144_vm1 = vweird.f32 %v14028_v25  ;;  %v4479_v1 = vadd.f32 %v14199_v41, %v18147_v20  ;;  %v4423_v36 = vsel %vm14827_vm8, %v14138_v42, %v14700_v13  ;;  %v18163_v15 = vld [vmem:[#allocation23_spill] sm:$0xff]  ;;  %v18190_v19 = vld [vmem:[#allocation72_spill] sm:$0xff] }
 0x4d2   : > { %4567 = vst.msk [vmem:[#allocation3 + $0x108] sm:$0xff] %vm18142_vm14, %v4534_v3  ;;  %vm14846_vm2 = vmor %vm18144_vm1, %vm18143_vm15  ;;  %v4383_v45 = vsel %vm14629_vm4, %v18148_v46, %v4378_v56  ;;  %v4539_v8 = vmul.f32 %v4338_v53, %v18149_v59  ;;  %vm18151_vm9 = vweird.f32 %v14169_v2  ;;  %vm18152_vm12 = vweird.f32 %v14035_v4  ;;  %v18191_v26 = vld [vmem:[#allocation27_spill] sm:$0xff]  ;;  %v18198_v46 = vld [vmem:[#allocation29_spill] sm:$0xff] }
 0x4d3   : > { %vm18150_vm11 = vmmov %vm18142_vm14  ;;  %v4494_v51 = vadd.f32 %v14218_v0, %v14564_v22  ;;  %v4438_v42 = vsel %vm14846_vm2, %v14145_v32, %v14728_v35  ;;  %v4398_v13 = vsel %vm14656_vm10, %v18155_v9, %v4393_v60  ;;  %v4540_v63 = vmul.f32 %v4353_v7, %v18156_v43  ;;  %v18200_v25 = vld [vmem:[#allocation30_spill] sm:$0xff]  ;;  %v18202_v9 = vld [vmem:[#allocation31_spill] sm:$0xff] }
 0x4d4   : > { %4568 = vst.msk [vmem:[#allocation3 + $0x110] sm:$0xff] %vm18150_vm11, %v4535_v16  ;;  %vm14865_vm14 = vmor %vm18152_vm12, %vm18151_vm9  ;;  %vm18158_vm8 = vweird.f32 %v14188_v21  ;;  %vm18159_vm15 = vweird.f32 %v18071_v58  ;;  %v4509_v22 = vadd.f32 %v14231_v11, %v14567_v14  ;;  %v4413_v35 = vsel %vm14686_vm13, %v18162_v40, %v4408_v23  ;;  %v18173_v16 = vld [vmem:[#allocation24_spill] sm:$0xff]  ;;  %v4635_v4 = vld [vmem:[#allocation3 + $0x128] sm:$0xff] }
 0x4d5   : > { %vm18157_vm4 = vmmov %vm18150_vm11  ;;  %v4453_v32 = vsel %vm14865_vm14, %v14169_v2, %v4449_v34  ;;  %v4541_v48 = vmul.f32 %v4368_v12, %v18163_v15  ;;  %v18165_v58 = vand.u32 2147483647, %v18083_v57  ;;  %vm18168_vm11 = vweird.f32 %v14199_v41  ;;  %v4697_v53 = vld [vmem:[#allocation3 + $0x127] sm:$0xff]  ;;  %v9153_v60 = vld [vmem:[%s17498_s9 + $0x30] sm:$0xff] }
 0x4d6   : > { %4565 = vst.msk [vmem:[#allocation3 + $0xe8] sm:$0xff] %vm18157_vm4, %v4532_v27  ;;  %vm14884_vm1 = vmor %vm18159_vm15, %vm18158_vm8  ;;  %vm18169_vm9 = vweird.f32 %v18083_v57  ;;  %v4428_v6 = vsel %vm14714_vm5, %v18172_v29, %v4423_v36  ;;  %v4542_v52 = vmul.f32 %v4383_v45, %v18173_v16  ;;  %v18175_v62 = vand.u32 2147483648, %v18083_v57  ;;  %v4698_v7 = vld [vmem:[#allocation3 + $0x12f] sm:$0xff]  ;;  %v18204_v43 = vld [vmem:[#allocation32_spill] sm:$0xff] }
 0x4d7   : > { %vm18164_vm10 = vmmov %vm18157_vm4  ;;  %vm14900_vm2 = vcmp.eq.f32.partialorder %v18165_v58, 8.507059e+37  ;;  %v4468_v14 = vsel %vm14884_vm1, %v14188_v21, %v4464_v31  ;;  %vm18176_vm14 = vweird.f32 %v14218_v0  ;;  %v4443_v5 = vsel %vm14744_vm3, %v18180_v37, %v4438_v42 }
 0x4d8   : > { %4566 = vst.msk [vmem:[#allocation3 + $0xf0] sm:$0xff] %vm18164_vm10, %v4533_v38  ;;  %vm14908_vm12 = vmor %vm18169_vm9, %vm18168_vm11  ;;  %v4487_v34 = vor.u32 1.1754944e-38, %v18175_v62  ;;  %v4543_v57 = vmul.f32 %v4398_v13, %v18181_v39  ;;  %v18183_v27 = vand.u32 2147483648, %v18094_v30  ;;  %vm18184_vm15 = vweird.f32 %v18103_v18  ;;  %v9154_v39 = vld [vmem:[%s17498_s9 + $0x38] sm:$0xff] }
 0x4d9   : > { %vm18174_vm13 = vmmov %vm18157_vm4  ;;  %vm18177_vm4 = vweird.f32 %v18094_v30  ;;  %v4483_v21 = vsel %vm14908_vm12, %v14199_v41, %v4479_v1  ;;  %v4458_v24 = vsel %vm14759_vm7, %v18187_v17, %v4453_v32  ;;  %v4544_v38 = vmul.f32 %v4413_v35, %v18188_v28  ;;  %v4695_v12 = vld [vmem:[#allocation3 + $0x107] sm:$0xff]  ;;  %5934 = vmatpush.bf16.msrb.mxu0 %v9154_v39 }
 0x4da   : > { %4571 = vst.msk [vmem:[#allocation3 + $0x148] sm:$0xff] %vm18174_vm13, %v4538_v33  ;;  %vm14926_vm8 = vmor %vm18177_vm4, %vm18176_vm14  ;;  %v4502_v10 = vor.u32 1.1754944e-38, %v18183_v27  ;;  %v4473_v31 = vsel %vm14780_vm0, %v18190_v19, %v4468_v14  ;;  %v9803_v23 = vpack.i.bf16 %v4698_v7, %v4697_v53  ;;  %v18193_v49 = vand.u32 2147483647, %v18094_v30  ;;  %v18206_v32 = vld [vmem:[#allocation33_spill] sm:$0xff]  ;;  %v9162_v19 = vld [vmem:[%s17498_s9 + $0x78] sm:$0xff] }
 0x4db   : > { %vm18182_vm5 = vmmov %vm18164_vm10  ;;  %v4498_v41 = vsel %vm14926_vm8, %v14218_v0, %v4494_v51  ;;  %v4545_v0 = vmul.f32 %v4428_v6, %v18191_v26  ;;  %v18194_v61 = vand.u32 2147483648, %v18103_v18  ;;  %v4488_v54 = vsel %vm14900_vm2, %v4487_v34, %v4483_v21  ;;  %v4696_v1 = vld [vmem:[#allocation3 + $0x10f] sm:$0xff]  ;;  %6023 = vmatpush.bf16.msra.mxu3 %v9162_v19 }
 0x4dc   : > { %4572 = vst.msk [vmem:[#allocation3 + $0x150] sm:$0xff] %vm18182_vm5, %v4539_v8  ;;  %vm14944_vm1 = vmor %vm18184_vm15, %vm4511_vm6  ;;  %vm4500_vm7 = vcmp.eq.f32.partialorder %v18193_v49, 8.507059e+37  ;;  %v18197_v55 = vand.u32 2147483647, %v18103_v18  ;;  %9804 = vrot.lane.b32.xlu1 %v9803_v23, %s17786_s29  ;;  %v4547_v30 = vmul.f32 %v4458_v24, %v18198_v46  ;;  %v9793_v45 = vpack.i.bf16 %v4696_v1, %v4695_v12  ;;  %v4633_v35 = vld [vmem:[#allocation3 + $0x108] sm:$0xff]  ;;  %v4634_v15 = vld [vmem:[#allocation3 + $0x110] sm:$0xff] }
 0x4dd   : > { %vm18189_vm3 = vmmov %vm18182_vm5  ;;  %v4513_v47 = vsel %vm14944_vm1, %v14231_v11, %v4509_v22  ;;  %v4517_v33 = vor.u32 1.1754944e-38, %v18194_v61  ;;  %v18195_v11 = vld [vmem:[#allocation28_spill] sm:$0xff]  ;;  %v4503_v36 = vsel %vm4500_vm7, %v4502_v10, %v4498_v41  ;;  %v4548_v51 = vmul.f32 %v4473_v31, %v18200_v25  ;;  %v4636_v22 = vld [vmem:[#allocation3 + $0x130] sm:$0xff]  ;;  %5935 = vmatpush.bf16.msrb.mxu0 %v9153_v60 }
 0x4de   : > { %4573 = vst.msk [vmem:[#allocation3 + $0x168] sm:$0xff] %vm18189_vm3, %v4540_v63  ;;  %vm18192_vm6 = vmmov %vm18189_vm3  ;;  %v4546_v20 = vmul.f32 %v4443_v5, %v18195_v11  ;;  %vm4515_vm0 = vcmp.eq.f32.partialorder %v18197_v55, 8.507059e+37  ;;  %v4693_v59 = vld [vmem:[#allocation3 + $0xe7] sm:$0xff]  ;;  %v4549_v13 = vmul.f32 %v4488_v54, %v18202_v9  ;;  %9794 = vrot.lane.b32.xlu2 %v9793_v45, %s17786_s29  ;;  %v4550_v63 = vmul.f32 %v4503_v36, %v18204_v43  ;;  %v9161_v61 = vld [vmem:[%s17498_s9 + $0x70] sm:$0xff] }
 0x4df   : > { %4574 = vst.msk [vmem:[#allocation3 + $0x170] sm:$0xff] %vm18192_vm6, %v4541_v48  ;;  %vm18196_vm10 = vmmov %vm18189_vm3  ;;  %v4518_v8 = vsel %vm4515_vm0, %v4517_v33, %v4513_v47  ;;  %v4694_v42 = vld [vmem:[#allocation3 + $0xef] sm:$0xff]  ;;  %v14989_v48 = vpack.i.bf16 %v4636_v22, %v4635_v4  ;;  %v14995_v2 = vpack.i.bf16 %v4634_v15, %v4633_v35  ;;  %6024 = vmatpush.bf16.msra.mxu3 %v9161_v61  ;;  %v9150_v1 = vld [vmem:[%s17498_s9 + $0x18] sm:$0xff]  ;;  %v9730_v4 = vpop.permute.xlu1 %9729 }
 0x4e0   : > { %4575 = vst.msk [vmem:[#allocation3 + $0x188] sm:$0xff] %vm18196_vm10, %v4542_v52  ;;  %vm18199_vm11 = vmmov %vm18189_vm3  ;;  %v9783_v18 = vpack.i.bf16 %v4694_v42, %v4693_v59  ;;  %v4551_v40 = vmul.f32 %v4518_v8, %v18206_v32  ;;  %v4631_v58 = vld [vmem:[#allocation3 + $0xe8] sm:$0xff]  ;;  %v4632_v3 = vld [vmem:[#allocation3 + $0xf0] sm:$0xff]  ;;  %v9732_v32 = vunpack.i.h.bf16 %v9730_v4 }
 0x4e1   : > { %4576 = vst.msk [vmem:[#allocation3 + $0x190] sm:$0xff] %vm18199_vm11, %v4543_v57  ;;  %vm18201_vm2 = vmmov %vm18189_vm3  ;;  %v14999_v14 = vpack.i.bf16 %v4632_v3, %v4631_v58  ;;  %v4699_v34 = vld [vmem:[#allocation3 + $0x147] sm:$0xff]  ;;  %v9149_v45 = vld [vmem:[%s17498_s9 + $0x10] sm:$0xff] }
 0x4e2   : > { %4577 = vst.msk [vmem:[#allocation3 + $0x1a8] sm:$0xff] %vm18201_vm2, %v4544_v38  ;;  %vm18203_vm9 = vmmov %vm18201_vm2  ;;  %9784 = vrot.lane.b32.xlu0 %v9783_v18, %s17786_s29  ;;  %v4637_v41 = vld [vmem:[#allocation3 + $0x148] sm:$0xff]  ;;  %v9159_v25 = vld [vmem:[%s17498_s9 + $0x60] sm:$0xff] }
 0x4e3   : > { %4578 = vst.msk [vmem:[#allocation3 + $0x1b0] sm:$0xff] %vm18203_vm9, %v4545_v0  ;;  %vm18205_vm12 = vmmov %vm18201_vm2  ;;  %v4700_v56 = vld [vmem:[#allocation3 + $0x14f] sm:$0xff]  ;;  %v9151_v0 = vld [vmem:[%s17498_s9 + $0x20] sm:$0xff] }
 0x4e4   : > { %4579 = vst.msk [vmem:[#allocation3 + $0x1c8] sm:$0xff] %vm18205_vm12, %v4546_v20  ;;  %vm18207_vm13 = vmmov %vm18201_vm2  ;;  %9819 = vrot.lane.b32.xlu1 %v14989_v48, %s17786_s29  ;;  %v9813_v37 = vpack.i.bf16 %v4700_v56, %v4699_v34  ;;  %v4638_v17 = vld [vmem:[#allocation3 + $0x150] sm:$0xff]  ;;  %v9152_v47 = vld [vmem:[%s17498_s9 + $0x28] sm:$0xff] }
 0x4e5   : > { %4580 = vst.msk [vmem:[#allocation3 + $0x1d0] sm:$0xff] %vm18207_vm13, %v4547_v30  ;;  %vm18208_vm14 = vmmov %vm18201_vm2  ;;  %v4701_v16 = vld [vmem:[#allocation3 + $0x167] sm:$0xff]  ;;  %v15020_v7 = vpack.i.bf16 %v4638_v17, %v4637_v41  ;;  %5936 = vmatpush.bf16.msrb.mxu0 %v9152_v47  ;;  %v15071_v22 = vld [vmem:[#allocation3 + $0x50] sm:$0xff] }
 0x4e6   : > { %4581 = vst.msk [vmem:[#allocation3 + $0x1e8] sm:$0xff] %vm18208_vm14, %v4548_v51  ;;  %vm18209_vm4 = vmmov %vm18201_vm2  ;;  %9809 = vrot.lane.b32.xlu2 %v14995_v2, %s17786_s29  ;;  %v4702_v52 = vld [vmem:[#allocation3 + $0x16f] sm:$0xff]  ;;  %v4585_v35 = vld [vmem:[#allocation3 + $0x7] sm:$0xff]  ;;  %v9725_v60 = vpop.permute.xlu0 %9724 }
 0x4e7   : > { %4582 = vst.msk [vmem:[#allocation3 + $0x1f0] sm:$0xff] %vm18209_vm4, %v4549_v13  ;;  %vm18210_vm8 = vmmov %vm18201_vm2  ;;  %v4703_v29 = vld [vmem:[#allocation3 + $0x187] sm:$0xff]  ;;  %v9823_v21 = vpack.i.bf16 %v4702_v52, %v4701_v16  ;;  %v4640_v27 = vld [vmem:[#allocation3 + $0x170] sm:$0xff] }
 0x4e8   : > { %4583 = vst.msk [vmem:[#allocation3 + $0x208] sm:$0xff] %vm18210_vm8, %v4550_v63  ;;  %vm18211_vm5 = vmmov %vm18201_vm2  ;;  %v4704_v6 = vld [vmem:[#allocation3 + $0x18f] sm:$0xff]  ;;  %v9158_v63 = vld [vmem:[%s17498_s9 + $0x58] sm:$0xff] }
 0x4e9   : > { %4584 = vst.msk [vmem:[#allocation3 + $0x210] sm:$0xff] %vm18211_vm5, %v4551_v40  ;;  %v9833_v62 = vpack.i.bf16 %v4704_v6, %v4703_v29  ;;  %v4641_v5 = vld [vmem:[#allocation3 + $0x188] sm:$0xff]  ;;  %v4642_v53 = vld [vmem:[#allocation3 + $0x190] sm:$0xff]  ;;  %5937 = vmatpush.bf16.msrb.mxu0 %v9151_v0  ;;  %v9731_v40 = vunpack.i.l.bf16 %v9730_v4  ;;  %v9147_v3 = vld [vmem:[%s17498_s9] sm:$0xff] }
 0x4ea   : > { %9799 = vrot.lane.b32.xlu0 %v14999_v14, %s17786_s29  ;;  %v4639_v57 = vld [vmem:[#allocation3 + $0x168] sm:$0xff]  ;;  %v15009_v10 = vpack.i.bf16 %v4642_v53, %v4641_v5  ;;  %v4644_v8 = vld [vmem:[#allocation3 + $0x1b0] sm:$0xff]  ;;  %vm18212_vm15 = vmmov %vm18201_vm2  ;;  %v9735_v53 = vpop.permute.xlu2 %9734 }
 0x4eb   : > { %v15016_v24 = vpack.i.bf16 %v4640_v27, %v4639_v57  ;;  %v4707_v31 = vld [vmem:[#allocation3 + $0x1c7] sm:$0xff]  ;;  %v4706_v49 = vld [vmem:[#allocation3 + $0x1af] sm:$0xff]  ;;  %v5386_v52 = vsel %vm18212_vm15, %v4585_v35, %v9731_v40  ;;  %vm18213_vm1 = vmmov %vm18201_vm2 }
 0x4ec   : > { %9834 = vrot.lane.b32.xlu1 %v9833_v62, %s17786_s29  ;;  %v4708_v23 = vld [vmem:[#allocation3 + $0x1cf] sm:$0xff]  ;;  %v4705_v12 = vld [vmem:[#allocation3 + $0x1a7] sm:$0xff]  ;;  %vm18214_vm3 = vmmov %vm18213_vm1 }
 0x4ed   : > { %v4709_v28 = vld [vmem:[#allocation3 + $0x1e7] sm:$0xff]  ;;  %v9853_v33 = vpack.i.bf16 %v4708_v23, %v4707_v31  ;;  %v9843_v54 = vpack.i.bf16 %v4706_v49, %v4705_v12  ;;  %v4646_v46 = vld [vmem:[#allocation3 + $0x1d0] sm:$0xff]  ;;  %5938 = vmatpush.bf16.msrb.mxu0 %v9150_v1  ;;  %vm18215_vm6 = vmmov %vm18213_vm1 }
 0x4ee   : > { %9824 = vrot.lane.b32.xlu2 %v9823_v21, %s17786_s29  ;;  %v4710_v38 = vld [vmem:[#allocation3 + $0x1ef] sm:$0xff]  ;;  %v9155_v0 = vld [vmem:[%s17498_s9 + $0x40] sm:$0xff]  ;;  %vm18217_vm7 = vmmov %vm18213_vm1 }
 0x4ef   : > { %v9863_v26 = vpack.i.bf16 %v4710_v38, %v4709_v28  ;;  %v4647_v11 = vld [vmem:[#allocation3 + $0x1e8] sm:$0xff]  ;;  %v4648_v20 = vld [vmem:[#allocation3 + $0x1f0] sm:$0xff]  ;;  %v9727_v28 = vunpack.i.h.bf16 %v9725_v60  ;;  %v9726_v38 = vunpack.i.l.bf16 %v9725_v60  ;;  %vm18218_vm10 = vmmov %vm18213_vm1 }
 0x4f0   : > { %v9160_v55 = vld [vmem:[%s17498_s9 + $0x68] sm:$0xff]  ;;  %v15045_v30 = vpack.i.bf16 %v4648_v20, %v4647_v11  ;;  %v4813_v13 = vld [vmem:[#allocation3 + $0x70] sm:$0xff]  ;;  %v18216_v11 = vld [vmem:[#allocation55_spill] sm:$0xff] }
 0x4f1   : > { %v4645_v36 = vld [vmem:[#allocation3 + $0x1c8] sm:$0xff]  ;;  %6025 = vmatpush.bf16.msra.mxu3 %v9160_v55  ;;  %5939 = vmatpush.bf16.msrb.mxu0 %v9149_v45  ;;  %v9157_v16 = vld [vmem:[%s17498_s9 + $0x50] sm:$0xff]  ;;  %vm18219_vm0 = vmmov %vm18213_vm1 }
 0x4f2   : > { %9814 = vrot.lane.b32.xlu0 %v9813_v37, %s17786_s29  ;;  %v4643_v59 = vld [vmem:[#allocation3 + $0x1a8] sm:$0xff]  ;;  %v15055_v51 = vpack.i.bf16 %v4646_v46, %v4645_v36  ;;  %v15087_v5 = vld [vmem:[#allocation3 + $0x71] sm:$0xff]  ;;  %vm18220_vm11 = vmmov %vm18219_vm0 }
 0x4f3   : > { %v15059_v42 = vpack.i.bf16 %v4644_v8, %v4643_v59  ;;  %v4812_v9 = vld [vmem:[#allocation3 + $0x68] sm:$0xff]  ;;  %v4650_v27 = vld [vmem:[#allocation3 + $0x11] sm:$0xff]  ;;  %vm18221_vm2 = vmmov %vm18219_vm0 }
 0x4f4   : > { %9849 = vrot.lane.b32.xlu1 %v15009_v10, %s17786_s29  ;;  %v15063_v18 = vld [vmem:[#allocation3 + $0x48] sm:$0xff]  ;;  %v9893_v58 = vpack.i.bf16 %v4813_v13, %v4812_v9  ;;  %v15095_v17 = vld [vmem:[#allocation3 + $0x51] sm:$0xff]  ;;  %v5419_v23 = vsel %vm18214_vm3, %v4650_v27, %v9727_v28  ;;  %vm18222_vm9 = vmmov %vm18219_vm0 }
 0x4f5   : > { %6026 = vmatpush.bf16.msra.mxu3 %v9159_v25  ;;  %v9148_v43 = vld [vmem:[%s17498_s9 + $0x8] sm:$0xff]  ;;  %v9883_v34 = vpack.i.bf16 %v15071_v22, %v15063_v18  ;;  %v4746_v31 = vld [vmem:[#allocation3 + $0x31] sm:$0xff]  ;;  %vm18223_vm12 = vmmov %vm18219_vm0 }
 0x4f6   : > { %9839 = vrot.lane.b32.xlu2 %v15016_v24, %s17786_s29  ;;  %v4586_v15 = vld [vmem:[#allocation3 + $0xf] sm:$0xff]  ;;  %5940 = vmatpush.bf16.msrb.mxu0 %v9148_v43  ;;  %v4711_v29 = vld [vmem:[#allocation3 + $0x207] sm:$0xff]  ;;  %v9737_v43 = vunpack.i.h.bf16 %v9735_v53  ;;  %vm18224_vm13 = vmmov %vm18219_vm0 }
 0x4f7   : > { %v4712_v6 = vld [vmem:[#allocation3 + $0x20f] sm:$0xff]  ;;  %v5387_v62 = vsel %vm18213_vm1, %v4586_v15, %v9732_v32  ;;  %v4587_v46 = vld [vmem:[#allocation3 + $0x27] sm:$0xff]  ;;  %v9745_v15 = vpop.permute.xlu1 %9744  ;;  %vm18225_vm14 = vmmov %vm18219_vm0 }
 0x4f8   : > { %v5514_v56 = vpack.c.bf16 %v5387_v62, %v5386_v52  ;;  %v9873_v21 = vpack.i.bf16 %v4712_v6, %v4711_v29  ;;  %v15085_v37 = vld [vmem:[#allocation3 + $0x69] sm:$0xff]  ;;  %v15115_v36 = vld [vmem:[#allocation3 + $0xd1] sm:$0xff]  ;;  %v9747_v28 = vunpack.i.h.bf16 %v9745_v15  ;;  %vm18226_vm4 = vmmov %vm18219_vm0 }
 0x4f9   : > { %6027 = vmatpush.bf16.msra.mxu3 %v9158_v63  ;;  %v9156_v39 = vld [vmem:[%s17498_s9 + $0x48] sm:$0xff]  ;;  %v9908_v47 = vpack.i.bf16 %v15087_v5, %v15085_v37  ;;  %v15123_v9 = vld [vmem:[#allocation3 + $0xb1] sm:$0xff]  ;;  %vm18227_vm8 = vmmov %vm18219_vm0 }
 0x4fa   : > { %9829 = vrot.lane.b32.xlu0 %v15020_v7, %s17786_s29  ;;  %5941 = vmatpush.bf16.msrb.mxu0 %v9147_v3  ;;  %v4649_v57 = vld [vmem:[#allocation3 + $0x9] sm:$0xff]  ;;  %v15129_v32 = vld [vmem:[#allocation3 + $0x91] sm:$0xff]  ;;  %v5421_v3 = vsel %vm18220_vm11, %v4746_v31, %v9737_v43  ;;  %vm18228_vm5 = vmmov %vm18219_vm0 }
 0x4fb   : > { %v15093_v41 = vld [vmem:[#allocation3 + $0x49] sm:$0xff]  ;;  %v15167_v27 = vld [vmem:[#allocation3 + $0x111] sm:$0xff]  ;;  %vm18229_vm15 = vmmov %vm18219_vm0 }
 0x4fc   : > { %9864 = vrot.lane.b32.xlu1 %v9863_v26, %s17786_s29  ;;  %v4745_v19 = vld [vmem:[#allocation3 + $0x29] sm:$0xff]  ;;  %v5418_v26 = vsel %vm18215_vm6, %v4649_v57, %v9726_v38  ;;  %v9898_v12 = vpack.i.bf16 %v15095_v17, %v15093_v41  ;;  %v9746_v38 = vunpack.i.l.bf16 %v9745_v15  ;;  %vm18230_vm1 = vmmov %vm18219_vm0 }
 0x4fd   : > { %6028 = vmatpush.bf16.msra.mxu3 %v9157_v16  ;;  %5942 = vmatmul.bf16.vlgmr.msrb.gmra.mxu0 %v5514_v56  ;;  %v9888_v49 = vpack.i.bf16 %v4746_v31, %v4745_v19  ;;  %v5515_v61 = vpack.c.bf16 %v5419_v23, %v5418_v26  ;;  %v15113_v55 = vld [vmem:[#allocation3 + $0xc9] sm:$0xff]  ;;  %v15152_v56 = vld [vmem:[#allocation3 + $0x131] sm:$0xff]  ;;  %vm18231_vm3 = vmmov %vm18219_vm0 }
 0x4fe   : > { %9854 = vrot.lane.b32.xlu2 %v9853_v33, %s17786_s29  ;;  %v9740_v33 = vpop.permute.xlu0 %9739  ;;  %v4588_v45 = vld [vmem:[#allocation3 + $0x2f] sm:$0xff]  ;;  %v9938_v63 = vpack.i.bf16 %v15115_v36, %v15113_v55  ;;  %v15148_v62 = vld [vmem:[#allocation3 + $0x47] sm:$0xff]  ;;  %vm18232_vm6 = vmmov %vm18219_vm0 }
 0x4ff   : > { %v9742_v20 = vunpack.i.h.bf16 %v9740_v33  ;;  %v9741_v1 = vunpack.i.l.bf16 %v9740_v33  ;;  %v15121_v25 = vld [vmem:[#allocation3 + $0xa9] sm:$0xff]  ;;  %vm18235_vm11 = vmmov %vm18219_vm0 }
 0x500   : > { %v15127_v4 = vld [vmem:[#allocation3 + $0x89] sm:$0xff] }
 0x501   : > { %6029 = vmatpush.bf16.msra.mxu3 %v9156_v39  ;;  %v5388_v59 = vsel %vm18217_vm7, %v4587_v46, %v9741_v1  ;;  %v5389_v8 = vsel %vm18218_vm10, %v4588_v45, %v9742_v20  ;;  %v9918_v35 = vpack.i.bf16 %v15129_v32, %v15127_v4  ;;  %v9178_v39 = vld [vmem:[%s17498_s9 + $0xf8] sm:$0xff]  ;;  %v15165_v57 = vld [vmem:[#allocation3 + $0x109] sm:$0xff]  ;;  %vm18233_vm7 = vmmov %vm18219_vm0 }
 0x502   : > { %9844 = vrot.lane.b32.xlu0 %v9843_v54, %s17786_s29  ;;  %v9750_v54 = vpop.permute.xlu2 %9749  ;;  %v5519_v13 = vpack.c.bf16 %v5389_v8, %v5388_v59  ;;  %6201 = vmatpush.bf16.msrb.mxu2 %v9178_v39  ;;  %v9177_v31 = vld [vmem:[%s17498_s9 + $0xf0] sm:$0xff]  ;;  %v9958_v23 = vpack.i.bf16 %v15167_v27, %v15165_v57  ;;  %v9176_v33 = vld [vmem:[%s17498_s9 + $0xe8] sm:$0xff]  ;;  %vm18234_vm10 = vmmov %vm18219_vm0 }
 0x503   : > { %v9752_v6 = vunpack.i.h.bf16 %v9750_v54  ;;  %v9751_v16 = vunpack.i.l.bf16 %v9750_v54  ;;  %v15203_v1 = vld [vmem:[#allocation3 + $0x67] sm:$0xff]  ;;  %v4768_v45 = vld [vmem:[#allocation3 + $0x191] sm:$0xff] }
 0x504   : > { %9879 = vrot.lane.b32.xlu1 %v15045_v30, %s17786_s29  ;;  %v4767_v46 = vld [vmem:[#allocation3 + $0x189] sm:$0xff] }
 0x505   : > { %6030 = vmatpush.bf16.msra.mxu3 %v9155_v0  ;;  %v5422_v0 = vsel %vm18223_vm12, %v15093_v41, %v9746_v38  ;;  %v9175_v41 = vld [vmem:[%s17498_s9 + $0xe0] sm:$0xff]  ;;  %v15205_v59 = vld [vmem:[#allocation3 + $0x6f] sm:$0xff]  ;;  %vm18238_vm12 = vmmov %vm18219_vm0 }
 0x506   : > { %9869 = vrot.lane.b32.xlu2 %v15055_v51, %s17786_s29  ;;  %6202 = vmatpush.bf16.msrb.mxu2 %v9177_v31  ;;  %v15218_v43 = vld [vmem:[#allocation3 + $0x169] sm:$0xff]  ;;  %v9171_v31 = vld [vmem:[%s17498_s9 + $0xc0] sm:$0xff] }
 0x507   : > { %v9173_v15 = vld [vmem:[%s17498_s9 + $0xd0] sm:$0xff] }
 0x508   : > { %6031 = vmatmul.bf16.vlgmr.msra.gmra.mxu3 %v5515_v61 }
 0x50a   : > { %9859 = vrot.lane.b32.xlu0 %v15059_v42, %s17786_s29  ;;  %6203 = vmatpush.bf16.msrb.mxu2 %v9176_v33 }
 0x50b   : > { %v15134_v40 = vpop.permute.xlu2 %9764 }
 0x50c   : > { %9894 = vrot.lane.b32.xlu1 %v9893_v58, %s17786_s29 }
 0x50d   : > { %5947 = vmatmul.bf16.gmra.mxu0 %v5519_v13 }
 0x50e   : > { %9884 = vrot.lane.b32.xlu2 %v9883_v34, %s17786_s29  ;;  %v15150_v34 = vld [vmem:[#allocation3 + $0x129] sm:$0xff]  ;;  %6204 = vmatpush.bf16.msrb.mxu2 %v9175_v41  ;;  %v4772_v41 = vld [vmem:[#allocation3 + $0x1d1] sm:$0xff] }
 0x512   : > { %9874 = vrot.lane.b32.xlu0 %v9873_v21, %s17786_s29  ;;  %v15154_v21 = vld [vmem:[#allocation3 + $0x4f] sm:$0xff] }
 0x514   : > { %9909 = vrot.lane.b32.xlu1 %v9908_v47, %s17786_s29  ;;  %v15171_v47 = vld [vmem:[#allocation3 + $0xe9] sm:$0xff] }
 0x516   : > { %9899 = vrot.lane.b32.xlu2 %v9898_v12, %s17786_s29  ;;  %v5423_v12 = vsel %vm18224_vm13, %v15095_v17, %v9747_v28  ;;  %vm18239_vm13 = vmmov %vm18219_vm0 }
 0x517   : > { %v5525_v61 = vpack.c.bf16 %v5423_v12, %v5422_v0  ;;  %v9170_v0 = vld [vmem:[%s17498_s9 + $0xb8] sm:$0xff]  ;;  %v4773_v12 = vld [vmem:[#allocation3 + $0x1e9] sm:$0xff] }
 0x518   : > { %6112 = vmatpush.bf16.msrb.mxu1 %v9170_v0 }
 0x519   : > { %v15146_v52 = vpop.permute.xlu2 %9779 }
 0x51a   : > { %9889 = vrot.lane.b32.xlu0 %v9888_v49, %s17786_s29 }
 0x51c   : > { %9924 = vrot.lane.b32.xlu1 %v18216_v11, %s17786_s29 }
 0x51e   : > { %9914 = vrot.lane.b32.xlu2 %v14616_v44, %s17786_s29  ;;  %v9736_v44 = vunpack.i.l.bf16 %v9735_v53  ;;  %v9760_v53 = vpop.permute.xlu1 %9759 }
 0x51f   : > { %v9762_v11 = vunpack.i.h.bf16 %v9760_v53  ;;  %v9761_v20 = vunpack.i.l.bf16 %v9760_v53 }
 0x520   : > { %v5420_v58 = vsel %vm18219_vm0, %v4745_v19, %v9736_v44  ;;  %v15173_v19 = vld [vmem:[#allocation3 + $0xf1] sm:$0xff] }
 0x521   : > { %v5520_v29 = vpack.c.bf16 %v5421_v3, %v5420_v58  ;;  %v9948_v26 = vpack.i.bf16 %v15173_v19, %v15171_v47  ;;  %v5392_v13 = vsel %vm18225_vm14, %v15203_v1, %v9761_v20  ;;  %v15220_v44 = vld [vmem:[#allocation3 + $0x171] sm:$0xff]  ;;  %v9767_v20 = vunpack.i.h.bf16 %v15134_v40  ;;  %vm18240_vm14 = vmmov %vm18219_vm0 }
 0x522   : > { %9904 = vrot.lane.b32.xlu0 %v14771_v50, %s17786_s29  ;;  %v9928_v50 = vpack.i.bf16 %v15123_v9, %v15121_v25 }
 0x523   : > { %6036 = vmatmul.bf16.gmra.mxu3 %v5520_v29  ;;  %v9988_v29 = vpack.i.bf16 %v15220_v44, %v15218_v43 }
 0x524   : > { %9939 = vrot.lane.b32.xlu1 %v9938_v63, %s17786_s29 }
 0x526   : > { %9929 = vrot.lane.b32.xlu2 %v9928_v50, %s17786_s29  ;;  %v15194_v54 = vpop.permute.xlu1 %9774  ;;  %v9998_v50 = vpack.i.bf16 %v4768_v45, %v4767_v46 }
 0x52a   : > { %9919 = vrot.lane.b32.xlu0 %v9918_v35, %s17786_s29  ;;  %v15224_v35 = vld [vmem:[#allocation3 + $0x151] sm:$0xff] }
 0x52c   : > { %9954 = vrot.lane.b32.xlu1 %v14989_v48, %s17786_s29  ;;  %v5390_v48 = vsel %vm18221_vm2, %v15148_v62, %v9751_v16  ;;  %vm18236_vm2 = vmmov %vm18219_vm0 }
 0x52d   : > { %v9755_v17 = vpop.permute.xlu0 %9754 }
 0x52e   : > { %9944 = vrot.lane.b32.xlu2 %v14995_v2, %s17786_s29  ;;  %v5391_v2 = vsel %vm18222_vm9, %v15154_v21, %v9752_v6  ;;  %v9757_v58 = vunpack.i.h.bf16 %v9755_v17  ;;  %v9756_v3 = vunpack.i.l.bf16 %v9755_v17  ;;  %v15232_v6 = vpop.permute.xlu1 %9789  ;;  %v9766_v17 = vunpack.i.l.bf16 %v15134_v40  ;;  %v9168_v40 = vld [vmem:[%s17498_s9 + $0xa8] sm:$0xff]  ;;  %vm18237_vm9 = vmmov %vm18219_vm0 }
 0x52f   : > { %v5524_v60 = vpack.c.bf16 %v5391_v2, %v5390_v48 }
 0x530   : > { %v5424_v2 = vsel %vm18227_vm8, %v15085_v37, %v9756_v3  ;;  %v5425_v39 = vsel %vm18228_vm5, %v15087_v5, %v9757_v58  ;;  %v15252_v37 = vld [vmem:[#allocation3 + $0x87] sm:$0xff]  ;;  %v5427_v58 = vsel %vm18232_vm6, %v15129_v32, %v9767_v20  ;;  %v9165_v20 = vld [vmem:[%s17498_s9 + $0x90] sm:$0xff]  ;;  %vm18242_vm8 = vmmov %vm18219_vm0 }
 0x531   : > { %5952 = vmatmul.bf16.gmra.mxu0 %v5524_v60  ;;  %v9172_v60 = vld [vmem:[%s17498_s9 + $0xc8] sm:$0xff]  ;;  %v5530_v28 = vpack.c.bf16 %v5425_v39, %v5424_v2  ;;  %vm18243_vm5 = vmmov %vm18219_vm0 }
 0x532   : > { %9934 = vrot.lane.b32.xlu0 %v14999_v14, %s17786_s29  ;;  %v9968_v14 = vpack.i.bf16 %v15152_v56, %v15150_v34  ;;  %v4838_v39 = vld [vmem:[#allocation3 + $0x208] sm:$0xff]  ;;  %vm18247_vm6 = vmmov %vm18219_vm0 }
 0x533   : > { %6041 = vmatmul.bf16.gmra.mxu3 %v5525_v61  ;;  %v4774_v61 = vld [vmem:[#allocation3 + $0x1f1] sm:$0xff]  ;;  %v15305_v32 = vld [vmem:[#allocation3 + $0xa7] sm:$0xff] }
 0x534   : > { %9969 = vrot.lane.b32.xlu1 %v9968_v14, %s17786_s29  ;;  %v10028_v45 = vpack.i.bf16 %v4774_v61, %v4773_v12  ;;  %v9777_v12 = vunpack.i.h.bf16 %v15194_v54  ;;  %v9776_v61 = vunpack.i.l.bf16 %v15194_v54 }
 0x536   : > { %9959 = vrot.lane.b32.xlu2 %v9958_v23, %s17786_s29  ;;  %v15254_v23 = vld [vmem:[#allocation3 + $0x8f] sm:$0xff]  ;;  %v5428_v54 = vsel %vm18219_vm0, %v15121_v25, %v9776_v61 }
 0x538   : > { %v15189_v49 = vpop.permute.xlu2 %9794 }
 0x53a   : > { %9949 = vrot.lane.b32.xlu0 %v9948_v26, %s17786_s29 }
 0x53c   : > { %9984 = vrot.lane.b32.xlu1 %v15009_v10, %s17786_s29  ;;  %v5393_v10 = vsel %vm18226_vm4, %v15205_v59, %v9762_v11  ;;  %vm18241_vm4 = vmmov %vm18219_vm0 }
 0x53d   : > { %v5529_v63 = vpack.c.bf16 %v5393_v10, %v5392_v13  ;;  %v9770_v53 = vpop.permute.xlu0 %9769  ;;  %v15275_v13 = vld [vmem:[#allocation3 + $0x1a9] sm:$0xff]  ;;  %v15277_v10 = vld [vmem:[#allocation3 + $0x1b1] sm:$0xff] }
 0x53e   : > { %9974 = vrot.lane.b32.xlu2 %v15016_v24, %s17786_s29  ;;  %v9174_v24 = vld [vmem:[%s17498_s9 + $0xd8] sm:$0xff]  ;;  %v9772_v38 = vunpack.i.h.bf16 %v9770_v53  ;;  %v9771_v14 = vunpack.i.l.bf16 %v9770_v53  ;;  %v9781_v53 = vunpack.i.l.bf16 %v15146_v52 }
 0x53f   : > { %6205 = vmatpush.bf16.msrb.mxu2 %v9174_v24 }
 0x540   : > { %v15209_v8 = vpop.permute.xlu2 %9809  ;;  %v5394_v26 = vsel %vm18229_vm15, %v15252_v37, %v9771_v14  ;;  %vm18244_vm15 = vmmov %vm18219_vm0 }
 0x541   : > { %5957 = vmatmul.bf16.gmra.mxu0 %v5529_v63  ;;  %v10008_v63 = vpack.i.bf16 %v15277_v10, %v15275_v13 }
 0x542   : > { %9964 = vrot.lane.b32.xlu0 %v15020_v7, %s17786_s29  ;;  %v15222_v7 = vld [vmem:[#allocation3 + $0x149] sm:$0xff] }
 0x543   : > { %v9978_v16 = vpack.i.bf16 %v15224_v35, %v15222_v7  ;;  %6206 = vmatpush.bf16.msrb.mxu2 %v9173_v15  ;;  %6046 = vmatmul.bf16.gmra.mxu3 %v5530_v28  ;;  %v5426_v15 = vsel %vm18231_vm3, %v15127_v4, %v9766_v17  ;;  %v9167_v4 = vld [vmem:[%s17498_s9 + $0xa0] sm:$0xff]  ;;  %v15307_v28 = vld [vmem:[#allocation3 + $0xaf] sm:$0xff]  ;;  %vm18246_vm3 = vmmov %vm18219_vm0 }
 0x544   : > { %9999 = vrot.lane.b32.xlu1 %v9998_v50, %s17786_s29  ;;  %v9164_v17 = vld [vmem:[%s17498_s9 + $0x88] sm:$0xff] }
 0x546   : > { %9989 = vrot.lane.b32.xlu2 %v9988_v29, %s17786_s29  ;;  %v5535_v29 = vpack.c.bf16 %v5427_v58, %v5426_v15 }
 0x547   : > { %6207 = vmatpush.bf16.msrb.mxu2 %v9172_v60  ;;  %v4839_v60 = vld [vmem:[#allocation3 + $0x210] sm:$0xff] }
 0x548   : > { %v15238_v48 = vpop.permute.xlu2 %9824  ;;  %v10023_v14 = vpack.i.bf16 %v4839_v60, %v4838_v39  ;;  %v15346_v60 = vld [vmem:[#allocation3 + $0xc7] sm:$0xff] }
 0x54a   : > { %9979 = vrot.lane.b32.xlu0 %v9978_v16, %s17786_s29  ;;  %v9782_v16 = vunpack.i.h.bf16 %v15146_v52 }
 0x54b   : > { %6208 = vmatpush.bf16.msrb.mxu2 %v9171_v31  ;;  %v5396_v31 = vsel %vm18233_vm7, %v15305_v32, %v9781_v53  ;;  %vm18248_vm7 = vmmov %vm18219_vm0 }
 0x54c   : > { %10014 = vrot.lane.b32.xlu1 %v15045_v30, %s17786_s29  ;;  %v5395_v30 = vsel %vm18230_vm1, %v15254_v23, %v9772_v38  ;;  %v9166_v38 = vld [vmem:[%s17498_s9 + $0x98] sm:$0xff]  ;;  %vm18245_vm1 = vmmov %vm18219_vm0 }
 0x54d   : > { %v5534_v11 = vpack.c.bf16 %v5395_v30, %v5394_v26  ;;  %v5397_v26 = vsel %vm18234_vm10, %v15307_v28, %v9782_v16  ;;  %v9791_v16 = vunpack.i.l.bf16 %v15232_v6  ;;  %vm18249_vm10 = vmmov %vm18219_vm0 }
 0x54e   : > { %10004 = vrot.lane.b32.xlu2 %v15055_v51, %s17786_s29  ;;  %v15258_v5 = vpop.permute.xlu1 %9804  ;;  %v4771_v51 = vld [vmem:[#allocation3 + $0x1c9] sm:$0xff]  ;;  %v5539_v0 = vpack.c.bf16 %v5397_v26, %v5396_v31 }
 0x54f   : > { %v10018_v24 = vpack.i.bf16 %v4772_v41, %v4771_v51  ;;  %v4775_v41 = vld [vmem:[#allocation3 + $0x209] sm:$0xff] }
 0x550   : > { %v15269_v33 = vpop.permute.xlu2 %9839 }
 0x551   : > { %5962 = vmatmul.bf16.gmra.mxu0 %v5534_v11  ;;  %v4776_v11 = vld [vmem:[#allocation3 + $0x211] sm:$0xff] }
 0x552   : > { %9994 = vrot.lane.b32.xlu0 %v15059_v42, %s17786_s29  ;;  %v9169_v42 = vld [vmem:[%s17498_s9 + $0xb0] sm:$0xff] }
 0x553   : > { %6113 = vmatpush.bf16.msrb.mxu1 %v9169_v42  ;;  %6051 = vmatmul.bf16.gmra.mxu3 %v5535_v29  ;;  %v9792_v29 = vunpack.i.h.bf16 %v15232_v6  ;;  %v9163_v6 = vld [vmem:[%s17498_s9 + $0x80] sm:$0xff] }
 0x554   : > { %v15273_v46 = vpop.permute.xlu0 %9784  ;;  %10029 = vrot.lane.b32.xlu1 %v10028_v45, %s17786_s29  ;;  %v10038_v45 = vpack.i.bf16 %v4776_v11, %v4775_v41 }
 0x555   : > { %v9787_v31 = vunpack.i.h.bf16 %v15273_v46  ;;  %v9786_v26 = vunpack.i.l.bf16 %v15273_v46 }
 0x556   : > { %10019 = vrot.lane.b32.xlu2 %v10018_v24, %s17786_s29  ;;  %v15289_v50 = vpop.permute.xlu1 %9819  ;;  %v5429_v24 = vsel %vm18235_vm11, %v15123_v9, %v9777_v12  ;;  %vm18250_vm11 = vmmov %vm18219_vm0 }
 0x557   : > { %6114 = vmatpush.bf16.msrb.mxu1 %v9168_v40  ;;  %v5540_v58 = vpack.c.bf16 %v5429_v24, %v5428_v54  ;;  %v5430_v41 = vsel %vm18240_vm14, %v15113_v55, %v9786_v26  ;;  %v5431_v11 = vsel %vm18241_vm4, %v15115_v36, %v9787_v31  ;;  %v15375_v24 = vld [vmem:[#allocation3 + $0xe7] sm:$0xff]  ;;  %vm18255_vm14 = vmmov %vm18219_vm0 }
 0x558   : > { %v15296_v3 = vpop.permute.xlu2 %9854  ;;  %vm18256_vm4 = vmmov %vm18219_vm0 }
 0x55a   : > { %10009 = vrot.lane.b32.xlu0 %v10008_v63, %s17786_s29 }
 0x55b   : > { %6115 = vmatpush.bf16.msrb.mxu1 %v9167_v4  ;;  %v15348_v4 = vld [vmem:[#allocation3 + $0xcf] sm:$0xff] }
 0x55c   : > { %v15300_v2 = vpop.permute.xlu0 %9799 }
 0x55e   : > { %v15312_v52 = vpop.permute.xlu1 %9834 }
 0x55f   : > { %6116 = vmatpush.bf16.msrb.mxu1 %v9166_v38 }
 0x560   : > { %v15319_v30 = vpop.permute.xlu2 %9869 }
 0x561   : > { %5967 = vmatmul.bf16.gmra.mxu0 %v5539_v0 }
 0x562   : > { %10024 = vrot.lane.b32.xlu0 %v10023_v14, %s17786_s29  ;;  %v5398_v14 = vsel %vm18238_vm12, %v15346_v60, %v9791_v16  ;;  %vm18253_vm12 = vmmov %vm18219_vm0 }
 0x563   : > { %6117 = vmatpush.bf16.msrb.mxu1 %v9165_v20  ;;  %6056 = vmatmul.bf16.gmra.mxu3 %v5540_v58  ;;  %v5545_v20 = vpack.c.bf16 %v5431_v11, %v5430_v41  ;;  %v9811_v11 = vunpack.i.l.bf16 %v15209_v8 }
 0x564   : > { %v15323_v51 = vpop.permute.xlu0 %9814 }
 0x566   : > { %v15331_v42 = vpop.permute.xlu1 %9849 }
 0x567   : > { %6118 = vmatpush.bf16.msrb.mxu1 %v9164_v17  ;;  %v9802_v17 = vunpack.i.h.bf16 %v15300_v2 }
 0x568   : > { %v9885_v40 = vpop.permute.xlu2 %9884 }
 0x569   : > { %v9887_v63 = vunpack.i.h.bf16 %v9885_v40  ;;  %v9886_v15 = vunpack.i.l.bf16 %v9885_v40  ;;  %v15377_v40 = vld [vmem:[#allocation3 + $0xef] sm:$0xff] }
 0x56a   : > { %10039 = vrot.lane.b32.xlu0 %v10038_v45, %s17786_s29  ;;  %v9801_v45 = vunpack.i.l.bf16 %v15300_v2  ;;  %v5401_v36 = vsel %vm18243_vm5, %v15377_v40, %v9802_v17  ;;  %vm18258_vm5 = vmmov %vm18219_vm0 }
 0x56b   : > { %v5483_v39 = vsel %vm18236_vm2, %v15154_v21, %v9887_v63  ;;  %v5482_v25 = vsel %vm18237_vm9, %v15148_v62, %v9886_v15  ;;  %v5399_v21 = vsel %vm18239_vm13, %v15348_v4, %v9792_v29  ;;  %6119 = vmatpush.bf16.msrb.mxu1 %v9163_v6  ;;  %v9796_v6 = vunpack.i.l.bf16 %v15189_v49  ;;  %vm18251_vm2 = vmmov %vm18219_vm0 }
 0x56c   : > { %v15340_v53 = vpop.permute.xlu0 %9829  ;;  %v5517_v9 = vpack.c.bf16 %v5483_v39, %v5482_v25  ;;  %v5544_v62 = vpack.c.bf16 %v5399_v21, %v5398_v14  ;;  %v5400_v55 = vsel %vm18242_vm8, %v15375_v24, %v9801_v45  ;;  %v4713_v45 = vld [vmem:[#allocation3 + $0x28] sm:$0xff]  ;;  %vm18252_vm9 = vmmov %vm18219_vm0 }
 0x56d   : > { %v5549_v25 = vpack.c.bf16 %v5401_v36, %v5400_v55  ;;  %v15411_v36 = vld [vmem:[#allocation3 + $0x107] sm:$0xff]  ;;  %vm18254_vm13 = vmmov %vm18219_vm0 }
 0x56e   : > { %6209 = vmatmul.bf16.vlgmr.msrb.gmra.mxu2 %v5517_v9  ;;  %v15350_v38 = vpop.permute.xlu1 %9864  ;;  %v9797_v9 = vunpack.i.h.bf16 %v15189_v49  ;;  %v5432_v49 = vsel %vm18248_vm7, %v15171_v47, %v9796_v6  ;;  %v15413_v47 = vld [vmem:[#allocation3 + $0x10f] sm:$0xff]  ;;  %vm18257_vm8 = vmmov %vm18219_vm0 }
 0x56f   : > { %vm18263_vm7 = vmmov %vm18219_vm0 }
 0x570   : > { %v15361_v0 = vpop.permute.xlu2 %9899  ;;  %v5433_v26 = vsel %vm18249_vm10, %v15173_v19, %v9797_v9  ;;  %v9806_v9 = vunpack.i.l.bf16 %v15258_v5  ;;  %vm18264_vm10 = vmmov %vm18219_vm0 }
 0x571   : > { %5972 = vmatmul.bf16.gmra.mxu0 %v5544_v62  ;;  %v5550_v41 = vpack.c.bf16 %v5433_v26, %v5432_v49 }
 0x573   : > { %6061 = vmatmul.bf16.gmra.mxu3 %v5545_v20 }
 0x574   : > { %v15363_v12 = vpop.permute.xlu0 %9844 }
 0x576   : > { %v15365_v61 = vpop.permute.xlu1 %9879 }
 0x578   : > { %v9915_v46 = vpop.permute.xlu2 %9914 }
 0x579   : > { %v9917_v15 = vunpack.i.h.bf16 %v9915_v46  ;;  %v9916_v58 = vunpack.i.l.bf16 %v9915_v46  ;;  %v4714_v46 = vld [vmem:[#allocation3 + $0x30] sm:$0xff] }
 0x57b   : > { %v15393_v62 = vsel %vm18246_vm3, %v15305_v32, %v9916_v58  ;;  %v15397_v31 = vsel %vm18247_vm6, %v15307_v28, %v9917_v15  ;;  %v9812_v32 = vunpack.i.h.bf16 %v15209_v8  ;;  %v5943_v58 = vpop.f32.mrf.mxu0  ;;  %v5402_v8 = vsel %vm18251_vm2, %v15411_v36, %v9811_v11  ;;  %vm18261_vm3 = vmmov %vm18219_vm0 }
 0x57c   : > { %v15373_v54 = vpop.permute.xlu0 %9859  ;;  %vm18262_vm6 = vmmov %vm18219_vm0 }
 0x57d   : > { %vm18266_vm2 = vmmov %vm18219_vm0 }
 0x57e   : > { %v9895_v63 = vpop.permute.xlu1 %9894 }
 0x57f   : > { %v9897_v29 = vunpack.i.h.bf16 %v9895_v63  ;;  %v9896_v16 = vunpack.i.l.bf16 %v9895_v63 }
 0x581   : > { %v5484_v2 = vsel %vm18244_vm15, %v15203_v1, %v9896_v16  ;;  %v5485_v39 = vsel %vm18245_vm1, %v15205_v59, %v9897_v29  ;;  %5977 = vmatmul.bf16.gmra.mxu0 %v5549_v25  ;;  %v5532_v1 = vpack.c.bf16 %v15397_v31, %v15393_v62  ;;  %v5403_v29 = vsel %vm18252_vm9, %v15413_v47, %v9812_v32  ;;  %vm18259_vm15 = vmmov %vm18219_vm0  ;;  %v15496_v62 = vld [vmem:[#allocation3 + $0x14f] sm:$0xff] }
 0x582   : > { %v5522_v21 = vpack.c.bf16 %v5485_v39, %v5484_v2  ;;  %v5554_v39 = vpack.c.bf16 %v5403_v29, %v5402_v8  ;;  %v9807_v25 = vunpack.i.h.bf16 %v15258_v5  ;;  %vm18260_vm1 = vmmov %vm18219_vm0  ;;  %v15455_v8 = vld [vmem:[#allocation3 + $0x127] sm:$0xff] }
 0x583   : > { %6066 = vmatmul.bf16.gmra.mxu3 %v5550_v41  ;;  %vm18267_vm9 = vmmov %vm18219_vm0 }
 0x584   : > { %v15389_v14 = vpop.permute.xlu0 %9874  ;;  %6214 = vmatmul.bf16.gmra.mxu2 %v5522_v21 }
 0x586   : > { %v15401_v59 = vpop.permute.xlu1 %9909 }
 0x58c   : > { %v9890_v20 = vpop.permute.xlu0 %9889 }
 0x58d   : > { %v9892_v28 = vunpack.i.h.bf16 %v9890_v20  ;;  %v9891_v17 = vunpack.i.l.bf16 %v9890_v20 }
 0x58e   : > { %v9925_v15 = vpop.permute.xlu1 %9924 }
 0x58f   : > { %v5451_v63 = vsel %vm18219_vm0, %v4714_v46, %v9892_v28  ;;  %v5450_v55 = vsel %vm18250_vm11, %v4713_v45, %v9891_v17  ;;  %v9927_v16 = vunpack.i.h.bf16 %v9925_v15  ;;  %v9926_v2 = vunpack.i.l.bf16 %v9925_v15  ;;  %v15438_v28 = vld [vmem:[%s17499_s10] ss:$0 sm:$0xff]  ;;  %v6032_v15 = vpop.f32.mrf.mxu3  ;;  %vm18265_vm11 = vmmov %vm18219_vm0 }
 0x590   : > { %v5516_v19 = vpack.c.bf16 %v5451_v63, %v5450_v55  ;;  %v5435_v17 = vsel %vm18258_vm5, %v15167_v27, %v9807_v25  ;;  %v9902_v45 = vunpack.i.h.bf16 %v15361_v0  ;;  %v9821_v63 = vunpack.i.l.bf16 %v15289_v50  ;;  %vm18273_vm5 = vmmov %vm18219_vm0 }
 0x591   : > { %5982 = vmatmul.bf16.gmra.mxu0 %v5554_v39  ;;  %v15423_v26 = vsel %vm18253_vm12, %v15346_v60, %v9926_v2  ;;  %v15427_v41 = vsel %vm18254_vm13, %v15348_v4, %v9927_v16  ;;  %v5945_v60 = vpop.f32.mrf.mxu0  ;;  %v5434_v4 = vsel %vm18257_vm8, %v15165_v57, %v9806_v9  ;;  %v9816_v39 = vunpack.i.l.bf16 %v15323_v51  ;;  %vm18268_vm12 = vmmov %vm18219_vm0 }
 0x592   : > { %6120 = vmatmul.bf16.vlgmr.msrb.gmra.mxu1 %v5516_v19  ;;  %v5537_v32 = vpack.c.bf16 %v15427_v41, %v15423_v26  ;;  %v5555_v46 = vpack.c.bf16 %v5435_v17, %v5434_v4  ;;  %v5944_v19 = vadd.f32 %v15438_v28, %v5943_v58  ;;  %v5453_v27 = vsel %vm18260_vm1, %v15071_v22, %v9902_v45  ;;  %vm18269_vm13 = vmmov %vm18219_vm0  ;;  %v15525_v26 = vld [vmem:[#allocation3 + $0x16f] sm:$0xff] }
 0x593   : > { %v9817_v22 = vunpack.i.h.bf16 %v15323_v51  ;;  %v5436_v51 = vsel %vm18219_vm0, %v15150_v34, %v9816_v39  ;;  %v9912_v17 = vunpack.i.h.bf16 %v15401_v59  ;;  %v9831_v34 = vunpack.i.l.bf16 %v15340_v53  ;;  %vm18272_vm8 = vmmov %vm18219_vm0 }
 0x594   : > { %v9905_v6 = vpop.permute.xlu0 %9904  ;;  %6071 = vmatmul.bf16.gmra.mxu3 %v5555_v46  ;;  %v15459_v16 = vadd.f32 %v6032_v15, %v5944_v19  ;;  %v4717_v46 = vld [vmem:[#allocation3 + $0x68] sm:$0xff]  ;;  %vm18275_vm1 = vmmov %vm18219_vm0 }
 0x595   : > { %v9907_v21 = vunpack.i.h.bf16 %v9905_v6  ;;  %v9906_v49 = vunpack.i.l.bf16 %v9905_v6  ;;  %v5437_v4 = vsel %vm18265_vm11, %v15152_v56, %v9817_v22  ;;  %vm18280_vm11 = vmmov %vm18219_vm0 }
 0x596   : > { %v5560_v45 = vpack.c.bf16 %v5437_v4, %v5436_v51  ;;  %v9841_v51 = vunpack.i.l.bf16 %v15269_v33  ;;  %v4719_v4 = vld [vmem:[#allocation3 + $0x88] sm:$0xff] }
 0x597   : > { %v5486_v11 = vsel %vm18255_vm14, %v15252_v37, %v9906_v49  ;;  %v5487_v5 = vsel %vm18256_vm4, %v15254_v23, %v9907_v21  ;;  %v9901_v37 = vunpack.i.l.bf16 %v15361_v0  ;;  %v9822_v23 = vunpack.i.h.bf16 %v15289_v50  ;;  %v15457_v0 = vld [vmem:[#allocation3 + $0x12f] sm:$0xff]  ;;  %v6034_v49 = vpop.f32.mrf.mxu3  ;;  %vm18270_vm14 = vmmov %vm18219_vm0 }
 0x598   : > { %v5527_v20 = vpack.c.bf16 %v5487_v5, %v5486_v11  ;;  %v5404_v50 = vsel %vm18261_vm3, %v15455_v8, %v9821_v63  ;;  %v5946_v21 = vadd.f32 %v15438_v28, %v5945_v60  ;;  %vm18271_vm4 = vmmov %vm18219_vm0 }
 0x599   : > { %v5452_v57 = vsel %vm18259_vm15, %v15063_v18, %v9901_v37  ;;  %v5405_v58 = vsel %vm18262_vm6, %v15457_v0, %v9822_v23  ;;  %v5948_v18 = vpop.f32.mrf.mxu0  ;;  %v9832_v37 = vunpack.i.h.bf16 %v15340_v53  ;;  %v4718_v23 = vld [vmem:[#allocation3 + $0x70] sm:$0xff]  ;;  %vm18274_vm15 = vmmov %vm18219_vm0 }
 0x59a   : > { %6219 = vmatmul.bf16.gmra.mxu2 %v5527_v20  ;;  %v5521_v29 = vpack.c.bf16 %v5453_v27, %v5452_v57  ;;  %v5559_v2 = vpack.c.bf16 %v5405_v58, %v5404_v50  ;;  %v15476_v20 = vadd.f32 %v6034_v49, %v5946_v21  ;;  %v5455_v63 = vsel %vm18267_vm9, %v4718_v23, %v9912_v17  ;;  %v15494_v57 = vld [vmem:[#allocation3 + $0x147] sm:$0xff]  ;;  %v4720_v17 = vld [vmem:[#allocation3 + $0x90] sm:$0xff]  ;;  %vm18276_vm3 = vmmov %vm18219_vm0 }
 0x59b   : > { %v5949_v19 = vadd.f32 %v15438_v28, %v5948_v18  ;;  %v5406_v53 = vsel %vm18268_vm12, %v15494_v57, %v9831_v34  ;;  %v5407_v27 = vsel %vm18269_vm13, %v15496_v62, %v9832_v37  ;;  %v9827_v50 = vunpack.i.h.bf16 %v15238_v48  ;;  %vm18277_vm6 = vmmov %vm18219_vm0 }
 0x59c   : > { %v15448_v55 = vpop.permute.xlu0 %9919  ;;  %v9826_v58 = vunpack.i.l.bf16 %v15238_v48  ;;  %v9842_v49 = vunpack.i.h.bf16 %v15269_v33  ;;  %v9836_v23 = vunpack.i.l.bf16 %v15312_v52  ;;  %vm18282_vm9 = vmmov %vm18219_vm0 }
 0x59d   : > { %vm18283_vm12 = vmmov %vm18219_vm0 }
 0x59e   : > { %v5438_v39 = vsel %vm18270_vm14, %v15222_v7, %v9826_v58  ;;  %v9851_v58 = vunpack.i.l.bf16 %v15331_v42  ;;  %vm18284_vm13 = vmmov %vm18219_vm0 }
 0x59f   : > { %vm18285_vm14 = vmmov %vm18219_vm0 }
 0x5a1   : > { %5987 = vmatmul.bf16.gmra.mxu0 %v5559_v2 }
 0x5a2   : > { %6125 = vmatmul.bf16.gmra.mxu1 %v5521_v29  ;;  %v5564_v29 = vpack.c.bf16 %v5407_v27, %v5406_v53 }
 0x5a4   : > { %v9935_v25 = vpop.permute.xlu0 %9934  ;;  %6076 = vmatmul.bf16.gmra.mxu3 %v5560_v45  ;;  %v5409_v45 = vsel %vm18275_vm1, %v15525_v26, %v9842_v49  ;;  %vm18290_vm1 = vmmov %vm18219_vm0 }
 0x5a5   : > { %v9937_v9 = vunpack.i.h.bf16 %v9935_v25  ;;  %v9936_v6 = vunpack.i.l.bf16 %v9935_v25  ;;  %v5439_v25 = vsel %vm18271_vm4, %v15224_v35, %v9827_v50  ;;  %v9852_v50 = vunpack.i.h.bf16 %v15331_v42  ;;  %vm18286_vm4 = vmmov %vm18219_vm0 }
 0x5a6   : > { %v5565_v21 = vpack.c.bf16 %v5439_v25, %v5438_v39 }
 0x5a7   : > { %v15470_v11 = vsel %vm18263_vm7, %v15375_v24, %v9936_v6  ;;  %v15474_v5 = vsel %vm18264_vm10, %v15377_v40, %v9937_v9  ;;  %v9911_v24 = vunpack.i.l.bf16 %v15401_v59  ;;  %v5950_v40 = vpop.f32.mrf.mxu0  ;;  %v6037_v59 = vpop.f32.mrf.mxu3  ;;  %v9922_v9 = vunpack.i.h.bf16 %v15448_v55  ;;  %vm18278_vm7 = vmmov %vm18219_vm0 }
 0x5a8   : > { %v5542_v60 = vpack.c.bf16 %v15474_v5, %v15470_v11  ;;  %v5951_v18 = vadd.f32 %v15438_v28, %v5950_v40  ;;  %v9921_v6 = vunpack.i.l.bf16 %v15448_v55  ;;  %v15523_v40 = vld [vmem:[#allocation3 + $0x167] sm:$0xff]  ;;  %vm18279_vm10 = vmmov %vm18219_vm0  ;;  %v15552_v11 = vld [vmem:[#allocation3 + $0x18f] sm:$0xff] }
 0x5a9   : > { %v5454_v56 = vsel %vm18266_vm2, %v4717_v46, %v9911_v24  ;;  %v5457_v35 = vsel %vm18273_vm5, %v4720_v17, %v9922_v9  ;;  %v5408_v33 = vsel %vm18274_vm15, %v15523_v40, %v9841_v51  ;;  %v9837_v46 = vunpack.i.h.bf16 %v15312_v52  ;;  %v15550_v9 = vld [vmem:[#allocation3 + $0x187] sm:$0xff]  ;;  %vm18281_vm2 = vmmov %vm18219_vm0 }
 0x5aa   : > { %6224 = vmatmul.bf16.gmra.mxu2 %v5532_v1  ;;  %v5526_v31 = vpack.c.bf16 %v5455_v63, %v5454_v56  ;;  %v15498_v1 = vadd.f32 %v6037_v59, %v5949_v19  ;;  %v5456_v7 = vsel %vm18272_vm8, %v4719_v4, %v9921_v6  ;;  %v5569_v34 = vpack.c.bf16 %v5409_v45, %v5408_v33  ;;  %v9930_v56 = vpop.permute.xlu2 %9929  ;;  %v15567_v33 = vld [vmem:[#allocation3 + $0x189] sm:$0xff]  ;;  %v15569_v45 = vld [vmem:[#allocation3 + $0x191] sm:$0xff]  ;;  %vm18287_vm8 = vmmov %vm18219_vm0 }
 0x5ab   : > { %v5531_v41 = vpack.c.bf16 %v5457_v35, %v5456_v7  ;;  %v5441_v53 = vsel %vm18277_vm6, %v15220_v44, %v9837_v46  ;;  %v9932_v27 = vunpack.i.h.bf16 %v9930_v56  ;;  %v5410_v6 = vsel %vm18219_vm0, %v15550_v9, %v9851_v58  ;;  %v9940_v35 = vpop.permute.xlu1 %9939  ;;  %vm18288_vm5 = vmmov %vm18219_vm0 }
 0x5ac   : > { %v5411_v42 = vsel %vm18280_vm11, %v15552_v11, %v9852_v50  ;;  %v9847_v17 = vunpack.i.h.bf16 %v15363_v12  ;;  %v9846_v7 = vunpack.i.l.bf16 %v15363_v12  ;;  %vm18289_vm15 = vmmov %vm18219_vm0 }
 0x5ad   : > { %v5574_v4 = vpack.c.bf16 %v5411_v42, %v5410_v6  ;;  %vm18292_vm6 = vmmov %vm18219_vm0 }
 0x5ae   : > { %v5442_v46 = vsel %vm18283_vm12, %v15567_v33, %v9846_v7  ;;  %v5443_v12 = vsel %vm18284_vm13, %v15569_v45, %v9847_v17  ;;  %vm18295_vm11 = vmmov %vm18219_vm0 }
 0x5af   : > { %v5953_v15 = vpop.f32.mrf.mxu0  ;;  %v6039_v2 = vpop.f32.mrf.mxu3  ;;  %vm18298_vm12 = vmmov %vm18219_vm0 }
 0x5b0   : > { %v15507_v22 = vadd.f32 %v6039_v2, %v5951_v18  ;;  %v5954_v24 = vadd.f32 %v15438_v28, %v5953_v15  ;;  %v9931_v15 = vunpack.i.l.bf16 %v9930_v56  ;;  %v4721_v18 = vld [vmem:[#allocation3 + $0xa8] sm:$0xff]  ;;  %v4722_v2 = vld [vmem:[#allocation3 + $0xb0] sm:$0xff]  ;;  %vm18299_vm13 = vmmov %vm18219_vm0 }
 0x5b1   : > { %5992 = vmatmul.bf16.gmra.mxu0 %v5564_v29 }
 0x5b2   : > { %6130 = vmatmul.bf16.gmra.mxu1 %v5526_v31  ;;  %v5440_v31 = vsel %vm18276_vm3, %v15218_v43, %v9836_v23  ;;  %v5458_v39 = vsel %vm18278_vm7, %v4721_v18, %v9931_v15  ;;  %v5459_v43 = vsel %vm18279_vm10, %v4722_v2, %v9932_v27  ;;  %v9945_v44 = vpop.permute.xlu2 %9944  ;;  %v9942_v23 = vunpack.i.h.bf16 %v9940_v35  ;;  %v4723_v15 = vld [vmem:[#allocation3 + $0xc8] sm:$0xff]  ;;  %vm18291_vm3 = vmmov %vm18219_vm0 }
 0x5b3   : > { %v5570_v29 = vpack.c.bf16 %v5441_v53, %v5440_v31  ;;  %v5536_v5 = vpack.c.bf16 %v5459_v43, %v5458_v39  ;;  %v9182_v31 = vld [vmem:[%s17498_s9 + $0x118] sm:$0xff]  ;;  %v9862_v53 = vunpack.i.h.bf16 %v15373_v54  ;;  %v9861_v27 = vunpack.i.l.bf16 %v15373_v54  ;;  %v9955_v58 = vpop.permute.xlu1 %9954  ;;  %v15588_v2 = vld [vmem:[#allocation3 + $0x1a7] sm:$0xff]  ;;  %v15590_v39 = vld [vmem:[#allocation3 + $0x1af] sm:$0xff] }
 0x5b4   : > { %6081 = vmatmul.bf16.gmra.mxu3 %v5565_v21  ;;  %v9946_v21 = vunpack.i.l.bf16 %v9945_v44  ;;  %6294 = vmatpush.bf16.msra.mxu0 %v9182_v31  ;;  %vm18293_vm7 = vmmov %vm18219_vm0  ;;  %v15616_v31 = vld [vmem:[#allocation3 + $0x1c7] sm:$0xff] }
 0x5b5   : > { %v5412_v54 = vsel %vm18287_vm8, %v15588_v2, %v9861_v27  ;;  %vm18294_vm10 = vmmov %vm18219_vm0 }
 0x5b6   : > { %vm18302_vm8 = vmmov %vm18219_vm0 }
 0x5b7   : > { %v5955_v48 = vpop.f32.mrf.mxu0  ;;  %v6042_v55 = vpop.f32.mrf.mxu3 }
 0x5b8   : > { %v5956_v63 = vadd.f32 %v15438_v28, %v5955_v48  ;;  %v9947_v48 = vunpack.i.h.bf16 %v9945_v44 }
 0x5ba   : > { %6229 = vmatmul.bf16.gmra.mxu2 %v5537_v32  ;;  %v15527_v32 = vadd.f32 %v6042_v55, %v5954_v24  ;;  %v5494_v24 = vsel %vm18281_vm2, %v15411_v36, %v9946_v21  ;;  %v5495_v55 = vsel %vm18282_vm9, %v15413_v47, %v9947_v48  ;;  %v9941_v36 = vunpack.i.l.bf16 %v9940_v35  ;;  %vm18296_vm2 = vmmov %vm18219_vm0 }
 0x5bb   : > { %v9857_v21 = vunpack.i.h.bf16 %v15296_v3  ;;  %vm18297_vm9 = vmmov %vm18219_vm0 }
 0x5bf   : > { %v5958_v37 = vpop.f32.mrf.mxu0  ;;  %v6044_v19 = vpop.f32.mrf.mxu3 }
 0x5c0   : > { %v15536_v59 = vadd.f32 %v6044_v19, %v5956_v63  ;;  %v5959_v25 = vadd.f32 %v15438_v28, %v5958_v37  ;;  %v5547_v37 = vpack.c.bf16 %v5495_v55, %v5494_v24  ;;  %v9184_v63 = vld [vmem:[%s17500_s11 + $0x8] sm:$0xff]  ;;  %v5575_v19 = vpack.c.bf16 %v5443_v12, %v5442_v46 }
 0x5c1   : > { %5997 = vmatmul.bf16.gmra.mxu0 %v5569_v34  ;;  %6465 = vmatpush.bf16.msrb.mxu3 %v9184_v63 }
 0x5c2   : > { %6135 = vmatmul.bf16.gmra.mxu1 %v5531_v41 }
 0x5c4   : > { %6086 = vmatmul.bf16.gmra.mxu3 %v5570_v29  ;;  %v5460_v29 = vsel %vm18285_vm14, %v4723_v15, %v9941_v36  ;;  %v4725_v36 = vld [vmem:[#allocation3 + $0xe8] sm:$0xff]  ;;  %vm18300_vm14 = vmmov %vm18219_vm0 }
 0x5c7   : > { %v5960_v52 = vpop.f32.mrf.mxu0 }
 0x5c8   : > { %v5961_v41 = vadd.f32 %v15438_v28, %v5960_v52  ;;  %v4724_v52 = vld [vmem:[#allocation3 + $0xd0] sm:$0xff] }
 0x5c9   : > { %v5461_v50 = vsel %vm18286_vm4, %v4724_v52, %v9942_v23  ;;  %v9871_v23 = vunpack.i.l.bf16 %v15319_v30  ;;  %vm18301_vm4 = vmmov %vm18219_vm0 }
 0x5ca   : > { %6234 = vmatmul.bf16.gmra.mxu2 %v5542_v60  ;;  %v6047_v60 = vpop.f32.mrf.mxu3  ;;  %v5541_v43 = vpack.c.bf16 %v5461_v50, %v5460_v29 }
 0x5cb   : > { %v15558_v49 = vadd.f32 %v6047_v60, %v5959_v25  ;;  %v5413_v25 = vsel %vm18288_vm5, %v15590_v39, %v9862_v53  ;;  %v9956_v60 = vunpack.i.l.bf16 %v9955_v58  ;;  %v15618_v53 = vld [vmem:[#allocation3 + $0x1cf] sm:$0xff]  ;;  %v5414_v52 = vsel %vm18219_vm0, %v15616_v31, %v9871_v23  ;;  %vm18303_vm5 = vmmov %vm18219_vm0 }
 0x5cc   : > { %v5579_v48 = vpack.c.bf16 %v5413_v25, %v5412_v54  ;;  %v9866_v54 = vunpack.i.l.bf16 %v15350_v38  ;;  %v9960_v25 = vpop.permute.xlu2 %9959 }
 0x5cd   : > { %v5496_v17 = vsel %vm18289_vm15, %v15455_v8, %v9956_v60  ;;  %vm18304_vm15 = vmmov %vm18219_vm0 }
 0x5cf   : > { %v5963_v51 = vpop.f32.mrf.mxu0 }
 0x5d0   : > { %v5964_v18 = vadd.f32 %v15438_v28, %v5963_v51  ;;  %v9856_v51 = vunpack.i.l.bf16 %v15296_v3 }
 0x5d1   : > { %6002 = vmatmul.bf16.gmra.mxu0 %v5574_v4  ;;  %v9950_v4 = vpop.permute.xlu0 %9949 }
 0x5d2   : > { %6140 = vmatmul.bf16.gmra.mxu1 %v5536_v5  ;;  %v6049_v34 = vpop.f32.mrf.mxu3  ;;  %v9957_v5 = vunpack.i.h.bf16 %v9955_v58  ;;  %v9951_v3 = vunpack.i.l.bf16 %v9950_v4 }
 0x5d3   : > { %v15575_v56 = vadd.f32 %v6049_v34, %v5961_v41  ;;  %v5444_v41 = vsel %vm18291_vm3, %v15275_v13, %v9856_v51  ;;  %v9952_v34 = vunpack.i.h.bf16 %v9950_v4  ;;  %vm18306_vm3 = vmmov %vm18219_vm0 }
 0x5d4   : > { %6091 = vmatmul.bf16.gmra.mxu3 %v5575_v19  ;;  %v5497_v7 = vsel %vm18290_vm1, %v15457_v0, %v9957_v5  ;;  %v9872_v0 = vunpack.i.h.bf16 %v15319_v30  ;;  %v5462_v63 = vsel %vm18293_vm7, %v4725_v36, %v9951_v3  ;;  %v9975_v23 = vpop.permute.xlu2 %9974  ;;  %vm18305_vm1 = vmmov %vm18219_vm0 }
 0x5d5   : > { %v5552_v24 = vpack.c.bf16 %v5497_v7, %v5496_v17  ;;  %v9962_v7 = vunpack.i.h.bf16 %v9960_v25  ;;  %vm18308_vm7 = vmmov %vm18219_vm0 }
 0x5d6   : > { %v5415_v30 = vsel %vm18295_vm11, %v15618_v53, %v9872_v0  ;;  %v4841_v0 = vld [vmem:[#allocation3 + $0x230] sm:$0xff]  ;;  %vm18310_vm11 = vmmov %vm18219_vm0 }
 0x5d7   : > { %v5965_v47 = vpop.f32.mrf.mxu0 }
 0x5d8   : > { %v5966_v35 = vadd.f32 %v15438_v28, %v5965_v47  ;;  %v4726_v47 = vld [vmem:[#allocation3 + $0xf0] sm:$0xff] }
 0x5d9   : > { %v5463_v13 = vsel %vm18294_vm10, %v4726_v47, %v9952_v34  ;;  %v9965_v19 = vpop.permute.xlu0 %9964  ;;  %v4728_v34 = vld [vmem:[#allocation3 + $0x110] sm:$0xff]  ;;  %vm18309_vm10 = vmmov %vm18219_vm0 }
 0x5da   : > { %6239 = vmatmul.bf16.gmra.mxu2 %v5547_v37  ;;  %v6052_v44 = vpop.f32.mrf.mxu3  ;;  %v5445_v37 = vsel %vm18292_vm6, %v15277_v10, %v9857_v21  ;;  %v5546_v27 = vpack.c.bf16 %v5463_v13, %v5462_v63  ;;  %v9967_v29 = vunpack.i.h.bf16 %v9965_v19  ;;  %v9966_v50 = vunpack.i.l.bf16 %v9965_v19  ;;  %v15635_v21 = vld [vmem:[#allocation3 + $0x1d1] sm:$0xff]  ;;  %v15648_v63 = vld [vmem:[#allocation3 + $0x1e7] sm:$0xff]  ;;  %vm18307_vm6 = vmmov %vm18219_vm0 }
 0x5db   : > { %v15596_v6 = vadd.f32 %v6052_v44, %v5964_v18  ;;  %v5580_v12 = vpack.c.bf16 %v5445_v37, %v5444_v41  ;;  %v9867_v44 = vunpack.i.h.bf16 %v15350_v38  ;;  %v9881_v41 = vunpack.i.l.bf16 %v15365_v61  ;;  %v4727_v37 = vld [vmem:[#allocation3 + $0x108] sm:$0xff] }
 0x5dc   : > { %v5498_v5 = vsel %vm18296_vm2, %v15494_v57, %v9966_v50  ;;  %v5499_v60 = vsel %vm18297_vm9, %v15496_v62, %v9967_v29  ;;  %v9961_v57 = vunpack.i.l.bf16 %v9960_v25  ;;  %v15650_v13 = vld [vmem:[#allocation3 + $0x1ef] sm:$0xff]  ;;  %vm18311_vm2 = vmmov %vm18219_vm0 }
 0x5dd   : > { %v5557_v51 = vpack.c.bf16 %v5499_v60, %v5498_v5  ;;  %v5447_v38 = vsel %vm18299_vm13, %v15635_v21, %v9867_v44  ;;  %v9970_v44 = vpop.permute.xlu1 %9969  ;;  %v15666_v60 = vld [vmem:[#allocation3 + $0x1e9] sm:$0xff]  ;;  %vm18312_vm9 = vmmov %vm18219_vm0  ;;  %vm18314_vm13 = vcmask 261120  }
 0x5de   : > { %v5464_v3 = vsel %vm18300_vm14, %v4727_v37, %v9961_v57  ;;  %vm18315_vm14 = vmmov %vm18219_vm0 }
 0x5df   : > { %v5968_v42 = vpop.f32.mrf.mxu0 }
 0x5e0   : > { %v5969_v10 = vadd.f32 %v15438_v28, %v5968_v42 }
 0x5e1   : > { %6007 = vmatmul.bf16.gmra.mxu0 %v5579_v48  ;;  %v15633_v48 = vld [vmem:[#allocation3 + $0x1c9] sm:$0xff] }
 0x5e2   : > { %6145 = vmatmul.bf16.gmra.mxu1 %v5541_v43  ;;  %v6054_v55 = vpop.f32.mrf.mxu3  ;;  %v5584_v43 = vpack.c.bf16 %v5415_v30, %v5414_v52  ;;  %v5446_v17 = vsel %vm18298_vm12, %v15633_v48, %v9866_v54  ;;  %v9976_v52 = vunpack.i.l.bf16 %v9975_v23  ;;  %vm18313_vm12 = vmmov %vm18219_vm0 }
 0x5e3   : > { %v15609_v46 = vadd.f32 %v6054_v55, %v5966_v35  ;;  %v9882_v55 = vunpack.i.h.bf16 %v15365_v61  ;;  %v5416_v61 = vsel %vm18302_vm8, %v15648_v63, %v9881_v41  ;;  %v4730_v41 = vld [vmem:[#allocation3 + $0x130] sm:$0xff]  ;;  %vm18317_vm8 = vmmov %vm18219_vm0 }
 0x5e4   : > { %6096 = vmatmul.bf16.gmra.mxu3 %v5580_v12  ;;  %v4840_v12 = vld [vmem:[#allocation3 + $0x228] sm:$0xff]  ;;  %v5500_v54 = vsel %vm18304_vm15, %v15523_v40, %v9976_v52  ;;  %vm18319_vm15 = vmmov %vm18219_vm0 }
 0x5e5   : > { %v10033_v36 = vpack.i.bf16 %v4841_v0, %v4840_v12 }
 0x5e7   : > { %v5970_v8 = vpop.f32.mrf.mxu0  ;;  %10034 = vrot.lane.b32.xlu2 %v10033_v36, %s17786_s29 }
 0x5e8   : > { %v5971_v42 = vadd.f32 %v15438_v28, %v5970_v8  ;;  %v5465_v8 = vsel %vm18301_vm4, %v4728_v34, %v9962_v7  ;;  %vm18316_vm4 = vmmov %vm18219_vm0 }
 0x5e9   : > { %v5551_v19 = vpack.c.bf16 %v5465_v8, %v5464_v3  ;;  %v9985_v3 = vpop.permute.xlu1 %9984 }
 0x5ea   : > { %6244 = vmatmul.bf16.gmra.mxu2 %v5552_v24  ;;  %v6057_v15 = vpop.f32.mrf.mxu3  ;;  %v5585_v24 = vpack.c.bf16 %v5447_v38, %v5446_v17  ;;  %v9971_v38 = vunpack.i.l.bf16 %v9970_v44 }
 0x5eb   : > { %v15624_v58 = vadd.f32 %v6057_v15, %v5969_v10  ;;  %v9977_v15 = vunpack.i.h.bf16 %v9975_v23 }
 0x5ed   : > { %v5501_v25 = vsel %vm18305_vm1, %v15525_v26, %v9977_v15  ;;  %v9972_v26 = vunpack.i.h.bf16 %v9970_v44  ;;  %vm18320_vm1 = vmmov %vm18314_vm13 }
 0x5ef   : > { %v5973_v18 = vpop.f32.mrf.mxu0  ;;  %v5467_v34 = vsel %vm18309_vm10, %v4730_v41, %v9972_v26  ;;  %v10518_v26 = vld [vmem:[%s10793_s27 + $0x8] sm:$0xff]  ;;  %vm18324_vm10 = vmmov %vm18219_vm0 }
 0x5f0   : > { %v5974_v47 = vadd.f32 %v15438_v28, %v5973_v18  ;;  %v9877_v18 = vunpack.i.h.bf16 %v15389_v14 }
 0x5f1   : > { %6012 = vmatmul.bf16.gmra.mxu0 %v5584_v43  ;;  %v9876_v43 = vunpack.i.l.bf16 %v15389_v14  ;;  %v9181_v14 = vld [vmem:[%s17498_s9 + $0x110] sm:$0xff] }
 0x5f2   : > { %6150 = vmatmul.bf16.gmra.mxu1 %v5546_v27  ;;  %v6059_v4 = vpop.f32.mrf.mxu3  ;;  %v5417_v27 = vsel %vm18303_vm5, %v15650_v13, %v9882_v55  ;;  %6295 = vmatpush.bf16.msra.mxu0 %v9181_v14  ;;  %v4729_v55 = vld [vmem:[#allocation3 + $0x128] sm:$0xff]  ;;  %vm18318_vm5 = vmmov %vm18219_vm0 }
 0x5f3   : > { %v15641_v35 = vadd.f32 %v6059_v4, %v5971_v42  ;;  %v5589_v50 = vpack.c.bf16 %v5417_v27, %v5416_v61  ;;  %v15668_v42 = vld [vmem:[#allocation3 + $0x1f1] sm:$0xff]  ;;  %v5448_v17 = vsel %vm18306_vm3, %v15666_v60, %v9876_v43  ;;  %v5466_v37 = vsel %vm18308_vm7, %v4729_v55, %v9971_v38  ;;  %vm18321_vm3 = vmmov %vm18219_vm0 }
 0x5f4   : > { %6101 = vmatmul.bf16.gmra.mxu3 %v5585_v24  ;;  %v5449_v40 = vsel %vm18307_vm6, %v15668_v42, %v9877_v18  ;;  %v5556_v23 = vpack.c.bf16 %v5467_v34, %v5466_v37  ;;  %v9987_v61 = vunpack.i.h.bf16 %v9985_v3  ;;  %v9986_v27 = vunpack.i.l.bf16 %v9985_v3  ;;  %v15693_v18 = vpop.f32.mrf.mxu2  ;;  %vm18322_vm6 = vmmov %vm18219_vm0 }
 0x5f5   : > { %v5590_v24 = vpack.c.bf16 %v5449_v40, %v5448_v17  ;;  %v10517_v40 = vld [vmem:[%s10793_s27] sm:$0xff]  ;;  %vm18323_vm7 = vmmov %vm18219_vm0 }
 0x5f6   : > { %v5503_v43 = vsel %vm18310_vm11, %v15552_v11, %v9987_v61  ;;  %v6379_v38 = vpack.c.bf16 %v10518_v26, %v10517_v40  ;;  %v4733_v26 = vld [vmem:[#allocation3 + $0x168] sm:$0xff]  ;;  %vm18325_vm11 = vmmov %vm18320_vm1 }
 0x5f7   : > { %v5975_v62 = vpop.f32.mrf.mxu0 }
 0x5f8   : > { %v5976_v5 = vadd.f32 %v15438_v28, %v5975_v62  ;;  %v9180_v62 = vld [vmem:[%s17498_s9 + $0x108] sm:$0xff] }
 0x5f9   : > { %6296 = vmatpush.bf16.msra.mxu0 %v9180_v62  ;;  %v4732_v62 = vld [vmem:[#allocation3 + $0x150] sm:$0xff] }
 0x5fa   : > { %6249 = vmatmul.bf16.gmra.mxu2 %v5557_v51  ;;  %v6062_v10 = vpop.f32.mrf.mxu3  ;;  %v5562_v51 = vpack.c.bf16 %v5501_v25, %v5500_v54 }
 0x5fb   : > { %v15657_v30 = vadd.f32 %v6062_v10, %v5974_v47  ;;  %v9179_v47 = vld [vmem:[%s17498_s9 + $0x100] sm:$0xff]  ;;  %v4843_v10 = vld [vmem:[#allocation3 + $0x51] sm:$0xff] }
 0x5fc   : > { %v15714_v41 = vpop.f32.mrf.mxu2 }
 0x5fd   : > { %6297 = vmatpush.bf16.msra.mxu0 %v9179_v47 }
 0x5ff   : > { %v5978_v29 = vpop.f32.mrf.mxu0 }
 0x600   : > { %v5979_v12 = vadd.f32 %v15438_v28, %v5978_v29  ;;  %v9980_v29 = vpop.permute.xlu0 %9979 }
 0x601   : > { %6017 = vmatmul.bf16.gmra.mxu0 %v5589_v50  ;;  %v9982_v14 = vunpack.i.h.bf16 %v9980_v29 }
 0x602   : > { %6155 = vmatmul.bf16.gmra.mxu1 %v5551_v19  ;;  %v6064_v4 = vpop.f32.mrf.mxu3  ;;  %v4842_v19 = vld [vmem:[#allocation3 + $0x49] sm:$0xff] }
 0x603   : > { %v15677_v7 = vadd.f32 %v6064_v4, %v5976_v5  ;;  %v5518_v50 = vpack.c.bf16 %v4843_v10, %v4842_v19  ;;  %v9183_v4 = vld [vmem:[%s17500_s11] sm:$0xff] }
 0x604   : > { %6106 = vmatmul.bf16.gmra.mxu3 %v5590_v24  ;;  %v5469_v24 = vsel %vm18313_vm12, %v4732_v62, %v9982_v14  ;;  %vm18328_vm12 = vmmov %vm18219_vm0 }
 0x605   : > { %6466 = vmatpush.bf16.msrb.mxu3 %v9183_v4 }
 0x607   : > { %v5980_v57 = vpop.f32.mrf.mxu0 }
 0x608   : > { %v5981_v54 = vadd.f32 %v15438_v28, %v5980_v57  ;;  %v4731_v57 = vld [vmem:[#allocation3 + $0x148] sm:$0xff]  ;;  %v9995_v55 = vpop.permute.xlu0 %9994 }
 0x609   : > { %v9997_v47 = vunpack.i.h.bf16 %v9995_v55  ;;  %v9996_v19 = vunpack.i.l.bf16 %v9995_v55 }
 0x60a   : > { %6254 = vmatmul.bf16.gmra.mxu2 %v5562_v51  ;;  %v6067_v36 = vpop.f32.mrf.mxu3 }
 0x60b   : > { %v15691_v15 = vadd.f32 %v6067_v36, %v5979_v12  ;;  %v4845_v36 = vld [vmem:[#allocation3 + $0x71] sm:$0xff] }
 0x60f   : > { %v6121_v8 = vpop.f32.mrf.mxu1  ;;  %v5983_v52 = vpop.f32.mrf.mxu0 }
 0x610   : > { %v15686_v0 = vadd.f32 %v6121_v8, %v15459_v16  ;;  %v5502_v16 = vsel %vm18219_vm0, %v15550_v9, %v9986_v27  ;;  %v9981_v9 = vunpack.i.l.bf16 %v9980_v29  ;;  %v5984_v34 = vadd.f32 %v15438_v28, %v5983_v52  ;;  %v15727_v29 = vpop.f32.mrf.mxu2 }
 0x611   : > { %8954 = vmatmul.msk.bf16.vlgmr.msra.gmra.mxu0 %vm18311_vm2, %v5518_v50  ;;  %v5567_v5 = vpack.c.bf16 %v5503_v43, %v5502_v16  ;;  %v9990_v50 = vpop.permute.xlu2 %9989  ;;  %v5504_v52 = vsel %vm18315_vm14, %v15588_v2, %v9996_v19  ;;  %vm18326_vm2 = vmmov %vm18219_vm0 }
 0x612   : > { %6160 = vmatmul.bf16.gmra.mxu1 %v5556_v23  ;;  %v6069_v51 = vpop.f32.mrf.mxu3  ;;  %v4844_v23 = vld [vmem:[#allocation3 + $0x69] sm:$0xff]  ;;  %v9991_v4 = vunpack.i.l.bf16 %v9990_v50  ;;  %vm18330_vm14 = vmmov %vm18219_vm0 }
 0x613   : > { %v15707_v17 = vadd.f32 %v6069_v51, %v5981_v54  ;;  %v5523_v27 = vpack.c.bf16 %v4845_v36, %v4844_v23  ;;  %v9992_v51 = vunpack.i.h.bf16 %v9990_v50  ;;  %v10000_v50 = vpop.permute.xlu1 %9999 }
 0x614   : > { %8978 = vmatmul.msk.bf16.vlgmr.msrb.gmra.mxu3 %vm18314_vm13, %v6379_v38  ;;  %v4734_v38 = vld [vmem:[#allocation3 + $0x170] sm:$0xff]  ;;  %vm18329_vm13 = vmmov %vm18219_vm0 }
 0x617   : > { %v6123_v44 = vpop.f32.mrf.mxu1  ;;  %v5985_v11 = vpop.f32.mrf.mxu0 }
 0x618   : > { %v15702_v25 = vadd.f32 %v6123_v44, %v15476_v20  ;;  %v5468_v20 = vsel %vm18312_vm9, %v4731_v57, %v9981_v9  ;;  %v5986_v43 = vadd.f32 %v15438_v28, %v5985_v11  ;;  %v10519_v9 = vld [vmem:[%s10793_s27 + $0x10] sm:$0xff]  ;;  %v5470_v57 = vsel %vm18318_vm5, %v4733_v26, %v9991_v4  ;;  %v4735_v26 = vld [vmem:[#allocation3 + $0x188] sm:$0xff]  ;;  %vm18327_vm9 = vmmov %vm18219_vm0 }
 0x619   : > { %v5561_v8 = vpack.c.bf16 %v5469_v24, %v5468_v20  ;;  %v5471_v11 = vsel %vm18319_vm15, %v4734_v38, %v9992_v51  ;;  %v15741_v24 = vpop.f32.mrf.mxu2  ;;  %v10002_v51 = vunpack.i.h.bf16 %v10000_v50  ;;  %vm18333_vm5 = vmmov %vm18219_vm0 }
 0x61a   : > { %6259 = vmatmul.bf16.gmra.mxu2 %v5567_v5  ;;  %v6072_v12 = vpop.f32.mrf.mxu3  ;;  %vm18334_vm15 = vmmov %vm18219_vm0 }
 0x61b   : > { %v15720_v10 = vadd.f32 %v6072_v12, %v5984_v34  ;;  %v4847_v12 = vld [vmem:[#allocation3 + $0x91] sm:$0xff] }
 0x61f   : > { %v6126_v37 = vpop.f32.mrf.mxu1  ;;  %v5988_v61 = vpop.f32.mrf.mxu0 }
 0x620   : > { %v15718_v3 = vadd.f32 %v6126_v37, %v15498_v1  ;;  %v5505_v1 = vsel %vm18316_vm4, %v15590_v39, %v9997_v47  ;;  %v10520_v39 = vld [vmem:[%s10793_s27 + $0x18] sm:$0xff]  ;;  %v5989_v20 = vadd.f32 %v15438_v28, %v5988_v61  ;;  %v5566_v37 = vpack.c.bf16 %v5471_v11, %v5470_v57  ;;  %vm18331_vm4 = vmmov %vm18320_vm1 }
 0x621   : > { %8955 = vmatmul.msk.bf16.gmra.mxu0 %vm18317_vm8, %v5523_v27  ;;  %v5572_v54 = vpack.c.bf16 %v5505_v1, %v5504_v52  ;;  %v6380_v40 = vpack.c.bf16 %v10520_v39, %v10519_v9  ;;  %v15763_v9 = vpop.f32.mrf.mxu2  ;;  %v10521_v39 = vld [vmem:[%s10793_s27 + $0x20] sm:$0xff]  ;;  %vm18332_vm8 = vmmov %vm18219_vm0 }
 0x622   : > { %6165 = vmatmul.bf16.gmra.mxu1 %v5561_v8  ;;  %v6074_v5 = vpop.f32.mrf.mxu3  ;;  %v4846_v8 = vld [vmem:[#allocation3 + $0x89] sm:$0xff] }
 0x623   : > { %v15733_v14 = vadd.f32 %v6074_v5, %v5986_v43  ;;  %v5528_v27 = vpack.c.bf16 %v4847_v12, %v4846_v8  ;;  %v15759_v5 = vadd.f32 %v15693_v18, %v15686_v0  ;;  %v10015_v0 = vpop.permute.xlu1 %10014 }
 0x624   : > { %8979 = vmatmul.msk.bf16.gmra.mxu3 %vm18320_vm1, %v6380_v40  ;;  %v10522_v40 = vld [vmem:[%s10793_s27 + $0x28] sm:$0xff]  ;;  %v10017_v8 = vunpack.i.h.bf16 %v10015_v0  ;;  %v10016_v12 = vunpack.i.l.bf16 %v10015_v0  ;;  %vm18335_vm1 = vmmov %vm18219_vm0 }
 0x627   : > { %v6128_v16 = vpop.f32.mrf.mxu1  ;;  %v5990_v2 = vpop.f32.mrf.mxu0 }
 0x628   : > { %v15731_v44 = vadd.f32 %v6128_v16, %v15507_v22  ;;  %v10005_v22 = vpop.permute.xlu2 %10004  ;;  %v5991_v1 = vadd.f32 %v15438_v28, %v5990_v2  ;;  %v6381_v2 = vpack.c.bf16 %v10522_v40, %v10521_v39  ;;  %v10523_v39 = vld [vmem:[%s10793_s27 + $0x30] sm:$0xff]  ;;  %v10524_v40 = vld [vmem:[%s10793_s27 + $0x38] sm:$0xff] }
 0x629   : > { %v10007_v23 = vunpack.i.h.bf16 %v10005_v22  ;;  %v10006_v36 = vunpack.i.l.bf16 %v10005_v22 }
 0x62a   : > { %6264 = vmatmul.bf16.gmra.mxu2 %v5572_v54  ;;  %v6077_v34 = vpop.f32.mrf.mxu3 }
 0x62b   : > { %v15746_v47 = vadd.f32 %v6077_v34, %v5989_v20  ;;  %v5506_v61 = vsel %vm18321_vm3, %v15616_v31, %v10006_v36  ;;  %v10001_v31 = vunpack.i.l.bf16 %v10000_v50  ;;  %v4849_v34 = vld [vmem:[#allocation3 + $0xb1] sm:$0xff]  ;;  %v15778_v36 = vadd.f32 %v15714_v41, %v15702_v25  ;;  %vm18336_vm3 = vmmov %vm18219_vm0 }
 0x62d   : > { %v5472_v38 = vsel %vm18324_vm10, %v4735_v26, %v10001_v31  ;;  %v4737_v26 = vld [vmem:[#allocation3 + $0x1a8] sm:$0xff]  ;;  %vm18339_vm10 = vmmov %vm18219_vm0 }
 0x62f   : > { %v6131_v62 = vpop.f32.mrf.mxu1  ;;  %v5993_v19 = vpop.f32.mrf.mxu0 }
 0x630   : > { %v15744_v55 = vadd.f32 %v6131_v62, %v15527_v32  ;;  %v5507_v32 = vsel %vm18322_vm6, %v15618_v53, %v10007_v23  ;;  %v5994_v11 = vadd.f32 %v15438_v28, %v5993_v19  ;;  %v15780_v19 = vpop.f32.mrf.mxu2  ;;  %vm18337_vm6 = vmmov %vm18331_vm4 }
 0x631   : > { %8956 = vmatmul.msk.bf16.gmra.mxu0 %vm18323_vm7, %v5528_v27  ;;  %v5577_v43 = vpack.c.bf16 %v5507_v32, %v5506_v61  ;;  %v10010_v61 = vpop.permute.xlu0 %10009  ;;  %v5509_v32 = vsel %vm18327_vm9, %v15650_v13, %v10017_v8  ;;  %v15811_v8 = vadd.f32 %v15741_v24, %v15731_v44  ;;  %vm18338_vm7 = vmmov %vm18219_vm0 }
 0x632   : > { %6170 = vmatmul.bf16.gmra.mxu1 %v5566_v37  ;;  %v6079_v54 = vpop.f32.mrf.mxu3  ;;  %v4848_v37 = vld [vmem:[#allocation3 + $0xa9] sm:$0xff]  ;;  %vm18342_vm9 = vmmov %vm18331_vm4 }
 0x633   : > { %v15761_v4 = vadd.f32 %v6079_v54, %v5991_v1  ;;  %v5533_v50 = vpack.c.bf16 %v4849_v34, %v4848_v37  ;;  %v10012_v54 = vunpack.i.h.bf16 %v10010_v61 }
 0x634   : > { %8980 = vmatmul.msk.bf16.gmra.mxu3 %vm18325_vm11, %v6381_v2  ;;  %v6382_v2 = vpack.c.bf16 %v10524_v40, %v10523_v39  ;;  %vm18340_vm11 = vmmov %vm18219_vm0 }
 0x637   : > { %v6133_v52 = vpop.f32.mrf.mxu1  ;;  %v5995_v53 = vpop.f32.mrf.mxu0 }
 0x638   : > { %v15755_v16 = vadd.f32 %v6133_v52, %v15536_v59  ;;  %v4736_v59 = vld [vmem:[#allocation3 + $0x190] sm:$0xff]  ;;  %v5996_v25 = vadd.f32 %v15438_v28, %v5995_v53 }
 0x639   : > { %v5473_v57 = vsel %vm18219_vm0, %v4736_v59, %v10002_v51  ;;  %v10011_v51 = vunpack.i.l.bf16 %v10010_v61  ;;  %v4738_v53 = vld [vmem:[#allocation3 + $0x1b0] sm:$0xff]  ;;  %v10020_v61 = vpop.permute.xlu2 %10019 }
 0x63a   : > { %6269 = vmatmul.bf16.gmra.mxu2 %v5577_v43  ;;  %v5571_v62 = vpack.c.bf16 %v5473_v57, %v5472_v38  ;;  %v6082_v20 = vpop.f32.mrf.mxu3  ;;  %v5475_v59 = vsel %vm18330_vm14, %v4738_v53, %v10012_v54  ;;  %v10025_v38 = vpop.permute.xlu0 %10024  ;;  %v10021_v39 = vunpack.i.l.bf16 %v10020_v61  ;;  %v10525_v53 = vld [vmem:[%s10793_s27 + $0x40] sm:$0xff]  ;;  %vm18346_vm14 = vmmov %vm18219_vm0 }
 0x63b   : > { %v15774_v23 = vadd.f32 %v6082_v20, %v5994_v11  ;;  %v15802_v57 = vpop.f32.mrf.mxu2  ;;  %v4850_v11 = vld [vmem:[#allocation3 + $0xc9] sm:$0xff]  ;;  %v10027_v20 = vunpack.i.h.bf16 %v10025_v38  ;;  %v10026_v37 = vunpack.i.l.bf16 %v10025_v38 }
 0x63c   : > { %v4740_v38 = vld [vmem:[#allocation3 + $0x1d0] sm:$0xff] }
 0x63f   : > { %v6136_v18 = vpop.f32.mrf.mxu1  ;;  %v5998_v27 = vpop.f32.mrf.mxu0 }
 0x640   : > { %v15772_v22 = vadd.f32 %v6136_v18, %v15558_v49  ;;  %v5508_v49 = vsel %vm18326_vm2, %v15648_v63, %v10016_v12  ;;  %v15795_v63 = vadd.f32 %v15727_v29, %v15718_v3  ;;  %v5999_v3 = vadd.f32 %v15438_v28, %v5998_v27  ;;  %vm18341_vm2 = vmmov %vm18219_vm0 }
 0x641   : > { %8957 = vmatmul.msk.bf16.gmra.mxu0 %vm18328_vm12, %v5533_v50  ;;  %v5582_v1 = vpack.c.bf16 %v5509_v32, %v5508_v49  ;;  %v4806_v49 = vld [vmem:[#allocation3 + $0x207] sm:$0xff]  ;;  %v4807_v32 = vld [vmem:[#allocation3 + $0x20f] sm:$0xff]  ;;  %vm18344_vm12 = vmmov %vm18219_vm0 }
 0x642   : > { %6175 = vmatmul.bf16.gmra.mxu1 %v5571_v62  ;;  %v6084_v43 = vpop.f32.mrf.mxu3  ;;  %v4851_v62 = vld [vmem:[#allocation3 + $0xd1] sm:$0xff]  ;;  %v5510_v27 = vsel %vm18332_vm8, %v4806_v49, %v10026_v37  ;;  %vm18348_vm8 = vmmov %vm18219_vm0 }
 0x643   : > { %v15791_v31 = vadd.f32 %v6084_v43, %v5996_v25  ;;  %v5538_v50 = vpack.c.bf16 %v4851_v62, %v4850_v11  ;;  %v15817_v43 = vpop.f32.mrf.mxu2  ;;  %v4852_v62 = vld [vmem:[#allocation3 + $0xe9] sm:$0xff]  ;;  %v4853_v49 = vld [vmem:[#allocation3 + $0xf1] sm:$0xff] }
 0x644   : > { %8981 = vmatmul.msk.bf16.gmra.mxu3 %vm18331_vm4, %v6382_v2  ;;  %v15826_v2 = vadd.f32 %v15763_v9, %v15744_v55 }
 0x647   : > { %v6138_v52 = vpop.f32.mrf.mxu1  ;;  %v6000_v13 = vpop.f32.mrf.mxu0 }
 0x648   : > { %v15789_v41 = vadd.f32 %v6138_v52, %v15575_v56  ;;  %v5474_v56 = vsel %vm18329_vm13, %v4737_v26, %v10011_v51  ;;  %v5511_v52 = vsel %vm18333_vm5, %v4807_v32, %v10027_v20  ;;  %v10022_v51 = vunpack.i.h.bf16 %v10020_v61  ;;  %v4809_v61 = vld [vmem:[#allocation3 + $0x22f] sm:$0xff]  ;;  %vm18345_vm13 = vmmov %vm18219_vm0 }
 0x649   : > { %v5576_v29 = vpack.c.bf16 %v5475_v59, %v5474_v56  ;;  %v5587_v24 = vpack.c.bf16 %v5511_v52, %v5510_v27  ;;  %v10526_v56 = vld [vmem:[%s10793_s27 + $0x48] sm:$0xff]  ;;  %v15840_v27 = vadd.f32 %v15780_v19, %v15755_v16  ;;  %vm18350_vm5 = vmmov %vm18331_vm4 }
 0x64a   : > { %6274 = vmatmul.bf16.gmra.mxu2 %v5582_v1  ;;  %v6087_v18 = vpop.f32.mrf.mxu3  ;;  %v6001_v1 = vadd.f32 %v15438_v28, %v6000_v13  ;;  %v6383_v13 = vpack.c.bf16 %v10526_v56, %v10525_v53  ;;  %v4739_v59 = vld [vmem:[#allocation3 + $0x1c8] sm:$0xff] }
 0x64b   : > { %v15807_v34 = vadd.f32 %v6087_v18, %v5999_v3  ;;  %v10035_v3 = vpop.permute.xlu2 %10034  ;;  %v6230_v52 = vpop.f32.mrf.mxu2 }
 0x64c   : > { %v10037_v55 = vunpack.i.h.bf16 %v10035_v3  ;;  %v10036_v9 = vunpack.i.l.bf16 %v10035_v3 }
 0x64f   : > { %v15804_v0 = vpop.f32.mrf.mxu1  ;;  %v6003_v12 = vpop.f32.mrf.mxu0 }
 0x650   : > { %v6004_v11 = vadd.f32 %v15438_v28, %v6003_v12  ;;  %v5513_v12 = vsel %vm18339_vm10, %v4809_v61, %v10037_v55  ;;  %v4855_v61 = vld [vmem:[#allocation3 + $0x111] sm:$0xff] }
 0x651   : > { %8958 = vmatmul.msk.bf16.gmra.mxu0 %vm18334_vm15, %v5538_v50  ;;  %v4808_v50 = vld [vmem:[#allocation3 + $0x227] sm:$0xff]  ;;  %vm18352_vm15 = vmmov %vm18219_vm0 }
 0x652   : > { %6180 = vmatmul.bf16.gmra.mxu1 %v5576_v29  ;;  %v6089_v54 = vpop.f32.mrf.mxu3  ;;  %v5477_v29 = vsel %vm18336_vm3, %v4740_v38, %v10022_v51  ;;  %v15853_v38 = vadd.f32 %v15802_v57, %v15772_v22  ;;  %vm18356_vm3 = vmmov %vm18219_vm0 }
 0x653   : > { %v15822_v40 = vadd.f32 %v6089_v54, %v6001_v1  ;;  %v5512_v1 = vsel %vm18338_vm7, %v4808_v50, %v10036_v9  ;;  %v10030_v54 = vpop.permute.xlu1 %10029  ;;  %v15857_v55 = vpop.f32.mrf.mxu2  ;;  %v4742_v9 = vld [vmem:[#allocation3 + $0x1f0] sm:$0xff]  ;;  %vm18360_vm7 = vmmov %vm18219_vm0 }
 0x654   : > { %8982 = vmatmul.msk.bf16.gmra.mxu3 %vm18337_vm6, %v6383_v13  ;;  %v5592_v51 = vpack.c.bf16 %v5513_v12, %v5512_v1  ;;  %v10032_v56 = vunpack.i.h.bf16 %v10030_v54  ;;  %v10031_v13 = vunpack.i.l.bf16 %v10030_v54  ;;  %v4854_v50 = vld [vmem:[#allocation3 + $0x109] sm:$0xff]  ;;  %v15869_v12 = vadd.f32 %v15817_v43, %v15789_v41  ;;  %v10040_v54 = vpop.permute.xlu0 %10039 }
 0x655   : > { %v10042_v43 = vunpack.i.h.bf16 %v10040_v54 }
 0x657   : > { %v6143_v25 = vpop.f32.mrf.mxu1  ;;  %v6005_v26 = vpop.f32.mrf.mxu0 }
 0x658   : > { %v15820_v44 = vadd.f32 %v6143_v25, %v15609_v46  ;;  %v5476_v46 = vsel %vm18335_vm1, %v4739_v59, %v10021_v39  ;;  %v6006_v53 = vadd.f32 %v15438_v28, %v6005_v26  ;;  %v4741_v26 = vld [vmem:[#allocation3 + $0x1e8] sm:$0xff]  ;;  %vm18354_vm1 = vmmov %vm18331_vm4 }
 0x659   : > { %v5581_v20 = vpack.c.bf16 %v5477_v29, %v5476_v46  ;;  %v10527_v46 = vld [vmem:[%s10793_s27 + $0x50] sm:$0xff]  ;;  %v10528_v29 = vld [vmem:[%s10793_s27 + $0x58] sm:$0xff]  ;;  %vm18358_vm6 = vmmov %vm18354_vm1 }
 0x65a   : > { %6279 = vmatmul.bf16.gmra.mxu2 %v5587_v24  ;;  %v6092_v37 = vpop.f32.mrf.mxu3  ;;  %v5543_v24 = vpack.c.bf16 %v4853_v49, %v4852_v62  ;;  %v5479_v62 = vsel %vm18341_vm2, %v4742_v9, %v10032_v56  ;;  %v10041_v56 = vunpack.i.l.bf16 %v10040_v54  ;;  %vm18362_vm10 = vmmov %vm18354_vm1 }
 0x65b   : > { %v15836_v32 = vadd.f32 %v6092_v37, %v6004_v11  ;;  %v6384_v11 = vpack.c.bf16 %v10528_v29, %v10527_v46  ;;  %v10530_v29 = vld [vmem:[%s10793_s27 + $0x60] sm:$0xff]  ;;  %vm18366_vm2 = vmmov %vm18219_vm0 }
 0x65f   : > { %v15833_v18 = vpop.f32.mrf.mxu1  ;;  %v6008_v25 = vpop.f32.mrf.mxu0 }
 0x660   : > { %v6009_v22 = vadd.f32 %v15438_v28, %v6008_v25  ;;  %v6142_v28 = vadd.f32 %v15804_v0, %v15596_v6  ;;  %v4743_v6 = vld [vmem:[#allocation3 + $0x208] sm:$0xff]  ;;  %v4744_v0 = vld [vmem:[#allocation3 + $0x210] sm:$0xff] }
 0x661   : > { %8959 = vmatmul.msk.bf16.gmra.mxu0 %vm18219_vm0, %v5543_v24  ;;  %v5548_v24 = vpack.c.bf16 %v4855_v61, %v4854_v50  ;;  %v4856_v50 = vld [vmem:[#allocation3 + $0x129] sm:$0xff]  ;;  %v4857_v61 = vld [vmem:[#allocation3 + $0x131] sm:$0xff] }
 0x662   : > { %6185 = vmatmul.bf16.gmra.mxu1 %v5581_v20  ;;  %v6094_v19 = vpop.f32.mrf.mxu3  ;;  %v15884_v9 = vadd.f32 %v6230_v52, %v6142_v28  ;;  %v5553_v54 = vpack.c.bf16 %v4857_v61, %v4856_v50  ;;  %v6147_v28 = vadd.f32 %v15833_v18, %v15624_v58  ;;  %v4858_v18 = vld [vmem:[#allocation3 + $0x149] sm:$0xff] }
 0x663   : > { %v15849_v59 = vadd.f32 %v6094_v19, %v6006_v53 }
 0x664   : > { %8983 = vmatmul.msk.bf16.gmra.mxu3 %vm18342_vm9, %v6384_v11  ;;  %v10531_v11 = vld [vmem:[%s10793_s27 + $0x68] sm:$0xff]  ;;  %vm18367_vm9 = vmmov %vm18354_vm1 }
 0x667   : > { %v6148_v39 = vpop.f32.mrf.mxu1  ;;  %v6010_v3 = vpop.f32.mrf.mxu0 }
 0x668   : > { %v15847_v16 = vadd.f32 %v6148_v39, %v15641_v35  ;;  %v5478_v35 = vsel %vm18340_vm11, %v4741_v26, %v10031_v13  ;;  %v10529_v39 = vld [vmem:[%s17499_s10] ss:$0 sm:$0xff]  ;;  %v6385_v26 = vpack.c.bf16 %v10531_v11, %v10530_v29  ;;  %v10532_v11 = vld [vmem:[%s10793_s27 + $0x70] sm:$0xff]  ;;  %vm18365_vm11 = vmmov %vm18354_vm1 }
 0x669   : > { %v5586_v57 = vpack.c.bf16 %v5479_v62, %v5478_v35  ;;  %v6011_v53 = vadd.f32 %v10529_v39, %v6010_v3  ;;  %v5480_v35 = vsel %vm18345_vm13, %v4743_v6, %v10041_v56  ;;  %v5481_v3 = vsel %vm18346_vm14, %v4744_v0, %v10042_v43  ;;  %vm18369_vm13 = vmmov %vm18354_vm1 }
 0x66a   : > { %6284 = vmatmul.bf16.gmra.mxu2 %v5592_v51  ;;  %v6097_v37 = vpop.f32.mrf.mxu3  ;;  %v6235_v51 = vpop.f32.mrf.mxu2  ;;  %vm18370_vm14 = vmmov %vm18219_vm0 }
 0x66b   : > { %v15865_v49 = vadd.f32 %v6097_v37, %v6009_v22  ;;  %v15903_v0 = vadd.f32 %v6235_v51, %v6147_v28 }
 0x66d   : > { %18343 = vst [vmem:[#allocation47_spill] sm:$0xff] %v15865_v49 }
 0x66f   : > { %v15862_v20 = vpop.f32.mrf.mxu1  ;;  %v6013_v1 = vpop.f32.mrf.mxu0 }
 0x670   : > { %v6014_v62 = vadd.f32 %v10529_v39, %v6013_v1  ;;  %v6152_v51 = vadd.f32 %v15862_v20, %v15657_v30 }
 0x671   : > { %8960 = vmatmul.msk.bf16.gmra.mxu0 %vm18344_vm12, %v5548_v24  ;;  %vm18368_vm12 = vmmov %vm18219_vm0 }
 0x672   : > { %6190 = vmatmul.bf16.gmra.mxu1 %v5586_v57  ;;  %v6099_v41 = vpop.f32.mrf.mxu3  ;;  %v15889_v22 = vpop.f32.mrf.mxu2  ;;  %v5591_v57 = vpack.c.bf16 %v5481_v3, %v5480_v35 }
 0x673   : > { %v15880_v13 = vadd.f32 %v6099_v41, %v6011_v53 }
 0x674   : > { %8984 = vmatmul.msk.bf16.gmra.mxu3 %vm18331_vm4, %v6385_v26  ;;  %v10533_v26 = vld [vmem:[%s10793_s27 + $0x78] sm:$0xff]  ;;  %vm18371_vm4 = vmmov %vm18354_vm1 }
 0x675   : > { %v6386_v6 = vpack.c.bf16 %v10533_v26, %v10532_v11  ;;  %v10535_v11 = vld [vmem:[%s10793_s27 + $0x88] sm:$0xff] }
 0x677   : > { %v6153_v25 = vpop.f32.mrf.mxu1  ;;  %v6015_v46 = vpop.f32.mrf.mxu0 }
 0x678   : > { %v15878_v19 = vadd.f32 %v6153_v25, %v15677_v7  ;;  %v6016_v1 = vadd.f32 %v10529_v39, %v6015_v46 }
 0x67a   : > { %v6102_v37 = vpop.f32.mrf.mxu3  ;;  %v6240_v56 = vpop.f32.mrf.mxu2 }
 0x67b   : > { %v15891_v52 = vadd.f32 %v6102_v37, %v6014_v62  ;;  %v15921_v26 = vadd.f32 %v6240_v56, %v6152_v51 }
 0x67d   : > { %18347 = vst [vmem:[#allocation34_spill] sm:$0xff] %v15891_v52 }
 0x67f   : > { %v6156_v7 = vpop.f32.mrf.mxu1  ;;  %v6018_v24 = vpop.f32.mrf.mxu0 }
 0x680   : > { %v6019_v3 = vadd.f32 %v10529_v39, %v6018_v24  ;;  %v6157_v56 = vadd.f32 %v6156_v7, %v15691_v15 }
 0x681   : > { %8961 = vmatmul.msk.bf16.gmra.mxu0 %vm18348_vm8, %v5553_v54  ;;  %vm18373_vm8 = vmmov %vm18219_vm0 }
 0x682   : > { %6195 = vmatmul.bf16.gmra.mxu1 %v5591_v57  ;;  %v6104_v41 = vpop.f32.mrf.mxu3  ;;  %v15909_v50 = vpop.f32.mrf.mxu2 }
 0x683   : > { %v15899_v43 = vadd.f32 %v6104_v41, %v6016_v1  ;;  %v10534_v41 = vld [vmem:[%s10793_s27 + $0x80] sm:$0xff] }
 0x684   : > { %8985 = vmatmul.msk.bf16.gmra.mxu3 %vm18350_vm5, %v6386_v6  ;;  %vm18374_vm5 = vmmov %vm18354_vm1 }
 0x685   : > { %18349 = vst [vmem:[#allocation48_spill] sm:$0xff] %v15899_v43 }
 0x687   : > { %v6158_v25 = vpop.f32.mrf.mxu1  ;;  %v6020_v29 = vpop.f32.mrf.mxu0 }
 0x688   : > { %v15897_v53 = vadd.f32 %v6158_v25, %v15707_v17  ;;  %v4859_v17 = vld [vmem:[#allocation3 + $0x151] sm:$0xff]  ;;  %v6021_v24 = vadd.f32 %v10529_v39, %v6020_v29 }
 0x689   : > { %v5558_v37 = vpack.c.bf16 %v4859_v17, %v4858_v18  ;;  %v4861_v39 = vld [vmem:[#allocation3 + $0x171] sm:$0xff] }
 0x68a   : > { %v6107_v58 = vpop.f32.mrf.mxu3 }
 0x68b   : > { %v15906_v46 = vadd.f32 %v6107_v58, %v6019_v3  ;;  %v6245_v3 = vpop.f32.mrf.mxu2 }
 0x68d   : > { %18351 = vst [vmem:[#allocation37_spill] sm:$0xff] %v15906_v46 }
 0x68f   : > { %v6161_v35 = vpop.f32.mrf.mxu1  ;;  %v6299_v62 = vpop.f32.mrf.mxu0 }
 0x690   : > { %v6300_v57 = vadd.f32 %v6299_v62, %v15759_v5  ;;  %v6387_v5 = vpack.c.bf16 %v10535_v11, %v10534_v41  ;;  %v15940_v41 = vadd.f32 %v6245_v3, %v6157_v56 }
 0x691   : > { %8962 = vmatmul.msk.bf16.gmra.mxu0 %vm18352_vm15, %v5558_v37  ;;  %vm18391_vm15 = vmmov %vm18219_vm0 }
 0x692   : > { %v6109_v28 = vpop.f32.mrf.mxu3 }
 0x693   : > { %v15917_v25 = vadd.f32 %v6109_v28, %v6021_v24  ;;  %v15930_v62 = vpop.f32.mrf.mxu2  ;;  %v10537_v28 = vld [vmem:[%s10793_s27 + $0x98] sm:$0xff] }
 0x694   : > { %8986 = vmatmul.msk.bf16.gmra.mxu3 %vm18354_vm1, %v6387_v5  ;;  %vm18392_vm1 = vmmov %vm18219_vm0 }
 0x695   : > { %18353 = vst [vmem:[#allocation49_spill] sm:$0xff] %v15917_v25  ;;  %v6589_v25 = vld [vmem:[%s17497_s8 + $0x38] sm:$0xff] }
 0x696   : > { %6772 = vmatpush.msra.mxu1 %v6589_v25 }
 0x697   : > { %v6163_v61 = vpop.f32.mrf.mxu1  ;;  %v6301_v1 = vpop.f32.mrf.mxu0 }
 0x698   : > { %v15915_v54 = vadd.f32 %v6163_v61, %v15733_v14  ;;  %v6302_v6 = vadd.f32 %v6301_v1, %v15778_v36  ;;  %v4860_v14 = vld [vmem:[#allocation3 + $0x169] sm:$0xff] }
 0x699   : > { %v5563_v17 = vpack.c.bf16 %v4861_v39, %v4860_v14  ;;  %v10538_v39 = vld [vmem:[%s10793_s27 + $0xa0] sm:$0xff] }
 0x69a   : > { %v6468_v20 = vpop.f32.mrf.mxu3 }
 0x69b   : > { %v15925_v29 = vadd.f32 %v6468_v20, %v6300_v57  ;;  %v10536_v57 = vld [vmem:[%s10793_s27 + $0x90] sm:$0xff]  ;;  %v6162_v20 = vadd.f32 %v6161_v35, %v15720_v10 }
 0x69c   : > { %v6388_v1 = vpack.c.bf16 %v10537_v28, %v10536_v57  ;;  %v4865_v10 = vld [vmem:[#allocation3 + $0x1b1] sm:$0xff] }
 0x69d   : > { %18355 = vst [vmem:[#allocation38_spill] sm:$0xff] %v15925_v29  ;;  %v6659_v25 = vmul.f32 %v15925_v29, %v15925_v29 }
 0x69f   : > { %v6166_v30 = vpop.f32.mrf.mxu1  ;;  %v6304_v58 = vpop.f32.mrf.mxu0 }
 0x6a0   : > { %v6305_v18 = vadd.f32 %v6304_v58, %v15795_v63  ;;  %v10539_v58 = vld [vmem:[%s10793_s27 + $0xa8] sm:$0xff]  ;;  %v6167_v57 = vadd.f32 %v6166_v30, %v15746_v47 }
 0x6a1   : > { %8963 = vmatmul.msk.bf16.gmra.mxu0 %vm18356_vm3, %v5563_v17  ;;  %v6389_v17 = vpack.c.bf16 %v10539_v58, %v10538_v39  ;;  %vm18393_vm3 = vmmov %vm18219_vm0 }
 0x6a2   : > { %v6470_v51 = vpop.f32.mrf.mxu3 }
 0x6a3   : > { %v15935_v61 = vadd.f32 %v6470_v51, %v6302_v6  ;;  %v5568_v6 = vpack.c.bf16 %v15569_v45, %v15567_v33  ;;  %v4864_v45 = vld [vmem:[#allocation3 + $0x1a9] sm:$0xff] }
 0x6a4   : > { %8987 = vmatmul.msk.bf16.gmra.mxu3 %vm18358_vm6, %v6388_v1  ;;  %vm18394_vm6 = vmmov %vm18219_vm0 }
 0x6a5   : > { %18357 = vst [vmem:[#allocation39_spill] sm:$0xff] %v15935_v61 }
 0x6a7   : > { %v6168_v36 = vpop.f32.mrf.mxu1  ;;  %v6306_v24 = vpop.f32.mrf.mxu0 }
 0x6a8   : > { %v15933_v37 = vadd.f32 %v6168_v36, %v15761_v4  ;;  %v6307_v63 = vadd.f32 %v6306_v24, %v15811_v8  ;;  %v6250_v4 = vpop.f32.mrf.mxu2  ;;  %v5573_v24 = vpack.c.bf16 %v4865_v10, %v4864_v45  ;;  %v10542_v45 = vld [vmem:[%s10793_s27 + $0xc0] sm:$0xff]  ;;  %v10543_v10 = vld [vmem:[%s10793_s27 + $0xc8] sm:$0xff] }
 0x6a9   : > { %v15955_v56 = vadd.f32 %v6250_v4, %v6162_v20  ;;  %v10541_v4 = vld [vmem:[%s10793_s27 + $0xb8] sm:$0xff] }
 0x6aa   : > { %v6473_v15 = vpop.f32.mrf.mxu3 }
 0x6ab   : > { %v15943_v7 = vadd.f32 %v6473_v15, %v6305_v18  ;;  %v10540_v15 = vld [vmem:[%s10793_s27 + $0xb0] sm:$0xff] }
 0x6ad   : > { %18359 = vst [vmem:[#allocation40_spill] sm:$0xff] %v15943_v7 }
 0x6af   : > { %v6309_v11 = vpop.f32.mrf.mxu0  ;;  %v6171_v39 = vpop.f32.mrf.mxu1 }
 0x6b0   : > { %v6310_v5 = vadd.f32 %v6309_v11, %v15826_v2  ;;  %v15957_v2 = vpop.f32.mrf.mxu2  ;;  %v6390_v11 = vpack.c.bf16 %v10541_v4, %v10540_v15 }
 0x6b1   : > { %8964 = vmatmul.msk.bf16.gmra.mxu0 %vm18360_vm7, %v5568_v6  ;;  %vm18396_vm7 = vmmov %vm18219_vm0 }
 0x6b2   : > { %v6475_v14 = vpop.f32.mrf.mxu3 }
 0x6b3   : > { %v15950_v8 = vadd.f32 %v6475_v14, %v6307_v63 }
 0x6b4   : > { %8988 = vmatmul.msk.bf16.gmra.mxu3 %vm18362_vm10, %v6389_v17  ;;  %vm18398_vm10 = vmmov %vm18219_vm0 }
 0x6b5   : > { %18361 = vst [vmem:[#allocation51_spill] sm:$0xff] %v15950_v8  ;;  %v6662_v52 = vmul.f32 %v15950_v8, %v15950_v8 }
 0x6b7   : > { %v6311_v3 = vpop.f32.mrf.mxu0 }
 0x6b8   : > { %v6312_v18 = vadd.f32 %v6311_v3, %v15840_v27  ;;  %v6255_v27 = vpop.f32.mrf.mxu2  ;;  %v5578_v3 = vpack.c.bf16 %v15635_v21, %v15633_v48 }
 0x6ba   : > { %v6478_v33 = vpop.f32.mrf.mxu3 }
 0x6bb   : > { %v15960_v35 = vadd.f32 %v6478_v33, %v6310_v5  ;;  %v15970_v5 = vadd.f32 %v6255_v27, %v6167_v57 }
 0x6bd   : > { %18363 = vst [vmem:[#allocation59_spill] sm:$0xff] %v15960_v35 }
 0x6bf   : > { %v6314_v36 = vpop.f32.mrf.mxu0 }
 0x6c0   : > { %v6315_v51 = vadd.f32 %v6314_v36, %v15853_v38  ;;  %v15973_v38 = vpop.f32.mrf.mxu2  ;;  %v6391_v36 = vpack.c.bf16 %v10543_v10, %v10542_v45 }
 0x6c1   : > { %8965 = vmatmul.msk.bf16.gmra.mxu0 %vm18219_vm0, %v5573_v24  ;;  %v5583_v24 = vpack.c.bf16 %v15668_v42, %v15666_v60 }
 0x6c2   : > { %v6480_v28 = vpop.f32.mrf.mxu3 }
 0x6c3   : > { %v15965_v1 = vadd.f32 %v6480_v28, %v6312_v18  ;;  %v10544_v28 = vld [vmem:[%s10793_s27 + $0xd0] sm:$0xff] }
 0x6c4   : > { %8989 = vmatmul.msk.bf16.gmra.mxu3 %vm18365_vm11, %v6390_v11  ;;  %v4870_v11 = vld [vmem:[#allocation3 + $0x209] sm:$0xff]  ;;  %vm18399_vm11 = vmmov %vm18219_vm0 }
 0x6c5   : > { %18364 = vst [vmem:[#allocation50_spill] sm:$0xff] %v15965_v1 }
 0x6c7   : > { %v6316_v63 = vpop.f32.mrf.mxu0 }
 0x6c8   : > { %v6317_v6 = vadd.f32 %v6316_v63, %v15869_v12  ;;  %v6172_v12 = vadd.f32 %v6171_v39, %v15774_v23  ;;  %v6260_v18 = vpop.f32.mrf.mxu2  ;;  %v10545_v63 = vld [vmem:[%s10793_s27 + $0xd8] sm:$0xff] }
 0x6c9   : > { %v6392_v15 = vpack.c.bf16 %v10545_v63, %v10544_v28 }
 0x6ca   : > { %v6483_v20 = vpop.f32.mrf.mxu3 }
 0x6cb   : > { %v15975_v14 = vadd.f32 %v6483_v20, %v6315_v51 }
 0x6cf   : > { %v6319_v47 = vpop.f32.mrf.mxu0 }
 0x6d0   : > { %v6320_v30 = vadd.f32 %v6319_v47, %v15884_v9  ;;  %v6261_v9 = vadd.f32 %v6260_v18, %v6172_v12  ;;  %v4873_v18 = vld [vmem:[#allocation3 + $0x231] sm:$0xff] }
 0x6d1   : > { %8966 = vmatmul.msk.bf16.gmra.mxu0 %vm18366_vm2, %v5578_v3  ;;  %v10547_v3 = vld [vmem:[%s10793_s27 + $0xe8] sm:$0xff]  ;;  %vm18400_vm2 = vmmov %vm18219_vm0 }
 0x6d2   : > { %v6485_v58 = vpop.f32.mrf.mxu3 }
 0x6d3   : > { %v15982_v17 = vadd.f32 %v6485_v58, %v6317_v6  ;;  %v4871_v6 = vld [vmem:[#allocation3 + $0x211] sm:$0xff]  ;;  %v4872_v58 = vld [vmem:[#allocation3 + $0x229] sm:$0xff] }
 0x6d4   : > { %8990 = vmatmul.msk.bf16.gmra.mxu3 %vm18367_vm9, %v6391_v36  ;;  %v5588_v42 = vpack.c.bf16 %v4871_v6, %v4870_v11  ;;  %vm18401_vm9 = vmmov %vm18219_vm0 }
 0x6d7   : > { %v15984_v33 = vpop.f32.mrf.mxu0 }
 0x6da   : > { %v6488_v48 = vpop.f32.mrf.mxu3 }
 0x6db   : > { %v15989_v21 = vadd.f32 %v6488_v48, %v6320_v30  ;;  %v10546_v30 = vld [vmem:[%s10793_s27 + $0xe0] sm:$0xff] }
 0x6dc   : > { %v6393_v39 = vpack.c.bf16 %v10547_v3, %v10546_v30 }
 0x6df   : > { %v6324_v51 = vpop.f32.mrf.mxu0 }
 0x6e0   : > { %v6325_v23 = vadd.f32 %v6324_v51, %v15903_v0 }
 0x6e1   : > { %8967 = vmatmul.msk.bf16.gmra.mxu0 %vm18368_vm12, %v5583_v24  ;;  %v10549_v24 = vld [vmem:[%s10793_s27 + $0xf8] sm:$0xff]  ;;  %vm18402_vm12 = vmmov %vm18219_vm0 }
 0x6e2   : > { %v15995_v27 = vpop.f32.mrf.mxu3 }
 0x6e4   : > { %8991 = vmatmul.msk.bf16.gmra.mxu3 %vm18369_vm13, %v6392_v15  ;;  %vm18403_vm13 = vmmov %vm18219_vm0 }
 0x6e7   : > { %v15997_v57 = vpop.f32.mrf.mxu0 }
 0x6ea   : > { %v6493_v4 = vpop.f32.mrf.mxu3 }
 0x6eb   : > { %v16002_v0 = vadd.f32 %v6493_v4, %v6325_v23  ;;  %v10548_v23 = vld [vmem:[%s10793_s27 + $0xf0] sm:$0xff]  ;;  %s10564_s27 = sshra.s32 %s8578_s24, 4  ;;  %s10565_s27 = int_to_ptr.hbm [resolvable:$true] %s10564_s27 }
 0x6ec   : > { %v6394_v28 = vpack.c.bf16 %v10549_v24, %v10548_v23  ;;  %s10566_s4 = scalar_lea.hbm %s10565_s27, 256  ;;  %p10571_p0 = scmp.lt.s32.totalorder %s10565_s27, %s17507_s18 }
 0x6ed   : > { %p10567_p11 = scmp.ne.s32.totalorder %s10565_s27, %s10566_s4  ;;  %p10572_p1 = scmp.lt.s32.totalorder %s10570_s20, %s10566_s4 }
 0x6ef   : > { %v6329_v20 = vpop.f32.mrf.mxu0  ;;  %p10568_p12 = pnand %p10567_p11, %p10753_p5  ;;  %p10573_p2 = por %p10572_p1, %p10571_p0 }
 0x6f0   : > { %v6330_v60 = vadd.f32 %v6329_v20, %v15921_v26  ;;  %v5593_v26 = vpack.c.bf16 %v4873_v18, %v4872_v58  ;;  %v16036_v58 = vpop.f32.mrf.mxu1 }
 0x6f1   : > { %8968 = vmatmul.msk.bf16.gmra.mxu0 %vm18370_vm14, %v5588_v42  ;;  %vm18404_vm14 = vmmov %vm18219_vm0  ;;  %p10569_p13 = pneg %p10568_p12 }
 0x6f2   : > { %v16006_v47 = vpop.f32.mrf.mxu3 }
 0x6f3   : > { %p10574_p3 = pnand %p10573_p2, %p10569_p13 }
 0x6f4   : > { %8992 = vmatmul.msk.bf16.gmra.mxu3 %vm18371_vm4, %v6393_v39  ;;  %vm18405_vm4 = vmmov %vm18219_vm0 }
 0x6f7   : > { %v16010_v12 = vpop.f32.mrf.mxu0 }
 0x6fa   : > { %v6498_v45 = vpop.f32.mrf.mxu3 }
 0x6fb   : > { %v16013_v10 = vadd.f32 %v6498_v45, %v6330_v60  ;;  %v16040_v45 = vpop.f32.mrf.mxu2 }
 0x6fd   : > { %18372 = vst [vmem:[#allocation61_spill] sm:$0xff] %v16013_v10 }
 0x6ff   : > { %v6334_v36 = vpop.f32.mrf.mxu0 }
 0x700   : > { %v6335_v48 = vadd.f32 %v6334_v36, %v15940_v41 }
 0x701   : > { %8969 = vmatmul.msk.bf16.gmra.mxu0 %vm18373_vm8, %v5593_v26  ;;  %vm18406_vm8 = vmmov %vm18219_vm0 }
 0x702   : > { %v16017_v51 = vpop.f32.mrf.mxu3 }
 0x704   : > { %8993 = vmatmul.msk.bf16.gmra.mxu3 %vm18374_vm5, %v6394_v28  ;;  %v16048_v28 = vpop.f32.mrf.mxu2  ;;  %vm18407_vm5 = vmmov %vm18219_vm0 }
 0x705   : > { %18379 = vst [vmem:[#allocation58_spill] sm:$0xff] %v16048_v28 }
 0x707   : > { %v16021_v63 = vpop.f32.mrf.mxu0 }
 0x70a   : > { %v6503_v15 = vpop.f32.mrf.mxu3 }
 0x70b   : > { %v16024_v4 = vadd.f32 %v6503_v15, %v6335_v48  ;;  %v16044_v48 = vpop.f32.mrf.mxu1 }
 0x70d   : > { %18375 = vst [vmem:[#allocation52_spill] sm:$0xff] %v16024_v4 }
 0x70f   : > { %v6339_v11 = vpop.f32.mrf.mxu0 }
 0x710   : > { %v6340_v6 = vadd.f32 %v6339_v11, %v15955_v56 }
 0x712   : > { %v16027_v20 = vpop.f32.mrf.mxu3 }
 0x713   : > { %v16052_v15 = vpop.f32.mrf.mxu1 }
 0x717   : > { %v16029_v41 = vpop.f32.mrf.mxu0 }
 0x71a   : > { %v6508_v60 = vpop.f32.mrf.mxu3 }
 0x71b   : > { %v16031_v42 = vadd.f32 %v6508_v60, %v6340_v6 }
 0x71d   : > { %18376 = vst [vmem:[#allocation41_spill] sm:$0xff] %v16031_v42 }
 0x71f   : > { %v6344_v30 = vpop.f32.mrf.mxu0 }
 0x720   : > { %v6345_v3 = vadd.f32 %v6344_v30, %v15970_v5  ;;  %v16058_v30 = vpop.f32.mrf.mxu2 }
 0x722   : > { %v16034_v39 = vpop.f32.mrf.mxu3 }
 0x727   : > { %v16038_v18 = vpop.f32.mrf.mxu0 }
 0x72a   : > { %v6513_v26 = vpop.f32.mrf.mxu3 }
 0x72b   : > { %v16042_v56 = vadd.f32 %v6513_v26, %v6345_v3  ;;  %v16060_v3 = vpop.f32.mrf.mxu1 }
 0x72d   : > { %18377 = vst [vmem:[#allocation56_spill] sm:$0xff] %v16042_v56  ;;  %v6691_v56 = vsel %vm18396_vm7, %v6659_v25, 0.0  ;;  %v6597_v25 = vsel %vm18400_vm2, %v15960_v35, 0.0  ;;  %vm18412_vm7 = vmmov %vm18219_vm0 }
 0x72e   : > { %vm18416_vm2 = vmmov %vm18219_vm0 }
 0x72f   : > { %v6349_v36 = vpop.f32.mrf.mxu0 }
 0x730   : > { %v6350_v23 = vadd.f32 %v6349_v36, %v6261_v9  ;;  %v16066_v36 = vpop.f32.mrf.mxu2 }
 0x731   : > { %18385 = vst [vmem:[#allocation44_spill] sm:$0xff] %v16066_v36 }
 0x732   : > { %v16046_v24 = vpop.f32.mrf.mxu3 }
 0x733   : > { %18378 = vst [vmem:[#allocation60_spill] sm:$0xff] %v16046_v24 }
 0x737   : > { %v16050_v5 = vpop.f32.mrf.mxu0 }
 0x738   : > { %18380 = vst [vmem:[#allocation14_spill] sm:$0xff] %v16050_v5  ;;  %v16077_v43 = vpop.f32.mrf.mxu2 }
 0x73a   : > { %v6518_v11 = vpop.f32.mrf.mxu3 }
 0x73b   : > { %v16054_v6 = vadd.f32 %v6518_v11, %v6350_v23  ;;  %v16073_v23 = vpop.f32.mrf.mxu1 }
 0x73d   : > { %18381 = vst [vmem:[#allocation43_spill] sm:$0xff] %v16054_v6 }
 0x73f   : > { %v16056_v60 = vpop.f32.mrf.mxu0 }
 0x740   : > { %18382 = vst [vmem:[#allocation57_spill] sm:$0xff] %v16056_v60  ;;  %v6590_v60 = vsel %vm18392_vm1, %v15925_v29, 0.0  ;;  %v6595_v29 = vsel %vm18219_vm0, %v15950_v8, 0.0  ;;  %vm18409_vm1 = vmmov %vm18219_vm0 }
 0x742   : > { %v16062_v26 = vpop.f32.mrf.mxu3 }
 0x743   : > { %18383 = vst [vmem:[#allocation53_spill] sm:$0xff] %v16062_v26  ;;  %v16085_v36 = vpop.f32.mrf.mxu1 }
 0x744   : > { %18390 = vst [vmem:[#allocation45_spill] sm:$0xff] %v16085_v36 }
 0x747   : > { %v16064_v9 = vpop.f32.mrf.mxu0 }
 0x748   : > { %18384 = vst [vmem:[#allocation17_spill] sm:$0xff] %v16064_v9  ;;  %v6660_v9 = vmul.f32 %v15935_v61, %v15935_v61 }
 0x74a   : > { %v16071_v46 = vpop.f32.mrf.mxu3 }
 0x74b   : > { %18386 = vst [vmem:[#allocation54_spill] sm:$0xff] %v16071_v46  ;;  %v6591_v46 = vsel %vm18391_vm15, %v15935_v61, 0.0  ;;  %v16103_v61 = vpop.f32.mrf.mxu2  ;;  %vm18408_vm15 = vmmov %vm18219_vm0 }
 0x74c   : > { %v6592_v28 = vadd.f32 %v6591_v46, %v6590_v60  ;;  %18397 = vst [vmem:[#allocation36_spill] sm:$0xff] %v16103_v61  ;;  %v6233_v46 = vadd.f32 %v15857_v55, %v15820_v44  ;;  %v6696_v60 = vsel %vm18399_vm11, %v6662_v52, 0.0  ;;  %v6665_v44 = vmul.f32 %v15975_v14, %v15975_v14  ;;  %vm18415_vm11 = vmmov %vm18219_vm0 }
 0x74d   : > { %v6238_v52 = vadd.f32 %v15889_v22, %v15847_v16  ;;  %v6603_v16 = vsel %vm18406_vm8, %v15982_v17, 0.0  ;;  %v6667_v22 = vmul.f32 %v15989_v21, %v15989_v21  ;;  %vm18424_vm8 = vmmov %vm18219_vm0 }
 0x74e   : > { %v6322_v55 = vadd.f32 %v15984_v33, %v6233_v46  ;;  %v6702_v33 = vsel %vm18405_vm4, %v6665_v44, 0.0  ;;  %vm18423_vm4 = vmmov %vm18219_vm0 }
 0x74f   : > { %v16075_v11 = vpop.f32.mrf.mxu0 }
 0x750   : > { %18387 = vst [vmem:[#allocation46_spill] sm:$0xff] %v16075_v11  ;;  %v6661_v11 = vmul.f32 %v15943_v7, %v15943_v7 }
 0x752   : > { %v16079_v6 = vpop.f32.mrf.mxu3  ;;  %v6694_v24 = vsel %vm18398_vm10, %v6661_v11, 0.0  ;;  %v6664_v11 = vmul.f32 %v15965_v1, %v15965_v1  ;;  %vm18414_vm10 = vmmov %vm18219_vm0 }
 0x753   : > { %18388 = vst [vmem:[#allocation21_spill] sm:$0xff] %v16079_v6  ;;  %v6692_v6 = vsel %vm18393_vm3, %v6660_v9, 0.0  ;;  %v6663_v9 = vmul.f32 %v15960_v35, %v15960_v35  ;;  %vm18410_vm3 = vmmov %vm18219_vm0 }
 0x754   : > { %v6693_v36 = vadd.f32 %v6692_v6, %v6691_v56  ;;  %v6599_v56 = vsel %vm18402_vm12, %v15965_v1, 0.0  ;;  %vm18419_vm12 = vmmov %vm18219_vm0 }
 0x756   : > { %v6695_v61 = vadd.f32 %v6694_v24, %v6693_v36  ;;  %v6700_v24 = vsel %vm18403_vm13, %v6664_v11, 0.0  ;;  %v16135_v36 = vadd.f32 %v15995_v27, %v6322_v55  ;;  %vm18421_vm13 = vmmov %vm18219_vm0 }
 0x757   : > { %v16081_v26 = vpop.f32.mrf.mxu0 }
 0x758   : > { %18389 = vst [vmem:[#allocation13_spill] sm:$0xff] %v16081_v26  ;;  %v6593_v26 = vsel %vm18394_vm6, %v15943_v7, 0.0  ;;  %v6697_v6 = vadd.f32 %v6696_v60, %v6695_v61  ;;  %v6327_v61 = vadd.f32 %v15997_v57, %v6238_v52  ;;  %v16147_v60 = vpop.f32.mrf.mxu2  ;;  %v6668_v11 = vmul.f32 %v16135_v36, %v16135_v36  ;;  %vm18411_vm6 = vmmov %vm18219_vm0 }
 0x759   : > { %v6594_v7 = vadd.f32 %v6593_v26, %v6592_v28  ;;  %v16122_v28 = vpop.f32.mrf.mxu1 }
 0x75a   : > { %v16100_v5 = vpop.f32.mrf.mxu3 }
 0x75b   : > { %18395 = vst [vmem:[#allocation62_spill] sm:$0xff] %v16100_v5  ;;  %v6596_v8 = vadd.f32 %v6595_v29, %v6594_v7  ;;  %v6698_v5 = vsel %vm18401_vm9, %v6663_v9, 0.0  ;;  %v6601_v29 = vsel %vm18404_vm14, %v15975_v14, 0.0  ;;  %v6666_v7 = vmul.f32 %v15982_v17, %v15982_v17  ;;  %vm18418_vm9 = vmmov %vm18219_vm0 }
 0x75c   : > { %v6699_v9 = vadd.f32 %v6698_v5, %v6697_v6  ;;  %v6248_v6 = vadd.f32 %v15930_v62, %v15897_v53  ;;  %v6253_v53 = vadd.f32 %v15957_v2, %v15915_v54  ;;  %v6174_v62 = vadd.f32 %v16036_v58, %v15791_v31  ;;  %vm18422_vm14 = vmmov %vm18219_vm0 }
 0x75d   : > { %v6598_v26 = vadd.f32 %v6597_v25, %v6596_v8  ;;  %v6243_v8 = vadd.f32 %v15909_v50, %v15878_v19  ;;  %v6704_v5 = vsel %vm18407_vm5, %v6666_v7, 0.0  ;;  %v6605_v25 = vsel %vm18408_vm15, %v15989_v21, 0.0  ;;  %vm18427_vm5 = vmmov %vm18219_vm0 }
 0x75e   : > { %v6701_v46 = vadd.f32 %v6700_v24, %v6699_v9  ;;  %v6706_v19 = vsel %vm18409_vm1, %v6667_v22, 0.0  ;;  %v6607_v50 = vsel %vm18410_vm3, %v16135_v36, 0.0  ;;  %v6588_v24 = vld [vmem:[%s17497_s8 + $0x30] sm:$0xff]  ;;  %v6708_v7 = vsel %vm18411_vm6, %v6668_v11, 0.0  ;;  %vm18428_vm15 = vmmov %vm18219_vm0 }
 0x75f   : > { %v16110_v49 = vpop.f32.mrf.mxu0  ;;  %v6600_v1 = vadd.f32 %v6599_v56, %v6598_v26  ;;  %v16155_v56 = vadd.f32 %v16006_v47, %v6327_v61  ;;  %v6332_v52 = vadd.f32 %v16010_v12, %v6243_v8  ;;  %v6609_v9 = vsel %vm18412_vm7, %v16002_v0, 0.0  ;;  %6773 = vmatpush.msra.mxu1 %v6588_v24  ;;  %vm18432_vm1 = vmmov %vm18219_vm0 }
 0x760   : > { %v6703_v44 = vadd.f32 %v6702_v33, %v6701_v46  ;;  %v6258_v54 = vadd.f32 %v15973_v38, %v15933_v37  ;;  %v6179_v31 = vadd.f32 %v16052_v15, %v15822_v40  ;;  %v6342_v38 = vadd.f32 %v16029_v41, %v6253_v53  ;;  %v16208_v15 = vpop.f32.mrf.mxu2  ;;  %vm18433_vm3 = vmmov %vm18219_vm0 }
 0x761   : > { %v6602_v27 = vadd.f32 %v6601_v29, %v6600_v1  ;;  %v6669_v1 = vmul.f32 %v16002_v0, %v16002_v0  ;;  %v16170_v29 = vpop.f32.mrf.mxu1  ;;  %v6670_v33 = vmul.f32 %v16155_v56, %v16155_v56  ;;  %v16178_v12 = vadd.f32 %v16017_v51, %v6332_v52  ;;  %vm18437_vm6 = vmmov %vm18219_vm0 }
 0x762   : > { %v16137_v35 = vpop.f32.mrf.mxu3  ;;  %v6705_v26 = vadd.f32 %v6704_v5, %v6703_v44  ;;  %v6611_v46 = vsel %vm18219_vm0, %v16155_v56, 0.0  ;;  %v6671_v51 = vmul.f32 %v16013_v10, %v16013_v10  ;;  %v6177_v40 = vadd.f32 %v16044_v48, %v15807_v34  ;;  %vm18438_vm7 = vmmov %vm18219_vm0 }
 0x763   : > { %v6604_v57 = vadd.f32 %v6603_v16, %v6602_v27  ;;  %18413 = vst [vmem:[#allocation18_spill] sm:$0xff] %v16178_v12  ;;  %v6710_v8 = vsel %vm18414_vm10, %v6669_v1, 0.0  ;;  %v6337_v27 = vadd.f32 %v16021_v63, %v6248_v6  ;;  %v6712_v5 = vsel %vm18415_vm11, %v6670_v33, 0.0  ;;  %vm18442_vm10 = vmmov %vm18219_vm0 }
 0x764   : > { %v6707_v16 = vadd.f32 %v6706_v19, %v6705_v26  ;;  %v6672_v11 = vmul.f32 %v16178_v12, %v16178_v12  ;;  %v6263_v63 = vadd.f32 %v16040_v45, %v6174_v62  ;;  %v6714_v19 = vsel %vm18418_vm9, %v6671_v51, 0.0  ;;  %vm18450_vm11 = vmmov %vm18219_vm0 }
 0x765   : > { %v6606_v47 = vadd.f32 %v6605_v25, %v6604_v57  ;;  %v6613_v25 = vsel %vm18416_vm2, %v16013_v10, 0.0  ;;  %v16202_v44 = vadd.f32 %v16027_v20, %v6337_v27  ;;  %v6673_v20 = vmul.f32 %v16024_v4, %v16024_v4  ;;  %v18429_v27 = vld [vmem:[#allocation60_spill] sm:$0xff]  ;;  %vm18451_vm2 = vmmov %vm18219_vm0 }
 0x766   : > { %v6709_v2 = vadd.f32 %v6708_v7, %v6707_v16  ;;  %v6184_v45 = vadd.f32 %v16073_v23, %v15849_v59  ;;  %v16218_v41 = vadd.f32 %v16034_v39, %v6342_v38  ;;  %v6268_v34 = vadd.f32 %v16058_v30, %v6179_v31  ;;  %vm18457_vm9 = vmmov %vm18219_vm0 }
 0x767   : > { %v16157_v55 = vpop.f32.mrf.mxu0  ;;  %v6608_v22 = vadd.f32 %v6607_v50, %v6606_v47  ;;  %18417 = vst [vmem:[#allocation15_spill] sm:$0xff] %v16202_v44  ;;  %v6615_v50 = vsel %vm18419_vm12, %v16178_v12, 0.0  ;;  %v6716_v48 = vsel %vm18421_vm13, %v6672_v11, 0.0  ;;  %v6617_v26 = vsel %vm18422_vm14, %v16024_v4, 0.0  ;;  %v18434_v11 = vld [vmem:[#allocation14_spill] sm:$0xff]  ;;  %vm18458_vm12 = vmmov %vm18219_vm0 }
 0x768   : > { %v6711_v57 = vadd.f32 %v6710_v8, %v6709_v2  ;;  %18420 = vst [vmem:[#allocation63_spill] sm:$0xff] %v16218_v41  ;;  %v6674_v47 = vmul.f32 %v16202_v44, %v16202_v44  ;;  %v6182_v59 = vadd.f32 %v16060_v3, %v15836_v32  ;;  %v6189_v23 = vadd.f32 %v16122_v28, %v15880_v13  ;;  %v18425_v28 = vld [vmem:[#allocation47_spill] sm:$0xff]  ;;  %v18431_v2 = vld [vmem:[#allocation56_spill] sm:$0xff]  ;;  %vm18462_vm13 = vmmov %vm18219_vm0 }
 0x769   : > { %v6610_v58 = vadd.f32 %v6609_v9, %v6608_v22  ;;  %v6193_v9 = vpop.f32.mrf.mxu1  ;;  %v6718_v30 = vsel %vm18423_vm4, %v6673_v20, 0.0  ;;  %v6619_v33 = vsel %vm18424_vm8, %v16202_v44, 0.0  ;;  %v6675_v53 = vmul.f32 %v16031_v42, %v16031_v42  ;;  %v18426_v22 = vld [vmem:[#allocation45_spill] sm:$0xff]  ;;  %vm18463_vm14 = vmmov %vm18219_vm0 }
 0x76a   : > { %v16184_v61 = vpop.f32.mrf.mxu3  ;;  %v6713_v1 = vadd.f32 %v6712_v5, %v6711_v57  ;;  %v6347_v62 = vadd.f32 %v16038_v18, %v6258_v54  ;;  %v6273_v32 = vadd.f32 %v16077_v43, %v6184_v45  ;;  %v6676_v13 = vmul.f32 %v16218_v41, %v16218_v41  ;;  %vm18464_vm4 = vmmov %vm18219_vm0 }
 0x76b   : > { %v6612_v37 = vadd.f32 %v6611_v46, %v6610_v58  ;;  %v6187_v8 = vadd.f32 %v18426_v22, %v18425_v28  ;;  %v6720_v46 = vsel %vm18427_vm5, %v6674_v47, 0.0  ;;  %v6621_v51 = vsel %vm18428_vm15, %v16031_v42, 0.0  ;;  %v18446_v22 = vld [vmem:[#allocation54_spill] sm:$0xff]  ;;  %vm18465_vm8 = vmmov %vm18219_vm0 }
 0x76c   : > { %v6715_v39 = vadd.f32 %v6714_v19, %v6713_v1  ;;  %v16249_v31 = vadd.f32 %v18429_v27, %v6347_v62  ;;  %v16252_v18 = vadd.f32 %v16147_v60, %v6189_v23  ;;  %v6677_v58 = vmul.f32 %v18431_v2, %v18431_v2  ;;  %v18436_v19 = vld [vmem:[#allocation34_spill] sm:$0xff]  ;;  %v6282_v1 = vpop.f32.mrf.mxu2  ;;  %v18440_v23 = vld [vmem:[#allocation53_spill] sm:$0xff]  ;;  %vm18467_vm5 = vmmov %vm18219_vm0 }
 0x76d   : > { %v6614_v52 = vadd.f32 %v6613_v25, %v6612_v37  ;;  %v6722_v5 = vsel %vm18432_vm1, %v6675_v53, 0.0  ;;  %v6623_v25 = vsel %vm18433_vm3, %v16218_v41, 0.0  ;;  %v6352_v57 = vadd.f32 %v18434_v11, %v6263_v63  ;;  %v18435_v37 = vld [vmem:[#allocation58_spill] sm:$0xff]  ;;  %vm18468_vm15 = vmmov %vm18219_vm0 }
 0x76e   : > { %v6717_v3 = vadd.f32 %v6716_v48, %v6715_v39  ;;  %18430 = vst [vmem:[#allocation19_spill] sm:$0xff] %v16249_v31  ;;  %v6266_v38 = vadd.f32 %v18435_v37, %v6177_v40  ;;  %v6724_v45 = vsel %vm18437_vm6, %v6676_v13, 0.0  ;;  %v6678_v48 = vmul.f32 %v16249_v31, %v16249_v31  ;;  %v18445_v13 = vld [vmem:[#allocation17_spill] sm:$0xff]  ;;  %vm18470_vm1 = vmmov %vm18219_vm0 }
 0x76f   : > { %v16220_v6 = vpop.f32.mrf.mxu0  ;;  %v6616_v24 = vadd.f32 %v6615_v50, %v6614_v52  ;;  %v6192_v50 = vadd.f32 %v16170_v29, %v18436_v19  ;;  %v6625_v52 = vsel %vm18438_vm7, %v18431_v2, 0.0  ;;  %v16270_v63 = vadd.f32 %v18440_v23, %v6352_v57  ;;  %v18452_v37 = vld [vmem:[#allocation21_spill] sm:$0xff]  ;;  %vm18471_vm3 = vmmov %vm18219_vm0 }
 0x770   : > { %v6719_v43 = vadd.f32 %v6718_v30, %v6717_v3  ;;  %v6726_v29 = vsel %vm18442_vm10, %v6677_v58, 0.0  ;;  %v6627_v62 = vsel %vm18219_vm0, %v16249_v31, 0.0  ;;  %v18444_v3 = vld [vmem:[#allocation43_spill] sm:$0xff]  ;;  %v6357_v28 = vadd.f32 %v18445_v13, %v6268_v34  ;;  %vm18473_vm6 = vmmov %vm18219_vm0 }
 0x771   : > { %v6618_v16 = vadd.f32 %v6617_v26, %v6616_v24  ;;  %v18439_v26 = vld [vmem:[#allocation57_spill] sm:$0xff]  ;;  %18441 = vst [vmem:[#allocation64_spill] sm:$0xff] %v16270_v63  ;;  %v18443_v24 = vld [vmem:[#allocation44_spill] sm:$0xff]  ;;  %v6629_v11 = vsel %vm18451_vm2, %v18444_v3, 0.0  ;;  %v6680_v57 = vmul.f32 %v16270_v63, %v16270_v63  ;;  %vm18474_vm7 = vmmov %vm18219_vm0 }
 0x772   : > { %v16232_v7 = vpop.f32.mrf.mxu3  ;;  %v6721_v20 = vadd.f32 %v6720_v46, %v6719_v43  ;;  %v6355_v47 = vadd.f32 %v18439_v26, %v6266_v38  ;;  %v6271_v30 = vadd.f32 %v18443_v24, %v6182_v59  ;;  %v18449_v59 = vld [vmem:[#allocation46_spill] sm:$0xff]  ;;  %v16294_v34 = vadd.f32 %v18452_v37, %v6357_v28  ;;  %vm18477_vm10 = vmmov %vm18219_vm0 }
 0x773   : > { %v6620_v54 = vadd.f32 %v6619_v33, %v6618_v16  ;;  %v6679_v16 = vmul.f32 %v18444_v3, %v18444_v3  ;;  %v6732_v13 = vsel %vm18462_vm13, %v6680_v57, 0.0  ;;  %vm18480_vm2 = vmmov %vm18219_vm0 }
 0x774   : > { %v6723_v40 = vadd.f32 %v6722_v5, %v6721_v20  ;;  %v16284_v46 = vadd.f32 %v18446_v22, %v6355_v47  ;;  %v6360_v58 = vadd.f32 %v18449_v59, %v6271_v30  ;;  %v6196_v5 = vpop.f32.mrf.mxu1  ;;  %18453 = vst [vmem:[#allocation42_spill] sm:$0xff] %v16294_v34  ;;  %v18454_v20 = vld [vmem:[#allocation13_spill] sm:$0xff]  ;;  %v6631_v47 = vsel %vm18458_vm12, %v16270_v63, 0.0  ;;  %vm18482_vm12 = vmmov %vm18219_vm0 }
 0x775   : > { %v6622_v60 = vadd.f32 %v6621_v51, %v6620_v54  ;;  %v18448_v51 = vld [vmem:[#allocation48_spill] sm:$0xff]  ;;  %v6730_v26 = vsel %vm18457_vm9, %v6679_v16, 0.0  ;;  %v6585_v16 = vld [vmem:[%s17497_s8 + $0x18] sm:$0xff]  ;;  %v6281_v59 = vadd.f32 %v16208_v15, %v6192_v50  ;;  %vm18481_vm9 = vmmov %vm18219_vm0 }
 0x776   : > { %18447 = vst [vmem:[#allocation20_spill] sm:$0xff] %v16284_v46  ;;  %v6194_v27 = vadd.f32 %v6193_v9, %v18448_v51  ;;  %v6725_v43 = vadd.f32 %v6724_v45, %v6723_v40  ;;  %v6362_v9 = vadd.f32 %v18454_v20, %v6273_v32  ;;  %v6681_v23 = vmul.f32 %v16284_v46, %v16284_v46  ;;  %v18459_v32 = vld [vmem:[#allocation36_spill] sm:$0xff]  ;;  %v6285_v51 = vpop.f32.mrf.mxu2  ;;  %v6583_v20 = vld [vmem:[%s17497_s8 + $0x8] sm:$0xff]  ;;  %vm18483_vm13 = vmmov %vm18219_vm0 }
 0x777   : > { %v6624_v39 = vadd.f32 %v6623_v25, %v6622_v60  ;;  %v16274_v33 = vpop.f32.mrf.mxu0  ;;  %v6728_v25 = vsel %vm18450_vm11, %v6678_v48, 0.0  ;;  %v18455_v60 = vld [vmem:[#allocation62_spill] sm:$0xff]  ;;  %v6586_v48 = vld [vmem:[%s17497_s8 + $0x20] sm:$0xff]  ;;  %v6276_v40 = vadd.f32 %v18459_v32, %v6187_v8  ;;  %v6633_v28 = vsel %vm18463_vm14, %v16284_v46, 0.0  ;;  %vm18479_vm11 = vmmov %vm18219_vm0 }
 0x778   : > { %v6727_v38 = vadd.f32 %v6726_v29, %v6725_v43  ;;  %v16298_v45 = vadd.f32 %v18455_v60, %v6360_v58  ;;  %v6682_v8 = vmul.f32 %v16294_v34, %v16294_v34  ;;  %v6283_v37 = vadd.f32 %v6282_v1, %v6194_v27  ;;  %v9021_v32 = vld [vmem:[%s17503_s14 + $0x30] sm:$0xf]  ;;  %vm18484_vm14 = vmmov %vm18219_vm0 }
 0x779   : > { %v6626_v54 = vadd.f32 %v6625_v52, %v6624_v39  ;;  %v6587_v52 = vld [vmem:[%s17497_s8 + $0x28] sm:$0xff]  ;;  %v6365_v22 = vadd.f32 %v16110_v49, %v6276_v40  ;;  %v6367_v49 = vadd.f32 %v16157_v55, %v16252_v18  ;;  %v9192_v40 = vld [vmem:[%s17503_s14 + $0x34] sm:$0xf0] }
 0x77a   : > { %v16276_v53 = vpop.f32.mrf.mxu3  ;;  %18456 = vst [vmem:[#allocation65_spill] sm:$0xff] %v16298_v45  ;;  %6774 = vmatpush.msra.mxu1 %v6587_v52  ;;  %v18460_v39 = vld [vmem:[#allocation37_spill] sm:$0xff]  ;;  %v6729_v24 = vadd.f32 %v6728_v25, %v6727_v38  ;;  %v6734_v25 = vsel %vm18464_vm4, %v6681_v23, 0.0  ;;  %v6637_v55 = vsel %vm18468_vm15, %v16298_v45, 0.0  ;;  %vm18485_vm4 = vmmov %vm18219_vm0  ;;  %vm18489_vm15 = vcmask 1040384  }
 0x77b   : > { %v6628_v19 = vadd.f32 %v6627_v62, %v6626_v54  ;;  %v6197_v29 = vadd.f32 %v6196_v5, %v18460_v39  ;;  %v16314_v62 = vadd.f32 %v16137_v35, %v6362_v9  ;;  %v6683_v35 = vmul.f32 %v16298_v45, %v16298_v45  ;;  %v6584_v5 = vld [vmem:[%s17497_s8 + $0x10] sm:$0xff] }
 0x77c   : > { %6775 = vmatpush.msra.mxu1 %v6586_v48  ;;  %v6731_v43 = vadd.f32 %v6730_v26, %v6729_v24  ;;  %v16337_v57 = vadd.f32 %v16184_v61, %v6365_v22  ;;  %v6736_v9 = vsel %vm18467_vm5, %v6682_v8, 0.0  ;;  %v6370_v61 = vadd.f32 %v16220_v6, %v6281_v59  ;;  %v6582_v48 = vld [vmem:[%s17497_s8] sm:$0xff]  ;;  %v6198_v26 = vpop.f32.mrf.mxu1  ;;  %vm18488_vm5 = vmmov %vm18219_vm0 }
 0x77d   : > { %v6630_v30 = vadd.f32 %v6629_v11, %v6628_v19  ;;  %18461 = vst [vmem:[#allocation16_spill] sm:$0xff] %v16314_v62  ;;  %v6635_v11 = vsel %vm18465_vm8, %v16294_v34, 0.0  ;;  %v6684_v50 = vmul.f32 %v16314_v62, %v16314_v62  ;;  %v16349_v18 = vadd.f32 %v16232_v7, %v6367_v49  ;;  %vm18487_vm8 = vmmov %vm18219_vm0 }
 0x77e   : > { %18466 = vst [vmem:[#allocation35_spill] sm:$0xff] %v16337_v57  ;;  %6776 = vmatpush.msra.mxu1 %v6585_v16  ;;  %v6733_v38 = vadd.f32 %v6732_v13, %v6731_v43  ;;  %v6286_v1 = vadd.f32 %v6285_v51, %v6197_v29  ;;  %v6738_v52 = vsel %vm18470_vm1, %v6683_v35, 0.0  ;;  %v6685_v6 = vmul.f32 %v16337_v57, %v16337_v57  ;;  %vm18490_vm1 = vmmov %vm18219_vm0 }
 0x77f   : > { %v6632_v54 = vadd.f32 %v6631_v47, %v6630_v30  ;;  %v6374_v19 = vpop.f32.mrf.mxu0  ;;  %18469 = vst [vmem:[#allocation66_spill] sm:$0xff] %v16349_v18  ;;  %v6639_v47 = vsel %vm18471_vm3, %v16314_v62, 0.0  ;;  %v6372_v7 = vadd.f32 %v16274_v33, %v6283_v37  ;;  %v16361_v23 = vadd.f32 %v16276_v53, %v6370_v61 }
 0x780   : > { %6777 = vmatpush.msra.mxu1 %v6584_v5  ;;  %v6735_v27 = vadd.f32 %v6734_v25, %v6733_v38  ;;  %v6740_v24 = vsel %vm18473_vm6, %v6684_v50, 0.0  ;;  %v9022_v30 = vor.u32 %v9192_v40, %v9021_v32  ;;  %v6641_v33 = vsel %vm18474_vm7, %v16337_v57, 0.0  ;;  %v6287_v25 = vpop.f32.mrf.mxu2 }
 0x781   : > { %v6634_v15 = vadd.f32 %v6633_v28, %v6632_v54  ;;  %18472 = vst [vmem:[#allocation12_spill] sm:$0xff] %v16361_v23  ;;  %v6686_v53 = vmul.f32 %v16349_v18, %v16349_v18  ;;  %v6375_v16 = vadd.f32 %v6374_v19, %v6286_v1  ;;  %v18476_v28 = vld [vmem:[#allocation49_spill] sm:$0xff]  ;;  %v6742_v54 = vsel %vm18477_vm10, %v6685_v6, 0.0  ;;  %vm18495_vm10 = vmmov %vm18219_vm0 }
 0x782   : > { %v6540_v58 = vpop.f32.mrf.mxu3  ;;  %6778 = vmatpush.msra.mxu1 %v6583_v20  ;;  %v6737_v39 = vadd.f32 %v6736_v9, %v6735_v27  ;;  %v6199_v8 = vadd.f32 %v6198_v26, %v18476_v28  ;;  %7059 = vmatpush.bf16.msra.mxu2 %v9022_v30  ;;  %v6643_v35 = vsel %vm18219_vm0, %v16349_v18, 0.0  ;;  %v6687_v59 = vmul.f32 %v16361_v23, %v16361_v23 }
 0x783   : > { %v6636_v60 = vadd.f32 %v6635_v11, %v6634_v15  ;;  %v16374_v13 = vadd.f32 %v6540_v58, %v6372_v7  ;;  %v6744_v49 = vsel %vm18479_vm11, %v6686_v53, 0.0  ;;  %v6645_v37 = vsel %vm18480_vm2, %v16361_v23, 0.0  ;;  %vm18498_vm11 = vmmov %vm18219_vm0 }
 0x784   : > { %6779 = vmatpush.msra.mxu1 %v6582_v48  ;;  %v6739_v22 = vadd.f32 %v6738_v52, %v6737_v39  ;;  %v6288_v20 = vadd.f32 %v6287_v25, %v6199_v8  ;;  %v6746_v9 = vsel %vm18481_vm9, %v6687_v59, 0.0  ;;  %vm18499_vm2 = vmmov %vm18219_vm0 }
 0x785   : > { %v6638_v29 = vadd.f32 %v6637_v55, %v6636_v60  ;;  %18475 = vst [vmem:[#allocation67_spill] sm:$0xff] %v16374_v13  ;;  %v6688_v38 = vmul.f32 %v16374_v13, %v16374_v13  ;;  %v6647_v55 = vsel %vm18482_vm12, %v16374_v13, 0.0  ;;  %vm18500_vm9 = vmmov %vm18219_vm0 }
 0x786   : > { %v6741_v58 = vadd.f32 %v6740_v24, %v6739_v22  ;;  %vm18501_vm12 = vmmov %vm18219_vm0 }
 0x787   : > { %v6640_v51 = vadd.f32 %v6639_v47, %v6638_v29  ;;  %v6376_v19 = vpop.f32.mrf.mxu0  ;;  %v6748_v60 = vsel %vm18483_vm13, %v6688_v38, 0.0  ;;  %v9191_v38 = vld [vmem:[%s17503_s14 + $0x34] sm:$0xf]  ;;  %vm18502_vm13 = vmmov %vm18219_vm0 }
 0x788   : > { %v6743_v15 = vadd.f32 %v6742_v54, %v6741_v58  ;;  %v6377_v52 = vadd.f32 %v6376_v19, %v6288_v20 }
 0x789   : > { %v6642_v11 = vadd.f32 %v6641_v33, %v6640_v51 }
 0x78a   : > { %v6543_v43 = vpop.f32.mrf.mxu3  ;;  %v6745_v1 = vadd.f32 %v6744_v49, %v6743_v15  ;;  %v9023_v15 = vld [vmem:[%s17503_s14 + $0x38] sm:$0xf0] }
 0x78b   : > { %v16382_v5 = vadd.f32 %v6543_v43, %v6375_v16  ;;  %v6644_v50 = vadd.f32 %v6643_v35, %v6642_v11 }
 0x78c   : > { %v6747_v26 = vadd.f32 %v6746_v9, %v6745_v1 }
 0x78d   : > { %18478 = vst [vmem:[#allocation22_spill] sm:$0xff] %v16382_v5  ;;  %v6689_v61 = vmul.f32 %v16382_v5, %v16382_v5  ;;  %v6646_v27 = vadd.f32 %v6645_v37, %v6644_v50  ;;  %v6649_v48 = vsel %vm18484_vm14, %v16382_v5, 0.0  ;;  %v9026_v50 = vor.u32 %v9191_v38, %v9023_v15  ;;  %vm18503_vm14 = vmmov %vm18219_vm0 }
 0x78e   : > { %v6749_v40 = vadd.f32 %v6748_v60, %v6747_v26  ;;  %v9190_v60 = vld [vmem:[%s17503_s14 + $0x24] sm:$0xf0]  ;;  %v9005_v26 = vld [vmem:[%s17503_s14 + $0x10] sm:$0xf] }
 0x78f   : > { %v6648_v47 = vadd.f32 %v6647_v55, %v6646_v27  ;;  %v6750_v7 = vsel %vm18485_vm4, %v6689_v61, 0.0  ;;  %7148 = vmatpush.bf16.msrb.mxu1 %v9026_v50  ;;  %v9013_v27 = vld [vmem:[%s17503_s14 + $0x20] sm:$0xf]  ;;  %vm18504_vm4 = vmmov %vm18219_vm0 }
 0x790   : > { %v6751_v30 = vadd.f32 %v6750_v7, %v6749_v40  ;;  %v9007_v7 = vld [vmem:[%s17503_s14 + $0x18] sm:$0xf0]  ;;  %v9014_v40 = vor.u32 %v9190_v60, %v9013_v27 }
 0x791   : > { %v6650_v39 = vadd.f32 %v6649_v48, %v6648_v47  ;;  %v9015_v48 = vld [vmem:[%s17503_s14 + $0x28] sm:$0xf0]  ;;  %v9188_v47 = vld [vmem:[%s17503_s14 + $0x14] sm:$0xf0] }
 0x792   : > { %v6545_v6 = vpop.f32.mrf.mxu3  ;;  %7060 = vmatpush.bf16.msra.mxu2 %v9014_v40 }
 0x793   : > { %v16398_v32 = vadd.f32 %v6545_v6, %v6377_v52  ;;  %v9189_v52 = vld [vmem:[%s17503_s14 + $0x24] sm:$0xf]  ;;  %v9187_v6 = vld [vmem:[%s17503_s14 + $0x14] sm:$0xf] }
 0x795   : > { %18486 = vst [vmem:[#allocation68_spill] sm:$0xff] %v16398_v32  ;;  %v6651_v29 = vsel %vm18487_vm8, %v16398_v32, 0.0  ;;  %v6690_v24 = vmul.f32 %v16398_v32, %v16398_v32  ;;  %vm18505_vm8 = vmmov %vm18219_vm0 }
 0x796   : > { %v6652_v33 = vadd.f32 %v6651_v29, %v6650_v39  ;;  %v9018_v39 = vor.u32 %v9189_v52, %v9015_v48  ;;  %v9006_v29 = vor.u32 %v9188_v47, %v9005_v26 }
 0x797   : > { %v6752_v53 = vsel %vm18488_vm5, %v6690_v24, 0.0  ;;  %v9010_v24 = vor.u32 %v9187_v6, %v9007_v7  ;;  %vm18506_vm5 = vmmov %vm18219_vm0 }
 0x798   : > { %v6653_v16 = vrot.slane %v6652_v33, 4  ;;  %v6753_v28 = vadd.f32 %v6752_v53, %v6751_v30  ;;  %7149 = vmatpush.bf16.msrb.mxu1 %v9018_v39  ;;  %v8997_v30 = vld [vmem:[%s17503_s14] sm:$0xf]  ;;  %v9185_v53 = vld [vmem:[%s17503_s14 + $0x4] sm:$0xf]  ;;  %7061 = vmatpush.bf16.msra.mxu2 %v9006_v29 }
 0x79a   : > { %v6654_v8 = vadd.f32 %v6653_v16, %v6652_v33  ;;  %v6754_v22 = vrot.slane %v6753_v28, 4  ;;  %v9186_v33 = vld [vmem:[%s17503_s14 + $0x4] sm:$0xf0]  ;;  %v8999_v16 = vld [vmem:[%s17503_s14 + $0x8] sm:$0xf0] }
 0x79c   : > { %v6655_v51 = vrot.slane %v6654_v8, 2  ;;  %v6755_v43 = vadd.f32 %v6754_v22, %v6753_v28  ;;  %7150 = vmatpush.bf16.msrb.mxu1 %v9010_v24  ;;  %v8998_v22 = vor.u32 %v9186_v33, %v8997_v30 }
 0x79e   : > { %v6656_v54 = vadd.f32 %v6655_v51, %v6654_v8  ;;  %v6756_v35 = vrot.slane %v6755_v43, 2  ;;  %v9002_v51 = vor.u32 %v9185_v53, %v8999_v16  ;;  %7062 = vmatpush.bf16.msra.mxu2 %v8998_v22 }
 0x7a0   : > { %v6657_v59 = vrot.slane %v6656_v54, 1  ;;  %v6757_v25 = vadd.f32 %v6756_v35, %v6755_v43  ;;  %7151 = vmatpush.bf16.msrb.mxu1 %v9002_v51 }
 0x7a2   : > { %v6758_v58 = vrot.slane %v6757_v25, 1  ;;  %v6658_v11 = vadd.f32 %v6657_v59, %v6656_v54 }
 0x7a4   : > { %v6759_v49 = vadd.f32 %v6758_v58, %v6757_v25  ;;  %v18491_v25 = vld [vmem:[#allocation38_spill] sm:$0xff] }
 0x7a6   : > { %v6760_v37 = vsel %vm18489_vm15, %v6658_v11, %v6759_v49  ;;  %v18492_v11 = vld [vmem:[#allocation39_spill] sm:$0xff]  ;;  %vm18507_vm15 = vmmov %vm18219_vm0 }
 0x7a7   : > { %8994 = vmatmul.msk.f32.vlgmr.msra.gmra.mxu1 %vm18490_vm1, %v6760_v37  ;;  %vm18508_vm1 = vmmov %vm18219_vm0 }
 0x824   : > { %v6781_v19 = vpop.f32.mrf.mxu1 }
 0x825   : > { %v6784_v20 = vmul.f32 %v6781_v19, %v6781_v19  ;;  %v16449_v54 = vperm.slane %v6781_v19, 0 }
 0x827   : > { %v6786_v9 = vrot.slane %v6784_v20, 7  ;;  %v6802_v58 = vsub.f32 %v18491_v25, %v16449_v54  ;;  %v6803_v49 = vsub.f32 %v18492_v11, %v16449_v54  ;;  %v6810_v37 = vsub.f32 %v15989_v21, %v16449_v54 }
 0x828   : > { %v6811_v38 = vsub.f32 %v16135_v36, %v16449_v54  ;;  %v6812_v50 = vsub.f32 %v16002_v0, %v16449_v54  ;;  %v6814_v20 = vsub.f32 %v16013_v10, %v16449_v54  ;;  %v6818_v27 = vsub.f32 %v16031_v42, %v16449_v54 }
 0x829   : > { %v6788_v55 = vsub.f32 %v6781_v19, %v6786_v9  ;;  %v6813_v19 = vsub.f32 %v16155_v56, %v16449_v54  ;;  %v6815_v9 = vsub.f32 %v16178_v12, %v16449_v54  ;;  %v6819_v60 = vsub.f32 %v16218_v41, %v16449_v54 }
 0x82a   : > { %v6820_v52 = vsub.f32 %v18431_v2, %v16449_v54  ;;  %v6821_v26 = vsub.f32 %v16249_v31, %v16449_v54  ;;  %v6822_v47 = vsub.f32 %v18444_v3, %v16449_v54  ;;  %v6823_v6 = vsub.f32 %v16270_v63, %v16449_v54 }
 0x82b   : > { %v6789_v61 = vmax.f32 %v6788_v55, 0.0  ;;  %v6816_v55 = vsub.f32 %v16024_v4, %v16449_v54  ;;  %v6824_v7 = vsub.f32 %v16284_v46, %v16449_v54  ;;  %v6825_v40 = vsub.f32 %v16294_v34, %v16449_v54 }
 0x82c   : > { %v6826_v39 = vsub.f32 %v16298_v45, %v16449_v54  ;;  %v6827_v29 = vsub.f32 %v16314_v62, %v16449_v54  ;;  %v6828_v24 = vsub.f32 %v16337_v57, %v16449_v54  ;;  %v6829_v30 = vsub.f32 %v16349_v18, %v16449_v54  ;;  %v18497_v62 = vld [vmem:[#allocation50_spill] sm:$0xff] }
 0x82d   : > { %v6790_v1 = vadd.f32 1e-05, %v6789_v61  ;;  %v6817_v61 = vsub.f32 %v16202_v44, %v16449_v54  ;;  %v6830_v33 = vsub.f32 %v16361_v23, %v16449_v54  ;;  %v6831_v53 = vsub.f32 %v16374_v13, %v16449_v54 }
 0x82e   : > { %v6832_v16 = vsub.f32 %v16382_v5, %v16449_v54  ;;  %v6807_v45 = vsub.f32 %v18497_v62, %v16449_v54 }
 0x82f   : > { %10312 = vrsqrt.f32 %v6790_v1  ;;  %vm6797_vm6 = vweird.f32 %v6790_v1 }
 0x835   : > { %v10313_v28 = vpop.eup %10312 }
 0x836   : > { %v6792_v8 = vmul.f32 %v10313_v28, %v6790_v1  ;;  %vm6798_vm3 = vweird.f32 %v10313_v28 }
 0x837   : > { %vm6799_vm7 = vmor %vm6797_vm6, %vm6798_vm3 }
 0x838   : > { %v6793_v43 = vmul.f32 %v10313_v28, %v6792_v8  ;;  %vm18509_vm3 = vmmov %vm18219_vm0 }
 0x839   : > { %vm18510_vm6 = vmmov %vm18219_vm0 }
 0x83a   : > { %v6794_v35 = vmul.f32 0.5, %v6793_v43 }
 0x83c   : > { %v6795_v59 = vsub.f32 1.5, %v6794_v35 }
 0x83e   : > { %v6796_v15 = vmul.f32 %v10313_v28, %v6795_v59 }
 0x840   : > { %v6800_v1 = vsel %vm6799_vm7, %v10313_v28, %v6796_v15  ;;  %v6833_v28 = vsub.f32 %v16398_v32, %v16449_v54  ;;  %vm18511_vm7 = vmmov %vm18219_vm0 }
 0x841   : > { %v16477_v48 = vperm.slane %v6800_v1, 1 }
 0x843   : > { %v6835_v8 = vmul.f32 %v16477_v48, %v6802_v58  ;;  %v6836_v22 = vmul.f32 %v16477_v48, %v6803_v49  ;;  %v6843_v51 = vmul.f32 %v16477_v48, %v6810_v37  ;;  %v6844_v43 = vmul.f32 %v16477_v48, %v6811_v38  ;;  %v16526_v49 = vld [vmem:[%s17501_s12] ss:$0 sm:$0xff] }
 0x844   : > { %v6845_v35 = vmul.f32 %v16477_v48, %v6812_v50  ;;  %v6846_v59 = vmul.f32 %v16477_v48, %v6813_v19  ;;  %v16512_v15 = vmul.f32 %v16477_v48, %v6814_v20  ;;  %v16515_v1 = vmul.f32 %v16477_v48, %v6815_v9 }
 0x845   : > { %v16518_v32 = vmul.f32 %v16477_v48, %v6816_v55  ;;  %v16521_v58 = vmul.f32 %v16477_v48, %v6817_v61  ;;  %v16529_v37 = vmul.f32 %v16477_v48, %v6818_v27  ;;  %v16532_v38 = vmul.f32 %v16477_v48, %v6819_v60  ;;  %v16555_v27 = vld [vmem:[%s17502_s13] ss:$0 sm:$0xff] }
 0x846   : > { %v16535_v50 = vmul.f32 %v16477_v48, %v6820_v52  ;;  %v16538_v19 = vmul.f32 %v16477_v48, %v6821_v26  ;;  %v16541_v20 = vmul.f32 %v16477_v48, %v6822_v47  ;;  %v16544_v9 = vmul.f32 %v16477_v48, %v6823_v6 }
 0x847   : > { %v16547_v55 = vmul.f32 %v16477_v48, %v6824_v7  ;;  %v16550_v61 = vmul.f32 %v16477_v48, %v6825_v40  ;;  %v16558_v60 = vmul.f32 %v16477_v48, %v6826_v39  ;;  %v16561_v52 = vmul.f32 %v16477_v48, %v6827_v29 }
 0x848   : > { %v16564_v26 = vmul.f32 %v16477_v48, %v6828_v24  ;;  %v16567_v47 = vmul.f32 %v16477_v48, %v6829_v30  ;;  %v16570_v6 = vmul.f32 %v16477_v48, %v6830_v33  ;;  %v16573_v7 = vmul.f32 %v16477_v48, %v6831_v53  ;;  %v18493_v33 = vld [vmem:[#allocation40_spill] sm:$0xff]  ;;  %v18494_v53 = vld [vmem:[#allocation51_spill] sm:$0xff] }
 0x849   : > { %v16576_v40 = vmul.f32 %v16477_v48, %v6832_v16  ;;  %v16579_v39 = vmul.f32 %v16477_v48, %v6833_v28  ;;  %v6870_v29 = vmul.f32 %v16526_v49, %v6835_v8  ;;  %v6871_v24 = vmul.f32 %v16526_v49, %v6836_v22 }
 0x84a   : > { %v6804_v23 = vsub.f32 %v18493_v33, %v16449_v54  ;;  %v6805_v18 = vsub.f32 %v18494_v53, %v16449_v54 }
 0x84b   : > { %v6905_v5 = vadd.f32 %v16555_v27, %v6870_v29  ;;  %v6906_v30 = vadd.f32 %v16555_v27, %v6871_v24 }
 0x84c   : > { %v6837_v16 = vmul.f32 %v16477_v48, %v6804_v23  ;;  %v6838_v28 = vmul.f32 %v16477_v48, %v6805_v18  ;;  %v6878_v18 = vmul.f32 %v16526_v49, %v6843_v51  ;;  %v6879_v23 = vmul.f32 %v16526_v49, %v6844_v43 }
 0x84d   : > { %v6937_v13 = vpack.c.bf16 %v6906_v30, %v6905_v5  ;;  %v18496_v30 = vld [vmem:[#allocation59_spill] sm:$0xff]  ;;  %v6808_v43 = vsub.f32 %v15975_v14, %v16449_v54 }
 0x84e   : > { %v6872_v8 = vmul.f32 %v16526_v49, %v6837_v16  ;;  %v6873_v22 = vmul.f32 %v16526_v49, %v6838_v28  ;;  %v6806_v57 = vsub.f32 %v18496_v30, %v16449_v54  ;;  %v6840_v16 = vmul.f32 %v16477_v48, %v6807_v45 }
 0x84f   : > { %9027 = vmatmul.msk.bf16.vlgmr.msra.gmra.mxu2 %vm18495_vm10, %v6937_v13  ;;  %9043 = vmatmul.msk.bf16.vlgmr.msrb.gmra.mxu1 %vm18219_vm0, %v6937_v13  ;;  %v6913_v28 = vadd.f32 %v16555_v27, %v6878_v18  ;;  %v6809_v45 = vsub.f32 %v15982_v17, %v16449_v54  ;;  %v6881_v18 = vmul.f32 %v16526_v49, %v6846_v59  ;;  %vm18512_vm10 = vmmov %vm18219_vm0 }
 0x850   : > { %v6907_v5 = vadd.f32 %v16555_v27, %v6872_v8  ;;  %v6908_v29 = vadd.f32 %v16555_v27, %v6873_v22  ;;  %v6839_v13 = vmul.f32 %v16477_v48, %v6806_v57  ;;  %v6914_v8 = vadd.f32 %v16555_v27, %v6879_v23 }
 0x851   : > { %v6880_v57 = vmul.f32 %v16526_v49, %v6845_v35  ;;  %v6841_v23 = vmul.f32 %v16477_v48, %v6808_v43  ;;  %v6883_v59 = vmul.f32 %v16526_v49, %v16515_v1  ;;  %v6888_v1 = vmul.f32 %v16526_v49, %v16535_v50 }
 0x852   : > { %v6938_v24 = vpack.c.bf16 %v6908_v29, %v6907_v5  ;;  %v6941_v22 = vpack.c.bf16 %v6914_v8, %v6913_v28  ;;  %v6874_v5 = vmul.f32 %v16526_v49, %v6839_v13  ;;  %v6875_v29 = vmul.f32 %v16526_v49, %v6840_v16 }
 0x853   : > { %v6842_v13 = vmul.f32 %v16477_v48, %v6809_v45  ;;  %v6916_v16 = vadd.f32 %v16555_v27, %v6881_v18  ;;  %v6876_v8 = vmul.f32 %v16526_v49, %v6841_v23  ;;  %v6882_v48 = vmul.f32 %v16526_v49, %v16512_v15 }
 0x854   : > { %v6909_v34 = vadd.f32 %v16555_v27, %v6874_v5  ;;  %v6884_v45 = vmul.f32 %v16526_v49, %v16518_v32  ;;  %v6886_v18 = vmul.f32 %v16526_v49, %v16529_v37  ;;  %v6887_v15 = vmul.f32 %v16526_v49, %v16532_v38 }
 0x855   : > { %v6877_v54 = vmul.f32 %v16526_v49, %v6842_v13  ;;  %v6911_v5 = vadd.f32 %v16555_v27, %v6876_v8  ;;  %v6889_v23 = vmul.f32 %v16526_v49, %v16538_v19  ;;  %v6890_v13 = vmul.f32 %v16526_v49, %v16541_v20 }
 0x856   : > { %v6891_v32 = vmul.f32 %v16526_v49, %v16544_v9  ;;  %v6921_v37 = vadd.f32 %v16555_v27, %v6886_v18  ;;  %v6922_v38 = vadd.f32 %v16555_v27, %v6887_v15  ;;  %v6892_v9 = vmul.f32 %v16526_v49, %v16547_v55 }
 0x857   : > { %v6924_v50 = vadd.f32 %v16555_v27, %v6889_v23  ;;  %v6925_v19 = vadd.f32 %v16555_v27, %v6890_v13  ;;  %v6896_v55 = vmul.f32 %v16526_v49, %v16564_v26  ;;  %v6899_v18 = vmul.f32 %v16526_v49, %v16573_v7 }
 0x858   : > { %v6926_v8 = vadd.f32 %v16555_v27, %v6891_v32  ;;  %v6900_v15 = vmul.f32 %v16526_v49, %v16576_v40 }
 0x85a   : > { %v6935_v13 = vadd.f32 %v16555_v27, %v6900_v15 }
 0x85f   : > { %9028 = vmatmul.msk.bf16.gmra.mxu2 %vm18498_vm11, %v6938_v24  ;;  %9044 = vmatmul.msk.bf16.gmra.mxu1 %vm18499_vm2, %v6938_v24  ;;  %v6910_v24 = vadd.f32 %v16555_v27, %v6875_v29  ;;  %v6912_v29 = vadd.f32 %v16555_v27, %v6877_v54  ;;  %v6945_v54 = vpack.c.bf16 %v6922_v38, %v6921_v37  ;;  %vm18513_vm11 = vmmov %vm18219_vm0 }
 0x860   : > { %vm18514_vm2 = vmmov %vm18219_vm0 }
 0x861   : > { %v6939_v51 = vpack.c.bf16 %v6910_v24, %v6909_v34  ;;  %v6915_v34 = vadd.f32 %v16555_v27, %v6880_v57  ;;  %v6940_v35 = vpack.c.bf16 %v6912_v29, %v6911_v5  ;;  %v6917_v24 = vadd.f32 %v16555_v27, %v6882_v48 }
 0x862   : > { %v6885_v57 = vmul.f32 %v16526_v49, %v16521_v58  ;;  %v6919_v58 = vadd.f32 %v16555_v27, %v6884_v45  ;;  %v6893_v5 = vmul.f32 %v16526_v49, %v16550_v61  ;;  %v6894_v48 = vmul.f32 %v16526_v49, %v16558_v60 }
 0x863   : > { %v6942_v28 = vpack.c.bf16 %v6916_v16, %v6915_v34  ;;  %v6923_v16 = vadd.f32 %v16555_v27, %v6888_v1  ;;  %v6897_v60 = vmul.f32 %v16526_v49, %v16567_v47  ;;  %v6901_v47 = vmul.f32 %v16526_v49, %v16579_v39 }
 0x864   : > { %v6920_v34 = vadd.f32 %v16555_v27, %v6885_v57  ;;  %v6929_v61 = vadd.f32 %v16555_v27, %v6894_v48 }
 0x865   : > { %v6946_v29 = vpack.c.bf16 %v6924_v50, %v6923_v16  ;;  %v6932_v1 = vadd.f32 %v16555_v27, %v6897_v60  ;;  %v6936_v7 = vadd.f32 %v16555_v27, %v6901_v47 }
 0x866   : > { %v6944_v20 = vpack.c.bf16 %v6920_v34, %v6919_v58 }
 0x867   : > { %v16699_v40 = vpack.c.bf16 %v6936_v7, %v6935_v13 }
 0x86f   : > { %9029 = vmatmul.msk.bf16.gmra.mxu2 %vm18500_vm9, %v6939_v51  ;;  %9045 = vmatmul.msk.bf16.gmra.mxu1 %vm18501_vm12, %v6939_v51  ;;  %v6918_v51 = vadd.f32 %v16555_v27, %v6883_v59  ;;  %v6895_v59 = vmul.f32 %v16526_v49, %v16561_v52  ;;  %v6898_v52 = vmul.f32 %v16526_v49, %v16570_v6  ;;  %vm18515_vm9 = vmmov %vm18219_vm0 }
 0x870   : > { %v6934_v6 = vadd.f32 %v16555_v27, %v6899_v18  ;;  %vm18516_vm12 = vmmov %vm18219_vm0 }
 0x871   : > { %v6943_v43 = vpack.c.bf16 %v6918_v51, %v6917_v24  ;;  %v6927_v24 = vadd.f32 %v16555_v27, %v6892_v9  ;;  %v6928_v51 = vadd.f32 %v16555_v27, %v6893_v5  ;;  %v6930_v45 = vadd.f32 %v16555_v27, %v6895_v59 }
 0x872   : > { %v6933_v23 = vadd.f32 %v16555_v27, %v6898_v52 }
 0x873   : > { %v6948_v57 = vpack.c.bf16 %v6928_v51, %v6927_v24  ;;  %v16686_v26 = vpack.c.bf16 %v6930_v45, %v6929_v61 }
 0x874   : > { %v16697_v58 = vpack.c.bf16 %v6934_v6, %v6933_v23 }
 0x87f   : > { %9030 = vmatmul.msk.bf16.gmra.mxu2 %vm18502_vm13, %v6940_v35  ;;  %9046 = vmatmul.msk.bf16.gmra.mxu1 %vm18503_vm14, %v6940_v35  ;;  %v6947_v35 = vpack.c.bf16 %v6926_v8, %v6925_v19  ;;  %vm18517_vm13 = vmmov %vm18219_vm0 }
 0x880   : > { %vm18518_vm14 = vmmov %vm18219_vm0 }
 0x88f   : > { %9031 = vmatmul.msk.bf16.gmra.mxu2 %vm18504_vm4, %v6941_v22  ;;  %9047 = vmatmul.msk.bf16.gmra.mxu1 %vm18505_vm8, %v6941_v22  ;;  %v6931_v22 = vadd.f32 %v16555_v27, %v6896_v55  ;;  %v6961_v27 = vld [vmem:[%s17504_s15] sm:$0x3]  ;;  %vm18519_vm4 = vmmov %vm18219_vm0 }
 0x890   : > { %v16712_v39 = vperm.slane %v6961_v27, 1  ;;  %v16720_v38 = vperm.slane %v6961_v27, 0  ;;  %vm18520_vm8 = vmmov %vm18219_vm0 }
 0x891   : > { %v16694_v32 = vpack.c.bf16 %v6932_v1, %v6931_v22 }
 0x89f   : > { %9032 = vmatmul.msk.bf16.gmra.mxu2 %vm18506_vm5, %v6942_v28  ;;  %9048 = vmatmul.msk.bf16.gmra.mxu1 %vm18507_vm15, %v6942_v28  ;;  %vm18521_vm5 = vmmov %vm18219_vm0 }
 0x8a0   : > { %vm18522_vm15 = vmmov %vm18219_vm0 }
 0x8af   : > { %9033 = vmatmul.msk.bf16.gmra.mxu2 %vm18508_vm1, %v6943_v43  ;;  %9049 = vmatmul.msk.bf16.gmra.mxu1 %vm18509_vm3, %v6943_v43  ;;  %vm18523_vm1 = vmmov %vm18219_vm0 }
 0x8b0   : > { %vm18524_vm3 = vmmov %vm18219_vm0 }
 0x8bf   : > { %9034 = vmatmul.msk.bf16.gmra.mxu2 %vm18510_vm6, %v6944_v20  ;;  %9050 = vmatmul.msk.bf16.gmra.mxu1 %vm18511_vm7, %v6944_v20  ;;  %vm18525_vm6 = vmmov %vm18219_vm0 }
 0x8c0   : > { %vm18526_vm7 = vmmov %vm18219_vm0 }
 0x8cc   : > { %v7153_v49 = vpop.f32.mrf.mxu1 }
 0x8cd   : > { %v16715_v37 = vadd.f32 %v7153_v49, %v16712_v39 }
 0x8cf   : > { %9035 = vmatmul.msk.bf16.gmra.mxu2 %vm18512_vm10, %v6945_v54  ;;  %9051 = vmatmul.msk.bf16.gmra.mxu1 %vm18219_vm0, %v6945_v54  ;;  %vm18529_vm10 = vmmov %vm18219_vm0 }
 0x8d2   : > { %v7064_v28 = vpop.f32.mrf.mxu2 }
 0x8d3   : > { %v7065_v19 = vadd.f32 %v7064_v28, %v16720_v38 }
 0x8d4   : > { %v7155_v34 = vpop.f32.mrf.mxu1 }
 0x8d5   : > { %v16718_v43 = vadd.f32 %v7155_v34, %v16712_v39 }
 0x8da   : > { %v7066_v50 = vpop.f32.mrf.mxu2 }
 0x8db   : > { %v7067_v8 = vadd.f32 %v7066_v50, %v16720_v38 }
 0x8dc   : > { %v7158_v20 = vpop.f32.mrf.mxu1 }
 0x8dd   : > { %v16726_v54 = vpack.c.bf16 %v7067_v8, %v7065_v19  ;;  %v16731_v48 = vadd.f32 %v7158_v20, %v16712_v39 }
 0x8df   : > { %9036 = vmatmul.msk.bf16.gmra.mxu2 %vm18513_vm11, %v6946_v29  ;;  %9052 = vmatmul.msk.bf16.gmra.mxu1 %vm18514_vm2, %v6946_v29  ;;  %vm18530_vm11 = vmmov %vm18219_vm0 }
 0x8e0   : > { %vm18531_vm2 = vmmov %vm18219_vm0 }
 0x8e2   : > { %v7069_v9 = vpop.f32.mrf.mxu2 }
 0x8e3   : > { %v7070_v55 = vadd.f32 %v7069_v9, %v16720_v38 }
 0x8e4   : > { %v7160_v5 = vpop.f32.mrf.mxu1 }
 0x8e5   : > { %v16734_v59 = vadd.f32 %v7160_v5, %v16712_v39 }
 0x8ea   : > { %v7071_v51 = vpop.f32.mrf.mxu2 }
 0x8eb   : > { %v7072_v61 = vadd.f32 %v7071_v51, %v16720_v38 }
 0x8ec   : > { %v7163_v45 = vpop.f32.mrf.mxu1 }
 0x8ed   : > { %v16740_v60 = vpack.c.bf16 %v7072_v61, %v7070_v55  ;;  %v16745_v22 = vadd.f32 %v7163_v45, %v16712_v39 }
 0x8ef   : > { %9037 = vmatmul.msk.bf16.gmra.mxu2 %vm18515_vm9, %v6947_v35  ;;  %9053 = vmatmul.msk.bf16.gmra.mxu1 %vm18516_vm12, %v6947_v35  ;;  %vm18532_vm9 = vmmov %vm18219_vm0 }
 0x8f0   : > { %vm18533_vm12 = vmmov %vm18219_vm0 }
 0x8f2   : > { %v7074_v29 = vpop.f32.mrf.mxu2 }
 0x8f3   : > { %v7075_v23 = vadd.f32 %v7074_v29, %v16720_v38 }
 0x8f4   : > { %v7165_v52 = vpop.f32.mrf.mxu1 }
 0x8f5   : > { %v16748_v18 = vadd.f32 %v7165_v52, %v16712_v39 }
 0x8f7   : > { %v8053_v15 = vpack.c.bf16 %v16748_v18, %v16745_v22 }
 0x8fa   : > { %v7076_v1 = vpop.f32.mrf.mxu2 }
 0x8fb   : > { %v7077_v47 = vadd.f32 %v7076_v1, %v16720_v38 }
 0x8fc   : > { %v7168_v6 = vpop.f32.mrf.mxu1 }
 0x8fd   : > { %v16754_v13 = vpack.c.bf16 %v7077_v47, %v7075_v23  ;;  %v7169_v49 = vadd.f32 %v7168_v6, %v16712_v39 }
 0x8ff   : > { %9038 = vmatmul.msk.bf16.gmra.mxu2 %vm18517_vm13, %v6948_v57  ;;  %9054 = vmatmul.msk.bf16.gmra.mxu1 %vm18518_vm14, %v6948_v57  ;;  %vm18534_vm13 = vmmov %vm18219_vm0 }
 0x900   : > { %vm18535_vm14 = vmmov %vm18219_vm0 }
 0x902   : > { %v7079_v35 = vpop.f32.mrf.mxu2 }
 0x903   : > { %v7080_v50 = vadd.f32 %v7079_v35, %v16720_v38 }
 0x904   : > { %v7170_v7 = vpop.f32.mrf.mxu1 }
 0x905   : > { %v7171_v27 = vadd.f32 %v7170_v7, %v16712_v39 }
 0x907   : > { %v8054_v28 = vpack.c.bf16 %v7171_v27, %v7169_v49 }
 0x90a   : > { %v7081_v34 = vpop.f32.mrf.mxu2 }
 0x90b   : > { %v7082_v19 = vadd.f32 %v7081_v34, %v16720_v38 }
 0x90c   : > { %v7173_v8 = vpop.f32.mrf.mxu1 }
 0x90d   : > { %v16762_v20 = vpack.c.bf16 %v7082_v19, %v7080_v50 }
 0x90f   : > { %9039 = vmatmul.msk.bf16.gmra.mxu2 %vm18519_vm4, %v16686_v26  ;;  %9055 = vmatmul.msk.bf16.gmra.mxu1 %vm18520_vm8, %v16686_v26  ;;  %vm18536_vm4 = vmmov %vm18219_vm0 }
 0x910   : > { %vm18537_vm8 = vmmov %vm18219_vm0 }
 0x912   : > { %v16768_v57 = vpop.f32.mrf.mxu2 }
 0x913   : > { %v7085_v2 = vadd.f32 %v16768_v57, %v16720_v38 }
 0x914   : > { %v7175_v9 = vpop.f32.mrf.mxu1 }
 0x91a   : > { %v16770_v5 = vpop.f32.mrf.mxu2 }
 0x91b   : > { %v7087_v3 = vadd.f32 %v16770_v5, %v16720_v38 }
 0x91c   : > { %v7178_v51 = vpop.f32.mrf.mxu1 }
 0x91d   : > { %v16854_v41 = vpack.c.bf16 %v7087_v3, %v7085_v2 }
 0x91f   : > { %9040 = vmatmul.msk.bf16.gmra.mxu2 %vm18521_vm5, %v16694_v32  ;;  %9056 = vmatmul.msk.bf16.gmra.mxu1 %vm18522_vm15, %v16694_v32  ;;  %vm18538_vm5 = vmmov %vm18219_vm0 }
 0x920   : > { %vm18539_vm15 = vmmov %vm18219_vm0 }
 0x922   : > { %v16776_v55 = vpop.f32.mrf.mxu2 }
 0x924   : > { %v7180_v61 = vpop.f32.mrf.mxu1 }
 0x925   : > { %v7181_v34 = vadd.f32 %v7180_v61, %v16712_v39  ;;  %v7174_v61 = vadd.f32 %v7173_v8, %v16712_v39 }
 0x92a   : > { %v16778_v45 = vpop.f32.mrf.mxu2 }
 0x92b   : > { %v7092_v2 = vadd.f32 %v16778_v45, %v16720_v38 }
 0x92c   : > { %v7183_v29 = vpop.f32.mrf.mxu1 }
 0x92d   : > { %v7184_v49 = vadd.f32 %v7183_v29, %v16712_v39 }
 0x92f   : > { %9041 = vmatmul.msk.bf16.gmra.mxu2 %vm18523_vm1, %v16697_v58  ;;  %9057 = vmatmul.msk.bf16.gmra.mxu1 %vm18524_vm3, %v16697_v58  ;;  %vm18540_vm1 = vmmov %vm18219_vm0 }
 0x930   : > { %vm18541_vm3 = vmmov %vm18219_vm0 }
 0x932   : > { %v16784_v26 = vpop.f32.mrf.mxu2 }
 0x934   : > { %v7185_v52 = vpop.f32.mrf.mxu1 }
 0x935   : > { %v7186_v58 = vadd.f32 %v7185_v52, %v16712_v39  ;;  %v7176_v52 = vadd.f32 %v7175_v9, %v16712_v39  ;;  %v18527_v9 = vpack.c.bf16 %v16734_v59, %v16731_v48 }
 0x937   : > { %v8057_v50 = vpack.c.bf16 %v7186_v58, %v7184_v49 }
 0x93a   : > { %v16786_v1 = vpop.f32.mrf.mxu2 }
 0x93c   : > { %v7188_v23 = vpop.f32.mrf.mxu1 }
 0x93d   : > { %v7189_v6 = vadd.f32 %v7188_v23, %v16712_v39  ;;  %v7179_v23 = vadd.f32 %v7178_v51, %v16712_v39 }
 0x93f   : > { %9042 = vmatmul.msk.bf16.gmra.mxu2 %vm18525_vm6, %v16699_v40  ;;  %9058 = vmatmul.msk.bf16.gmra.mxu1 %vm18526_vm7, %v16699_v40  ;;  %vm18542_vm6 = vmmov %vm18219_vm0 }
 0x940   : > { %vm18543_vm7 = vmmov %vm18219_vm0 }
 0x942   : > { %v7099_v32 = vpop.f32.mrf.mxu2 }
 0x943   : > { %v7100_v19 = vadd.f32 %v7099_v32, %v16720_v38  ;;  %v8055_v32 = vpack.c.bf16 %v7176_v52, %v7174_v61 }
 0x944   : > { %v7190_v47 = vpop.f32.mrf.mxu1 }
 0x945   : > { %v7191_v35 = vadd.f32 %v7190_v47, %v16712_v39  ;;  %v8056_v47 = vpack.c.bf16 %v7181_v34, %v7179_v23 }
 0x947   : > { %v8058_v7 = vpack.c.bf16 %v7191_v35, %v7189_v6 }
 0x949   : > { %8067 = vmatpush.bf16.msrb.mxu2 %v8058_v7  ;;  %v18528_v7 = vpack.c.bf16 %v16718_v43, %v16715_v37 }
 0x94a   : > { %v7101_v27 = vpop.f32.mrf.mxu2 }
 0x94b   : > { %v7102_v40 = vadd.f32 %v7101_v27, %v16720_v38 }
 0x94c   : > { %v16799_v16 = vpop.f32.mrf.mxu1 }
 0x94d   : > { %v16802_v24 = vpack.c.bf16 %v7102_v40, %v7100_v19  ;;  %8068 = vmatpush.bf16.msrb.mxu2 %v8057_v50 }
 0x94f   : > { %7279 = vrot.lane.b32.xlu2 %v16802_v24, %s17786_s29 }
 0x951   : > { %8069 = vmatpush.bf16.msrb.mxu2 %v8056_v47 }
 0x952   : > { %v16808_v29 = vpop.f32.mrf.mxu2 }
 0x954   : > { %v16810_v6 = vpop.f32.mrf.mxu1 }
 0x955   : > { %8070 = vmatpush.bf16.msrb.mxu2 %v8055_v32 }
 0x959   : > { %8071 = vmatpush.bf16.msrb.mxu2 %v8054_v28 }
 0x95a   : > { %v16812_v51 = vpop.f32.mrf.mxu2 }
 0x95c   : > { %v16814_v35 = vpop.f32.mrf.mxu1 }
 0x95d   : > { %8072 = vmatpush.bf16.msrb.mxu2 %v8053_v15 }
 0x961   : > { %8073 = vmatpush.bf16.msrb.mxu2 %v18527_v9 }
 0x962   : > { %v16822_v8 = vpop.f32.mrf.mxu2 }
 0x964   : > { %v16824_v58 = vpop.f32.mrf.mxu1 }
 0x965   : > { %8074 = vmatpush.bf16.msrb.mxu2 %v18528_v7 }
 0x96a   : > { %v16829_v28 = vpop.f32.mrf.mxu2 }
 0x96c   : > { %v16831_v49 = vpop.f32.mrf.mxu1 }
 0x972   : > { %v7114_v27 = vpop.f32.mrf.mxu2 }
 0x974   : > { %v16833_v34 = vpop.f32.mrf.mxu1 }
 0x97a   : > { %v7116_v22 = vpop.f32.mrf.mxu2 }
 0x97c   : > { %v16835_v18 = vpop.f32.mrf.mxu1 }
 0x982   : > { %v7119_v48 = vpop.f32.mrf.mxu2 }
 0x984   : > { %v16837_v59 = vpop.f32.mrf.mxu1 }
 0x98a   : > { %v7121_v15 = vpop.f32.mrf.mxu2 }
 0x98b   : > { %v7122_v45 = vadd.f32 %v7121_v15, %v16720_v38 }
 0x98c   : > { %v7213_v50 = vpop.f32.mrf.mxu1 }
 0x992   : > { %v16839_v19 = vpop.f32.mrf.mxu2 }
 0x994   : > { %v7215_v40 = vpop.f32.mrf.mxu1 }
 0x99a   : > { %v16841_v37 = vpop.f32.mrf.mxu2 }
 0x99c   : > { %v7218_v43 = vpop.f32.mrf.mxu1 }
 0x9a2   : > { %v7129_v23 = vpop.f32.mrf.mxu2 }
 0x9a3   : > { %v7130_v9 = vadd.f32 %v7129_v23, %v16720_v38  ;;  %v7117_v23 = vadd.f32 %v7116_v22, %v16720_v38 }
 0x9a4   : > { %v7220_v52 = vpop.f32.mrf.mxu1 }
 0x9a9   : > { %v7280_v47 = vpop.permute.xlu2 %7279 }
 0x9aa   : > { %v7367_v61 = vsel %vm18529_vm10, %v7280_v47, 0  ;;  %v7131_v32 = vpop.f32.mrf.mxu2  ;;  %vm18544_vm10 = vmmov %vm18219_vm0 }
 0x9ab   : > { %v7132_v7 = vadd.f32 %v7131_v32, %v16720_v38  ;;  %7393 = vmatpush.bf16.xpose.msrb.mxu0 %v7367_v61  ;;  %v7115_v32 = vadd.f32 %v7114_v27, %v16720_v38 }
 0x9ac   : > { %v7223_v46 = vpop.f32.mrf.mxu1 }
 0x9ad   : > { %v16846_v63 = vpack.c.bf16 %v7132_v7, %v7130_v9  ;;  %v16862_v42 = vpack.c.bf16 %v7117_v23, %v7115_v32 }
 0x9af   : > { %7291 = vrot.lane.b32.xlu2 %v16846_v63, %s17786_s29 }
 0x9b2   : > { %v7134_v31 = vpop.f32.mrf.mxu2 }
 0x9b3   : > { %v7135_v9 = vadd.f32 %v7134_v31, %v16720_v38  ;;  %v7090_v31 = vadd.f32 %v16776_v55, %v16720_v38  ;;  %v7224_v55 = vadd.f32 %v7223_v46, %v16712_v39  ;;  %v7216_v46 = vadd.f32 %v7215_v40, %v16712_v39 }
 0x9b4   : > { %v7225_v47 = vpop.f32.mrf.mxu1 }
 0x9b5   : > { %v16874_v27 = vpack.c.bf16 %v7092_v2, %v7090_v31 }
 0x9b7   : > { %7273 = vrot.lane.b32.xlu2 %v16854_v41, %s17786_s29 }
 0x9ba   : > { %v7136_v61 = vpop.f32.mrf.mxu2 }
 0x9bb   : > { %v7137_v7 = vadd.f32 %v7136_v61, %v16720_v38  ;;  %v7226_v61 = vadd.f32 %v7225_v47, %v16712_v39 }
 0x9bc   : > { %v7228_v5 = vpop.f32.mrf.mxu1 }
 0x9bd   : > { %v16864_v44 = vpack.c.bf16 %v7137_v7, %v7135_v9  ;;  %v7229_v22 = vadd.f32 %v7228_v5, %v16712_v39  ;;  %v7120_v9 = vadd.f32 %v7119_v48, %v16720_v38  ;;  %v7221_v5 = vadd.f32 %v7220_v52, %v16712_v39 }
 0x9be   : > { %v8065_v2 = vpack.c.bf16 %v7226_v61, %v7224_v55  ;;  %v7097_v48 = vadd.f32 %v16786_v1, %v16720_v38  ;;  %v7214_v52 = vadd.f32 %v7213_v50, %v16712_v39  ;;  %v7201_v50 = vadd.f32 %v16824_v58, %v16712_v39 }
 0x9bf   : > { %7293 = vrot.lane.b32.xlu0 %v16864_v44, %s17786_s29  ;;  %7285 = vrot.lane.b32.xlu2 %v16862_v42, %s17786_s29 }
 0x9c0   : > { %v8063_v40 = vpack.c.bf16 %v7216_v46, %v7214_v52 }
 0x9c2   : > { %v7139_v3 = vpop.f32.mrf.mxu2 }
 0x9c3   : > { %v7140_v47 = vadd.f32 %v7139_v3, %v16720_v38  ;;  %v7211_v3 = vadd.f32 %v16837_v59, %v16712_v39  ;;  %v7204_v59 = vadd.f32 %v16831_v49, %v16712_v39 }
 0x9c4   : > { %v7230_v57 = vpop.f32.mrf.mxu1 }
 0x9c5   : > { %v7231_v23 = vadd.f32 %v7230_v57, %v16712_v39  ;;  %v16889_v57 = vpack.c.bf16 %v7122_v45, %v7120_v9  ;;  %v7206_v45 = vadd.f32 %v16833_v34, %v16712_v39  ;;  %v7105_v34 = vadd.f32 %v16808_v29, %v16720_v38 }
 0x9c6   : > { %v7125_v9 = vadd.f32 %v16839_v19, %v16720_v38  ;;  %v7194_v29 = vadd.f32 %v16799_v16, %v16712_v39 }
 0x9c7   : > { %v8066_v32 = vpack.c.bf16 %v7231_v23, %v7229_v22  ;;  %7275 = vrot.lane.b32.xlu0 %v16874_v27, %s17786_s29  ;;  %7267 = vrot.lane.b32.xlu2 %v16740_v60, %s17786_s29  ;;  %v7219_v22 = vadd.f32 %v7218_v43, %v16712_v39  ;;  %v7095_v43 = vadd.f32 %v16784_v26, %v16720_v38 }
 0x9c8   : > { %v7107_v26 = vadd.f32 %v16812_v51, %v16720_v38  ;;  %v8061_v55 = vpack.c.bf16 %v7206_v45, %v7204_v59  ;;  %v7199_v51 = vadd.f32 %v16814_v35, %v16712_v39  ;;  %v7112_v35 = vadd.f32 %v16829_v28, %v16720_v38 }
 0x9c9   : > { %8156 = vmatpush.bf16.msra.mxu1 %v8066_v32  ;;  %v8064_v15 = vpack.c.bf16 %v7221_v5, %v7219_v22  ;;  %v16906_v61 = vpack.c.bf16 %v7097_v48, %v7095_v43  ;;  %v7209_v32 = vadd.f32 %v16835_v18, %v16712_v39  ;;  %v7127_v18 = vadd.f32 %v16841_v37, %v16720_v38 }
 0x9ca   : > { %v7141_v7 = vpop.f32.mrf.mxu2  ;;  %v7196_v37 = vadd.f32 %v16810_v6, %v16712_v39  ;;  %v8060_v5 = vpack.c.bf16 %v7201_v50, %v7199_v51  ;;  %v7110_v6 = vadd.f32 %v16822_v8, %v16720_v38 }
 0x9cb   : > { %v7142_v31 = vadd.f32 %v7141_v7, %v16720_v38  ;;  %v8062_v1 = vpack.c.bf16 %v7211_v3, %v7209_v32  ;;  %v16928_v7 = vpack.c.bf16 %v7107_v26, %v7105_v34  ;;  %v16932_v49 = vpack.c.bf16 %v7127_v18, %v7125_v9 }
 0x9cc   : > { %v8059_v58 = vpack.c.bf16 %v7196_v37, %v7194_v29  ;;  %v16948_v19 = vpack.c.bf16 %v7112_v35, %v7110_v6 }
 0x9cd   : > { %v16892_v23 = vpack.c.bf16 %v7142_v31, %v7140_v47  ;;  %8157 = vmatpush.bf16.msra.mxu1 %v8065_v2 }
 0x9cf   : > { %7295 = vrot.lane.b32.xlu1 %v16892_v23, %s17786_s29  ;;  %7287 = vrot.lane.b32.xlu0 %v16889_v57, %s17786_s29 }
 0x9d1   : > { %8158 = vmatpush.bf16.msra.mxu1 %v8064_v15 }
 0x9d5   : > { %8159 = vmatpush.bf16.msra.mxu1 %v8063_v40 }
 0x9d7   : > { %7277 = vrot.lane.b32.xlu1 %v16906_v61, %s17786_s29  ;;  %7269 = vrot.lane.b32.xlu0 %v16754_v13, %s17786_s29 }
 0x9d9   : > { %8160 = vmatpush.bf16.msra.mxu1 %v8062_v1 }
 0x9dd   : > { %8161 = vmatpush.bf16.msra.mxu1 %v8061_v55 }
 0x9df   : > { %7289 = vrot.lane.b32.xlu1 %v16932_v49, %s17786_s29  ;;  %7281 = vrot.lane.b32.xlu0 %v16928_v7, %s17786_s29 }
 0x9e1   : > { %8162 = vmatpush.bf16.msra.mxu1 %v8060_v5 }
 0x9e5   : > { %8163 = vmatpush.bf16.msra.mxu1 %v8059_v58 }
 0x9e7   : > { %7271 = vrot.lane.b32.xlu1 %v16762_v20, %s17786_s29 }
 0x9ef   : > { %7283 = vrot.lane.b32.xlu1 %v16948_v19, %s17786_s29 }
 0x9f7   : > { %7265 = vrot.lane.b32.xlu1 %v16726_v54, %s17786_s29  ;;  %s17320_s29 = scalar_lea.vmem [#allocation4], %s8653_s5 }
 0x9f8   : > { %s8575_s26 = sshll.u32 %s17320_s29, 4  ;;  %s8576_s26 = int_to_ptr.vmem [resolvable:$true] %s8575_s26 }
 0xa09   : > { %v7292_v38 = vpop.permute.xlu2 %7291 }
 0xa0a   : > { %v7385_v22 = vsel %vm18532_vm9, %v7292_v38, 0  ;;  %vm18547_vm9 = vmmov %vm18219_vm0 }
 0xa11   : > { %v7274_v48 = vpop.permute.xlu2 %7273 }
 0xa12   : > { %v7358_v52 = vsel %vm18534_vm13, %v7274_v48, 0  ;;  %vm18549_vm13 = vmmov %vm18219_vm0 }
 0xa19   : > { %v7286_v1 = vpop.permute.xlu2 %7285 }
 0xa1a   : > { %v7376_v59 = vsel %vm18538_vm5, %v7286_v1, 0  ;;  %vm18553_vm5 = vmmov %vm18219_vm0 }
 0xa21   : > { %v7268_v50 = vpop.permute.xlu2 %7267 }
 0xa22   : > { %v7349_v55 = vsel %vm18540_vm1, %v7268_v50, 0  ;;  %vm18555_vm1 = vmmov %vm18219_vm0 }
 0xa31   : > { %v7294_v2 = vpop.permute.xlu0 %7293 }
 0xa32   : > { %v7388_v31 = vsel %vm18530_vm11, %v7294_v2, 0  ;;  %vm18545_vm11 = vmmov %vm18219_vm0 }
 0xa39   : > { %v7276_v8 = vpop.permute.xlu0 %7275 }
 0xa3a   : > { %v7361_v46 = vsel %vm18533_vm12, %v7276_v8, 0  ;;  %vm18548_vm12 = vmmov %vm18219_vm0 }
 0xa41   : > { %v7296_v39 = vpop.permute.xlu1 %7295  ;;  %v7288_v3 = vpop.permute.xlu0 %7287 }
 0xa42   : > { %v7391_v16 = vsel %vm18219_vm0, %v7296_v39, 0  ;;  %v7379_v32 = vsel %vm18536_vm4, %v7288_v3, 0  ;;  %vm18551_vm4 = vmmov %vm18219_vm0 }
 0xa43   : > { %7482 = vmatpush.bf16.xpose.msra.mxu3 %v7391_v16 }
 0xa49   : > { %v7278_v47 = vpop.permute.xlu1 %7277  ;;  %v7270_v26 = vpop.permute.xlu0 %7269 }
 0xa4a   : > { %v7364_v28 = vsel %vm18531_vm2, %v7278_v47, 0  ;;  %v7352_v18 = vsel %vm18539_vm15, %v7270_v26, 0  ;;  %vm18546_vm2 = vmmov %vm18219_vm0 }
 0xa4b   : > { %7394 = vmatpush.bf16.xpose.msrb.mxu0 %v7364_v28  ;;  %7483 = vmatpush.bf16.xpose.msra.mxu3 %v7388_v31  ;;  %vm18554_vm15 = vmmov %vm18219_vm0 }
 0xa51   : > { %v7290_v15 = vpop.permute.xlu1 %7289  ;;  %v7282_v51 = vpop.permute.xlu0 %7281 }
 0xa52   : > { %v7382_v43 = vsel %vm18535_vm14, %v7290_v15, 0  ;;  %v7370_v5 = vsel %vm18542_vm6, %v7282_v51, 0  ;;  %vm18550_vm14 = vmmov %vm18219_vm0 }
 0xa53   : > { %7395 = vmatpush.bf16.xpose.msrb.mxu0 %v7361_v46  ;;  %7484 = vmatpush.bf16.xpose.msra.mxu3 %v7385_v22  ;;  %vm18557_vm6 = vmmov %vm18219_vm0 }
 0xa59   : > { %v7272_v40 = vpop.permute.xlu1 %7271 }
 0xa5a   : > { %v7355_v45 = vsel %vm18537_vm8, %v7272_v40, 0  ;;  %vm18552_vm8 = vmmov %vm18219_vm0 }
 0xa5b   : > { %7396 = vmatpush.bf16.xpose.msrb.mxu0 %v7358_v52  ;;  %7485 = vmatpush.bf16.xpose.msra.mxu3 %v7382_v43 }
 0xa61   : > { %v7284_v34 = vpop.permute.xlu1 %7283 }
 0xa62   : > { %v7373_v9 = vsel %vm18541_vm3, %v7284_v34, 0  ;;  %vm18556_vm3 = vmmov %vm18219_vm0 }
 0xa63   : > { %7397 = vmatpush.bf16.xpose.msrb.mxu0 %v7355_v45  ;;  %7486 = vmatpush.bf16.xpose.msra.mxu3 %v7379_v32 }
 0xa69   : > { %v7266_v37 = vpop.permute.xlu1 %7265 }
 0xa6a   : > { %v7346_v29 = vsel %vm18543_vm7, %v7266_v37, 0  ;;  %vm18558_vm7 = vmmov %vm18219_vm0 }
 0xa6b   : > { %7398 = vmatpush.bf16.xpose.msrb.mxu0 %v7352_v18  ;;  %7487 = vmatpush.bf16.xpose.msra.mxu3 %v7376_v59 }
 0xa73   : > { %7399 = vmatpush.bf16.xpose.msrb.mxu0 %v7349_v55  ;;  %7488 = vmatpush.bf16.xpose.msra.mxu3 %v7373_v9 }
 0xa7b   : > { %7400 = vmatpush.bf16.xpose.msrb.mxu0 %v7346_v29  ;;  %7489 = vmatpush.bf16.xpose.msra.mxu3 %v7370_v5 }
 0xa82   : > { %9059 = vmatmul.msk.bf16.vlgmr.msrb.gmra.mxu0 %vm18544_vm10, %v16726_v54  ;;  %9075 = vmatmul.msk.bf16.vlgmr.msra.gmra.mxu3 %vm18219_vm0, %v16726_v54  ;;  %vm18559_vm10 = vmmov %vm18219_vm0 }
 0xa92   : > { %9060 = vmatmul.msk.bf16.gmra.mxu0 %vm18545_vm11, %v16740_v60  ;;  %9076 = vmatmul.msk.bf16.gmra.mxu3 %vm18546_vm2, %v16740_v60  ;;  %vm18560_vm11 = vmmov %vm18219_vm0 }
 0xa93   : > { %vm18561_vm2 = vmmov %vm18219_vm0 }
 0xaa2   : > { %9061 = vmatmul.msk.bf16.gmra.mxu0 %vm18547_vm9, %v16754_v13  ;;  %9077 = vmatmul.msk.bf16.gmra.mxu3 %vm18548_vm12, %v16754_v13  ;;  %vm18562_vm9 = vmmov %vm18219_vm0 }
 0xaa3   : > { %vm18563_vm12 = vmmov %vm18219_vm0 }
 0xab2   : > { %9062 = vmatmul.msk.bf16.gmra.mxu0 %vm18549_vm13, %v16762_v20  ;;  %9078 = vmatmul.msk.bf16.gmra.mxu3 %vm18550_vm14, %v16762_v20  ;;  %vm18564_vm13 = vmmov %vm18219_vm0 }
 0xab3   : > { %vm18565_vm14 = vmmov %vm18219_vm0 }
 0xac2   : > { %9063 = vmatmul.msk.bf16.gmra.mxu0 %vm18551_vm4, %v16854_v41  ;;  %9079 = vmatmul.msk.bf16.gmra.mxu3 %vm18552_vm8, %v16854_v41  ;;  %vm18566_vm4 = vmmov %vm18219_vm0 }
 0xac3   : > { %vm18567_vm8 = vmmov %vm18219_vm0 }
 0xad2   : > { %9064 = vmatmul.msk.bf16.gmra.mxu0 %vm18553_vm5, %v16874_v27  ;;  %9080 = vmatmul.msk.bf16.gmra.mxu3 %vm18554_vm15, %v16874_v27  ;;  %vm18568_vm5 = vmmov %vm18219_vm0 }
 0xad3   : > { %vm18569_vm15 = vmmov %vm18219_vm0 }
 0xae2   : > { %9065 = vmatmul.msk.bf16.gmra.mxu0 %vm18555_vm1, %v16906_v61  ;;  %9081 = vmatmul.msk.bf16.gmra.mxu3 %vm18556_vm3, %v16906_v61  ;;  %vm18570_vm1 = vmmov %vm18219_vm0 }
 0xae3   : > { %vm18571_vm3 = vmmov %vm18219_vm0 }
 0xaf2   : > { %9066 = vmatmul.msk.bf16.gmra.mxu0 %vm18557_vm6, %v16802_v24  ;;  %9082 = vmatmul.msk.bf16.gmra.mxu3 %vm18558_vm7, %v16802_v24  ;;  %vm18572_vm6 = vmmov %vm18219_vm0 }
 0xaf3   : > { %vm18573_vm7 = vmmov %vm18219_vm0 }
 0xaff   : > { %v7402_v54 = vpop.f32.mrf.mxu0 }
 0xb00   : > { %v17005_v60 = vmul.f32 0.125, %v7402_v54 }
 0xb02   : > { %9067 = vmatmul.msk.bf16.gmra.mxu0 %vm18559_vm10, %v16928_v7  ;;  %9083 = vmatmul.msk.bf16.gmra.mxu3 %vm18219_vm0, %v16928_v7  ;;  %vm18574_vm10 = vmmov %vm18219_vm0 }
 0xb05   : > { %v7491_v41 = vpop.f32.mrf.mxu3 }
 0xb06   : > { %v17007_v13 = vmul.f32 0.125, %v7491_v41 }
 0xb07   : > { %v7404_v20 = vpop.f32.mrf.mxu0 }
 0xb08   : > { %v7635_v27 = vmax.f32 %v17005_v60, %v17007_v13  ;;  %v17011_v58 = vmul.f32 0.125, %v7404_v20 }
 0xb0a   : > { %7636 = vmax.xlane.f32.xlu2 %v7635_v27 }
 0xb0d   : > { %v7493_v61 = vpop.f32.mrf.mxu3 }
 0xb0e   : > { %v17013_v24 = vmul.f32 0.125, %v7493_v61 }
 0xb0f   : > { %v7407_v35 = vpop.f32.mrf.mxu0 }
 0xb10   : > { %v7638_v6 = vmax.f32 %v17011_v58, %v17013_v24  ;;  %v17021_v39 = vmul.f32 0.125, %v7407_v35 }
 0xb12   : > { %9068 = vmatmul.msk.bf16.gmra.mxu0 %vm18560_vm11, %v16948_v19  ;;  %9084 = vmatmul.msk.bf16.gmra.mxu3 %vm18561_vm2, %v16948_v19  ;;  %vm18575_vm11 = vmmov %vm18219_vm0 }
 0xb13   : > { %7639 = vmax.xlane.f32.xlu0 %v7638_v6  ;;  %vm18576_vm2 = vmmov %vm18219_vm0 }
 0xb15   : > { %v7496_v7 = vpop.f32.mrf.mxu3 }
 0xb16   : > { %v17023_v16 = vmul.f32 0.125, %v7496_v7 }
 0xb17   : > { %v7409_v2 = vpop.f32.mrf.mxu0 }
 0xb18   : > { %v7641_v47 = vmax.f32 %v17021_v39, %v17023_v16  ;;  %v17027_v28 = vmul.f32 0.125, %v7409_v2 }
 0xb1a   : > { %7642 = vmax.xlane.f32.xlu1 %v7641_v47 }
 0xb1d   : > { %v7498_v31 = vpop.f32.mrf.mxu3 }
 0xb1e   : > { %v17029_v38 = vmul.f32 0.125, %v7498_v31 }
 0xb1f   : > { %v7412_v8 = vpop.f32.mrf.mxu0 }
 0xb20   : > { %v7644_v19 = vmax.f32 %v17027_v28, %v17029_v38  ;;  %v17037_v46 = vmul.f32 0.125, %v7412_v8 }
 0xb22   : > { %9069 = vmatmul.msk.bf16.gmra.mxu0 %vm18562_vm9, %v16862_v42  ;;  %9085 = vmatmul.msk.bf16.gmra.mxu3 %vm18563_vm12, %v16862_v42  ;;  %vm18577_vm9 = vmmov %vm18219_vm0 }
 0xb23   : > { %7645 = vmax.xlane.f32.xlu2 %v7644_v19  ;;  %vm18578_vm12 = vmmov %vm18219_vm0 }
 0xb25   : > { %v7501_v22 = vpop.f32.mrf.mxu3 }
 0xb26   : > { %v17039_v15 = vmul.f32 0.125, %v7501_v22 }
 0xb27   : > { %v7414_v48 = vpop.f32.mrf.mxu0 }
 0xb28   : > { %v7647_v52 = vmax.f32 %v17037_v46, %v17039_v15  ;;  %v17043_v3 = vmul.f32 0.125, %v7414_v48 }
 0xb2b   : > { %7648 = vmax.xlane.f32.xlu2 %v7647_v52 }
 0xb2d   : > { %v7503_v43 = vpop.f32.mrf.mxu3 }
 0xb2e   : > { %v17045_v40 = vmul.f32 0.125, %v7503_v43 }
 0xb2f   : > { %v7417_v32 = vpop.f32.mrf.mxu0 }
 0xb30   : > { %v7650_v42 = vmax.f32 %v17043_v3, %v17045_v40  ;;  %v17053_v1 = vmul.f32 0.125, %v7417_v32 }
 0xb32   : > { %9070 = vmatmul.msk.bf16.gmra.mxu0 %vm18564_vm13, %v16889_v57  ;;  %9086 = vmatmul.msk.bf16.gmra.mxu3 %vm18565_vm14, %v16889_v57  ;;  %vm18579_vm13 = vmmov %vm18219_vm0 }
 0xb33   : > { %7651 = vmax.xlane.f32.xlu0 %v7650_v42  ;;  %vm18580_vm14 = vmmov %vm18219_vm0 }
 0xb35   : > { %v7506_v45 = vpop.f32.mrf.mxu3 }
 0xb36   : > { %v17055_v26 = vmul.f32 0.125, %v7506_v45 }
 0xb37   : > { %v7419_v59 = vpop.f32.mrf.mxu0 }
 0xb38   : > { %v7653_v18 = vmax.f32 %v17053_v1, %v17055_v26  ;;  %v17059_v50 = vmul.f32 0.125, %v7419_v59 }
 0xb3a   : > { %7654 = vmax.xlane.f32.xlu1 %v7653_v18 }
 0xb3d   : > { %v7508_v34 = vpop.f32.mrf.mxu3 }
 0xb3e   : > { %v17061_v55 = vmul.f32 0.125, %v7508_v34 }
 0xb3f   : > { %v7422_v9 = vpop.f32.mrf.mxu0 }
 0xb40   : > { %v7656_v57 = vmax.f32 %v17059_v50, %v17061_v55  ;;  %v17069_v37 = vmul.f32 0.125, %v7422_v9 }
 0xb42   : > { %9071 = vmatmul.msk.bf16.gmra.mxu0 %vm18566_vm4, %v16932_v49  ;;  %9087 = vmatmul.msk.bf16.gmra.mxu3 %vm18567_vm8, %v16932_v49  ;;  %vm18581_vm4 = vmmov %vm18219_vm0 }
 0xb43   : > { %7657 = vmax.xlane.f32.xlu2 %v7656_v57  ;;  %vm18582_vm8 = vmmov %vm18219_vm0 }
 0xb45   : > { %v7511_v51 = vpop.f32.mrf.mxu3 }
 0xb46   : > { %v17071_v5 = vmul.f32 0.125, %v7511_v51 }
 0xb47   : > { %v7424_v29 = vpop.f32.mrf.mxu0 }
 0xb48   : > { %v7659_v54 = vmax.f32 %v17069_v37, %v17071_v5  ;;  %v17075_v20 = vmul.f32 0.125, %v7424_v29 }
 0xb4a   : > { %7660 = vmax.xlane.f32.xlu0 %v7659_v54 }
 0xb4d   : > { %v7513_v41 = vpop.f32.mrf.mxu3 }
 0xb4e   : > { %v17077_v27 = vmul.f32 0.125, %v7513_v41 }
 0xb4f   : > { %v7427_v61 = vpop.f32.mrf.mxu0 }
 0xb50   : > { %v7662_v49 = vmax.f32 %v17075_v20, %v17077_v27  ;;  %v17085_v6 = vmul.f32 0.125, %v7427_v61 }
 0xb52   : > { %9072 = vmatmul.msk.bf16.gmra.mxu0 %vm18568_vm5, %v16846_v63  ;;  %9088 = vmatmul.msk.bf16.gmra.mxu3 %vm18569_vm15, %v16846_v63  ;;  %vm18583_vm5 = vmmov %vm18219_vm0 }
 0xb53   : > { %7663 = vmax.xlane.f32.xlu1 %v7662_v49  ;;  %vm18584_vm15 = vmmov %vm18219_vm0 }
 0xb55   : > { %v7516_v35 = vpop.f32.mrf.mxu3 }
 0xb56   : > { %v17087_v7 = vmul.f32 0.125, %v7516_v35 }
 0xb57   : > { %v7429_v2 = vpop.f32.mrf.mxu0 }
 0xb58   : > { %v7665_v47 = vmax.f32 %v17085_v6, %v17087_v7  ;;  %v17091_v8 = vmul.f32 0.125, %v7429_v2 }
 0xb5a   : > { %7666 = vmax.xlane.f32.xlu2 %v7665_v47 }
 0xb5d   : > { %v7518_v31 = vpop.f32.mrf.mxu3 }
 0xb5e   : > { %v17093_v19 = vmul.f32 0.125, %v7518_v31 }
 0xb5f   : > { %v7432_v22 = vpop.f32.mrf.mxu0 }
 0xb60   : > { %v7668_v63 = vmax.f32 %v17091_v8, %v17093_v19  ;;  %v17101_v52 = vmul.f32 0.125, %v7432_v22 }
 0xb62   : > { %9073 = vmatmul.msk.bf16.gmra.mxu0 %vm18570_vm1, %v16864_v44  ;;  %9089 = vmatmul.msk.bf16.gmra.mxu3 %vm18571_vm3, %v16864_v44  ;;  %vm18585_vm1 = vmmov %vm18219_vm0 }
 0xb63   : > { %7669 = vmax.xlane.f32.xlu0 %v7668_v63  ;;  %vm18586_vm3 = vmmov %vm18219_vm0 }
 0xb65   : > { %v7521_v48 = vpop.f32.mrf.mxu3 }
 0xb66   : > { %v17103_v43 = vmul.f32 0.125, %v7521_v48 }
 0xb67   : > { %v7434_v32 = vpop.f32.mrf.mxu0 }
 0xb68   : > { %v7671_v42 = vmax.f32 %v17101_v52, %v17103_v43  ;;  %v17107_v59 = vmul.f32 0.125, %v7434_v32 }
 0xb6a   : > { %7672 = vmax.xlane.f32.xlu1 %v7671_v42 }
 0xb6d   : > { %v7523_v45 = vpop.f32.mrf.mxu3 }
 0xb6e   : > { %v17109_v18 = vmul.f32 0.125, %v7523_v45 }
 0xb6f   : > { %v7437_v34 = vpop.f32.mrf.mxu0 }
 0xb70   : > { %v7674_v44 = vmax.f32 %v17107_v59, %v17109_v18  ;;  %v17117_v57 = vmul.f32 0.125, %v7437_v34 }
 0xb72   : > { %9074 = vmatmul.msk.bf16.gmra.mxu0 %vm18572_vm6, %v16892_v23  ;;  %9090 = vmatmul.msk.bf16.gmra.mxu3 %vm18573_vm7, %v16892_v23  ;;  %vm18587_vm6 = vmmov %vm18219_vm0 }
 0xb73   : > { %7675 = vmax.xlane.f32.xlu2 %v7674_v44  ;;  %vm18588_vm7 = vmmov %vm18219_vm0 }
 0xb75   : > { %v7526_v9 = vpop.f32.mrf.mxu3 }
 0xb76   : > { %v17119_v51 = vmul.f32 0.125, %v7526_v9 }
 0xb77   : > { %v7439_v29 = vpop.f32.mrf.mxu0 }
 0xb78   : > { %v7677_v54 = vmax.f32 %v17117_v57, %v17119_v51  ;;  %v17123_v61 = vmul.f32 0.125, %v7439_v29 }
 0xb7a   : > { %7678 = vmax.xlane.f32.xlu0 %v7677_v54 }
 0xb7d   : > { %v7528_v41 = vpop.f32.mrf.mxu3  ;;  %v7637_v49 = vpop.xlane.xlu2 %7636 }
 0xb7e   : > { %v17125_v35 = vmul.f32 0.125, %v7528_v41  ;;  %v7731_v47 = vsub.f32 %v17005_v60, %v7637_v49  ;;  %v7732_v31 = vsub.f32 %v17007_v13, %v7637_v49 }
 0xb7f   : > { %v7442_v2 = vpop.f32.mrf.mxu0 }
 0xb80   : > { %v7680_v23 = vmax.f32 %v17123_v61, %v17125_v35  ;;  %v7795_v22 = vmul.f32 1.442695, %v7731_v47  ;;  %v7797_v48 = vmul.f32 1.442695, %v7732_v31  ;;  %v17131_v32 = vmul.f32 0.125, %v7442_v2 }
 0xb82   : > { %7681 = vmax.xlane.f32.xlu1 %v7680_v23  ;;  %10314 = vpow2.f32 %v7795_v22 }
 0xb83   : > { %10316 = vpow2.f32 %v7797_v48 }
 0xb85   : > { %v7531_v63 = vpop.f32.mrf.mxu3 }
 0xb86   : > { %v7640_v42 = vpop.xlane.xlu0 %7639  ;;  %v17133_v45 = vmul.f32 0.125, %v7531_v63 }
 0xb87   : > { %v7733_v34 = vsub.f32 %v17011_v58, %v7640_v42  ;;  %v7734_v44 = vsub.f32 %v17013_v24, %v7640_v42  ;;  %v7444_v9 = vpop.f32.mrf.mxu0 }
 0xb88   : > { %v7683_v29 = vmax.f32 %v17131_v32, %v17133_v45  ;;  %v17139_v41 = vmul.f32 0.125, %v7444_v9  ;;  %v10315_v58 = vpop.eup %10314 }
 0xb89   : > { %v7799_v60 = vmul.f32 1.442695, %v7733_v34  ;;  %v7801_v13 = vmul.f32 1.442695, %v7734_v44  ;;  %v10317_v24 = vpop.eup %10316 }
 0xb8a   : > { %7684 = vmax.xlane.f32.xlu2 %v7683_v29 }
 0xb8b   : > { %10318 = vpow2.f32 %v7799_v60 }
 0xb8c   : > { %10320 = vpow2.f32 %v7801_v13 }
 0xb8d   : > { %v7533_v54 = vpop.f32.mrf.mxu3  ;;  %v7643_v49 = vpop.xlane.xlu1 %7642 }
 0xb8e   : > { %v17141_v2 = vmul.f32 0.125, %v7533_v54  ;;  %v7735_v22 = vsub.f32 %v17021_v39, %v7643_v49  ;;  %v7736_v42 = vsub.f32 %v17023_v16, %v7643_v49  ;;  %v7923_v49 = vadd.f32 %v10317_v24, %v10315_v58 }
 0xb8f   : > { %v7447_v23 = vpop.f32.mrf.mxu0 }
 0xb90   : > { %v7686_v47 = vmax.f32 %v17139_v41, %v17141_v2  ;;  %v7803_v44 = vmul.f32 1.442695, %v7735_v22  ;;  %v7805_v29 = vmul.f32 1.442695, %v7736_v42  ;;  %v17147_v60 = vmul.f32 0.125, %v7447_v23 }
 0xb91   : > { %v10319_v31 = vpop.eup %10318 }
 0xb92   : > { %v10321_v63 = vpop.eup %10320  ;;  %v8019_v48 = vpack.c.bf16 %v10319_v31, %v10315_v58  ;;  %7687 = vmax.xlane.f32.xlu0 %v7686_v47  ;;  %10322 = vpow2.f32 %v7803_v44 }
 0xb93   : > { %v8020_v34 = vpack.c.bf16 %v10321_v63, %v10317_v24  ;;  %10324 = vpow2.f32 %v7805_v29  ;;  %v7926_v24 = vadd.f32 %v10321_v63, %v10319_v31 }
 0xb94   : > { %8075 = vmatmul.bf16.vlgmr.msrb.gmra.mxu2 %v8019_v48 }
 0xb95   : > { %8164 = vmatmul.bf16.vlgmr.msra.gmra.mxu1 %v8020_v34  ;;  %v7536_v9 = vpop.f32.mrf.mxu3 }
 0xb96   : > { %v7646_v13 = vpop.xlane.xlu2 %7645  ;;  %v17149_v54 = vmul.f32 0.125, %v7536_v9 }
 0xb97   : > { %v7737_v4 = vsub.f32 %v17027_v28, %v7646_v13  ;;  %v7738_v39 = vsub.f32 %v17029_v38, %v7646_v13  ;;  %v7449_v12 = vpop.f32.mrf.mxu0 }
 0xb98   : > { %v7689_v16 = vmax.f32 %v17147_v60, %v17149_v54  ;;  %v17155_v48 = vmul.f32 0.125, %v7449_v12  ;;  %v10323_v38 = vpop.eup %10322 }
 0xb99   : > { %v7807_v47 = vmul.f32 1.442695, %v7737_v4  ;;  %v7809_v22 = vmul.f32 1.442695, %v7738_v39  ;;  %v10325_v9 = vpop.eup %10324 }
 0xb9a   : > { %7924 = vadd.xlane.f32.xlu0 %v7923_v49  ;;  %7690 = vmax.xlane.f32.xlu1 %v7689_v16 }
 0xb9b   : > { %10326 = vpow2.f32 %v7807_v47 }
 0xb9c   : > { %10328 = vpow2.f32 %v7809_v22 }
 0xb9d   : > { %v7538_v23 = vpop.f32.mrf.mxu3 }
 0xb9e   : > { %v7649_v42 = vpop.xlane.xlu2 %7648  ;;  %v17157_v28 = vmul.f32 0.125, %v7538_v23 }
 0xb9f   : > { %v7452_v34 = vpop.f32.mrf.mxu0  ;;  %v7739_v44 = vsub.f32 %v17037_v46, %v7649_v42  ;;  %v7740_v13 = vsub.f32 %v17039_v15, %v7649_v42  ;;  %v7929_v42 = vadd.f32 %v10325_v9, %v10323_v38 }
 0xba0   : > { %v7692_v58 = vmax.f32 %v17155_v48, %v17157_v28  ;;  %v17163_v22 = vmul.f32 0.125, %v7452_v34 }
 0xba1   : > { %v10327_v4 = vpop.eup %10326  ;;  %v7811_v16 = vmul.f32 1.442695, %v7739_v44  ;;  %v7813_v47 = vmul.f32 1.442695, %v7740_v13 }
 0xba2   : > { %v10329_v29 = vpop.eup %10328  ;;  %7927 = vadd.xlane.f32.xlu1 %v7926_v24  ;;  %7693 = vmax.xlane.f32.xlu2 %v7692_v58  ;;  %v8021_v12 = vpack.c.bf16 %v10327_v4, %v10323_v38 }
 0xba3   : > { %v8022_v39 = vpack.c.bf16 %v10329_v29, %v10325_v9  ;;  %10330 = vpow2.f32 %v7811_v16  ;;  %v7932_v9 = vadd.f32 %v10329_v29, %v10327_v4 }
 0xba4   : > { %8080 = vmatmul.bf16.gmra.mxu2 %v8021_v12  ;;  %10332 = vpow2.f32 %v7813_v47 }
 0xba5   : > { %8169 = vmatmul.bf16.gmra.mxu1 %v8022_v39  ;;  %v7541_v49 = vpop.f32.mrf.mxu3 }
 0xba6   : > { %v7652_v23 = vpop.xlane.xlu0 %7651  ;;  %v17165_v10 = vmul.f32 0.125, %v7541_v49 }
 0xba7   : > { %v7741_v31 = vsub.f32 %v17043_v3, %v7652_v23  ;;  %v7742_v46 = vsub.f32 %v17045_v40, %v7652_v23  ;;  %v7454_v63 = vpop.f32.mrf.mxu0 }
 0xba8   : > { %v7695_v15 = vmax.f32 %v17163_v22, %v17165_v10  ;;  %v17171_v44 = vmul.f32 0.125, %v7454_v63 }
 0xba9   : > { %v7815_v58 = vmul.f32 1.442695, %v7741_v31  ;;  %v7817_v24 = vmul.f32 1.442695, %v7742_v46  ;;  %v10331_v40 = vpop.eup %10330 }
 0xbaa   : > { %7930 = vadd.xlane.f32.xlu1 %v7929_v42  ;;  %7696 = vmax.xlane.f32.xlu2 %v7695_v15  ;;  %v10333_v39 = vpop.eup %10332 }
 0xbab   : > { %10334 = vpow2.f32 %v7815_v58 }
 0xbac   : > { %10336 = vpow2.f32 %v7817_v24 }
 0xbad   : > { %v7543_v34 = vpop.f32.mrf.mxu3  ;;  %v7655_v13 = vpop.xlane.xlu1 %7654 }
 0xbae   : > { %v17173_v3 = vmul.f32 0.125, %v7543_v34  ;;  %v7743_v49 = vsub.f32 %v17053_v1, %v7655_v13  ;;  %v7744_v23 = vsub.f32 %v17055_v26, %v7655_v13  ;;  %v7935_v13 = vadd.f32 %v10333_v39, %v10331_v40 }
 0xbaf   : > { %v7457_v12 = vpop.f32.mrf.mxu0 }
 0xbb0   : > { %v7698_v38 = vmax.f32 %v17171_v44, %v17173_v3  ;;  %v7819_v63 = vmul.f32 1.442695, %v7743_v49  ;;  %v7821_v42 = vmul.f32 1.442695, %v7744_v23  ;;  %v17179_v58 = vmul.f32 0.125, %v7457_v12 }
 0xbb1   : > { %v10335_v16 = vpop.eup %10334 }
 0xbb2   : > { %v10337_v47 = vpop.eup %10336  ;;  %7933 = vadd.xlane.f32.xlu2 %v7932_v9  ;;  %7699 = vmax.xlane.f32.xlu0 %v7698_v38  ;;  %v8023_v31 = vpack.c.bf16 %v10335_v16, %v10331_v40  ;;  %10338 = vpow2.f32 %v7819_v63 }
 0xbb3   : > { %v8024_v46 = vpack.c.bf16 %v10337_v47, %v10333_v39  ;;  %10340 = vpow2.f32 %v7821_v42  ;;  %v7938_v39 = vadd.f32 %v10337_v47, %v10335_v16 }
 0xbb4   : > { %8085 = vmatmul.bf16.gmra.mxu2 %v8023_v31 }
 0xbb5   : > { %8174 = vmatmul.bf16.gmra.mxu1 %v8024_v46  ;;  %v7546_v15 = vpop.f32.mrf.mxu3 }
 0xbb6   : > { %v7658_v24 = vpop.xlane.xlu2 %7657  ;;  %v17181_v34 = vmul.f32 0.125, %v7546_v15 }
 0xbb7   : > { %v7745_v4 = vsub.f32 %v17059_v50, %v7658_v24  ;;  %v7746_v1 = vsub.f32 %v17061_v55, %v7658_v24  ;;  %v7459_v29 = vpop.f32.mrf.mxu0 }
 0xbb8   : > { %v7701_v26 = vmax.f32 %v17179_v58, %v17181_v34  ;;  %v17187_v49 = vmul.f32 0.125, %v7459_v29  ;;  %v10339_v55 = vpop.eup %10338 }
 0xbb9   : > { %v7823_v38 = vmul.f32 1.442695, %v7745_v4  ;;  %v7825_v9 = vmul.f32 1.442695, %v7746_v1  ;;  %v10341_v46 = vpop.eup %10340 }
 0xbba   : > { %7936 = vadd.xlane.f32.xlu2 %v7935_v13  ;;  %7702 = vmax.xlane.f32.xlu0 %v7701_v26 }
 0xbbb   : > { %10342 = vpow2.f32 %v7823_v38 }
 0xbbc   : > { %10344 = vpow2.f32 %v7825_v9 }
 0xbbd   : > { %v7548_v12 = vpop.f32.mrf.mxu3  ;;  %v7661_v23 = vpop.xlane.xlu0 %7660 }
 0xbbe   : > { %v17189_v50 = vmul.f32 0.125, %v7548_v12  ;;  %v7747_v15 = vsub.f32 %v17069_v37, %v7661_v23  ;;  %v7748_v24 = vsub.f32 %v17071_v5, %v7661_v23  ;;  %v7941_v23 = vadd.f32 %v10341_v46, %v10339_v55 }
 0xbbf   : > { %v7462_v31 = vpop.f32.mrf.mxu0 }
 0xbc0   : > { %v7704_v40 = vmax.f32 %v17187_v49, %v17189_v50  ;;  %v7827_v29 = vmul.f32 1.442695, %v7747_v15  ;;  %v7829_v13 = vmul.f32 1.442695, %v7748_v24  ;;  %v17195_v38 = vmul.f32 0.125, %v7462_v31  ;;  %v9196_v31 = vld [vmem:[%s17505_s16 + $0x18] sm:$0xff] }
 0xbc1   : > { %v10343_v63 = vpop.eup %10342  ;;  %8413 = vmatpush.bf16.msra.mxu0 %v9196_v31 }
 0xbc2   : > { %v10345_v42 = vpop.eup %10344  ;;  %7939 = vadd.xlane.f32.xlu0 %v7938_v39  ;;  %7705 = vmax.xlane.f32.xlu1 %v7704_v40  ;;  %v8025_v4 = vpack.c.bf16 %v10343_v63, %v10339_v55  ;;  %10346 = vpow2.f32 %v7827_v29 }
 0xbc3   : > { %v8026_v1 = vpack.c.bf16 %v10345_v42, %v10341_v46  ;;  %10348 = vpow2.f32 %v7829_v13  ;;  %v7944_v29 = vadd.f32 %v10345_v42, %v10343_v63 }
 0xbc4   : > { %8090 = vmatmul.bf16.gmra.mxu2 %v8025_v4 }
 0xbc5   : > { %8179 = vmatmul.bf16.gmra.mxu1 %v8026_v1  ;;  %v7551_v26 = vpop.f32.mrf.mxu3 }
 0xbc6   : > { %v7664_v9 = vpop.xlane.xlu1 %7663  ;;  %v17197_v12 = vmul.f32 0.125, %v7551_v26 }
 0xbc7   : > { %v7749_v16 = vsub.f32 %v17075_v20, %v7664_v9  ;;  %v7750_v37 = vsub.f32 %v17077_v27, %v7664_v9  ;;  %v7464_v47 = vpop.f32.mrf.mxu0 }
 0xbc8   : > { %v7707_v5 = vmax.f32 %v17195_v38, %v17197_v12  ;;  %v17206_v15 = vmul.f32 0.125, %v7464_v47  ;;  %v10347_v55 = vpop.eup %10346 }
 0xbc9   : > { %v7831_v40 = vmul.f32 1.442695, %v7749_v16  ;;  %v7833_v39 = vmul.f32 1.442695, %v7750_v37  ;;  %v10349_v4 = vpop.eup %10348 }
 0xbca   : > { %7942 = vadd.xlane.f32.xlu0 %v7941_v23  ;;  %7708 = vmax.xlane.f32.xlu1 %v7707_v5 }
 0xbcb   : > { %10350 = vpow2.f32 %v7831_v40 }
 0xbcc   : > { %10352 = vpow2.f32 %v7833_v39 }
 0xbcd   : > { %v7553_v20 = vpop.f32.mrf.mxu3  ;;  %v7667_v27 = vpop.xlane.xlu2 %7666 }
 0xbce   : > { %v17208_v24 = vmul.f32 0.125, %v7553_v20  ;;  %v7751_v13 = vsub.f32 %v17085_v6, %v7667_v27  ;;  %v7752_v16 = vsub.f32 %v17087_v7, %v7667_v27  ;;  %v7947_v27 = vadd.f32 %v10349_v4, %v10347_v55 }
 0xbcf   : > { %v7467_v46 = vpop.f32.mrf.mxu0 }
 0xbd0   : > { %v7710_v1 = vmax.f32 %v17206_v15, %v17208_v24  ;;  %v7835_v5 = vmul.f32 1.442695, %v7751_v13  ;;  %v7837_v40 = vmul.f32 1.442695, %v7752_v16  ;;  %v17214_v39 = vmul.f32 0.125, %v7467_v46 }
 0xbd1   : > { %v10351_v26 = vpop.eup %10350 }
 0xbd2   : > { %v10353_v9 = vpop.eup %10352  ;;  %7945 = vadd.xlane.f32.xlu1 %v7944_v29  ;;  %7711 = vmax.xlane.f32.xlu2 %v7710_v1  ;;  %v8027_v37 = vpack.c.bf16 %v10351_v26, %v10347_v55  ;;  %10354 = vpow2.f32 %v7835_v5 }
 0xbd3   : > { %v8028_v47 = vpack.c.bf16 %v10353_v9, %v10349_v4  ;;  %10356 = vpow2.f32 %v7837_v40  ;;  %v7950_v4 = vadd.f32 %v10353_v9, %v10351_v26 }
 0xbd4   : > { %8095 = vmatmul.bf16.gmra.mxu2 %v8027_v37 }
 0xbd5   : > { %8184 = vmatmul.bf16.gmra.mxu1 %v8028_v47  ;;  %v7556_v23 = vpop.f32.mrf.mxu3 }
 0xbd6   : > { %v7670_v31 = vpop.xlane.xlu0 %7669  ;;  %v17216_v20 = vmul.f32 0.125, %v7556_v23 }
 0xbd7   : > { %v7753_v63 = vsub.f32 %v17091_v8, %v7670_v31  ;;  %v7754_v6 = vsub.f32 %v17093_v19, %v7670_v31  ;;  %v7469_v42 = vpop.f32.mrf.mxu0 }
 0xbd8   : > { %v7713_v7 = vmax.f32 %v17214_v39, %v17216_v20  ;;  %v17222_v13 = vmul.f32 0.125, %v7469_v42  ;;  %v10355_v19 = vpop.eup %10354 }
 0xbd9   : > { %v7839_v1 = vmul.f32 1.442695, %v7753_v63  ;;  %v7841_v29 = vmul.f32 1.442695, %v7754_v6  ;;  %v10357_v47 = vpop.eup %10356 }
 0xbda   : > { %7948 = vadd.xlane.f32.xlu1 %v7947_v27  ;;  %7714 = vmax.xlane.f32.xlu2 %v7713_v7 }
 0xbdb   : > { %10358 = vpow2.f32 %v7839_v1 }
 0xbdc   : > { %10360 = vpow2.f32 %v7841_v29 }
 0xbdd   : > { %v7558_v46 = vpop.f32.mrf.mxu3  ;;  %v7673_v16 = vpop.xlane.xlu1 %7672 }
 0xbde   : > { %v17224_v8 = vmul.f32 0.125, %v7558_v46  ;;  %v7755_v23 = vsub.f32 %v17101_v52, %v7673_v16  ;;  %v7756_v31 = vsub.f32 %v17103_v43, %v7673_v16  ;;  %v7953_v16 = vadd.f32 %v10357_v47, %v10355_v19 }
 0xbdf   : > { %v7472_v37 = vpop.f32.mrf.mxu0 }
 0xbe0   : > { %v7716_v55 = vmax.f32 %v17222_v13, %v17224_v8  ;;  %v7843_v42 = vmul.f32 1.442695, %v7755_v23  ;;  %v7845_v27 = vmul.f32 1.442695, %v7756_v31  ;;  %v17230_v1 = vmul.f32 0.125, %v7472_v37 }
 0xbe1   : > { %v10359_v5 = vpop.eup %10358 }
 0xbe2   : > { %v10361_v40 = vpop.eup %10360  ;;  %7951 = vadd.xlane.f32.xlu2 %v7950_v4  ;;  %7717 = vmax.xlane.f32.xlu0 %v7716_v55  ;;  %v8029_v63 = vpack.c.bf16 %v10359_v5, %v10355_v19  ;;  %10362 = vpow2.f32 %v7843_v42 }
 0xbe3   : > { %v8030_v6 = vpack.c.bf16 %v10361_v40, %v10357_v47  ;;  %10364 = vpow2.f32 %v7845_v27  ;;  %v7956_v47 = vadd.f32 %v10361_v40, %v10359_v5 }
 0xbe4   : > { %8100 = vmatmul.bf16.gmra.mxu2 %v8029_v63 }
 0xbe5   : > { %8189 = vmatmul.bf16.gmra.mxu1 %v8030_v6  ;;  %v7561_v7 = vpop.f32.mrf.mxu3 }
 0xbe6   : > { %v7676_v29 = vpop.xlane.xlu2 %7675  ;;  %v17232_v46 = vmul.f32 0.125, %v7561_v7 }
 0xbe7   : > { %v7757_v26 = vsub.f32 %v17107_v59, %v7676_v29  ;;  %v7758_v52 = vsub.f32 %v17109_v18, %v7676_v29  ;;  %v7474_v9 = vpop.f32.mrf.mxu0 }
 0xbe8   : > { %v7719_v43 = vmax.f32 %v17230_v1, %v17232_v46  ;;  %v17238_v31 = vmul.f32 0.125, %v7474_v9  ;;  %v10363_v18 = vpop.eup %10362 }
 0xbe9   : > { %v7847_v55 = vmul.f32 1.442695, %v7757_v26  ;;  %v7849_v4 = vmul.f32 1.442695, %v7758_v52  ;;  %v10365_v63 = vpop.eup %10364 }
 0xbea   : > { %7954 = vadd.xlane.f32.xlu2 %v7953_v16  ;;  %7720 = vmax.xlane.f32.xlu0 %v7719_v43 }
 0xbeb   : > { %10366 = vpow2.f32 %v7847_v55 }
 0xbec   : > { %10368 = vpow2.f32 %v7849_v4 }
 0xbed   : > { %v7679_v37 = vpop.xlane.xlu0 %7678  ;;  %v7563_v23 = vpop.f32.mrf.mxu3 }
 0xbee   : > { %v17240_v59 = vmul.f32 0.125, %v7563_v23  ;;  %v7759_v6 = vsub.f32 %v17117_v57, %v7679_v37  ;;  %v7760_v7 = vsub.f32 %v17119_v51, %v7679_v37  ;;  %v7959_v51 = vadd.f32 %v10365_v63, %v10363_v18 }
 0xbef   : > { %v7477_v27 = vpop.f32.mrf.mxu0 }
 0xbf0   : > { %v7722_v19 = vmax.f32 %v17238_v31, %v17240_v59  ;;  %v7851_v9 = vmul.f32 1.442695, %v7759_v6  ;;  %v7853_v43 = vmul.f32 1.442695, %v7760_v7  ;;  %v17246_v57 = vmul.f32 0.125, %v7477_v27 }
 0xbf1   : > { %v10367_v42 = vpop.eup %10366 }
 0xbf2   : > { %v10369_v29 = vpop.eup %10368  ;;  %7957 = vadd.xlane.f32.xlu0 %v7956_v47  ;;  %7723 = vmax.xlane.f32.xlu1 %v7722_v19  ;;  %v8031_v26 = vpack.c.bf16 %v10367_v42, %v10363_v18  ;;  %10370 = vpow2.f32 %v7851_v9 }
 0xbf3   : > { %v8032_v52 = vpack.c.bf16 %v10369_v29, %v10365_v63  ;;  %10372 = vpow2.f32 %v7853_v43 }
 0xbf4   : > { %8105 = vmatmul.bf16.gmra.mxu2 %v8031_v26 }
 0xbf5   : > { %8194 = vmatmul.bf16.gmra.mxu1 %v8032_v52  ;;  %v7682_v16 = vpop.xlane.xlu1 %7681  ;;  %v7566_v55 = vpop.f32.mrf.mxu3 }
 0xbf6   : > { %v7761_v4 = vsub.f32 %v17123_v61, %v7682_v16  ;;  %v7762_v5 = vsub.f32 %v17125_v35, %v7682_v16  ;;  %v17250_v40 = vmul.f32 0.125, %v7566_v55  ;;  %v9195_v61 = vld [vmem:[%s17505_s16 + $0x10] sm:$0xff] }
 0xbf7   : > { %v7479_v19 = vpop.f32.mrf.mxu0  ;;  %8414 = vmatpush.bf16.msra.mxu0 %v9195_v61 }
 0xbf8   : > { %v7855_v37 = vmul.f32 1.442695, %v7761_v4  ;;  %v7857_v23 = vmul.f32 1.442695, %v7762_v5  ;;  %v7725_v6 = vmax.f32 %v17246_v57, %v17250_v40  ;;  %v10371_v18 = vpop.eup %10370  ;;  %v17257_v63 = vmul.f32 0.125, %v7479_v19 }
 0xbf9   : > { %v10373_v52 = vpop.eup %10372  ;;  %v7962_v4 = vadd.f32 %v10369_v29, %v10367_v42  ;;  %v9193_v29 = vld [vmem:[%s17505_s16] sm:$0xff] }
 0xbfa   : > { %10374 = vpow2.f32 %v7855_v37  ;;  %7960 = vadd.xlane.f32.xlu0 %v7959_v51  ;;  %7726 = vmax.xlane.f32.xlu1 %v7725_v6 }
 0xbfb   : > { %10376 = vpow2.f32 %v7857_v23 }
 0xbfd   : > { %v7685_v35 = vpop.xlane.xlu2 %7684  ;;  %v7568_v47 = vpop.f32.mrf.mxu3 }
 0xbfe   : > { %v7763_v7 = vsub.f32 %v17131_v32, %v7685_v35  ;;  %v7764_v27 = vsub.f32 %v17133_v45, %v7685_v35  ;;  %v17261_v26 = vmul.f32 0.125, %v7568_v47  ;;  %v9194_v32 = vld [vmem:[%s17505_s16 + $0x8] sm:$0xff]  ;;  %v7965_v47 = vadd.f32 %v10373_v52, %v10371_v18 }
 0xbff   : > { %8415 = vmatpush.bf16.msra.mxu0 %v9194_v32 }
 0xc00   : > { %v10375_v9 = vpop.eup %10374  ;;  %v7859_v43 = vmul.f32 1.442695, %v7763_v7  ;;  %v7861_v16 = vmul.f32 1.442695, %v7764_v27  ;;  %v7728_v55 = vmax.f32 %v17257_v63, %v17261_v26 }
 0xc01   : > { %v10377_v5 = vpop.eup %10376  ;;  %v8033_v51 = vpack.c.bf16 %v10375_v9, %v10371_v18 }
 0xc02   : > { %10378 = vpow2.f32 %v7859_v43  ;;  %7963 = vadd.xlane.f32.xlu1 %v7962_v4  ;;  %7729 = vmax.xlane.f32.xlu2 %v7728_v55  ;;  %v8034_v37 = vpack.c.bf16 %v10377_v5, %v10373_v52  ;;  %v7968_v23 = vadd.f32 %v10377_v5, %v10375_v9 }
 0xc03   : > { %10380 = vpow2.f32 %v7861_v16  ;;  %8416 = vmatpush.bf16.msra.mxu0 %v9193_v29 }
 0xc04   : > { %8110 = vmatmul.bf16.gmra.mxu2 %v8033_v51  ;;  %7969 = vadd.xlane.f32.xlu0 %v7968_v23 }
 0xc05   : > { %8199 = vmatmul.bf16.gmra.mxu1 %v8034_v37  ;;  %v7688_v45 = vpop.xlane.xlu0 %7687 }
 0xc06   : > { %v7765_v6 = vsub.f32 %v17139_v41, %v7688_v45  ;;  %v7766_v42 = vsub.f32 %v17141_v2, %v7688_v45 }
 0xc08   : > { %v10379_v19 = vpop.eup %10378  ;;  %v7863_v61 = vmul.f32 1.442695, %v7765_v6  ;;  %v7865_v35 = vmul.f32 1.442695, %v7766_v42 }
 0xc09   : > { %v10381_v7 = vpop.eup %10380 }
 0xc0a   : > { %10382 = vpow2.f32 %v7863_v61  ;;  %7966 = vadd.xlane.f32.xlu2 %v7965_v47  ;;  %v7971_v27 = vadd.f32 %v10381_v7, %v10379_v19 }
 0xc0b   : > { %10384 = vpow2.f32 %v7865_v35 }
 0xc0c   : > { %7972 = vadd.xlane.f32.xlu1 %v7971_v27 }
 0xc0d   : > { %v7691_v9 = vpop.xlane.xlu1 %7690  ;;  %v7925_v37 = vpop.xlane.xlu0 %7924 }
 0xc0e   : > { %v7767_v41 = vsub.f32 %v17147_v60, %v7691_v9  ;;  %v7768_v2 = vsub.f32 %v17149_v54, %v7691_v9 }
 0xc10   : > { %v10383_v43 = vpop.eup %10382  ;;  %v7867_v16 = vmul.f32 1.442695, %v7767_v41  ;;  %v7869_v55 = vmul.f32 1.442695, %v7768_v2 }
 0xc11   : > { %v10385_v4 = vpop.eup %10384  ;;  %v8035_v5 = vpack.c.bf16 %v10383_v43, %v10379_v19 }
 0xc12   : > { %10386 = vpow2.f32 %v7867_v16  ;;  %v8165_v51 = vpop.f32.mrf.mxu1  ;;  %v8036_v18 = vpack.c.bf16 %v10385_v4, %v10381_v7  ;;  %v7974_v52 = vadd.f32 %v10385_v4, %v10383_v43 }
 0xc13   : > { %10388 = vpow2.f32 %v7869_v55 }
 0xc14   : > { %8115 = vmatmul.bf16.gmra.mxu2 %v8035_v5  ;;  %7975 = vadd.xlane.f32.xlu2 %v7974_v52  ;;  %10390 = vrcp.f32 %v7925_v37 }
 0xc15   : > { %8204 = vmatmul.bf16.gmra.mxu1 %v8036_v18  ;;  %v7694_v23 = vpop.xlane.xlu2 %7693  ;;  %v7928_v32 = vpop.xlane.xlu1 %7927 }
 0xc16   : > { %v7769_v60 = vsub.f32 %v17155_v48, %v7694_v23  ;;  %v7770_v54 = vsub.f32 %v17157_v28, %v7694_v23  ;;  %10392 = vrcp.f32 %v7928_v32 }
 0xc17   : > { %v8076_v45 = vpop.f32.mrf.mxu2 }
 0xc18   : > { %v10387_v6 = vpop.eup %10386  ;;  %v7871_v42 = vmul.f32 1.442695, %v7769_v60  ;;  %v7873_v29 = vmul.f32 1.442695, %v7770_v54  ;;  %v8166_v47 = vadd.f32 %v8165_v51, %v8076_v45 }
 0xc19   : > { %v10389_v19 = vpop.eup %10388 }
 0xc1a   : > { %10394 = vpow2.f32 %v7871_v42  ;;  %v8167_v61 = vpop.f32.mrf.mxu1  ;;  %v7977_v35 = vadd.f32 %v10389_v19, %v10387_v6  ;;  %v10391_v27 = vpop.eup %10390 }
 0xc1b   : > { %10396 = vpow2.f32 %v7873_v29  ;;  %v8277_v5 = vmul.f32 %v10391_v27, %v8166_v47 }
 0xc1c   : > { %7978 = vadd.xlane.f32.xlu0 %v7977_v35  ;;  %v10393_v28 = vpop.eup %10392 }
 0xc1d   : > { %v7697_v7 = vpop.xlane.xlu2 %7696 }
 0xc1e   : > { %v7771_v9 = vsub.f32 %v17163_v22, %v7697_v7  ;;  %v7772_v48 = vsub.f32 %v17165_v10, %v7697_v7  ;;  %v7931_v22 = vpop.xlane.xlu1 %7930 }
 0xc1f   : > { %v8078_v41 = vpop.f32.mrf.mxu2 }
 0xc20   : > { %v10395_v2 = vpop.eup %10394  ;;  %v7875_v43 = vmul.f32 1.442695, %v7771_v9  ;;  %v7877_v16 = vmul.f32 1.442695, %v7772_v48  ;;  %v8168_v55 = vadd.f32 %v8167_v61, %v8078_v41 }
 0xc21   : > { %v10397_v4 = vpop.eup %10396  ;;  %v8037_v18 = vpack.c.bf16 %v10395_v2, %v10387_v6 }
 0xc22   : > { %10398 = vpow2.f32 %v7875_v43  ;;  %v8278_v52 = vmul.f32 %v10393_v28, %v8168_v55  ;;  %v8170_v37 = vpop.f32.mrf.mxu1  ;;  %v8038_v23 = vpack.c.bf16 %v10397_v4, %v10389_v19  ;;  %v7980_v51 = vadd.f32 %v10397_v4, %v10395_v2 }
 0xc23   : > { %10400 = vpow2.f32 %v7877_v16 }
 0xc24   : > { %v8309_v32 = vpack.c.bf16 %v8278_v52, %v8277_v5  ;;  %8120 = vmatmul.bf16.gmra.mxu2 %v8037_v18  ;;  %7981 = vadd.xlane.f32.xlu1 %v7980_v51  ;;  %10402 = vrcp.f32 %v7931_v22 }
 0xc25   : > { %8209 = vmatmul.bf16.gmra.mxu1 %v8038_v23  ;;  %v7700_v10 = vpop.xlane.xlu0 %7699  ;;  %v7934_v60 = vpop.xlane.xlu2 %7933 }
 0xc26   : > { %9107 = vmatmul.msk.bf16.vlgmr.msra.gmra.mxu0 %vm18574_vm10, %v8309_v32  ;;  %v7773_v54 = vsub.f32 %v17171_v44, %v7700_v10  ;;  %v7774_v45 = vsub.f32 %v17173_v3, %v7700_v10  ;;  %10404 = vrcp.f32 %v7934_v60  ;;  %vm18589_vm10 = vmmov %vm18219_vm0 }
 0xc27   : > { %v8081_v6 = vpop.f32.mrf.mxu2 }
 0xc28   : > { %v10399_v42 = vpop.eup %10398  ;;  %v7879_v29 = vmul.f32 1.442695, %v7773_v54  ;;  %v7881_v19 = vmul.f32 1.442695, %v7774_v45  ;;  %v8171_v7 = vadd.f32 %v8170_v37, %v8081_v6 }
 0xc29   : > { %v10401_v61 = vpop.eup %10400 }
 0xc2a   : > { %10406 = vpow2.f32 %v7879_v29  ;;  %v8172_v35 = vpop.f32.mrf.mxu1  ;;  %v7983_v47 = vadd.f32 %v10401_v61, %v10399_v42  ;;  %v10403_v9 = vpop.eup %10402 }
 0xc2b   : > { %10408 = vpow2.f32 %v7881_v19  ;;  %v8279_v4 = vmul.f32 %v10403_v9, %v8171_v7 }
 0xc2c   : > { %7984 = vadd.xlane.f32.xlu2 %v7983_v47  ;;  %v10405_v3 = vpop.eup %10404 }
 0xc2d   : > { %v7703_v27 = vpop.xlane.xlu0 %7702 }
 0xc2e   : > { %v7775_v48 = vsub.f32 %v17179_v58, %v7703_v27  ;;  %v7776_v44 = vsub.f32 %v17181_v34, %v7703_v27  ;;  %v7937_v58 = vpop.xlane.xlu2 %7936 }
 0xc2f   : > { %v8083_v28 = vpop.f32.mrf.mxu2 }
 0xc30   : > { %v10407_v41 = vpop.eup %10406  ;;  %v7883_v2 = vmul.f32 1.442695, %v7775_v48  ;;  %v7885_v43 = vmul.f32 1.442695, %v7776_v44  ;;  %v8173_v16 = vadd.f32 %v8172_v35, %v8083_v28 }
 0xc31   : > { %v10409_v55 = vpop.eup %10408  ;;  %v8039_v5 = vpack.c.bf16 %v10407_v41, %v10399_v42 }
 0xc32   : > { %10410 = vpow2.f32 %v7883_v2  ;;  %v8280_v18 = vmul.f32 %v10405_v3, %v8173_v16  ;;  %v8175_v52 = vpop.f32.mrf.mxu1  ;;  %v8040_v23 = vpack.c.bf16 %v10409_v55, %v10401_v61  ;;  %v7986_v37 = vadd.f32 %v10409_v55, %v10407_v41 }
 0xc33   : > { %10412 = vpow2.f32 %v7885_v43 }
 0xc34   : > { %v8310_v51 = vpack.c.bf16 %v8280_v18, %v8279_v4  ;;  %8125 = vmatmul.bf16.gmra.mxu2 %v8039_v5  ;;  %7987 = vadd.xlane.f32.xlu0 %v7986_v37  ;;  %10414 = vrcp.f32 %v7937_v58 }
 0xc35   : > { %8214 = vmatmul.bf16.gmra.mxu1 %v8040_v23  ;;  %v7706_v34 = vpop.xlane.xlu1 %7705  ;;  %v7940_v32 = vpop.xlane.xlu0 %7939 }
 0xc36   : > { %9108 = vmatmul.msk.bf16.gmra.mxu0 %vm18219_vm0, %v8310_v51  ;;  %v7777_v22 = vsub.f32 %v17187_v49, %v7706_v34  ;;  %v7778_v10 = vsub.f32 %v17189_v50, %v7706_v34  ;;  %10416 = vrcp.f32 %v7940_v32 }
 0xc37   : > { %v8086_v60 = vpop.f32.mrf.mxu2 }
 0xc38   : > { %v10411_v54 = vpop.eup %10410  ;;  %v7887_v45 = vmul.f32 1.442695, %v7777_v22  ;;  %v7889_v6 = vmul.f32 1.442695, %v7778_v10  ;;  %v8176_v61 = vadd.f32 %v8175_v52, %v8086_v60 }
 0xc39   : > { %v10413_v42 = vpop.eup %10412 }
 0xc3a   : > { %10418 = vpow2.f32 %v7887_v45  ;;  %v8177_v29 = vpop.f32.mrf.mxu1  ;;  %v7989_v19 = vadd.f32 %v10413_v42, %v10411_v54  ;;  %v10415_v47 = vpop.eup %10414 }
 0xc3b   : > { %10420 = vpow2.f32 %v7889_v6  ;;  %v8281_v41 = vmul.f32 %v10415_v47, %v8176_v61 }
 0xc3c   : > { %7990 = vadd.xlane.f32.xlu1 %v7989_v19  ;;  %v10417_v50 = vpop.eup %10416 }
 0xc3d   : > { %v7709_v35 = vpop.xlane.xlu1 %7708 }
 0xc3e   : > { %v7779_v7 = vsub.f32 %v17195_v38, %v7709_v35  ;;  %v7780_v49 = vsub.f32 %v17197_v12, %v7709_v35  ;;  %v7943_v38 = vpop.xlane.xlu0 %7942 }
 0xc3f   : > { %v8088_v27 = vpop.f32.mrf.mxu2 }
 0xc40   : > { %v10419_v9 = vpop.eup %10418  ;;  %v7891_v48 = vmul.f32 1.442695, %v7779_v7  ;;  %v7893_v44 = vmul.f32 1.442695, %v7780_v49  ;;  %v8178_v3 = vadd.f32 %v8177_v29, %v8088_v27 }
 0xc41   : > { %v10421_v28 = vpop.eup %10420  ;;  %v8041_v2 = vpack.c.bf16 %v10419_v9, %v10411_v54 }
 0xc42   : > { %10422 = vpow2.f32 %v7891_v48  ;;  %v8282_v43 = vmul.f32 %v10417_v50, %v8178_v3  ;;  %v8180_v16 = vpop.f32.mrf.mxu1  ;;  %v8042_v55 = vpack.c.bf16 %v10421_v28, %v10413_v42  ;;  %v7992_v4 = vadd.f32 %v10421_v28, %v10419_v9 }
 0xc43   : > { %10424 = vpow2.f32 %v7893_v44 }
 0xc44   : > { %v8311_v5 = vpack.c.bf16 %v8282_v43, %v8281_v41  ;;  %8130 = vmatmul.bf16.gmra.mxu2 %v8041_v2  ;;  %7993 = vadd.xlane.f32.xlu2 %v7992_v4  ;;  %10426 = vrcp.f32 %v7943_v38 }
 0xc45   : > { %8219 = vmatmul.bf16.gmra.mxu1 %v8042_v55  ;;  %v7712_v12 = vpop.xlane.xlu2 %7711  ;;  %v7946_v18 = vpop.xlane.xlu1 %7945 }
 0xc46   : > { %9109 = vmatmul.msk.bf16.gmra.mxu0 %vm18575_vm11, %v8311_v5  ;;  %v7781_v52 = vsub.f32 %v17206_v15, %v7712_v12  ;;  %v7782_v23 = vsub.f32 %v17208_v24, %v7712_v12  ;;  %10428 = vrcp.f32 %v7946_v18  ;;  %vm18590_vm11 = vmmov %vm18219_vm0 }
 0xc47   : > { %v8091_v37 = vpop.f32.mrf.mxu2 }
 0xc48   : > { %v10423_v51 = vpop.eup %10422  ;;  %v7895_v58 = vmul.f32 1.442695, %v7781_v52  ;;  %v7897_v34 = vmul.f32 1.442695, %v7782_v23  ;;  %v8181_v60 = vadd.f32 %v8180_v16, %v8091_v37 }
 0xc49   : > { %v10425_v32 = vpop.eup %10424 }
 0xc4a   : > { %10430 = vpow2.f32 %v7895_v58  ;;  %v8182_v22 = vpop.f32.mrf.mxu1  ;;  %v7995_v10 = vadd.f32 %v10425_v32, %v10423_v51  ;;  %v10427_v45 = vpop.eup %10426 }
 0xc4b   : > { %10432 = vpow2.f32 %v7897_v34  ;;  %v8283_v7 = vmul.f32 %v10427_v45, %v8181_v60 }
 0xc4c   : > { %7996 = vadd.xlane.f32.xlu0 %v7995_v10  ;;  %v10429_v24 = vpop.eup %10428 }
 0xc4d   : > { %v7715_v54 = vpop.xlane.xlu2 %7714 }
 0xc4e   : > { %v7783_v6 = vsub.f32 %v17214_v39, %v7715_v54  ;;  %v7784_v15 = vsub.f32 %v17216_v20, %v7715_v54  ;;  %v7949_v39 = vpop.xlane.xlu1 %7948 }
 0xc4f   : > { %v8093_v42 = vpop.f32.mrf.mxu2 }
 0xc50   : > { %v10431_v29 = vpop.eup %10430  ;;  %v7899_v19 = vmul.f32 1.442695, %v7783_v6  ;;  %v7901_v61 = vmul.f32 1.442695, %v7784_v15  ;;  %v8183_v35 = vadd.f32 %v8182_v22, %v8093_v42 }
 0xc51   : > { %v10433_v47 = vpop.eup %10432  ;;  %v8043_v49 = vpack.c.bf16 %v10431_v29, %v10423_v51 }
 0xc52   : > { %10434 = vpow2.f32 %v7899_v19  ;;  %v8284_v50 = vmul.f32 %v10429_v24, %v8183_v35  ;;  %v8185_v27 = vpop.f32.mrf.mxu1  ;;  %v8044_v9 = vpack.c.bf16 %v10433_v47, %v10425_v32  ;;  %v7998_v48 = vadd.f32 %v10433_v47, %v10431_v29 }
 0xc53   : > { %10436 = vpow2.f32 %v7901_v61 }
 0xc54   : > { %v8312_v44 = vpack.c.bf16 %v8284_v50, %v8283_v7  ;;  %8135 = vmatmul.bf16.gmra.mxu2 %v8043_v49  ;;  %7999 = vadd.xlane.f32.xlu1 %v7998_v48  ;;  %10438 = vrcp.f32 %v7949_v39 }
 0xc55   : > { %8224 = vmatmul.bf16.gmra.mxu1 %v8044_v9  ;;  %v7718_v20 = vpop.xlane.xlu0 %7717  ;;  %v7952_v3 = vpop.xlane.xlu2 %7951 }
 0xc56   : > { %9110 = vmatmul.msk.bf16.gmra.mxu0 %vm18576_vm2, %v8312_v44  ;;  %v7785_v28 = vsub.f32 %v17222_v13, %v7718_v20  ;;  %v7786_v41 = vsub.f32 %v17224_v8, %v7718_v20  ;;  %10440 = vrcp.f32 %v7952_v3  ;;  %vm18591_vm2 = vmmov %vm18219_vm0 }
 0xc57   : > { %v8096_v2 = vpop.f32.mrf.mxu2 }
 0xc58   : > { %v10435_v43 = vpop.eup %10434  ;;  %v7903_v16 = vmul.f32 1.442695, %v7785_v28  ;;  %v7905_v55 = vmul.f32 1.442695, %v7786_v41  ;;  %v8186_v12 = vadd.f32 %v8185_v27, %v8096_v2 }
 0xc59   : > { %v10437_v4 = vpop.eup %10436 }
 0xc5a   : > { %10442 = vpow2.f32 %v7903_v16  ;;  %v8187_v5 = vpop.f32.mrf.mxu1  ;;  %v8001_v38 = vadd.f32 %v10437_v4, %v10435_v43  ;;  %v10439_v52 = vpop.eup %10438 }
 0xc5b   : > { %10444 = vpow2.f32 %v7905_v55  ;;  %v8285_v10 = vmul.f32 %v10439_v52, %v8186_v12 }
 0xc5c   : > { %8002 = vadd.xlane.f32.xlu2 %v8001_v38  ;;  %v10441_v8 = vpop.eup %10440 }
 0xc5d   : > { %v7721_v18 = vpop.xlane.xlu0 %7720 }
 0xc5e   : > { %v7787_v23 = vsub.f32 %v17230_v1, %v7721_v18  ;;  %v7788_v13 = vsub.f32 %v17232_v46, %v7721_v18  ;;  %v7955_v1 = vpop.xlane.xlu2 %7954 }
 0xc5f   : > { %v8098_v37 = vpop.f32.mrf.mxu2 }
 0xc60   : > { %v10443_v51 = vpop.eup %10442  ;;  %v7907_v58 = vmul.f32 1.442695, %v7787_v23  ;;  %v7909_v34 = vmul.f32 1.442695, %v7788_v13  ;;  %v8188_v32 = vadd.f32 %v8187_v5, %v8098_v37 }
 0xc61   : > { %v10445_v22 = vpop.eup %10444  ;;  %v8045_v60 = vpack.c.bf16 %v10443_v51, %v10435_v43 }
 0xc62   : > { %10446 = vpow2.f32 %v7907_v58  ;;  %v8286_v54 = vmul.f32 %v10441_v8, %v8188_v32  ;;  %v8190_v45 = vpop.f32.mrf.mxu1  ;;  %v8046_v6 = vpack.c.bf16 %v10445_v22, %v10437_v4  ;;  %v8004_v15 = vadd.f32 %v10445_v22, %v10443_v51 }
 0xc63   : > { %10448 = vpow2.f32 %v7909_v34 }
 0xc64   : > { %v8313_v24 = vpack.c.bf16 %v8286_v54, %v8285_v10  ;;  %8140 = vmatmul.bf16.gmra.mxu2 %v8045_v60  ;;  %8005 = vadd.xlane.f32.xlu0 %v8004_v15  ;;  %10450 = vrcp.f32 %v7955_v1 }
 0xc65   : > { %8229 = vmatmul.bf16.gmra.mxu1 %v8046_v6  ;;  %v7724_v46 = vpop.xlane.xlu1 %7723  ;;  %v7958_v42 = vpop.xlane.xlu0 %7957 }
 0xc66   : > { %9111 = vmatmul.msk.bf16.gmra.mxu0 %vm18577_vm9, %v8313_v24  ;;  %v7789_v29 = vsub.f32 %v17238_v31, %v7724_v46  ;;  %v7790_v19 = vsub.f32 %v17240_v59, %v7724_v46  ;;  %10452 = vrcp.f32 %v7958_v42  ;;  %vm18592_vm9 = vmmov %vm18219_vm0 }
 0xc67   : > { %v8101_v61 = vpop.f32.mrf.mxu2 }
 0xc68   : > { %v10447_v35 = vpop.eup %10446  ;;  %v7911_v47 = vmul.f32 1.442695, %v7789_v29  ;;  %v7913_v7 = vmul.f32 1.442695, %v7790_v19  ;;  %v8191_v9 = vadd.f32 %v8190_v45, %v8101_v61 }
 0xc69   : > { %v10449_v49 = vpop.eup %10448 }
 0xc6a   : > { %10454 = vpow2.f32 %v7911_v47  ;;  %v8192_v50 = vpop.f32.mrf.mxu1  ;;  %v8007_v27 = vadd.f32 %v10449_v49, %v10447_v35  ;;  %v10451_v44 = vpop.eup %10450 }
 0xc6b   : > { %10456 = vpow2.f32 %v7913_v7  ;;  %v8287_v16 = vmul.f32 %v10451_v44, %v8191_v9 }
 0xc6c   : > { %8008 = vadd.xlane.f32.xlu1 %v8007_v27  ;;  %v10453_v59 = vpop.eup %10452 }
 0xc6d   : > { %v7727_v48 = vpop.xlane.xlu1 %7726 }
 0xc6e   : > { %v7791_v39 = vsub.f32 %v17246_v57, %v7727_v48  ;;  %v7792_v31 = vsub.f32 %v17250_v40, %v7727_v48  ;;  %v7961_v57 = vpop.xlane.xlu0 %7960 }
 0xc6f   : > { %v8103_v20 = vpop.f32.mrf.mxu2 }
 0xc70   : > { %v10455_v3 = vpop.eup %10454  ;;  %v7915_v28 = vmul.f32 1.442695, %v7791_v39  ;;  %v7917_v41 = vmul.f32 1.442695, %v7792_v31  ;;  %v8193_v2 = vadd.f32 %v8192_v50, %v8103_v20 }
 0xc71   : > { %v10457_v43 = vpop.eup %10456  ;;  %v8047_v55 = vpack.c.bf16 %v10455_v3, %v10447_v35 }
 0xc72   : > { %10458 = vpow2.f32 %v7915_v28  ;;  %v8288_v4 = vmul.f32 %v10453_v59, %v8193_v2  ;;  %v8195_v5 = vpop.f32.mrf.mxu1  ;;  %v8048_v38 = vpack.c.bf16 %v10457_v43, %v10449_v49  ;;  %v8010_v12 = vadd.f32 %v10457_v43, %v10455_v3 }
 0xc73   : > { %10460 = vpow2.f32 %v7917_v41 }
 0xc74   : > { %v8314_v18 = vpack.c.bf16 %v8288_v4, %v8287_v16  ;;  %8145 = vmatmul.bf16.gmra.mxu2 %v8047_v55  ;;  %8011 = vadd.xlane.f32.xlu2 %v8010_v12  ;;  %10462 = vrcp.f32 %v7961_v57  ;;  %v17313_v4 = vld [vmem:[%s17506_s17] ss:$0 sm:$0xff] }
 0xc75   : > { %8234 = vmatmul.bf16.gmra.mxu1 %v8048_v38  ;;  %v7730_v40 = vpop.xlane.xlu2 %7729  ;;  %v7964_v52 = vpop.xlane.xlu1 %7963 }
 0xc76   : > { %9112 = vmatmul.msk.bf16.gmra.mxu0 %vm18578_vm12, %v8314_v18  ;;  %v7793_v23 = vsub.f32 %v17257_v63, %v7730_v40  ;;  %v7794_v13 = vsub.f32 %v17261_v26, %v7730_v40  ;;  %10464 = vrcp.f32 %v7964_v52  ;;  %vm18593_vm12 = vmmov %vm18219_vm0 }
 0xc77   : > { %v8106_v8 = vpop.f32.mrf.mxu2  ;;  %v7970_v61 = vpop.xlane.xlu0 %7969 }
 0xc78   : > { %v10459_v37 = vpop.eup %10458  ;;  %v7919_v51 = vmul.f32 1.442695, %v7793_v23  ;;  %v7921_v58 = vmul.f32 1.442695, %v7794_v13  ;;  %v8196_v60 = vadd.f32 %v8195_v5, %v8106_v8 }
 0xc79   : > { %v10461_v34 = vpop.eup %10460 }
 0xc7a   : > { %10466 = vpow2.f32 %v7919_v51  ;;  %v8197_v32 = vpop.f32.mrf.mxu1  ;;  %v8013_v22 = vadd.f32 %v10461_v34, %v10459_v37  ;;  %v10463_v10 = vpop.eup %10462 }
 0xc7b   : > { %10468 = vpow2.f32 %v7921_v58  ;;  %v8289_v24 = vmul.f32 %v10463_v10, %v8196_v60 }
 0xc7c   : > { %8014 = vadd.xlane.f32.xlu0 %v8013_v22  ;;  %v10465_v54 = vpop.eup %10464  ;;  %10470 = vrcp.f32 %v7970_v61 }
 0xc7d   : > { %v7967_v47 = vpop.xlane.xlu2 %7966 }
 0xc7e   : > { %10472 = vrcp.f32 %v7967_v47 }
 0xc7f   : > { %v8108_v45 = vpop.f32.mrf.mxu2  ;;  %v7973_v20 = vpop.xlane.xlu1 %7972 }
 0xc80   : > { %v10467_v6 = vpop.eup %10466  ;;  %v8198_v63 = vadd.f32 %v8197_v32, %v8108_v45  ;;  %10474 = vrcp.f32 %v7973_v20 }
 0xc81   : > { %v10469_v15 = vpop.eup %10468  ;;  %v8049_v26 = vpack.c.bf16 %v10467_v6, %v10459_v37 }
 0xc82   : > { %v8290_v1 = vmul.f32 %v10465_v54, %v8198_v63  ;;  %v8200_v46 = vpop.f32.mrf.mxu1  ;;  %v8050_v42 = vpack.c.bf16 %v10469_v15, %v10461_v34  ;;  %v8016_v29 = vadd.f32 %v10469_v15, %v10467_v6  ;;  %v10471_v27 = vpop.eup %10470 }
 0xc84   : > { %v8315_v19 = vpack.c.bf16 %v8290_v1, %v8289_v24  ;;  %8150 = vmatmul.bf16.gmra.mxu2 %v8049_v26  ;;  %8017 = vadd.xlane.f32.xlu1 %v8016_v29  ;;  %v10473_v48 = vpop.eup %10472 }
 0xc85   : > { %8239 = vmatmul.bf16.gmra.mxu1 %v8050_v42 }
 0xc86   : > { %9113 = vmatmul.msk.bf16.gmra.mxu0 %vm18579_vm13, %v8315_v19  ;;  %v10475_v16 = vpop.eup %10474  ;;  %vm18594_vm13 = vmmov %vm18219_vm0 }
 0xc87   : > { %v8111_v35 = vpop.f32.mrf.mxu2  ;;  %v7976_v28 = vpop.xlane.xlu2 %7975 }
 0xc88   : > { %v8201_v49 = vadd.f32 %v8200_v46, %v8111_v35  ;;  %10476 = vrcp.f32 %v7976_v28 }
 0xc8a   : > { %v8202_v7 = vpop.f32.mrf.mxu1  ;;  %v8291_v44 = vmul.f32 %v10473_v48, %v8201_v49 }
 0xc8e   : > { %v10477_v5 = vpop.eup %10476 }
 0xc8f   : > { %v8113_v50 = vpop.f32.mrf.mxu2  ;;  %v7979_v13 = vpop.xlane.xlu0 %7978 }
 0xc90   : > { %v8203_v9 = vadd.f32 %v8202_v7, %v8113_v50  ;;  %10478 = vrcp.f32 %v7979_v13 }
 0xc92   : > { %v8292_v39 = vmul.f32 %v10471_v27, %v8203_v9  ;;  %v8205_v31 = vpop.f32.mrf.mxu1 }
 0xc94   : > { %v8316_v59 = vpack.c.bf16 %v8292_v39, %v8291_v44 }
 0xc96   : > { %9114 = vmatmul.msk.bf16.gmra.mxu0 %vm18580_vm14, %v8316_v59  ;;  %v10479_v10 = vpop.eup %10478  ;;  %vm18595_vm14 = vmmov %vm18219_vm0 }
 0xc97   : > { %v8116_v3 = vpop.f32.mrf.mxu2  ;;  %v7982_v37 = vpop.xlane.xlu1 %7981 }
 0xc98   : > { %v8206_v2 = vadd.f32 %v8205_v31, %v8116_v3  ;;  %10480 = vrcp.f32 %v7982_v37 }
 0xc9a   : > { %v8207_v41 = vpop.f32.mrf.mxu1  ;;  %v8293_v38 = vmul.f32 %v10475_v16, %v8206_v2 }
 0xc9e   : > { %v10481_v54 = vpop.eup %10480 }
 0xc9f   : > { %v8118_v43 = vpop.f32.mrf.mxu2 }
 0xca0   : > { %v8208_v55 = vadd.f32 %v8207_v41, %v8118_v43 }
 0xca2   : > { %v8294_v12 = vmul.f32 %v10477_v5, %v8208_v55  ;;  %v8210_v18 = vpop.f32.mrf.mxu1 }
 0xca3   : > { %v8418_v57 = vpop.f32.mrf.mxu0 }
 0xca4   : > { %v8317_v40 = vpack.c.bf16 %v8294_v12, %v8293_v38  ;;  %v8419_v52 = vadd.f32 %v17313_v4, %v8418_v57 }
 0xca6   : > { %v8498_v23 = vadd.f32 %v8419_v52, %v18491_v25  ;;  %9115 = vmatmul.msk.bf16.gmra.mxu0 %vm18581_vm4, %v8317_v40  ;;  %vm18596_vm4 = vmmov %vm18219_vm0 }
 0xca7   : > { %v8121_v8 = vpop.f32.mrf.mxu2  ;;  %v7988_v42 = vpop.xlane.xlu0 %7987 }
 0xca8   : > { %8530 = vst.msk [vmem:[%s17320_s29] sm:$0xff] %vm18582_vm8, %v8498_v23  ;;  %v8211_v32 = vadd.f32 %v8210_v18, %v8121_v8  ;;  %vm18597_vm8 = vmmov %vm18219_vm0 }
 0xcaa   : > { %v8212_v51 = vpop.f32.mrf.mxu1  ;;  %v8295_v45 = vmul.f32 %v10479_v10, %v8211_v32 }
 0xcab   : > { %v8420_v58 = vpop.f32.mrf.mxu0 }
 0xcac   : > { %v8421_v34 = vadd.f32 %v17313_v4, %v8420_v58 }
 0xcae   : > { %v8499_v25 = vadd.f32 %v8421_v34, %v18492_v11  ;;  %v7985_v11 = vpop.xlane.xlu2 %7984 }
 0xcaf   : > { %v8123_v22 = vpop.f32.mrf.mxu2  ;;  %10482 = vrcp.f32 %v7985_v11 }
 0xcb0   : > { %8531 = vst.msk [vmem:[%s17320_s29 + $0x8] sm:$0xff] %vm18583_vm5, %v8499_v25  ;;  %v8213_v60 = vadd.f32 %v8212_v51, %v8123_v22  ;;  %10484 = vrcp.f32 %v7988_v42  ;;  %vm18599_vm5 = vmmov %vm18219_vm0 }
 0xcb2   : > { %v8296_v6 = vmul.f32 %v10481_v54, %v8213_v60  ;;  %v8215_v63 = vpop.f32.mrf.mxu1 }
 0xcb3   : > { %v8423_v15 = vpop.f32.mrf.mxu0 }
 0xcb4   : > { %v8318_v26 = vpack.c.bf16 %v8296_v6, %v8295_v45  ;;  %v8424_v24 = vadd.f32 %v17313_v4, %v8423_v15 }
 0xcb5   : > { %v10483_v49 = vpop.eup %10482 }
 0xcb6   : > { %v8500_v1 = vadd.f32 %v8424_v24, %v18493_v33  ;;  %9116 = vmatmul.msk.bf16.gmra.mxu0 %vm18584_vm15, %v8318_v26  ;;  %v10485_v50 = vpop.eup %10484  ;;  %vm18600_vm15 = vmmov %vm18219_vm0 }
 0xcb7   : > { %v8126_v46 = vpop.f32.mrf.mxu2  ;;  %v7994_v3 = vpop.xlane.xlu2 %7993 }
 0xcb8   : > { %8532 = vst.msk [vmem:[%s17320_s29 + $0x10] sm:$0xff] %vm18585_vm1, %v8500_v1  ;;  %v8216_v35 = vadd.f32 %v8215_v63, %v8126_v46  ;;  %vm18602_vm1 = vmmov %vm18219_vm0 }
 0xcba   : > { %v8217_v29 = vpop.f32.mrf.mxu1  ;;  %v8297_v27 = vmul.f32 %v10483_v49, %v8216_v35 }
 0xcbb   : > { %v8425_v19 = vpop.f32.mrf.mxu0 }
 0xcbc   : > { %v8426_v61 = vadd.f32 %v17313_v4, %v8425_v19 }
 0xcbe   : > { %v8501_v47 = vadd.f32 %v8426_v61, %v18494_v53  ;;  %v7991_v53 = vpop.xlane.xlu1 %7990 }
 0xcbf   : > { %v8128_v7 = vpop.f32.mrf.mxu2  ;;  %10486 = vrcp.f32 %v7991_v53 }
 0xcc0   : > { %8533 = vst.msk [vmem:[%s17320_s29 + $0x18] sm:$0xff] %vm18586_vm3, %v8501_v47  ;;  %v8218_v33 = vadd.f32 %v8217_v29, %v8128_v7  ;;  %10488 = vrcp.f32 %v7994_v3  ;;  %vm18604_vm3 = vmmov %vm18219_vm0 }
 0xcc2   : > { %v8298_v9 = vmul.f32 %v10485_v50, %v8218_v33  ;;  %v8220_v48 = vpop.f32.mrf.mxu1 }
 0xcc3   : > { %v8428_v44 = vpop.f32.mrf.mxu0 }
 0xcc4   : > { %v8319_v39 = vpack.c.bf16 %v8298_v9, %v8297_v27  ;;  %v8429_v31 = vadd.f32 %v17313_v4, %v8428_v44 }
 0xcc5   : > { %v10487_v5 = vpop.eup %10486 }
 0xcc6   : > { %v8502_v59 = vadd.f32 %v8429_v31, %v18496_v30  ;;  %9117 = vmatmul.msk.bf16.gmra.mxu0 %vm18587_vm6, %v8319_v39  ;;  %v10489_v38 = vpop.eup %10488  ;;  %vm18605_vm6 = vmmov %vm18219_vm0 }
 0xcc7   : > { %v8131_v20 = vpop.f32.mrf.mxu2  ;;  %v8000_v37 = vpop.xlane.xlu1 %7999 }
 0xcc8   : > { %8534 = vst.msk [vmem:[%s17320_s29 + $0x20] sm:$0xff] %vm18588_vm7, %v8502_v59  ;;  %v8221_v43 = vadd.f32 %v8220_v48, %v8131_v20  ;;  %vm18607_vm7 = vmmov %vm18219_vm0 }
 0xcca   : > { %v8222_v28 = vpop.f32.mrf.mxu1  ;;  %v8299_v12 = vmul.f32 %v10487_v5, %v8221_v43 }
 0xccb   : > { %v8430_v41 = vpop.f32.mrf.mxu0 }
 0xccc   : > { %v8431_v2 = vadd.f32 %v17313_v4, %v8430_v41 }
 0xcce   : > { %v8503_v16 = vadd.f32 %v8431_v2, %v18497_v62  ;;  %v7997_v62 = vpop.xlane.xlu0 %7996 }
 0xccf   : > { %v8133_v55 = vpop.f32.mrf.mxu2  ;;  %10490 = vrcp.f32 %v7997_v62 }
 0xcd0   : > { %8535 = vst.msk [vmem:[%s17320_s29 + $0x28] sm:$0xff] %vm18589_vm10, %v8503_v16  ;;  %v8223_v30 = vadd.f32 %v8222_v28, %v8133_v55  ;;  %10492 = vrcp.f32 %v8000_v37  ;;  %vm18609_vm10 = vmmov %vm18219_vm0 }
 0xcd2   : > { %v8300_v18 = vmul.f32 %v10489_v38, %v8223_v30  ;;  %v8225_v57 = vpop.f32.mrf.mxu1 }
 0xcd3   : > { %v8433_v40 = vpop.f32.mrf.mxu0 }
 0xcd4   : > { %v8320_v52 = vpack.c.bf16 %v8300_v18, %v8299_v12  ;;  %v8434_v23 = vadd.f32 %v17313_v4, %v8433_v40  ;;  %v18598_v18 = vld [vmem:[#allocation61_spill] sm:$0xff] }
 0xcd5   : > { %v10491_v10 = vpop.eup %10490 }
 0xcd6   : > { %v8504_v13 = vadd.f32 %v8434_v23, %v15975_v14  ;;  %9118 = vmatmul.msk.bf16.gmra.mxu0 %vm18219_vm0, %v8320_v52  ;;  %v10493_v60 = vpop.eup %10492 }
 0xcd7   : > { %v8136_v8 = vpop.f32.mrf.mxu2  ;;  %v8006_v11 = vpop.xlane.xlu0 %8005 }
 0xcd8   : > { %8536 = vst.msk [vmem:[%s17320_s29 + $0x30] sm:$0xff] %vm18590_vm11, %v8504_v13  ;;  %v8226_v32 = vadd.f32 %v8225_v57, %v8136_v8  ;;  %v18601_v8 = vld [vmem:[#allocation18_spill] sm:$0xff]  ;;  %vm18612_vm11 = vmmov %vm18219_vm0 }
 0xcda   : > { %v8227_v51 = vpop.f32.mrf.mxu1  ;;  %v8301_v54 = vmul.f32 %v10491_v10, %v8226_v32 }
 0xcdb   : > { %v8435_v58 = vpop.f32.mrf.mxu0 }
 0xcdc   : > { %v8436_v34 = vadd.f32 %v17313_v4, %v8435_v58 }
 0xcde   : > { %v8505_v25 = vadd.f32 %v8436_v34, %v15982_v17  ;;  %v8003_v17 = vpop.xlane.xlu2 %8002 }
 0xcdf   : > { %v8138_v22 = vpop.f32.mrf.mxu2  ;;  %10494 = vrcp.f32 %v8003_v17 }
 0xce0   : > { %8537 = vst.msk [vmem:[%s17320_s29 + $0x38] sm:$0xff] %vm18591_vm2, %v8505_v25  ;;  %v8228_v14 = vadd.f32 %v8227_v51, %v8138_v22  ;;  %10496 = vrcp.f32 %v8006_v11  ;;  %v18608_v11 = vld [vmem:[#allocation41_spill] sm:$0xff]  ;;  %vm18614_vm2 = vmmov %vm18219_vm0 }
 0xce2   : > { %v8302_v45 = vmul.f32 %v10493_v60, %v8228_v14  ;;  %v8230_v6 = vpop.f32.mrf.mxu1 }
 0xce3   : > { %v8438_v63 = vpop.f32.mrf.mxu0 }
 0xce4   : > { %v8321_v15 = vpack.c.bf16 %v8302_v45, %v8301_v54  ;;  %v8439_v26 = vadd.f32 %v17313_v4, %v8438_v63  ;;  %v18603_v45 = vld [vmem:[#allocation52_spill] sm:$0xff] }
 0xce5   : > { %v10495_v47 = vpop.eup %10494 }
 0xce6   : > { %v8506_v24 = vadd.f32 %v8439_v26, %v15989_v21  ;;  %9119 = vmatmul.msk.bf16.gmra.mxu0 %vm18592_vm9, %v8321_v15  ;;  %v10497_v7 = vpop.eup %10496  ;;  %v18606_v26 = vld [vmem:[#allocation15_spill] sm:$0xff]  ;;  %vm18616_vm9 = vmmov %vm18219_vm0 }
 0xce7   : > { %v8141_v1 = vpop.f32.mrf.mxu2  ;;  %v8012_v31 = vpop.xlane.xlu2 %8011 }
 0xce8   : > { %8538 = vst.msk [vmem:[%s17320_s29 + $0x40] sm:$0xff] %vm18593_vm12, %v8506_v24  ;;  %v8231_v19 = vadd.f32 %v8230_v6, %v8141_v1  ;;  %vm18618_vm12 = vmmov %vm18219_vm0 }
 0xcea   : > { %v8232_v46 = vpop.f32.mrf.mxu1  ;;  %v8303_v49 = vmul.f32 %v10495_v47, %v8231_v19  ;;  %v18610_v19 = vld [vmem:[#allocation63_spill] sm:$0xff] }
 0xceb   : > { %v8440_v42 = vpop.f32.mrf.mxu0 }
 0xcec   : > { %v8441_v29 = vadd.f32 %v17313_v4, %v8440_v42 }
 0xcee   : > { %v8507_v61 = vadd.f32 %v8441_v29, %v16135_v36  ;;  %v8009_v36 = vpop.xlane.xlu1 %8008 }
 0xcef   : > { %v8143_v35 = vpop.f32.mrf.mxu2  ;;  %10498 = vrcp.f32 %v8009_v36 }
 0xcf0   : > { %8539 = vst.msk [vmem:[%s17320_s29 + $0x48] sm:$0xff] %vm18594_vm13, %v8507_v61  ;;  %v8233_v21 = vadd.f32 %v8232_v46, %v8143_v35  ;;  %10500 = vrcp.f32 %v8012_v31  ;;  %vm18620_vm13 = vmmov %vm18219_vm0 }
 0xcf2   : > { %v8304_v33 = vmul.f32 %v10497_v7, %v8233_v21  ;;  %v8235_v50 = vpop.f32.mrf.mxu1  ;;  %v18611_v21 = vld [vmem:[#allocation56_spill] sm:$0xff] }
 0xcf3   : > { %v8443_v27 = vpop.f32.mrf.mxu0 }
 0xcf4   : > { %v8322_v9 = vpack.c.bf16 %v8304_v33, %v8303_v49  ;;  %v8444_v48 = vadd.f32 %v17313_v4, %v8443_v27 }
 0xcf5   : > { %v10499_v2 = vpop.eup %10498 }
 0xcf6   : > { %v8508_v44 = vadd.f32 %v8444_v48, %v16002_v0  ;;  %9120 = vmatmul.msk.bf16.gmra.mxu0 %vm18595_vm14, %v8322_v9  ;;  %v10501_v43 = vpop.eup %10500  ;;  %vm18622_vm14 = vmmov %vm18219_vm0 }
 0xcf7   : > { %v8146_v39 = vpop.f32.mrf.mxu2  ;;  %v8018_v52 = vpop.xlane.xlu1 %8017 }
 0xcf8   : > { %8540 = vst.msk [vmem:[%s17320_s29 + $0x50] sm:$0xff] %vm18596_vm4, %v8508_v44  ;;  %v8236_v3 = vadd.f32 %v8235_v50, %v8146_v39  ;;  %v18613_v50 = vld [vmem:[#allocation19_spill] sm:$0xff]  ;;  %vm18624_vm4 = vmmov %vm18219_vm0 }
 0xcf9   : > { %v18615_v44 = vld [vmem:[#allocation43_spill] sm:$0xff] }
 0xcfa   : > { %v8237_v59 = vpop.f32.mrf.mxu1  ;;  %v8305_v16 = vmul.f32 %v10499_v2, %v8236_v3 }
 0xcfb   : > { %v8445_v53 = vpop.f32.mrf.mxu0 }
 0xcfc   : > { %v8446_v20 = vadd.f32 %v17313_v4, %v8445_v53 }
 0xcfe   : > { %v8509_v28 = vadd.f32 %v8446_v20, %v16155_v56  ;;  %v8015_v56 = vpop.xlane.xlu0 %8014 }
 0xcff   : > { %v8148_v41 = vpop.f32.mrf.mxu2  ;;  %10502 = vrcp.f32 %v8015_v56 }
 0xd00   : > { %8541 = vst.msk [vmem:[%s17320_s29 + $0x58] sm:$0xff] %vm18597_vm8, %v8509_v28  ;;  %v8238_v0 = vadd.f32 %v8237_v59, %v8148_v41  ;;  %10504 = vrcp.f32 %v8018_v52  ;;  %v18617_v59 = vld [vmem:[#allocation64_spill] sm:$0xff]  ;;  %vm18626_vm8 = vmmov %vm18219_vm0 }
 0xd01   : > { %v18619_v28 = vld [vmem:[#allocation20_spill] sm:$0xff] }
 0xd02   : > { %v8306_v55 = vmul.f32 %v10501_v43, %v8238_v0  ;;  %v8240_v12 = vpop.f32.mrf.mxu1  ;;  %v18621_v43 = vld [vmem:[#allocation42_spill] sm:$0xff] }
 0xd03   : > { %v8448_v5 = vpop.f32.mrf.mxu0 }
 0xd04   : > { %v8323_v30 = vpack.c.bf16 %v8306_v55, %v8305_v16  ;;  %v8449_v38 = vadd.f32 %v17313_v4, %v8448_v5 }
 0xd05   : > { %v10503_v34 = vpop.eup %10502 }
 0xd06   : > { %v8510_v57 = vadd.f32 %v8449_v38, %v18598_v18  ;;  %9121 = vmatmul.msk.bf16.gmra.mxu0 %vm18599_vm5, %v8323_v30  ;;  %v10505_v25 = vpop.eup %10504  ;;  %v18623_v30 = vld [vmem:[#allocation65_spill] sm:$0xff]  ;;  %vm18628_vm5 = vmmov %vm18219_vm0 }
 0xd07   : > { %v8151_v40 = vpop.f32.mrf.mxu2 }
 0xd08   : > { %8542 = vst.msk [vmem:[%s17320_s29 + $0x60] sm:$0xff] %vm18600_vm15, %v8510_v57  ;;  %v8241_v62 = vadd.f32 %v8240_v12, %v8151_v40  ;;  %v18625_v57 = vld [vmem:[#allocation16_spill] sm:$0xff]  ;;  %vm18630_vm15 = vmmov %vm18219_vm0 }
 0xd0a   : > { %v8242_v51 = vpop.f32.mrf.mxu1  ;;  %v8307_v22 = vmul.f32 %v10503_v34, %v8241_v62 }
 0xd0b   : > { %v8450_v23 = vpop.f32.mrf.mxu0 }
 0xd0c   : > { %v8451_v13 = vadd.f32 %v17313_v4, %v8450_v23  ;;  %v18627_v23 = vld [vmem:[#allocation35_spill] sm:$0xff] }
 0xd0e   : > { %v8511_v37 = vadd.f32 %v8451_v13, %v18601_v8 }
 0xd0f   : > { %v8153_v58 = vpop.f32.mrf.mxu2 }
 0xd10   : > { %8543 = vst.msk [vmem:[%s17320_s29 + $0x68] sm:$0xff] %vm18602_vm1, %v8511_v37  ;;  %v8243_v32 = vadd.f32 %v8242_v51, %v8153_v58  ;;  %v18629_v37 = vld [vmem:[#allocation66_spill] sm:$0xff]  ;;  %vm18632_vm1 = vmmov %vm18219_vm0 }
 0xd12   : > { %v8308_v10 = vmul.f32 %v10505_v25, %v8243_v32  ;;  %v18631_v32 = vld [vmem:[#allocation12_spill] sm:$0xff] }
 0xd13   : > { %v8453_v14 = vpop.f32.mrf.mxu0 }
 0xd14   : > { %v8324_v60 = vpack.c.bf16 %v8308_v10, %v8307_v22  ;;  %v8454_v54 = vadd.f32 %v17313_v4, %v8453_v14  ;;  %v18633_v14 = vld [vmem:[#allocation67_spill] sm:$0xff] }
 0xd16   : > { %v8512_v6 = vadd.f32 %v8454_v54, %v18603_v45  ;;  %9122 = vmatmul.msk.bf16.gmra.mxu0 %vm18604_vm3, %v8324_v60  ;;  %vm18634_vm3 = vmmov %vm18219_vm0 }
 0xd18   : > { %8544 = vst.msk [vmem:[%s17320_s29 + $0x70] sm:$0xff] %vm18605_vm6, %v8512_v6  ;;  %v18635_v6 = vld [vmem:[#allocation22_spill] sm:$0xff]  ;;  %vm18636_vm6 = vmmov %vm18219_vm0 }
 0xd1b   : > { %v8455_v63 = vpop.f32.mrf.mxu0 }
 0xd1c   : > { %v8456_v15 = vadd.f32 %v17313_v4, %v8455_v63 }
 0xd1e   : > { %v8513_v24 = vadd.f32 %v8456_v15, %v18606_v26 }
 0xd20   : > { %8545 = vst.msk [vmem:[%s17320_s29 + $0x78] sm:$0xff] %vm18607_vm7, %v8513_v24  ;;  %v18637_v24 = vld [vmem:[#allocation68_spill] sm:$0xff]  ;;  %vm18638_vm7 = vmmov %vm18219_vm0 }
 0xd23   : > { %v8458_v17 = vpop.f32.mrf.mxu0 }
 0xd24   : > { %v8459_v1 = vadd.f32 %v17313_v4, %v8458_v17 }
 0xd26   : > { %v8514_v46 = vadd.f32 %v8459_v1, %v18608_v11 }
 0xd28   : > { %8546 = vst.msk [vmem:[%s17320_s29 + $0x80] sm:$0xff] %vm18609_vm10, %v8514_v46 }
 0xd2b   : > { %v8460_v42 = vpop.f32.mrf.mxu0 }
 0xd2c   : > { %v8461_v29 = vadd.f32 %v17313_v4, %v8460_v42 }
 0xd2e   : > { %v8515_v61 = vadd.f32 %v8461_v29, %v18610_v19 }
 0xd30   : > { %8547 = vst.msk [vmem:[%s17320_s29 + $0x88] sm:$0xff] %vm18219_vm0, %v8515_v61 }
 0xd33   : > { %v8463_v35 = vpop.f32.mrf.mxu0 }
 0xd34   : > { %v8464_v47 = vadd.f32 %v17313_v4, %v8463_v35 }
 0xd36   : > { %v8516_v7 = vadd.f32 %v8464_v47, %v18611_v21 }
 0xd38   : > { %8548 = vst.msk [vmem:[%s17320_s29 + $0x90] sm:$0xff] %vm18612_vm11, %v8516_v7 }
 0xd3b   : > { %v8465_v49 = vpop.f32.mrf.mxu0 }
 0xd3c   : > { %v8466_v33 = vadd.f32 %v17313_v4, %v8465_v49 }
 0xd3e   : > { %v8517_v27 = vadd.f32 %v8466_v33, %v18613_v50 }
 0xd40   : > { %8549 = vst.msk [vmem:[%s17320_s29 + $0x98] sm:$0xff] %vm18614_vm2, %v8517_v27 }
 0xd43   : > { %v8468_v9 = vpop.f32.mrf.mxu0 }
 0xd44   : > { %v8469_v48 = vadd.f32 %v17313_v4, %v8468_v9 }
 0xd46   : > { %v8518_v36 = vadd.f32 %v8469_v48, %v18615_v44 }
 0xd48   : > { %8550 = vst.msk [vmem:[%s17320_s29 + $0xa0] sm:$0xff] %vm18616_vm9, %v8518_v36 }
 0xd4b   : > { %v8470_v39 = vpop.f32.mrf.mxu0 }
 0xd4c   : > { %v8471_v31 = vadd.f32 %v17313_v4, %v8470_v39 }
 0xd4e   : > { %v8519_v53 = vadd.f32 %v8471_v31, %v18617_v59 }
 0xd50   : > { %8551 = vst.msk [vmem:[%s17320_s29 + $0xa8] sm:$0xff] %vm18618_vm12, %v8519_v53 }
 0xd53   : > { %v8473_v20 = vpop.f32.mrf.mxu0 }
 0xd54   : > { %v8474_v3 = vadd.f32 %v17313_v4, %v8473_v20 }
 0xd56   : > { %v8520_v41 = vadd.f32 %v8474_v3, %v18619_v28 }
 0xd58   : > { %8552 = vst.msk [vmem:[%s17320_s29 + $0xb0] sm:$0xff] %vm18620_vm13, %v8520_v41 }
 0xd5b   : > { %v8475_v2 = vpop.f32.mrf.mxu0 }
 0xd5c   : > { %v8476_v0 = vadd.f32 %v17313_v4, %v8475_v2 }
 0xd5e   : > { %v8521_v16 = vadd.f32 %v8476_v0, %v18621_v43 }
 0xd60   : > { %8553 = vst.msk [vmem:[%s17320_s29 + $0xb8] sm:$0xff] %vm18622_vm14, %v8521_v16 }
 0xd63   : > { %v8478_v55 = vpop.f32.mrf.mxu0 }
 0xd64   : > { %v8479_v5 = vadd.f32 %v17313_v4, %v8478_v55 }
 0xd66   : > { %v8522_v38 = vadd.f32 %v8479_v5, %v18623_v30 }
 0xd68   : > { %8554 = vst.msk [vmem:[%s17320_s29 + $0xc0] sm:$0xff] %vm18624_vm4, %v8522_v38 }
 0xd6b   : > { %v8480_v12 = vpop.f32.mrf.mxu0 }
 0xd6c   : > { %v8481_v18 = vadd.f32 %v17313_v4, %v8480_v12 }
 0xd6e   : > { %v8523_v56 = vadd.f32 %v8481_v18, %v18625_v57 }
 0xd70   : > { %8555 = vst.msk [vmem:[%s17320_s29 + $0xc8] sm:$0xff] %vm18626_vm8, %v8523_v56 }
 0xd73   : > { %v8483_v40 = vpop.f32.mrf.mxu0 }
 0xd74   : > { %v8484_v52 = vadd.f32 %v17313_v4, %v8483_v40 }
 0xd76   : > { %v8524_v13 = vadd.f32 %v8484_v52, %v18627_v23 }
 0xd78   : > { %8556 = vst.msk [vmem:[%s17320_s29 + $0xd0] sm:$0xff] %vm18628_vm5, %v8524_v13 }
 0xd7b   : > { %v8485_v62 = vpop.f32.mrf.mxu0 }
 0xd7c   : > { %v8486_v8 = vadd.f32 %v17313_v4, %v8485_v62 }
 0xd7e   : > { %v8525_v51 = vadd.f32 %v8486_v8, %v18629_v37 }
 0xd80   : > { %8557 = vst.msk [vmem:[%s17320_s29 + $0xd8] sm:$0xff] %vm18630_vm15, %v8525_v51 }
 0xd83   : > { %v8488_v58 = vpop.f32.mrf.mxu0 }
 0xd84   : > { %v8489_v34 = vadd.f32 %v17313_v4, %v8488_v58 }
 0xd86   : > { %v8526_v25 = vadd.f32 %v8489_v34, %v18631_v32 }
 0xd88   : > { %8558 = vst.msk [vmem:[%s17320_s29 + $0xe0] sm:$0xff] %vm18632_vm1, %v8526_v25 }
 0xd8b   : > { %v8490_v22 = vpop.f32.mrf.mxu0 }
 0xd8c   : > { %v8491_v10 = vadd.f32 %v17313_v4, %v8490_v22 }
 0xd8e   : > { %v8527_v60 = vadd.f32 %v8491_v10, %v18633_v14 }
 0xd90   : > { %8559 = vst.msk [vmem:[%s17320_s29 + $0xe8] sm:$0xff] %vm18634_vm3, %v8527_v60 }
 0xd93   : > { %v8493_v54 = vpop.f32.mrf.mxu0 }
 0xd94   : > { %v8494_v45 = vadd.f32 %v17313_v4, %v8493_v54 }
 0xd96   : > { %v8528_v63 = vadd.f32 %v8494_v45, %v18635_v6 }
 0xd98   : > { %8560 = vst.msk [vmem:[%s17320_s29 + $0xf0] sm:$0xff] %vm18636_vm6, %v8528_v63 }
 0xd9b   : > { %v8495_v15 = vpop.f32.mrf.mxu0 }
 0xd9c   : > { %v8496_v26 = vadd.f32 %v17313_v4, %v8495_v15 }
 0xd9e   : > { %v8529_v17 = vadd.f32 %v8496_v26, %v18637_v24 }
 0xda0   : > { %8561 = vst.msk [vmem:[%s17320_s29 + $0xf8] sm:$0xff] %vm18638_vm7, %v8529_v17 }
 0xda1   : > { %10577 = shalt.err (!%p10574_p3)
}
 0xda2   : > { %s10618_s3 = smov 128   ;;  %s10619_s29 = smov 8  }
 0xda3   : > { %9198 = dma.vmem_to_hbm [thread:$0]  (%p10753_p5), %s8576_s26, 4096, %s8578_s24, %s8563_s0, %s10618_s3, %s10618_s3, %s10619_s29  }
 0xda4 PF: > { %s18639_s21 = sld [smem:[#allocation7_spill]]  ;;  %p9204_p4 = scmp.ge.s32.totalorder %s10612_s30, 2 }
 0xda6   : > { %p9201_p7 = pnand %p9204_p4, %p10757_p6 }
 0xda8   : > { %p9202_p8 = pneg %p9201_p7 }
 0xdaa   : > { %s8592_s23 = sand.u32 1, %s18639_s21  }
 0xdab   : > { %s8593_s5 = scalar_lea.sflag [#allocation5], %s8592_s23 }
 0xdac   : > { %10595 = dma.done.wait (%p9202_p8), %s8593_s5, 4096  }
 0xdad   : > { %10597 = vsyncadd (%p9202_p8), %s8593_s5, 4294963200  ;;  %s18641_s30 = sld [smem:[#allocation9_spill]]  ;;  %s18644_s27 = smov %s10604_s28 }
 0xdae   : > { %s18642_s4 = sld [smem:[#allocation8_spill]] }
 0xdaf   : > { %s18643_s29 = sld [smem:[#allocation10_spill]] }
 0xdb3   : > { %p28_p9 = scmp.ge.s32.totalorder %s18641_s30, 4  }
 0xdb4   : > { %s18645_s28 = smov %s18642_s4 }
 0xdb5   :  { %30 = sbr.rel (!%p28_p9) target bundleno = 11 (0xb), region = 134 }
 0xdba   :  { %8599 = vsyncpa [#allocation5], 1 }
 0xdbb   :  { %8601 = vsyncpa [#allocation5 + $0x1], 1 }

</bundles_post_ra>
